<compile_context>
chip_gen: v7x
topology: tpu7x:2x2x1
jax: 0.10.0
libtpu: 0.0.40
codegen_flags: <defaults>
</compile_context>

<pallas_src>
import jax
import jax.numpy as jnp
from jax.experimental import pallas as pl
from jax.experimental.pallas import tpu as pltpu


# ---------------------------------------------------------------------------
# small helpers
# ---------------------------------------------------------------------------
def _round_up(x, m):
    return ((x + m - 1) // m) * m


def _pick_tile(dim_padded, max_tile, unit):
    """Largest multiple of `unit` that divides `dim_padded` and is <= max_tile."""
    best = unit
    d = unit
    limit = min(max_tile, dim_padded)
    while d <= limit:
        if dim_padded % d == 0:
            best = d
        d += unit
    return best


def _pad2d(a, rows, cols, value=0.0):
    r, c = a.shape
    if r == rows and c == cols:
        return a
    return jnp.pad(a, ((0, rows - r), (0, cols - c)), constant_values=value)


# ---------------------------------------------------------------------------
# Fused tiled matmul kernel:  out = maybe_relu((x @ w) * scale + bias (+ res))
# ---------------------------------------------------------------------------
def _fused_matmul(x, w, scale, bias, residual=None, apply_relu=False,
                  out_dtype=jnp.bfloat16):
    """x: (M, K), w: (K, N), scale/bias: (N,), residual: (M, N) or None."""
    M, K = x.shape
    K2, N = w.shape
    assert K == K2
    has_res = residual is not None

    # Pad to hardware-friendly sizes and pick tiles that divide them.
    Mp = _round_up(M, 8)
    Np = _round_up(N, 128)
    Kp = _round_up(K, 128)
    tm = _pick_tile(Mp, 256, 8)     # 256-wide M tiles where M allows
    tn = _pick_tile(Np, 256, 128)   # 256-wide N tiles for the 2x256^2 MXUs
    tk = _pick_tile(Kp, 512, 128)

    xb = _pad2d(x.astype(jnp.bfloat16), Mp, Kp)
    wb = _pad2d(w.astype(jnp.bfloat16), Kp, Np)
    sb = _pad2d(scale.astype(jnp.float32).reshape(1, N), 1, Np)
    bb = _pad2d(bias.astype(jnp.float32).reshape(1, N), 1, Np)

    inputs = [xb, wb, sb, bb]
    in_specs = [
        pl.BlockSpec((tm, tk), lambda i, j, k: (i, k)),
        pl.BlockSpec((tk, tn), lambda i, j, k: (k, j)),
        pl.BlockSpec((1, tn), lambda i, j, k: (0, j)),
        pl.BlockSpec((1, tn), lambda i, j, k: (0, j)),
    ]
    if has_res:
        rb = _pad2d(residual.astype(jnp.bfloat16), Mp, Np)
        inputs.append(rb)
        in_specs.append(pl.BlockSpec((tm, tn), lambda i, j, k: (i, j)))

    grid = (Mp // tm, Np // tn, Kp // tk)

    def kernel(*refs):
        if has_res:
            x_ref, w_ref, s_ref, b_ref, r_ref, o_ref, acc_ref = refs
        else:
            x_ref, w_ref, s_ref, b_ref, o_ref, acc_ref = refs
            r_ref = None
        kk = pl.program_id(2)

        @pl.when(kk == 0)
        def _init():
            acc_ref[...] = jnp.zeros_like(acc_ref)

        acc_ref[...] += jnp.dot(x_ref[...], w_ref[...],
                                preferred_element_type=jnp.float32)

        @pl.when(kk == pl.num_programs(2) - 1)
        def _finalize():
            acc = acc_ref[...] * s_ref[...] + b_ref[...]
            if r_ref is not None:
                acc = acc + r_ref[...].astype(jnp.float32)
            if apply_relu:
                acc = jnp.maximum(acc, 0.0)
            o_ref[...] = acc.astype(o_ref.dtype)

    out = pl.pallas_call(
        kernel,
        out_shape=jax.ShapeDtypeStruct((Mp, Np), out_dtype),
        grid_spec=pltpu.PrefetchScalarGridSpec(
            num_scalar_prefetch=0,
            grid=grid,
            in_specs=in_specs,
            out_specs=pl.BlockSpec((tm, tn), lambda i, j, k: (i, j)),
            scratch_shapes=[pltpu.VMEM((tm, tn), jnp.float32)],
        ),
        compiler_params=pltpu.CompilerParams(
            dimension_semantics=("parallel", "parallel", "arbitrary")),
    )(*inputs)

    if Mp != M or Np != N:
        out = out[:M, :N]
    return out


# ---------------------------------------------------------------------------
# MaxPool2d(kernel=3, stride=2, padding=1) on NHWC, tiled over rows
# ---------------------------------------------------------------------------
def _max_reduce_kernel(x_ref, o_ref):
    # x_ref: (9, tm, C) -> elementwise max over the 9 window positions.
    acc = x_ref[0]
    for i in range(1, x_ref.shape[0]):
        acc = jnp.maximum(acc, x_ref[i])
    o_ref[...] = acc


def _maxpool_3x3_s2_p1(x):
    N, H, W, C = x.shape
    neg = jnp.asarray(jnp.finfo(x.dtype).min, x.dtype)
    xp = jnp.pad(x, ((0, 0), (1, 1), (1, 1), (0, 0)), constant_values=neg)
    Ho = (H + 2 - 3) // 2 + 1
    Wo = (W + 2 - 3) // 2 + 1
    # TODO(synk): the 9 shifted views are still materialized in HBM; a fully
    # stack-free version would window the padded input inside the kernel.
    views = [xp[:, i:i + 2 * Ho:2, j:j + 2 * Wo:2, :]
             for i in range(3) for j in range(3)]
    stacked = jnp.stack(views, axis=0).reshape(9, N * Ho * Wo, C)

    M = N * Ho * Wo
    Mp = _round_up(M, 8)
    tm = _pick_tile(Mp, 512, 8)
    if Mp != M:
        stacked = jnp.pad(stacked, ((0, 0), (0, Mp - M), (0, 0)),
                          constant_values=neg)

    out = pl.pallas_call(
        _max_reduce_kernel,
        out_shape=jax.ShapeDtypeStruct((Mp, C), x.dtype),
        grid_spec=pltpu.PrefetchScalarGridSpec(
            num_scalar_prefetch=0,
            grid=(Mp // tm,),
            in_specs=[pl.BlockSpec((9, tm, C), lambda i: (0, i, 0))],
            out_specs=pl.BlockSpec((tm, C), lambda i: (i, 0)),
        ),
        compiler_params=pltpu.CompilerParams(
            dimension_semantics=("parallel",)),
    )(stacked)
    return out[:M].reshape(N, Ho, Wo, C)


# ---------------------------------------------------------------------------
# Conv = im2col (glue) + fused tiled Pallas matmul
# ---------------------------------------------------------------------------
def _im2col(x, kh, kw, stride, pad):
    """x: (N, H, W, C) -> patches (N*Ho*Wo, kh*kw*C), K ordered (kh, kw, C)."""
    xp = jnp.pad(x, ((0, 0), (pad, pad), (pad, pad), (0, 0)))
    N, Hp, Wp, C = xp.shape
    Ho = (Hp - kh) // stride + 1
    Wo = (Wp - kw) // stride + 1
    cols = []
    for i in range(kh):
        for j in range(kw):
            cols.append(xp[:, i:i + stride * Ho:stride, j:j + stride * Wo:stride, :])
    patches = jnp.concatenate(cols, axis=-1)            # (N, Ho, Wo, kh*kw*C)
    return patches.reshape(N * Ho * Wo, kh * kw * C), (N, Ho, Wo)


def _conv_bn(x, weight, scale, bias, stride, pad, relu=True, residual=None,
             out_dtype=jnp.bfloat16):
    """weight in PyTorch layout (C_out, C_in, kh, kw); x NHWC; returns NHWC."""
    C_out, C_in, kh, kw = weight.shape
    if kh == 1 and kw == 1 and pad == 0:
        # 1x1 (downsample) conv: pure strided-subsample GEMM, no im2col glue.
        xs = x[:, ::stride, ::stride, :]
        N, Ho, Wo, _ = xs.shape
        patches = xs.reshape(N * Ho * Wo, C_in)
    else:
        # TODO(synk): 3x3/7x7 convs still materialize im2col patches in HBM;
        # a tap-wise K-reduction over the padded NHWC tensor would remove the
        # 9x/49x read amplification.
        patches, (N, Ho, Wo) = _im2col(x, kh, kw, stride, pad)
    w2d = jnp.transpose(weight, (2, 3, 1, 0)).reshape(kh * kw * C_in, C_out)
    res2d = residual.reshape(N * Ho * Wo, C_out) if residual is not None else None
    out = _fused_matmul(patches, w2d, scale, bias, residual=res2d,
                        apply_relu=relu, out_dtype=out_dtype)
    return out.reshape(N, Ho, Wo, C_out)


def _basic_block(x, p, stride):
    identity = x
    out = _conv_bn(x, p['conv1_w'], p['bn1_scale'], p['bn1_bias'],
                   stride=stride, pad=1, relu=True)
    if 'down_w' in p:
        identity = _conv_bn(x, p['down_w'], p['dbn_scale'], p['dbn_bias'],
                            stride=stride, pad=0, relu=False)
    # conv2 -> bn2 -> (+ identity) -> relu, fused into one Pallas call epilogue
    out = _conv_bn(out, p['conv2_w'], p['bn2_scale'], p['bn2_bias'],
                   stride=1, pad=1, relu=True, residual=identity)
    return out


# ---------------------------------------------------------------------------
# Parameter construction (deterministic, synthetic — shapes match resnet18)
# ---------------------------------------------------------------------------
def init_params(key):
    keys = iter(jax.random.split(key, 256))

    def conv_w(cout, cin, k):
        fan_in = cin * k * k
        return (jax.random.normal(next(keys), (cout, cin, k, k), jnp.float32)
                * jnp.sqrt(2.0 / fan_in))

    def bn(c, eps=1e-5):
        gamma = 1.0 + 0.1 * jax.random.normal(next(keys), (c,), jnp.float32)
        beta = 0.1 * jax.random.normal(next(keys), (c,), jnp.float32)
        mean = 0.1 * jax.random.normal(next(keys), (c,), jnp.float32)
        var = 1.0 + jnp.abs(jax.random.normal(next(keys), (c,), jnp.float32))
        scale = gamma / jnp.sqrt(var + eps)       # inference-mode BN folding
        bias = beta - mean * scale
        return scale, bias

    params = {'conv1_w': conv_w(64, 3, 7)}
    params['bn1_scale'], params['bn1_bias'] = bn(64)

    layers = []
    in_c = 64
    for out_c, stride in [(64, 1), (128, 2), (256, 2), (512, 2)]:
        blocks = []
        for b in range(2):
            s = stride if b == 0 else 1
            bp = {'conv1_w': conv_w(out_c, in_c, 3)}
            bp['bn1_scale'], bp['bn1_bias'] = bn(out_c)
            bp['conv2_w'] = conv_w(out_c, out_c, 3)
            bp['bn2_scale'], bp['bn2_bias'] = bn(out_c)
            if s != 1 or in_c != out_c:
                bp['down_w'] = conv_w(out_c, in_c, 1)
                bp['dbn_scale'], bp['dbn_bias'] = bn(out_c)
            blocks.append(bp)
            in_c = out_c
        layers.append(blocks)
    params['layers'] = layers

    params['fc_w'] = (jax.random.normal(next(keys), (7, 512), jnp.float32)
                      * jnp.sqrt(1.0 / 512.0))          # nn.Linear(512, 7).weight
    params['fc_b'] = 0.1 * jax.random.normal(next(keys), (7,), jnp.float32)
    return params


# ---------------------------------------------------------------------------
# Forward pass (matches Resnet18.forward)
# ---------------------------------------------------------------------------
def resnet18_forward(params, x_nchw):
    # layout: input is NCHW (PyTorch); convert once to NHWC (channels on lanes)
    # and to bf16 for MXU-native matmuls; all accumulation stays f32 in-kernel.
    x = jnp.transpose(x_nchw, (0, 2, 3, 1)).astype(jnp.bfloat16)

    # conv1 (7x7/2, pad 3) + bn1 + relu, fused
    x = _conv_bn(x, params['conv1_w'], params['bn1_scale'], params['bn1_bias'],
                 stride=2, pad=3, relu=True)
    # maxpool 3x3/2 pad 1
    x = _maxpool_3x3_s2_p1(x)

    # layer1..layer4 (2 BasicBlocks each)
    for blocks, stride in zip(params['layers'], (1, 2, 2, 2)):
        x = _basic_block(x, blocks[0], stride)
        x = _basic_block(x, blocks[1], 1)

    # AdaptiveAvgPool2d((1,1)) + view(-1, 512)
    x = jnp.mean(x.astype(jnp.float32), axis=(1, 2))    # (N, 512)

    # custom fc: Linear(512, 7), via the same fused Pallas matmul kernel
    # (N padded to a lane-dense 128 inside _fused_matmul, sliced back to 7).
    logits = _fused_matmul(x, params['fc_w'].T,
                           jnp.ones((7,), jnp.float32), params['fc_b'],
                           apply_relu=False, out_dtype=jnp.float32)
    return logits                                       # (N, 7)


# TODO(synk): BatchNorm is implemented in inference mode (folded running
# stats); PyTorch train-mode batch statistics and pretrained weights are not
# reproduced.


if __name__ == "__main__":
    key = jax.random.PRNGKey(0)
    pkey, xkey = jax.random.split(key)
    params = init_params(pkey)

    # Small input consistent with the module: NCHW, 3 channels, 32x32 spatial
    # (the minimum at which resnet18's feature map reaches 1x1 before avgpool).
    x = jax.random.normal(xkey, (2, 3, 32, 32), jnp.float32)

    fwd = jax.jit(resnet18_forward)
    out = fwd(params, x)
    out = jax.block_until_ready(out)

    assert out.shape == (2, 7), out.shape
    assert bool(jnp.all(jnp.isfinite(out)))
    print("KERNEL_OK")
</pallas_src>

<mosaic_0001>
module attributes {stable_mosaic.version = 11 : i64} {
  func.func @kernel(%arg0: i32, %arg1: i32, %arg2: i32, %arg3: memref<256x256xbf16, #tpu.memory_space<vmem>>, %arg4: memref<256x128xbf16, #tpu.memory_space<vmem>>, %arg5: memref<1x128xf32, #tpu.memory_space<vmem>>, %arg6: memref<1x128xf32, #tpu.memory_space<vmem>>, %arg7: memref<256x128xbf16, #tpu.memory_space<vmem>>, %arg8: memref<256x128xf32, #tpu.memory_space<vmem>>) attributes {dimension_semantics = [#tpu.dimension_semantics<parallel>, #tpu.dimension_semantics<parallel>, #tpu.dimension_semantics<arbitrary>], iteration_bounds = array<i64: 2, 1, 1>, scalar_prefetch = 0 : i64, scratch_operands = 1 : i64, tpu.core_type = #tpu.core_type<tc>, window_params = [{transform_indices = @transform_0, window_bounds = array<i64: 256, 256>}, {transform_indices = @transform_1, window_bounds = array<i64: 256, 128>}, {transform_indices = @transform_2, window_bounds = array<i64: 1, 128>}, {transform_indices = @transform_3, window_bounds = array<i64: 1, 128>}, {transform_indices = @transform_4, window_bounds = array<i64: 256, 128>}]} {
    %c0_i32 = arith.constant 0 : i32
    %0 = arith.cmpi eq, %arg2, %c0_i32 : i32
    %1 = arith.extui %0 : i1 to i32
    %c0_i32_0 = arith.constant 0 : i32
    %2 = arith.cmpi ne, %1, %c0_i32_0 : i32
    scf.if %2 {
      %cst_10 = arith.constant 0.000000e+00 : f32
      %12 = vector.broadcast %cst_10 : f32 to vector<256x128xf32>
      %c0_11 = arith.constant 0 : index
      %c0_12 = arith.constant 0 : index
      %13 = vector.load %arg8[%c0_11, %c0_12] : memref<256x128xf32, #tpu.memory_space<vmem>>, vector<256x128xf32>
      tpu.vector_store %arg8[%c0_11, %c0_12], %12 {strides = array<i32>} : memref<256x128xf32, #tpu.memory_space<vmem>>, vector<256x128xf32>,
    } else {
    }
    %c0 = arith.constant 0 : index
    %c0_1 = arith.constant 0 : index
    %3 = vector.load %arg8[%c0, %c0_1] : memref<256x128xf32, #tpu.memory_space<vmem>>, vector<256x128xf32>
    %c0_2 = arith.constant 0 : index
    %c0_3 = arith.constant 0 : index
    %4 = vector.load %arg3[%c0_2, %c0_3] : memref<256x256xbf16, #tpu.memory_space<vmem>>, vector<256x256xbf16>
    %c0_4 = arith.constant 0 : index
    %c0_5 = arith.constant 0 : index
    %5 = vector.load %arg4[%c0_4, %c0_5] : memref<256x128xbf16, #tpu.memory_space<vmem>>, vector<256x128xbf16>
    %cst = arith.constant dense<0.000000e+00> : vector<256x128xf32>
    %6 = tpu.matmul %4, %5, %cst {dimension_numbers = #tpu.dot_dimension_numbers<[1], [0], [0], [1], [0, 0, 1, 1], [], []>} : vector<256x256xbf16>, vector<256x128xbf16>, vector<256x128xf32> -> vector<256x128xf32>
    %7 = arith.addf %3, %6 : vector<256x128xf32>
    %c0_6 = arith.constant 0 : index
    %c0_7 = arith.constant 0 : index
    %8 = vector.load %arg8[%c0_6, %c0_7] : memref<256x128xf32, #tpu.memory_space<vmem>>, vector<256x128xf32>
    tpu.vector_store %arg8[%c0_6, %c0_7], %7 {strides = array<i32>} : memref<256x128xf32, #tpu.memory_space<vmem>>, vector<256x128xf32>,
    %c0_i32_8 = arith.constant 0 : i32
    %9 = arith.cmpi eq, %arg2, %c0_i32_8 : i32
    %10 = arith.extui %9 : i1 to i32
    %c0_i32_9 = arith.constant 0 : i32
    %11 = arith.cmpi ne, %10, %c0_i32_9 : i32
    scf.if %11 {
      %c0_10 = arith.constant 0 : index
      %c0_11 = arith.constant 0 : index
      %12 = vector.load %arg8[%c0_10, %c0_11] : memref<256x128xf32, #tpu.memory_space<vmem>>, vector<256x128xf32>
      %c0_12 = arith.constant 0 : index
      %c0_13 = arith.constant 0 : index
      %13 = vector.load %arg5[%c0_12, %c0_13] : memref<1x128xf32, #tpu.memory_space<vmem>>, vector<1x128xf32>
      %14 = vector.broadcast %13 : vector<1x128xf32> to vector<256x128xf32>
      %15 = arith.mulf %12, %14 : vector<256x128xf32>
      %c0_14 = arith.constant 0 : index
      %c0_15 = arith.constant 0 : index
      %16 = vector.load %arg6[%c0_14, %c0_15] : memref<1x128xf32, #tpu.memory_space<vmem>>, vector<1x128xf32>
      %17 = vector.broadcast %16 : vector<1x128xf32> to vector<256x128xf32>
      %18 = arith.addf %15, %17 : vector<256x128xf32>
      %cst_16 = arith.constant 0.000000e+00 : f32
      %19 = vector.broadcast %cst_16 : f32 to vector<256x128xf32>
      %20 = arith.maximumf %18, %19 : vector<256x128xf32>
      %21 = arith.truncf %20 : vector<256x128xf32> to vector<256x128xbf16>
      %c0_17 = arith.constant 0 : index
      %c0_18 = arith.constant 0 : index
      %22 = vector.load %arg7[%c0_17, %c0_18] : memref<256x128xbf16, #tpu.memory_space<vmem>>, vector<256x128xbf16>
      tpu.vector_store %arg7[%c0_17, %c0_18], %21 {strides = array<i32>} : memref<256x128xbf16, #tpu.memory_space<vmem>>, vector<256x128xbf16>,
    } else {
    }
    return
  }
  func.func @transform_0(%arg0: i32, %arg1: i32, %arg2: i32) -> (i32, i32) {
    %c0_i32 = arith.constant 0 : i32
    return %arg0, %arg2 : i32, i32
  }
  func.func @transform_1(%arg0: i32, %arg1: i32, %arg2: i32) -> (i32, i32) {
    %c0_i32 = arith.constant 0 : i32
    return %arg2, %arg1 : i32, i32
  }
  func.func @transform_2(%arg0: i32, %arg1: i32, %arg2: i32) -> (i32, i32) {
    %c0_i32 = arith.constant 0 : i32
    %c0_i32_0 = arith.constant 0 : i32
    return %c0_i32, %arg1 : i32, i32
  }
  func.func @transform_3(%arg0: i32, %arg1: i32, %arg2: i32) -> (i32, i32) {
    %c0_i32 = arith.constant 0 : i32
    %c0_i32_0 = arith.constant 0 : i32
    return %c0_i32, %arg1 : i32, i32
  }
  func.func @transform_4(%arg0: i32, %arg1: i32, %arg2: i32) -> (i32, i32) {
    %c0_i32 = arith.constant 0 : i32
    return %arg0, %arg1 : i32, i32
  }
}

module attributes {stable_mosaic.version = 11 : i64} {
  func.func @_max_reduce_kernel(%arg0: i32, %arg1: memref<9x128x64xbf16, #tpu.memory_space<vmem>>, %arg2: memref<128x64xbf16, #tpu.memory_space<vmem>>) attributes {dimension_semantics = [#tpu.dimension_semantics<parallel>], iteration_bounds = array<i64: 1>, scalar_prefetch = 0 : i64, scratch_operands = 0 : i64, tpu.core_type = #tpu.core_type<tc>, window_params = [{transform_indices = @transform_0, window_bounds = array<i64: 9, 128, 64>}, {transform_indices = @transform_1, window_bounds = array<i64: 128, 64>}]} {
    %c0 = arith.constant 0 : index
    %c0_0 = arith.constant 0 : index
    %c0_1 = arith.constant 0 : index
    %0 = vector.load %arg1[%c0, %c0_0, %c0_1] : memref<9x128x64xbf16, #tpu.memory_space<vmem>>, vector<1x128x64xbf16>
    %1 = vector.shape_cast %0 : vector<1x128x64xbf16> to vector<128x64xbf16>
    %c1 = arith.constant 1 : index
    %c0_2 = arith.constant 0 : index
    %c0_3 = arith.constant 0 : index
    %2 = vector.load %arg1[%c1, %c0_2, %c0_3] : memref<9x128x64xbf16, #tpu.memory_space<vmem>>, vector<1x128x64xbf16>
    %3 = vector.shape_cast %2 : vector<1x128x64xbf16> to vector<128x64xbf16>
    %4 = arith.maximumf %1, %3 : vector<128x64xbf16>
    %c2 = arith.constant 2 : index
    %c0_4 = arith.constant 0 : index
    %c0_5 = arith.constant 0 : index
    %5 = vector.load %arg1[%c2, %c0_4, %c0_5] : memref<9x128x64xbf16, #tpu.memory_space<vmem>>, vector<1x128x64xbf16>
    %6 = vector.shape_cast %5 : vector<1x128x64xbf16> to vector<128x64xbf16>
    %7 = arith.maximumf %4, %6 : vector<128x64xbf16>
    %c3 = arith.constant 3 : index
    %c0_6 = arith.constant 0 : index
    %c0_7 = arith.constant 0 : index
    %8 = vector.load %arg1[%c3, %c0_6, %c0_7] : memref<9x128x64xbf16, #tpu.memory_space<vmem>>, vector<1x128x64xbf16>
    %9 = vector.shape_cast %8 : vector<1x128x64xbf16> to vector<128x64xbf16>
    %10 = arith.maximumf %7, %9 : vector<128x64xbf16>
    %c4 = arith.constant 4 : index
    %c0_8 = arith.constant 0 : index
    %c0_9 = arith.constant 0 : index
    %11 = vector.load %arg1[%c4, %c0_8, %c0_9] : memref<9x128x64xbf16, #tpu.memory_space<vmem>>, vector<1x128x64xbf16>
    %12 = vector.shape_cast %11 : vector<1x128x64xbf16> to vector<128x64xbf16>
    %13 = arith.maximumf %10, %12 : vector<128x64xbf16>
    %c5 = arith.constant 5 : index
    %c0_10 = arith.constant 0 : index
    %c0_11 = arith.constant 0 : index
    %14 = vector.load %arg1[%c5, %c0_10, %c0_11] : memref<9x128x64xbf16, #tpu.memory_space<vmem>>, vector<1x128x64xbf16>
    %15 = vector.shape_cast %14 : vector<1x128x64xbf16> to vector<128x64xbf16>
    %16 = arith.maximumf %13, %15 : vector<128x64xbf16>
    %c6 = arith.constant 6 : index
    %c0_12 = arith.constant 0 : index
    %c0_13 = arith.constant 0 : index
    %17 = vector.load %arg1[%c6, %c0_12, %c0_13] : memref<9x128x64xbf16, #tpu.memory_space<vmem>>, vector<1x128x64xbf16>
    %18 = vector.shape_cast %17 : vector<1x128x64xbf16> to vector<128x64xbf16>
    %19 = arith.maximumf %16, %18 : vector<128x64xbf16>
    %c7 = arith.constant 7 : index
    %c0_14 = arith.constant 0 : index
    %c0_15 = arith.constant 0 : index
    %20 = vector.load %arg1[%c7, %c0_14, %c0_15] : memref<9x128x64xbf16, #tpu.memory_space<vmem>>, vector<1x128x64xbf16>
    %21 = vector.shape_cast %20 : vector<1x128x64xbf16> to vector<128x64xbf16>
    %22 = arith.maximumf %19, %21 : vector<128x64xbf16>
    %c8 = arith.constant 8 : index
    %c0_16 = arith.constant 0 : index
    %c0_17 = arith.constant 0 : index
    %23 = vector.load %arg1[%c8, %c0_16, %c0_17] : memref<9x128x64xbf16, #tpu.memory_space<vmem>>, vector<1x128x64xbf16>
    %24 = vector.shape_cast %23 : vector<1x128x64xbf16> to vector<128x64xbf16>
    %25 = arith.maximumf %22, %24 : vector<128x64xbf16>
    %c0_18 = arith.constant 0 : index
    %c0_19 = arith.constant 0 : index
    %26 = vector.load %arg2[%c0_18, %c0_19] : memref<128x64xbf16, #tpu.memory_space<vmem>>, vector<128x64xbf16>
    tpu.vector_store %arg2[%c0_18, %c0_19], %25 {strides = array<i32>} : memref<128x64xbf16, #tpu.memory_space<vmem>>, vector<128x64xbf16>,
    return
  }
  func.func @transform_0(%arg0: i32) -> (i32, i32, i32) {
    %c0_i32 = arith.constant 0 : i32
    %c0_i32_0 = arith.constant 0 : i32
    %c0_i32_1 = arith.constant 0 : i32
    return %c0_i32, %arg0, %c0_i32_0 : i32, i32, i32
  }
  func.func @transform_1(%arg0: i32) -> (i32, i32) {
    %c0_i32 = arith.constant 0 : i32
    %c0_i32_0 = arith.constant 0 : i32
    return %arg0, %c0_i32 : i32, i32
  }
}

module attributes {stable_mosaic.version = 11 : i64} {
  func.func @kernel(%arg0: i32, %arg1: i32, %arg2: i32, %arg3: memref<128x128xbf16, #tpu.memory_space<vmem>>, %arg4: memref<128x128xbf16, #tpu.memory_space<vmem>>, %arg5: memref<1x128xf32, #tpu.memory_space<vmem>>, %arg6: memref<1x128xf32, #tpu.memory_space<vmem>>, %arg7: memref<128x128xbf16, #tpu.memory_space<vmem>>, %arg8: memref<128x128xf32, #tpu.memory_space<vmem>>) attributes {dimension_semantics = [#tpu.dimension_semantics<parallel>, #tpu.dimension_semantics<parallel>, #tpu.dimension_semantics<arbitrary>], iteration_bounds = array<i64: 1, 1, 5>, scalar_prefetch = 0 : i64, scratch_operands = 1 : i64, tpu.core_type = #tpu.core_type<tc>, window_params = [{transform_indices = @transform_0, window_bounds = array<i64: 128, 128>}, {transform_indices = @transform_1, window_bounds = array<i64: 128, 128>}, {transform_indices = @transform_2, window_bounds = array<i64: 1, 128>}, {transform_indices = @transform_3, window_bounds = array<i64: 1, 128>}, {transform_indices = @transform_4, window_bounds = array<i64: 128, 128>}]} {
    %c0_i32 = arith.constant 0 : i32
    %0 = arith.cmpi eq, %arg2, %c0_i32 : i32
    %1 = arith.extui %0 : i1 to i32
    %c0_i32_0 = arith.constant 0 : i32
    %2 = arith.cmpi ne, %1, %c0_i32_0 : i32
    scf.if %2 {
      %cst_9 = arith.constant 0.000000e+00 : f32
      %12 = vector.broadcast %cst_9 : f32 to vector<128x128xf32>
      %c0_10 = arith.constant 0 : index
      %c0_11 = arith.constant 0 : index
      %13 = vector.load %arg8[%c0_10, %c0_11] : memref<128x128xf32, #tpu.memory_space<vmem>>, vector<128x128xf32>
      tpu.vector_store %arg8[%c0_10, %c0_11], %12 {strides = array<i32>} : memref<128x128xf32, #tpu.memory_space<vmem>>, vector<128x128xf32>,
    } else {
    }
    %c0 = arith.constant 0 : index
    %c0_1 = arith.constant 0 : index
    %3 = vector.load %arg8[%c0, %c0_1] : memref<128x128xf32, #tpu.memory_space<vmem>>, vector<128x128xf32>
    %c0_2 = arith.constant 0 : index
    %c0_3 = arith.constant 0 : index
    %4 = vector.load %arg3[%c0_2, %c0_3] : memref<128x128xbf16, #tpu.memory_space<vmem>>, vector<128x128xbf16>
    %c0_4 = arith.constant 0 : index
    %c0_5 = arith.constant 0 : index
    %5 = vector.load %arg4[%c0_4, %c0_5] : memref<128x128xbf16, #tpu.memory_space<vmem>>, vector<128x128xbf16>
    %cst = arith.constant dense<0.000000e+00> : vector<128x128xf32>
    %6 = tpu.matmul %4, %5, %cst {dimension_numbers = #tpu.dot_dimension_numbers<[1], [0], [0], [1], [0, 0, 1, 1], [], []>} : vector<128x128xbf16>, vector<128x128xbf16>, vector<128x128xf32> -> vector<128x128xf32>
    %7 = arith.addf %3, %6 : vector<128x128xf32>
    %c0_6 = arith.constant 0 : index
    %c0_7 = arith.constant 0 : index
    %8 = vector.load %arg8[%c0_6, %c0_7] : memref<128x128xf32, #tpu.memory_space<vmem>>, vector<128x128xf32>
    tpu.vector_store %arg8[%c0_6, %c0_7], %7 {strides = array<i32>} : memref<128x128xf32, #tpu.memory_space<vmem>>, vector<128x128xf32>,
    %c4_i32 = arith.constant 4 : i32
    %9 = arith.cmpi eq, %arg2, %c4_i32 : i32
    %10 = arith.extui %9 : i1 to i32
    %c0_i32_8 = arith.constant 0 : i32
    %11 = arith.cmpi ne, %10, %c0_i32_8 : i32
    scf.if %11 {
      %c0_9 = arith.constant 0 : index
      %c0_10 = arith.constant 0 : index
      %12 = vector.load %arg8[%c0_9, %c0_10] : memref<128x128xf32, #tpu.memory_space<vmem>>, vector<128x128xf32>
      %c0_11 = arith.constant 0 : index
      %c0_12 = arith.constant 0 : index
      %13 = vector.load %arg5[%c0_11, %c0_12] : memref<1x128xf32, #tpu.memory_space<vmem>>, vector<1x128xf32>
      %14 = vector.broadcast %13 : vector<1x128xf32> to vector<128x128xf32>
      %15 = arith.mulf %12, %14 : vector<128x128xf32>
      %c0_13 = arith.constant 0 : index
      %c0_14 = arith.constant 0 : index
      %16 = vector.load %arg6[%c0_13, %c0_14] : memref<1x128xf32, #tpu.memory_space<vmem>>, vector<1x128xf32>
      %17 = vector.broadcast %16 : vector<1x128xf32> to vector<128x128xf32>
      %18 = arith.addf %15, %17 : vector<128x128xf32>
      %cst_15 = arith.constant 0.000000e+00 : f32
      %19 = vector.broadcast %cst_15 : f32 to vector<128x128xf32>
      %20 = arith.maximumf %18, %19 : vector<128x128xf32>
      %21 = arith.truncf %20 : vector<128x128xf32> to vector<128x128xbf16>
      %c0_16 = arith.constant 0 : index
      %c0_17 = arith.constant 0 : index
      %22 = vector.load %arg7[%c0_16, %c0_17] : memref<128x128xbf16, #tpu.memory_space<vmem>>, vector<128x128xbf16>
      tpu.vector_store %arg7[%c0_16, %c0_17], %21 {strides = array<i32>} : memref<128x128xbf16, #tpu.memory_space<vmem>>, vector<128x128xbf16>,
    } else {
    }
    return
  }
  func.func @transform_0(%arg0: i32, %arg1: i32, %arg2: i32) -> (i32, i32) {
    %c0_i32 = arith.constant 0 : i32
    return %arg0, %arg2 : i32, i32
  }
  func.func @transform_1(%arg0: i32, %arg1: i32, %arg2: i32) -> (i32, i32) {
    %c0_i32 = arith.constant 0 : i32
    return %arg2, %arg1 : i32, i32
  }
  func.func @transform_2(%arg0: i32, %arg1: i32, %arg2: i32) -> (i32, i32) {
    %c0_i32 = arith.constant 0 : i32
    %c0_i32_0 = arith.constant 0 : i32
    return %c0_i32, %arg1 : i32, i32
  }
  func.func @transform_3(%arg0: i32, %arg1: i32, %arg2: i32) -> (i32, i32) {
    %c0_i32 = arith.constant 0 : i32
    %c0_i32_0 = arith.constant 0 : i32
    return %c0_i32, %arg1 : i32, i32
  }
  func.func @transform_4(%arg0: i32, %arg1: i32, %arg2: i32) -> (i32, i32) {
    %c0_i32 = arith.constant 0 : i32
    return %arg0, %arg1 : i32, i32
  }
}

module attributes {stable_mosaic.version = 11 : i64} {
  func.func @kernel(%arg0: i32, %arg1: i32, %arg2: i32, %arg3: memref<128x128xbf16, #tpu.memory_space<vmem>>, %arg4: memref<128x128xbf16, #tpu.memory_space<vmem>>, %arg5: memref<1x128xf32, #tpu.memory_space<vmem>>, %arg6: memref<1x128xf32, #tpu.memory_space<vmem>>, %arg7: memref<128x128xbf16, #tpu.memory_space<vmem>>, %arg8: memref<128x128xbf16, #tpu.memory_space<vmem>>, %arg9: memref<128x128xf32, #tpu.memory_space<vmem>>) attributes {dimension_semantics = [#tpu.dimension_semantics<parallel>, #tpu.dimension_semantics<parallel>, #tpu.dimension_semantics<arbitrary>], iteration_bounds = array<i64: 1, 1, 5>, scalar_prefetch = 0 : i64, scratch_operands = 1 : i64, tpu.core_type = #tpu.core_type<tc>, window_params = [{transform_indices = @transform_0, window_bounds = array<i64: 128, 128>}, {transform_indices = @transform_1, window_bounds = array<i64: 128, 128>}, {transform_indices = @transform_2, window_bounds = array<i64: 1, 128>}, {transform_indices = @transform_3, window_bounds = array<i64: 1, 128>}, {transform_indices = @transform_4, window_bounds = array<i64: 128, 128>}, {transform_indices = @transform_5, window_bounds = array<i64: 128, 128>}]} {
    %c0_i32 = arith.constant 0 : i32
    %0 = arith.cmpi eq, %arg2, %c0_i32 : i32
    %1 = arith.extui %0 : i1 to i32
    %c0_i32_0 = arith.constant 0 : i32
    %2 = arith.cmpi ne, %1, %c0_i32_0 : i32
    scf.if %2 {
      %cst_9 = arith.constant 0.000000e+00 : f32
      %12 = vector.broadcast %cst_9 : f32 to vector<128x128xf32>
      %c0_10 = arith.constant 0 : index
      %c0_11 = arith.constant 0 : index
      %13 = vector.load %arg9[%c0_10, %c0_11] : memref<128x128xf32, #tpu.memory_space<vmem>>, vector<128x128xf32>
      tpu.vector_store %arg9[%c0_10, %c0_11], %12 {strides = array<i32>} : memref<128x128xf32, #tpu.memory_space<vmem>>, vector<128x128xf32>,
    } else {
    }
    %c0 = arith.constant 0 : index
    %c0_1 = arith.constant 0 : index
    %3 = vector.load %arg9[%c0, %c0_1] : memref<128x128xf32, #tpu.memory_space<vmem>>, vector<128x128xf32>
    %c0_2 = arith.constant 0 : index
    %c0_3 = arith.constant 0 : index
    %4 = vector.load %arg3[%c0_2, %c0_3] : memref<128x128xbf16, #tpu.memory_space<vmem>>, vector<128x128xbf16>
    %c0_4 = arith.constant 0 : index
    %c0_5 = arith.constant 0 : index
    %5 = vector.load %arg4[%c0_4, %c0_5] : memref<128x128xbf16, #tpu.memory_space<vmem>>, vector<128x128xbf16>
    %cst = arith.constant dense<0.000000e+00> : vector<128x128xf32>
    %6 = tpu.matmul %4, %5, %cst {dimension_numbers = #tpu.dot_dimension_numbers<[1], [0], [0], [1], [0, 0, 1, 1], [], []>} : vector<128x128xbf16>, vector<128x128xbf16>, vector<128x128xf32> -> vector<128x128xf32>
    %7 = arith.addf %3, %6 : vector<128x128xf32>
    %c0_6 = arith.constant 0 : index
    %c0_7 = arith.constant 0 : index
    %8 = vector.load %arg9[%c0_6, %c0_7] : memref<128x128xf32, #tpu.memory_space<vmem>>, vector<128x128xf32>
    tpu.vector_store %arg9[%c0_6, %c0_7], %7 {strides = array<i32>} : memref<128x128xf32, #tpu.memory_space<vmem>>, vector<128x128xf32>,
    %c4_i32 = arith.constant 4 : i32
    %9 = arith.cmpi eq, %arg2, %c4_i32 : i32
    %10 = arith.extui %9 : i1 to i32
    %c0_i32_8 = arith.constant 0 : i32
    %11 = arith.cmpi ne, %10, %c0_i32_8 : i32
    scf.if %11 {
      %c0_9 = arith.constant 0 : index
      %c0_10 = arith.constant 0 : index
      %12 = vector.load %arg9[%c0_9, %c0_10] : memref<128x128xf32, #tpu.memory_space<vmem>>, vector<128x128xf32>
      %c0_11 = arith.constant 0 : index
      %c0_12 = arith.constant 0 : index
      %13 = vector.load %arg5[%c0_11, %c0_12] : memref<1x128xf32, #tpu.memory_space<vmem>>, vector<1x128xf32>
      %14 = vector.broadcast %13 : vector<1x128xf32> to vector<128x128xf32>
      %15 = arith.mulf %12, %14 : vector<128x128xf32>
      %c0_13 = arith.constant 0 : index
      %c0_14 = arith.constant 0 : index
      %16 = vector.load %arg6[%c0_13, %c0_14] : memref<1x128xf32, #tpu.memory_space<vmem>>, vector<1x128xf32>
      %17 = vector.broadcast %16 : vector<1x128xf32> to vector<128x128xf32>
      %18 = arith.addf %15, %17 : vector<128x128xf32>
      %c0_15 = arith.constant 0 : index
      %c0_16 = arith.constant 0 : index
      %19 = vector.load %arg7[%c0_15, %c0_16] : memref<128x128xbf16, #tpu.memory_space<vmem>>, vector<128x128xbf16>
      %20 = arith.extf %19 : vector<128x128xbf16> to vector<128x128xf32>
      %21 = arith.addf %18, %20 : vector<128x128xf32>
      %cst_17 = arith.constant 0.000000e+00 : f32
      %22 = vector.broadcast %cst_17 : f32 to vector<128x128xf32>
      %23 = arith.maximumf %21, %22 : vector<128x128xf32>
      %24 = arith.truncf %23 : vector<128x128xf32> to vector<128x128xbf16>
      %c0_18 = arith.constant 0 : index
      %c0_19 = arith.constant 0 : index
      %25 = vector.load %arg8[%c0_18, %c0_19] : memref<128x128xbf16, #tpu.memory_space<vmem>>, vector<128x128xbf16>
      tpu.vector_store %arg8[%c0_18, %c0_19], %24 {strides = array<i32>} : memref<128x128xbf16, #tpu.memory_space<vmem>>, vector<128x128xbf16>,
    } else {
    }
    return
  }
  func.func @transform_0(%arg0: i32, %arg1: i32, %arg2: i32) -> (i32, i32) {
    %c0_i32 = arith.constant 0 : i32
    return %arg0, %arg2 : i32, i32
  }
  func.func @transform_1(%arg0: i32, %arg1: i32, %arg2: i32) -> (i32, i32) {
    %c0_i32 = arith.constant 0 : i32
    return %arg2, %arg1 : i32, i32
  }
  func.func @transform_2(%arg0: i32, %arg1: i32, %arg2: i32) -> (i32, i32) {
    %c0_i32 = arith.constant 0 : i32
    %c0_i32_0 = arith.constant 0 : i32
    return %c0_i32, %arg1 : i32, i32
  }
  func.func @transform_3(%arg0: i32, %arg1: i32, %arg2: i32) -> (i32, i32) {
    %c0_i32 = arith.constant 0 : i32
    %c0_i32_0 = arith.constant 0 : i32
    return %c0_i32, %arg1 : i32, i32
  }
  func.func @transform_4(%arg0: i32, %arg1: i32, %arg2: i32) -> (i32, i32) {
    %c0_i32 = arith.constant 0 : i32
    return %arg0, %arg1 : i32, i32
  }
  func.func @transform_5(%arg0: i32, %arg1: i32, %arg2: i32) -> (i32, i32) {
    %c0_i32 = arith.constant 0 : i32
    return %arg0, %arg1 : i32, i32
  }
}

module attributes {stable_mosaic.version = 11 : i64} {
  func.func @kernel(%arg0: i32, %arg1: i32, %arg2: i32, %arg3: memref<32x128xbf16, #tpu.memory_space<vmem>>, %arg4: memref<128x128xbf16, #tpu.memory_space<vmem>>, %arg5: memref<1x128xf32, #tpu.memory_space<vmem>>, %arg6: memref<1x128xf32, #tpu.memory_space<vmem>>, %arg7: memref<32x128xbf16, #tpu.memory_space<vmem>>, %arg8: memref<32x128xf32, #tpu.memory_space<vmem>>) attributes {dimension_semantics = [#tpu.dimension_semantics<parallel>, #tpu.dimension_semantics<parallel>, #tpu.dimension_semantics<arbitrary>], iteration_bounds = array<i64: 1, 1, 5>, scalar_prefetch = 0 : i64, scratch_operands = 1 : i64, tpu.core_type = #tpu.core_type<tc>, window_params = [{transform_indices = @transform_0, window_bounds = array<i64: 32, 128>}, {transform_indices = @transform_1, window_bounds = array<i64: 128, 128>}, {transform_indices = @transform_2, window_bounds = array<i64: 1, 128>}, {transform_indices = @transform_3, window_bounds = array<i64: 1, 128>}, {transform_indices = @transform_4, window_bounds = array<i64: 32, 128>}]} {
    %c0_i32 = arith.constant 0 : i32
    %0 = arith.cmpi eq, %arg2, %c0_i32 : i32
    %1 = arith.extui %0 : i1 to i32
    %c0_i32_0 = arith.constant 0 : i32
    %2 = arith.cmpi ne, %1, %c0_i32_0 : i32
    scf.if %2 {
      %cst_9 = arith.constant 0.000000e+00 : f32
      %12 = vector.broadcast %cst_9 : f32 to vector<32x128xf32>
      %c0_10 = arith.constant 0 : index
      %c0_11 = arith.constant 0 : index
      %13 = vector.load %arg8[%c0_10, %c0_11] : memref<32x128xf32, #tpu.memory_space<vmem>>, vector<32x128xf32>
      tpu.vector_store %arg8[%c0_10, %c0_11], %12 {strides = array<i32>} : memref<32x128xf32, #tpu.memory_space<vmem>>, vector<32x128xf32>,
    } else {
    }
    %c0 = arith.constant 0 : index
    %c0_1 = arith.constant 0 : index
    %3 = vector.load %arg8[%c0, %c0_1] : memref<32x128xf32, #tpu.memory_space<vmem>>, vector<32x128xf32>
    %c0_2 = arith.constant 0 : index
    %c0_3 = arith.constant 0 : index
    %4 = vector.load %arg3[%c0_2, %c0_3] : memref<32x128xbf16, #tpu.memory_space<vmem>>, vector<32x128xbf16>
    %c0_4 = arith.constant 0 : index
    %c0_5 = arith.constant 0 : index
    %5 = vector.load %arg4[%c0_4, %c0_5] : memref<128x128xbf16, #tpu.memory_space<vmem>>, vector<128x128xbf16>
    %cst = arith.constant dense<0.000000e+00> : vector<32x128xf32>
    %6 = tpu.matmul %4, %5, %cst {dimension_numbers = #tpu.dot_dimension_numbers<[1], [0], [0], [1], [0, 0, 1, 1], [], []>} : vector<32x128xbf16>, vector<128x128xbf16>, vector<32x128xf32> -> vector<32x128xf32>
    %7 = arith.addf %3, %6 : vector<32x128xf32>
    %c0_6 = arith.constant 0 : index
    %c0_7 = arith.constant 0 : index
    %8 = vector.load %arg8[%c0_6, %c0_7] : memref<32x128xf32, #tpu.memory_space<vmem>>, vector<32x128xf32>
    tpu.vector_store %arg8[%c0_6, %c0_7], %7 {strides = array<i32>} : memref<32x128xf32, #tpu.memory_space<vmem>>, vector<32x128xf32>,
    %c4_i32 = arith.constant 4 : i32
    %9 = arith.cmpi eq, %arg2, %c4_i32 : i32
    %10 = arith.extui %9 : i1 to i32
    %c0_i32_8 = arith.constant 0 : i32
    %11 = arith.cmpi ne, %10, %c0_i32_8 : i32
    scf.if %11 {
      %c0_9 = arith.constant 0 : index
      %c0_10 = arith.constant 0 : index
      %12 = vector.load %arg8[%c0_9, %c0_10] : memref<32x128xf32, #tpu.memory_space<vmem>>, vector<32x128xf32>
      %c0_11 = arith.constant 0 : index
      %c0_12 = arith.constant 0 : index
      %13 = vector.load %arg5[%c0_11, %c0_12] : memref<1x128xf32, #tpu.memory_space<vmem>>, vector<1x128xf32>
      %14 = vector.broadcast %13 : vector<1x128xf32> to vector<32x128xf32>
      %15 = arith.mulf %12, %14 : vector<32x128xf32>
      %c0_13 = arith.constant 0 : index
      %c0_14 = arith.constant 0 : index
      %16 = vector.load %arg6[%c0_13, %c0_14] : memref<1x128xf32, #tpu.memory_space<vmem>>, vector<1x128xf32>
      %17 = vector.broadcast %16 : vector<1x128xf32> to vector<32x128xf32>
      %18 = arith.addf %15, %17 : vector<32x128xf32>
      %cst_15 = arith.constant 0.000000e+00 : f32
      %19 = vector.broadcast %cst_15 : f32 to vector<32x128xf32>
      %20 = arith.maximumf %18, %19 : vector<32x128xf32>
      %21 = arith.truncf %20 : vector<32x128xf32> to vector<32x128xbf16>
      %c0_16 = arith.constant 0 : index
      %c0_17 = arith.constant 0 : index
      %22 = vector.load %arg7[%c0_16, %c0_17] : memref<32x128xbf16, #tpu.memory_space<vmem>>, vector<32x128xbf16>
      tpu.vector_store %arg7[%c0_16, %c0_17], %21 {strides = array<i32>} : memref<32x128xbf16, #tpu.memory_space<vmem>>, vector<32x128xbf16>,
    } else {
    }
    return
  }
  func.func @transform_0(%arg0: i32, %arg1: i32, %arg2: i32) -> (i32, i32) {
    %c0_i32 = arith.constant 0 : i32
    return %arg0, %arg2 : i32, i32
  }
  func.func @transform_1(%arg0: i32, %arg1: i32, %arg2: i32) -> (i32, i32) {
    %c0_i32 = arith.constant 0 : i32
    return %arg2, %arg1 : i32, i32
  }
  func.func @transform_2(%arg0: i32, %arg1: i32, %arg2: i32) -> (i32, i32) {
    %c0_i32 = arith.constant 0 : i32
    %c0_i32_0 = arith.constant 0 : i32
    return %c0_i32, %arg1 : i32, i32
  }
  func.func @transform_3(%arg0: i32, %arg1: i32, %arg2: i32) -> (i32, i32) {
    %c0_i32 = arith.constant 0 : i32
    %c0_i32_0 = arith.constant 0 : i32
    return %c0_i32, %arg1 : i32, i32
  }
  func.func @transform_4(%arg0: i32, %arg1: i32, %arg2: i32) -> (i32, i32) {
    %c0_i32 = arith.constant 0 : i32
    return %arg0, %arg1 : i32, i32
  }
}

module attributes {stable_mosaic.version = 11 : i64} {
  func.func @kernel(%arg0: i32, %arg1: i32, %arg2: i32, %arg3: memref<32x128xbf16, #tpu.memory_space<vmem>>, %arg4: memref<128x128xbf16, #tpu.memory_space<vmem>>, %arg5: memref<1x128xf32, #tpu.memory_space<vmem>>, %arg6: memref<1x128xf32, #tpu.memory_space<vmem>>, %arg7: memref<32x128xbf16, #tpu.memory_space<vmem>>, %arg8: memref<32x128xf32, #tpu.memory_space<vmem>>) attributes {dimension_semantics = [#tpu.dimension_semantics<parallel>, #tpu.dimension_semantics<parallel>, #tpu.dimension_semantics<arbitrary>], iteration_bounds = array<i64: 1, 1, 1>, scalar_prefetch = 0 : i64, scratch_operands = 1 : i64, tpu.core_type = #tpu.core_type<tc>, window_params = [{transform_indices = @transform_0, window_bounds = array<i64: 32, 128>}, {transform_indices = @transform_1, window_bounds = array<i64: 128, 128>}, {transform_indices = @transform_2, window_bounds = array<i64: 1, 128>}, {transform_indices = @transform_3, window_bounds = array<i64: 1, 128>}, {transform_indices = @transform_4, window_bounds = array<i64: 32, 128>}]} {
    %c0_i32 = arith.constant 0 : i32
    %0 = arith.cmpi eq, %arg2, %c0_i32 : i32
    %1 = arith.extui %0 : i1 to i32
    %c0_i32_0 = arith.constant 0 : i32
    %2 = arith.cmpi ne, %1, %c0_i32_0 : i32
    scf.if %2 {
      %cst_10 = arith.constant 0.000000e+00 : f32
      %12 = vector.broadcast %cst_10 : f32 to vector<32x128xf32>
      %c0_11 = arith.constant 0 : index
      %c0_12 = arith.constant 0 : index
      %13 = vector.load %arg8[%c0_11, %c0_12] : memref<32x128xf32, #tpu.memory_space<vmem>>, vector<32x128xf32>
      tpu.vector_store %arg8[%c0_11, %c0_12], %12 {strides = array<i32>} : memref<32x128xf32, #tpu.memory_space<vmem>>, vector<32x128xf32>,
    } else {
    }
    %c0 = arith.constant 0 : index
    %c0_1 = arith.constant 0 : index
    %3 = vector.load %arg8[%c0, %c0_1] : memref<32x128xf32, #tpu.memory_space<vmem>>, vector<32x128xf32>
    %c0_2 = arith.constant 0 : index
    %c0_3 = arith.constant 0 : index
    %4 = vector.load %arg3[%c0_2, %c0_3] : memref<32x128xbf16, #tpu.memory_space<vmem>>, vector<32x128xbf16>
    %c0_4 = arith.constant 0 : index
    %c0_5 = arith.constant 0 : index
    %5 = vector.load %arg4[%c0_4, %c0_5] : memref<128x128xbf16, #tpu.memory_space<vmem>>, vector<128x128xbf16>
    %cst = arith.constant dense<0.000000e+00> : vector<32x128xf32>
    %6 = tpu.matmul %4, %5, %cst {dimension_numbers = #tpu.dot_dimension_numbers<[1], [0], [0], [1], [0, 0, 1, 1], [], []>} : vector<32x128xbf16>, vector<128x128xbf16>, vector<32x128xf32> -> vector<32x128xf32>
    %7 = arith.addf %3, %6 : vector<32x128xf32>
    %c0_6 = arith.constant 0 : index
    %c0_7 = arith.constant 0 : index
    %8 = vector.load %arg8[%c0_6, %c0_7] : memref<32x128xf32, #tpu.memory_space<vmem>>, vector<32x128xf32>
    tpu.vector_store %arg8[%c0_6, %c0_7], %7 {strides = array<i32>} : memref<32x128xf32, #tpu.memory_space<vmem>>, vector<32x128xf32>,
    %c0_i32_8 = arith.constant 0 : i32
    %9 = arith.cmpi eq, %arg2, %c0_i32_8 : i32
    %10 = arith.extui %9 : i1 to i32
    %c0_i32_9 = arith.constant 0 : i32
    %11 = arith.cmpi ne, %10, %c0_i32_9 : i32
    scf.if %11 {
      %c0_10 = arith.constant 0 : index
      %c0_11 = arith.constant 0 : index
      %12 = vector.load %arg8[%c0_10, %c0_11] : memref<32x128xf32, #tpu.memory_space<vmem>>, vector<32x128xf32>
      %c0_12 = arith.constant 0 : index
      %c0_13 = arith.constant 0 : index
      %13 = vector.load %arg5[%c0_12, %c0_13] : memref<1x128xf32, #tpu.memory_space<vmem>>, vector<1x128xf32>
      %14 = vector.broadcast %13 : vector<1x128xf32> to vector<32x128xf32>
      %15 = arith.mulf %12, %14 : vector<32x128xf32>
      %c0_14 = arith.constant 0 : index
      %c0_15 = arith.constant 0 : index
      %16 = vector.load %arg6[%c0_14, %c0_15] : memref<1x128xf32, #tpu.memory_space<vmem>>, vector<1x128xf32>
      %17 = vector.broadcast %16 : vector<1x128xf32> to vector<32x128xf32>
      %18 = arith.addf %15, %17 : vector<32x128xf32>
      %19 = arith.truncf %18 : vector<32x128xf32> to vector<32x128xbf16>
      %c0_16 = arith.constant 0 : index
      %c0_17 = arith.constant 0 : index
      %20 = vector.load %arg7[%c0_16, %c0_17] : memref<32x128xbf16, #tpu.memory_space<vmem>>, vector<32x128xbf16>
      tpu.vector_store %arg7[%c0_16, %c0_17], %19 {strides = array<i32>} : memref<32x128xbf16, #tpu.memory_space<vmem>>, vector<32x128xbf16>,
    } else {
    }
    return
  }
  func.func @transform_0(%arg0: i32, %arg1: i32, %arg2: i32) -> (i32, i32) {
    %c0_i32 = arith.constant 0 : i32
    return %arg0, %arg2 : i32, i32
  }
  func.func @transform_1(%arg0: i32, %arg1: i32, %arg2: i32) -> (i32, i32) {
    %c0_i32 = arith.constant 0 : i32
    return %arg2, %arg1 : i32, i32
  }
  func.func @transform_2(%arg0: i32, %arg1: i32, %arg2: i32) -> (i32, i32) {
    %c0_i32 = arith.constant 0 : i32
    %c0_i32_0 = arith.constant 0 : i32
    return %c0_i32, %arg1 : i32, i32
  }
  func.func @transform_3(%arg0: i32, %arg1: i32, %arg2: i32) -> (i32, i32) {
    %c0_i32 = arith.constant 0 : i32
    %c0_i32_0 = arith.constant 0 : i32
    return %c0_i32, %arg1 : i32, i32
  }
  func.func @transform_4(%arg0: i32, %arg1: i32, %arg2: i32) -> (i32, i32) {
    %c0_i32 = arith.constant 0 : i32
    return %arg0, %arg1 : i32, i32
  }
}

module attributes {stable_mosaic.version = 11 : i64} {
  func.func @kernel(%arg0: i32, %arg1: i32, %arg2: i32, %arg3: memref<32x384xbf16, #tpu.memory_space<vmem>>, %arg4: memref<384x128xbf16, #tpu.memory_space<vmem>>, %arg5: memref<1x128xf32, #tpu.memory_space<vmem>>, %arg6: memref<1x128xf32, #tpu.memory_space<vmem>>, %arg7: memref<32x128xbf16, #tpu.memory_space<vmem>>, %arg8: memref<32x128xbf16, #tpu.memory_space<vmem>>, %arg9: memref<32x128xf32, #tpu.memory_space<vmem>>) attributes {dimension_semantics = [#tpu.dimension_semantics<parallel>, #tpu.dimension_semantics<parallel>, #tpu.dimension_semantics<arbitrary>], iteration_bounds = array<i64: 1, 1, 3>, scalar_prefetch = 0 : i64, scratch_operands = 1 : i64, tpu.core_type = #tpu.core_type<tc>, window_params = [{transform_indices = @transform_0, window_bounds = array<i64: 32, 384>}, {transform_indices = @transform_1, window_bounds = array<i64: 384, 128>}, {transform_indices = @transform_2, window_bounds = array<i64: 1, 128>}, {transform_indices = @transform_3, window_bounds = array<i64: 1, 128>}, {transform_indices = @transform_4, window_bounds = array<i64: 32, 128>}, {transform_indices = @transform_5, window_bounds = array<i64: 32, 128>}]} {
    %c0_i32 = arith.constant 0 : i32
    %0 = arith.cmpi eq, %arg2, %c0_i32 : i32
    %1 = arith.extui %0 : i1 to i32
    %c0_i32_0 = arith.constant 0 : i32
    %2 = arith.cmpi ne, %1, %c0_i32_0 : i32
    scf.if %2 {
      %cst_9 = arith.constant 0.000000e+00 : f32
      %12 = vector.broadcast %cst_9 : f32 to vector<32x128xf32>
      %c0_10 = arith.constant 0 : index
      %c0_11 = arith.constant 0 : index
      %13 = vector.load %arg9[%c0_10, %c0_11] : memref<32x128xf32, #tpu.memory_space<vmem>>, vector<32x128xf32>
      tpu.vector_store %arg9[%c0_10, %c0_11], %12 {strides = array<i32>} : memref<32x128xf32, #tpu.memory_space<vmem>>, vector<32x128xf32>,
    } else {
    }
    %c0 = arith.constant 0 : index
    %c0_1 = arith.constant 0 : index
    %3 = vector.load %arg9[%c0, %c0_1] : memref<32x128xf32, #tpu.memory_space<vmem>>, vector<32x128xf32>
    %c0_2 = arith.constant 0 : index
    %c0_3 = arith.constant 0 : index
    %4 = vector.load %arg3[%c0_2, %c0_3] : memref<32x384xbf16, #tpu.memory_space<vmem>>, vector<32x384xbf16>
    %c0_4 = arith.constant 0 : index
    %c0_5 = arith.constant 0 : index
    %5 = vector.load %arg4[%c0_4, %c0_5] : memref<384x128xbf16, #tpu.memory_space<vmem>>, vector<384x128xbf16>
    %cst = arith.constant dense<0.000000e+00> : vector<32x128xf32>
    %6 = tpu.matmul %4, %5, %cst {dimension_numbers = #tpu.dot_dimension_numbers<[1], [0], [0], [1], [0, 0, 1, 1], [], []>} : vector<32x384xbf16>, vector<384x128xbf16>, vector<32x128xf32> -> vector<32x128xf32>
    %7 = arith.addf %3, %6 : vector<32x128xf32>
    %c0_6 = arith.constant 0 : index
    %c0_7 = arith.constant 0 : index
    %8 = vector.load %arg9[%c0_6, %c0_7] : memref<32x128xf32, #tpu.memory_space<vmem>>, vector<32x128xf32>
    tpu.vector_store %arg9[%c0_6, %c0_7], %7 {strides = array<i32>} : memref<32x128xf32, #tpu.memory_space<vmem>>, vector<32x128xf32>,
    %c2_i32 = arith.constant 2 : i32
    %9 = arith.cmpi eq, %arg2, %c2_i32 : i32
    %10 = arith.extui %9 : i1 to i32
    %c0_i32_8 = arith.constant 0 : i32
    %11 = arith.cmpi ne, %10, %c0_i32_8 : i32
    scf.if %11 {
      %c0_9 = arith.constant 0 : index
      %c0_10 = arith.constant 0 : index
      %12 = vector.load %arg9[%c0_9, %c0_10] : memref<32x128xf32, #tpu.memory_space<vmem>>, vector<32x128xf32>
      %c0_11 = arith.constant 0 : index
      %c0_12 = arith.constant 0 : index
      %13 = vector.load %arg5[%c0_11, %c0_12] : memref<1x128xf32, #tpu.memory_space<vmem>>, vector<1x128xf32>
      %14 = vector.broadcast %13 : vector<1x128xf32> to vector<32x128xf32>
      %15 = arith.mulf %12, %14 : vector<32x128xf32>
      %c0_13 = arith.constant 0 : index
      %c0_14 = arith.constant 0 : index
      %16 = vector.load %arg6[%c0_13, %c0_14] : memref<1x128xf32, #tpu.memory_space<vmem>>, vector<1x128xf32>
      %17 = vector.broadcast %16 : vector<1x128xf32> to vector<32x128xf32>
      %18 = arith.addf %15, %17 : vector<32x128xf32>
      %c0_15 = arith.constant 0 : index
      %c0_16 = arith.constant 0 : index
      %19 = vector.load %arg7[%c0_15, %c0_16] : memref<32x128xbf16, #tpu.memory_space<vmem>>, vector<32x128xbf16>
      %20 = arith.extf %19 : vector<32x128xbf16> to vector<32x128xf32>
      %21 = arith.addf %18, %20 : vector<32x128xf32>
      %cst_17 = arith.constant 0.000000e+00 : f32
      %22 = vector.broadcast %cst_17 : f32 to vector<32x128xf32>
      %23 = arith.maximumf %21, %22 : vector<32x128xf32>
      %24 = arith.truncf %23 : vector<32x128xf32> to vector<32x128xbf16>
      %c0_18 = arith.constant 0 : index
      %c0_19 = arith.constant 0 : index
      %25 = vector.load %arg8[%c0_18, %c0_19] : memref<32x128xbf16, #tpu.memory_space<vmem>>, vector<32x128xbf16>
      tpu.vector_store %arg8[%c0_18, %c0_19], %24 {strides = array<i32>} : memref<32x128xbf16, #tpu.memory_space<vmem>>, vector<32x128xbf16>,
    } else {
    }
    return
  }
  func.func @transform_0(%arg0: i32, %arg1: i32, %arg2: i32) -> (i32, i32) {
    %c0_i32 = arith.constant 0 : i32
    return %arg0, %arg2 : i32, i32
  }
  func.func @transform_1(%arg0: i32, %arg1: i32, %arg2: i32) -> (i32, i32) {
    %c0_i32 = arith.constant 0 : i32
    return %arg2, %arg1 : i32, i32
  }
  func.func @transform_2(%arg0: i32, %arg1: i32, %arg2: i32) -> (i32, i32) {
    %c0_i32 = arith.constant 0 : i32
    %c0_i32_0 = arith.constant 0 : i32
    return %c0_i32, %arg1 : i32, i32
  }
  func.func @transform_3(%arg0: i32, %arg1: i32, %arg2: i32) -> (i32, i32) {
    %c0_i32 = arith.constant 0 : i32
    %c0_i32_0 = arith.constant 0 : i32
    return %c0_i32, %arg1 : i32, i32
  }
  func.func @transform_4(%arg0: i32, %arg1: i32, %arg2: i32) -> (i32, i32) {
    %c0_i32 = arith.constant 0 : i32
    return %arg0, %arg1 : i32, i32
  }
  func.func @transform_5(%arg0: i32, %arg1: i32, %arg2: i32) -> (i32, i32) {
    %c0_i32 = arith.constant 0 : i32
    return %arg0, %arg1 : i32, i32
  }
}

module attributes {stable_mosaic.version = 11 : i64} {
  func.func @kernel(%arg0: i32, %arg1: i32, %arg2: i32, %arg3: memref<32x384xbf16, #tpu.memory_space<vmem>>, %arg4: memref<384x128xbf16, #tpu.memory_space<vmem>>, %arg5: memref<1x128xf32, #tpu.memory_space<vmem>>, %arg6: memref<1x128xf32, #tpu.memory_space<vmem>>, %arg7: memref<32x128xbf16, #tpu.memory_space<vmem>>, %arg8: memref<32x128xf32, #tpu.memory_space<vmem>>) attributes {dimension_semantics = [#tpu.dimension_semantics<parallel>, #tpu.dimension_semantics<parallel>, #tpu.dimension_semantics<arbitrary>], iteration_bounds = array<i64: 1, 1, 3>, scalar_prefetch = 0 : i64, scratch_operands = 1 : i64, tpu.core_type = #tpu.core_type<tc>, window_params = [{transform_indices = @transform_0, window_bounds = array<i64: 32, 384>}, {transform_indices = @transform_1, window_bounds = array<i64: 384, 128>}, {transform_indices = @transform_2, window_bounds = array<i64: 1, 128>}, {transform_indices = @transform_3, window_bounds = array<i64: 1, 128>}, {transform_indices = @transform_4, window_bounds = array<i64: 32, 128>}]} {
    %c0_i32 = arith.constant 0 : i32
    %0 = arith.cmpi eq, %arg2, %c0_i32 : i32
    %1 = arith.extui %0 : i1 to i32
    %c0_i32_0 = arith.constant 0 : i32
    %2 = arith.cmpi ne, %1, %c0_i32_0 : i32
    scf.if %2 {
      %cst_9 = arith.constant 0.000000e+00 : f32
      %12 = vector.broadcast %cst_9 : f32 to vector<32x128xf32>
      %c0_10 = arith.constant 0 : index
      %c0_11 = arith.constant 0 : index
      %13 = vector.load %arg8[%c0_10, %c0_11] : memref<32x128xf32, #tpu.memory_space<vmem>>, vector<32x128xf32>
      tpu.vector_store %arg8[%c0_10, %c0_11], %12 {strides = array<i32>} : memref<32x128xf32, #tpu.memory_space<vmem>>, vector<32x128xf32>,
    } else {
    }
    %c0 = arith.constant 0 : index
    %c0_1 = arith.constant 0 : index
    %3 = vector.load %arg8[%c0, %c0_1] : memref<32x128xf32, #tpu.memory_space<vmem>>, vector<32x128xf32>
    %c0_2 = arith.constant 0 : index
    %c0_3 = arith.constant 0 : index
    %4 = vector.load %arg3[%c0_2, %c0_3] : memref<32x384xbf16, #tpu.memory_space<vmem>>, vector<32x384xbf16>
    %c0_4 = arith.constant 0 : index
    %c0_5 = arith.constant 0 : index
    %5 = vector.load %arg4[%c0_4, %c0_5] : memref<384x128xbf16, #tpu.memory_space<vmem>>, vector<384x128xbf16>
    %cst = arith.constant dense<0.000000e+00> : vector<32x128xf32>
    %6 = tpu.matmul %4, %5, %cst {dimension_numbers = #tpu.dot_dimension_numbers<[1], [0], [0], [1], [0, 0, 1, 1], [], []>} : vector<32x384xbf16>, vector<384x128xbf16>, vector<32x128xf32> -> vector<32x128xf32>
    %7 = arith.addf %3, %6 : vector<32x128xf32>
    %c0_6 = arith.constant 0 : index
    %c0_7 = arith.constant 0 : index
    %8 = vector.load %arg8[%c0_6, %c0_7] : memref<32x128xf32, #tpu.memory_space<vmem>>, vector<32x128xf32>
    tpu.vector_store %arg8[%c0_6, %c0_7], %7 {strides = array<i32>} : memref<32x128xf32, #tpu.memory_space<vmem>>, vector<32x128xf32>,
    %c2_i32 = arith.constant 2 : i32
    %9 = arith.cmpi eq, %arg2, %c2_i32 : i32
    %10 = arith.extui %9 : i1 to i32
    %c0_i32_8 = arith.constant 0 : i32
    %11 = arith.cmpi ne, %10, %c0_i32_8 : i32
    scf.if %11 {
      %c0_9 = arith.constant 0 : index
      %c0_10 = arith.constant 0 : index
      %12 = vector.load %arg8[%c0_9, %c0_10] : memref<32x128xf32, #tpu.memory_space<vmem>>, vector<32x128xf32>
      %c0_11 = arith.constant 0 : index
      %c0_12 = arith.constant 0 : index
      %13 = vector.load %arg5[%c0_11, %c0_12] : memref<1x128xf32, #tpu.memory_space<vmem>>, vector<1x128xf32>
      %14 = vector.broadcast %13 : vector<1x128xf32> to vector<32x128xf32>
      %15 = arith.mulf %12, %14 : vector<32x128xf32>
      %c0_13 = arith.constant 0 : index
      %c0_14 = arith.constant 0 : index
      %16 = vector.load %arg6[%c0_13, %c0_14] : memref<1x128xf32, #tpu.memory_space<vmem>>, vector<1x128xf32>
      %17 = vector.broadcast %16 : vector<1x128xf32> to vector<32x128xf32>
      %18 = arith.addf %15, %17 : vector<32x128xf32>
      %cst_15 = arith.constant 0.000000e+00 : f32
      %19 = vector.broadcast %cst_15 : f32 to vector<32x128xf32>
      %20 = arith.maximumf %18, %19 : vector<32x128xf32>
      %21 = arith.truncf %20 : vector<32x128xf32> to vector<32x128xbf16>
      %c0_16 = arith.constant 0 : index
      %c0_17 = arith.constant 0 : index
      %22 = vector.load %arg7[%c0_16, %c0_17] : memref<32x128xbf16, #tpu.memory_space<vmem>>, vector<32x128xbf16>
      tpu.vector_store %arg7[%c0_16, %c0_17], %21 {strides = array<i32>} : memref<32x128xbf16, #tpu.memory_space<vmem>>, vector<32x128xbf16>,
    } else {
    }
    return
  }
  func.func @transform_0(%arg0: i32, %arg1: i32, %arg2: i32) -> (i32, i32) {
    %c0_i32 = arith.constant 0 : i32
    return %arg0, %arg2 : i32, i32
  }
  func.func @transform_1(%arg0: i32, %arg1: i32, %arg2: i32) -> (i32, i32) {
    %c0_i32 = arith.constant 0 : i32
    return %arg2, %arg1 : i32, i32
  }
  func.func @transform_2(%arg0: i32, %arg1: i32, %arg2: i32) -> (i32, i32) {
    %c0_i32 = arith.constant 0 : i32
    %c0_i32_0 = arith.constant 0 : i32
    return %c0_i32, %arg1 : i32, i32
  }
  func.func @transform_3(%arg0: i32, %arg1: i32, %arg2: i32) -> (i32, i32) {
    %c0_i32 = arith.constant 0 : i32
    %c0_i32_0 = arith.constant 0 : i32
    return %c0_i32, %arg1 : i32, i32
  }
  func.func @transform_4(%arg0: i32, %arg1: i32, %arg2: i32) -> (i32, i32) {
    %c0_i32 = arith.constant 0 : i32
    return %arg0, %arg1 : i32, i32
  }
}

module attributes {stable_mosaic.version = 11 : i64} {
  func.func @kernel(%arg0: i32, %arg1: i32, %arg2: i32, %arg3: memref<8x384xbf16, #tpu.memory_space<vmem>>, %arg4: memref<384x256xbf16, #tpu.memory_space<vmem>>, %arg5: memref<1x256xf32, #tpu.memory_space<vmem>>, %arg6: memref<1x256xf32, #tpu.memory_space<vmem>>, %arg7: memref<8x256xbf16, #tpu.memory_space<vmem>>, %arg8: memref<8x256xf32, #tpu.memory_space<vmem>>) attributes {dimension_semantics = [#tpu.dimension_semantics<parallel>, #tpu.dimension_semantics<parallel>, #tpu.dimension_semantics<arbitrary>], iteration_bounds = array<i64: 1, 1, 3>, scalar_prefetch = 0 : i64, scratch_operands = 1 : i64, tpu.core_type = #tpu.core_type<tc>, window_params = [{transform_indices = @transform_0, window_bounds = array<i64: 8, 384>}, {transform_indices = @transform_1, window_bounds = array<i64: 384, 256>}, {transform_indices = @transform_2, window_bounds = array<i64: 1, 256>}, {transform_indices = @transform_3, window_bounds = array<i64: 1, 256>}, {transform_indices = @transform_4, window_bounds = array<i64: 8, 256>}]} {
    %c0_i32 = arith.constant 0 : i32
    %0 = arith.cmpi eq, %arg2, %c0_i32 : i32
    %1 = arith.extui %0 : i1 to i32
    %c0_i32_0 = arith.constant 0 : i32
    %2 = arith.cmpi ne, %1, %c0_i32_0 : i32
    scf.if %2 {
      %cst_9 = arith.constant 0.000000e+00 : f32
      %12 = vector.broadcast %cst_9 : f32 to vector<8x256xf32>
      %c0_10 = arith.constant 0 : index
      %c0_11 = arith.constant 0 : index
      %13 = vector.load %arg8[%c0_10, %c0_11] : memref<8x256xf32, #tpu.memory_space<vmem>>, vector<8x256xf32>
      tpu.vector_store %arg8[%c0_10, %c0_11], %12 {strides = array<i32>} : memref<8x256xf32, #tpu.memory_space<vmem>>, vector<8x256xf32>,
    } else {
    }
    %c0 = arith.constant 0 : index
    %c0_1 = arith.constant 0 : index
    %3 = vector.load %arg8[%c0, %c0_1] : memref<8x256xf32, #tpu.memory_space<vmem>>, vector<8x256xf32>
    %c0_2 = arith.constant 0 : index
    %c0_3 = arith.constant 0 : index
    %4 = vector.load %arg3[%c0_2, %c0_3] : memref<8x384xbf16, #tpu.memory_space<vmem>>, vector<8x384xbf16>
    %c0_4 = arith.constant 0 : index
    %c0_5 = arith.constant 0 : index
    %5 = vector.load %arg4[%c0_4, %c0_5] : memref<384x256xbf16, #tpu.memory_space<vmem>>, vector<384x256xbf16>
    %cst = arith.constant dense<0.000000e+00> : vector<8x256xf32>
    %6 = tpu.matmul %4, %5, %cst {dimension_numbers = #tpu.dot_dimension_numbers<[1], [0], [0], [1], [0, 0, 1, 1], [], []>} : vector<8x384xbf16>, vector<384x256xbf16>, vector<8x256xf32> -> vector<8x256xf32>
    %7 = arith.addf %3, %6 : vector<8x256xf32>
    %c0_6 = arith.constant 0 : index
    %c0_7 = arith.constant 0 : index
    %8 = vector.load %arg8[%c0_6, %c0_7] : memref<8x256xf32, #tpu.memory_space<vmem>>, vector<8x256xf32>
    tpu.vector_store %arg8[%c0_6, %c0_7], %7 {strides = array<i32>} : memref<8x256xf32, #tpu.memory_space<vmem>>, vector<8x256xf32>,
    %c2_i32 = arith.constant 2 : i32
    %9 = arith.cmpi eq, %arg2, %c2_i32 : i32
    %10 = arith.extui %9 : i1 to i32
    %c0_i32_8 = arith.constant 0 : i32
    %11 = arith.cmpi ne, %10, %c0_i32_8 : i32
    scf.if %11 {
      %c0_9 = arith.constant 0 : index
      %c0_10 = arith.constant 0 : index
      %12 = vector.load %arg8[%c0_9, %c0_10] : memref<8x256xf32, #tpu.memory_space<vmem>>, vector<8x256xf32>
      %c0_11 = arith.constant 0 : index
      %c0_12 = arith.constant 0 : index
      %13 = vector.load %arg5[%c0_11, %c0_12] : memref<1x256xf32, #tpu.memory_space<vmem>>, vector<1x256xf32>
      %14 = vector.broadcast %13 : vector<1x256xf32> to vector<8x256xf32>
      %15 = arith.mulf %12, %14 : vector<8x256xf32>
      %c0_13 = arith.constant 0 : index
      %c0_14 = arith.constant 0 : index
      %16 = vector.load %arg6[%c0_13, %c0_14] : memref<1x256xf32, #tpu.memory_space<vmem>>, vector<1x256xf32>
      %17 = vector.broadcast %16 : vector<1x256xf32> to vector<8x256xf32>
      %18 = arith.addf %15, %17 : vector<8x256xf32>
      %cst_15 = arith.constant 0.000000e+00 : f32
      %19 = vector.broadcast %cst_15 : f32 to vector<8x256xf32>
      %20 = arith.maximumf %18, %19 : vector<8x256xf32>
      %21 = arith.truncf %20 : vector<8x256xf32> to vector<8x256xbf16>
      %c0_16 = arith.constant 0 : index
      %c0_17 = arith.constant 0 : index
      %22 = vector.load %arg7[%c0_16, %c0_17] : memref<8x256xbf16, #tpu.memory_space<vmem>>, vector<8x256xbf16>
      tpu.vector_store %arg7[%c0_16, %c0_17], %21 {strides = array<i32>} : memref<8x256xbf16, #tpu.memory_space<vmem>>, vector<8x256xbf16>,
    } else {
    }
    return
  }
  func.func @transform_0(%arg0: i32, %arg1: i32, %arg2: i32) -> (i32, i32) {
    %c0_i32 = arith.constant 0 : i32
    return %arg0, %arg2 : i32, i32
  }
  func.func @transform_1(%arg0: i32, %arg1: i32, %arg2: i32) -> (i32, i32) {
    %c0_i32 = arith.constant 0 : i32
    return %arg2, %arg1 : i32, i32
  }
  func.func @transform_2(%arg0: i32, %arg1: i32, %arg2: i32) -> (i32, i32) {
    %c0_i32 = arith.constant 0 : i32
    %c0_i32_0 = arith.constant 0 : i32
    return %c0_i32, %arg1 : i32, i32
  }
  func.func @transform_3(%arg0: i32, %arg1: i32, %arg2: i32) -> (i32, i32) {
    %c0_i32 = arith.constant 0 : i32
    %c0_i32_0 = arith.constant 0 : i32
    return %c0_i32, %arg1 : i32, i32
  }
  func.func @transform_4(%arg0: i32, %arg1: i32, %arg2: i32) -> (i32, i32) {
    %c0_i32 = arith.constant 0 : i32
    return %arg0, %arg1 : i32, i32
  }
}

module attributes {stable_mosaic.version = 11 : i64} {
  func.func @kernel(%arg0: i32, %arg1: i32, %arg2: i32, %arg3: memref<8x128xbf16, #tpu.memory_space<vmem>>, %arg4: memref<128x256xbf16, #tpu.memory_space<vmem>>, %arg5: memref<1x256xf32, #tpu.memory_space<vmem>>, %arg6: memref<1x256xf32, #tpu.memory_space<vmem>>, %arg7: memref<8x256xbf16, #tpu.memory_space<vmem>>, %arg8: memref<8x256xf32, #tpu.memory_space<vmem>>) attributes {dimension_semantics = [#tpu.dimension_semantics<parallel>, #tpu.dimension_semantics<parallel>, #tpu.dimension_semantics<arbitrary>], iteration_bounds = array<i64: 1, 1, 1>, scalar_prefetch = 0 : i64, scratch_operands = 1 : i64, tpu.core_type = #tpu.core_type<tc>, window_params = [{transform_indices = @transform_0, window_bounds = array<i64: 8, 128>}, {transform_indices = @transform_1, window_bounds = array<i64: 128, 256>}, {transform_indices = @transform_2, window_bounds = array<i64: 1, 256>}, {transform_indices = @transform_3, window_bounds = array<i64: 1, 256>}, {transform_indices = @transform_4, window_bounds = array<i64: 8, 256>}]} {
    %c0_i32 = arith.constant 0 : i32
    %0 = arith.cmpi eq, %arg2, %c0_i32 : i32
    %1 = arith.extui %0 : i1 to i32
    %c0_i32_0 = arith.constant 0 : i32
    %2 = arith.cmpi ne, %1, %c0_i32_0 : i32
    scf.if %2 {
      %cst_10 = arith.constant 0.000000e+00 : f32
      %12 = vector.broadcast %cst_10 : f32 to vector<8x256xf32>
      %c0_11 = arith.constant 0 : index
      %c0_12 = arith.constant 0 : index
      %13 = vector.load %arg8[%c0_11, %c0_12] : memref<8x256xf32, #tpu.memory_space<vmem>>, vector<8x256xf32>
      tpu.vector_store %arg8[%c0_11, %c0_12], %12 {strides = array<i32>} : memref<8x256xf32, #tpu.memory_space<vmem>>, vector<8x256xf32>,
    } else {
    }
    %c0 = arith.constant 0 : index
    %c0_1 = arith.constant 0 : index
    %3 = vector.load %arg8[%c0, %c0_1] : memref<8x256xf32, #tpu.memory_space<vmem>>, vector<8x256xf32>
    %c0_2 = arith.constant 0 : index
    %c0_3 = arith.constant 0 : index
    %4 = vector.load %arg3[%c0_2, %c0_3] : memref<8x128xbf16, #tpu.memory_space<vmem>>, vector<8x128xbf16>
    %c0_4 = arith.constant 0 : index
    %c0_5 = arith.constant 0 : index
    %5 = vector.load %arg4[%c0_4, %c0_5] : memref<128x256xbf16, #tpu.memory_space<vmem>>, vector<128x256xbf16>
    %cst = arith.constant dense<0.000000e+00> : vector<8x256xf32>
    %6 = tpu.matmul %4, %5, %cst {dimension_numbers = #tpu.dot_dimension_numbers<[1], [0], [0], [1], [0, 0, 1, 1], [], []>} : vector<8x128xbf16>, vector<128x256xbf16>, vector<8x256xf32> -> vector<8x256xf32>
    %7 = arith.addf %3, %6 : vector<8x256xf32>
    %c0_6 = arith.constant 0 : index
    %c0_7 = arith.constant 0 : index
    %8 = vector.load %arg8[%c0_6, %c0_7] : memref<8x256xf32, #tpu.memory_space<vmem>>, vector<8x256xf32>
    tpu.vector_store %arg8[%c0_6, %c0_7], %7 {strides = array<i32>} : memref<8x256xf32, #tpu.memory_space<vmem>>, vector<8x256xf32>,
    %c0_i32_8 = arith.constant 0 : i32
    %9 = arith.cmpi eq, %arg2, %c0_i32_8 : i32
    %10 = arith.extui %9 : i1 to i32
    %c0_i32_9 = arith.constant 0 : i32
    %11 = arith.cmpi ne, %10, %c0_i32_9 : i32
    scf.if %11 {
      %c0_10 = arith.constant 0 : index
      %c0_11 = arith.constant 0 : index
      %12 = vector.load %arg8[%c0_10, %c0_11] : memref<8x256xf32, #tpu.memory_space<vmem>>, vector<8x256xf32>
      %c0_12 = arith.constant 0 : index
      %c0_13 = arith.constant 0 : index
      %13 = vector.load %arg5[%c0_12, %c0_13] : memref<1x256xf32, #tpu.memory_space<vmem>>, vector<1x256xf32>
      %14 = vector.broadcast %13 : vector<1x256xf32> to vector<8x256xf32>
      %15 = arith.mulf %12, %14 : vector<8x256xf32>
      %c0_14 = arith.constant 0 : index
      %c0_15 = arith.constant 0 : index
      %16 = vector.load %arg6[%c0_14, %c0_15] : memref<1x256xf32, #tpu.memory_space<vmem>>, vector<1x256xf32>
      %17 = vector.broadcast %16 : vector<1x256xf32> to vector<8x256xf32>
      %18 = arith.addf %15, %17 : vector<8x256xf32>
      %19 = arith.truncf %18 : vector<8x256xf32> to vector<8x256xbf16>
      %c0_16 = arith.constant 0 : index
      %c0_17 = arith.constant 0 : index
      %20 = vector.load %arg7[%c0_16, %c0_17] : memref<8x256xbf16, #tpu.memory_space<vmem>>, vector<8x256xbf16>
      tpu.vector_store %arg7[%c0_16, %c0_17], %19 {strides = array<i32>} : memref<8x256xbf16, #tpu.memory_space<vmem>>, vector<8x256xbf16>,
    } else {
    }
    return
  }
  func.func @transform_0(%arg0: i32, %arg1: i32, %arg2: i32) -> (i32, i32) {
    %c0_i32 = arith.constant 0 : i32
    return %arg0, %arg2 : i32, i32
  }
  func.func @transform_1(%arg0: i32, %arg1: i32, %arg2: i32) -> (i32, i32) {
    %c0_i32 = arith.constant 0 : i32
    return %arg2, %arg1 : i32, i32
  }
  func.func @transform_2(%arg0: i32, %arg1: i32, %arg2: i32) -> (i32, i32) {
    %c0_i32 = arith.constant 0 : i32
    %c0_i32_0 = arith.constant 0 : i32
    return %c0_i32, %arg1 : i32, i32
  }
  func.func @transform_3(%arg0: i32, %arg1: i32, %arg2: i32) -> (i32, i32) {
    %c0_i32 = arith.constant 0 : i32
    %c0_i32_0 = arith.constant 0 : i32
    return %c0_i32, %arg1 : i32, i32
  }
  func.func @transform_4(%arg0: i32, %arg1: i32, %arg2: i32) -> (i32, i32) {
    %c0_i32 = arith.constant 0 : i32
    return %arg0, %arg1 : i32, i32
  }
}

module attributes {stable_mosaic.version = 11 : i64} {
  func.func @kernel(%arg0: i32, %arg1: i32, %arg2: i32, %arg3: memref<8x384xbf16, #tpu.memory_space<vmem>>, %arg4: memref<384x256xbf16, #tpu.memory_space<vmem>>, %arg5: memref<1x256xf32, #tpu.memory_space<vmem>>, %arg6: memref<1x256xf32, #tpu.memory_space<vmem>>, %arg7: memref<8x256xbf16, #tpu.memory_space<vmem>>, %arg8: memref<8x256xbf16, #tpu.memory_space<vmem>>, %arg9: memref<8x256xf32, #tpu.memory_space<vmem>>) attributes {dimension_semantics = [#tpu.dimension_semantics<parallel>, #tpu.dimension_semantics<parallel>, #tpu.dimension_semantics<arbitrary>], iteration_bounds = array<i64: 1, 1, 6>, scalar_prefetch = 0 : i64, scratch_operands = 1 : i64, tpu.core_type = #tpu.core_type<tc>, window_params = [{transform_indices = @transform_0, window_bounds = array<i64: 8, 384>}, {transform_indices = @transform_1, window_bounds = array<i64: 384, 256>}, {transform_indices = @transform_2, window_bounds = array<i64: 1, 256>}, {transform_indices = @transform_3, window_bounds = array<i64: 1, 256>}, {transform_indices = @transform_4, window_bounds = array<i64: 8, 256>}, {transform_indices = @transform_5, window_bounds = array<i64: 8, 256>}]} {
    %c0_i32 = arith.constant 0 : i32
    %0 = arith.cmpi eq, %arg2, %c0_i32 : i32
    %1 = arith.extui %0 : i1 to i32
    %c0_i32_0 = arith.constant 0 : i32
    %2 = arith.cmpi ne, %1, %c0_i32_0 : i32
    scf.if %2 {
      %cst_9 = arith.constant 0.000000e+00 : f32
      %12 = vector.broadcast %cst_9 : f32 to vector<8x256xf32>
      %c0_10 = arith.constant 0 : index
      %c0_11 = arith.constant 0 : index
      %13 = vector.load %arg9[%c0_10, %c0_11] : memref<8x256xf32, #tpu.memory_space<vmem>>, vector<8x256xf32>
      tpu.vector_store %arg9[%c0_10, %c0_11], %12 {strides = array<i32>} : memref<8x256xf32, #tpu.memory_space<vmem>>, vector<8x256xf32>,
    } else {
    }
    %c0 = arith.constant 0 : index
    %c0_1 = arith.constant 0 : index
    %3 = vector.load %arg9[%c0, %c0_1] : memref<8x256xf32, #tpu.memory_space<vmem>>, vector<8x256xf32>
    %c0_2 = arith.constant 0 : index
    %c0_3 = arith.constant 0 : index
    %4 = vector.load %arg3[%c0_2, %c0_3] : memref<8x384xbf16, #tpu.memory_space<vmem>>, vector<8x384xbf16>
    %c0_4 = arith.constant 0 : index
    %c0_5 = arith.constant 0 : index
    %5 = vector.load %arg4[%c0_4, %c0_5] : memref<384x256xbf16, #tpu.memory_space<vmem>>, vector<384x256xbf16>
    %cst = arith.constant dense<0.000000e+00> : vector<8x256xf32>
    %6 = tpu.matmul %4, %5, %cst {dimension_numbers = #tpu.dot_dimension_numbers<[1], [0], [0], [1], [0, 0, 1, 1], [], []>} : vector<8x384xbf16>, vector<384x256xbf16>, vector<8x256xf32> -> vector<8x256xf32>
    %7 = arith.addf %3, %6 : vector<8x256xf32>
    %c0_6 = arith.constant 0 : index
    %c0_7 = arith.constant 0 : index
    %8 = vector.load %arg9[%c0_6, %c0_7] : memref<8x256xf32, #tpu.memory_space<vmem>>, vector<8x256xf32>
    tpu.vector_store %arg9[%c0_6, %c0_7], %7 {strides = array<i32>} : memref<8x256xf32, #tpu.memory_space<vmem>>, vector<8x256xf32>,
    %c5_i32 = arith.constant 5 : i32
    %9 = arith.cmpi eq, %arg2, %c5_i32 : i32
    %10 = arith.extui %9 : i1 to i32
    %c0_i32_8 = arith.constant 0 : i32
    %11 = arith.cmpi ne, %10, %c0_i32_8 : i32
    scf.if %11 {
      %c0_9 = arith.constant 0 : index
      %c0_10 = arith.constant 0 : index
      %12 = vector.load %arg9[%c0_9, %c0_10] : memref<8x256xf32, #tpu.memory_space<vmem>>, vector<8x256xf32>
      %c0_11 = arith.constant 0 : index
      %c0_12 = arith.constant 0 : index
      %13 = vector.load %arg5[%c0_11, %c0_12] : memref<1x256xf32, #tpu.memory_space<vmem>>, vector<1x256xf32>
      %14 = vector.broadcast %13 : vector<1x256xf32> to vector<8x256xf32>
      %15 = arith.mulf %12, %14 : vector<8x256xf32>
      %c0_13 = arith.constant 0 : index
      %c0_14 = arith.constant 0 : index
      %16 = vector.load %arg6[%c0_13, %c0_14] : memref<1x256xf32, #tpu.memory_space<vmem>>, vector<1x256xf32>
      %17 = vector.broadcast %16 : vector<1x256xf32> to vector<8x256xf32>
      %18 = arith.addf %15, %17 : vector<8x256xf32>
      %c0_15 = arith.constant 0 : index
      %c0_16 = arith.constant 0 : index
      %19 = vector.load %arg7[%c0_15, %c0_16] : memref<8x256xbf16, #tpu.memory_space<vmem>>, vector<8x256xbf16>
      %20 = arith.extf %19 : vector<8x256xbf16> to vector<8x256xf32>
      %21 = arith.addf %18, %20 : vector<8x256xf32>
      %cst_17 = arith.constant 0.000000e+00 : f32
      %22 = vector.broadcast %cst_17 : f32 to vector<8x256xf32>
      %23 = arith.maximumf %21, %22 : vector<8x256xf32>
      %24 = arith.truncf %23 : vector<8x256xf32> to vector<8x256xbf16>
      %c0_18 = arith.constant 0 : index
      %c0_19 = arith.constant 0 : index
      %25 = vector.load %arg8[%c0_18, %c0_19] : memref<8x256xbf16, #tpu.memory_space<vmem>>, vector<8x256xbf16>
      tpu.vector_store %arg8[%c0_18, %c0_19], %24 {strides = array<i32>} : memref<8x256xbf16, #tpu.memory_space<vmem>>, vector<8x256xbf16>,
    } else {
    }
    return
  }
  func.func @transform_0(%arg0: i32, %arg1: i32, %arg2: i32) -> (i32, i32) {
    %c0_i32 = arith.constant 0 : i32
    return %arg0, %arg2 : i32, i32
  }
  func.func @transform_1(%arg0: i32, %arg1: i32, %arg2: i32) -> (i32, i32) {
    %c0_i32 = arith.constant 0 : i32
    return %arg2, %arg1 : i32, i32
  }
  func.func @transform_2(%arg0: i32, %arg1: i32, %arg2: i32) -> (i32, i32) {
    %c0_i32 = arith.constant 0 : i32
    %c0_i32_0 = arith.constant 0 : i32
    return %c0_i32, %arg1 : i32, i32
  }
  func.func @transform_3(%arg0: i32, %arg1: i32, %arg2: i32) -> (i32, i32) {
    %c0_i32 = arith.constant 0 : i32
    %c0_i32_0 = arith.constant 0 : i32
    return %c0_i32, %arg1 : i32, i32
  }
  func.func @transform_4(%arg0: i32, %arg1: i32, %arg2: i32) -> (i32, i32) {
    %c0_i32 = arith.constant 0 : i32
    return %arg0, %arg1 : i32, i32
  }
  func.func @transform_5(%arg0: i32, %arg1: i32, %arg2: i32) -> (i32, i32) {
    %c0_i32 = arith.constant 0 : i32
    return %arg0, %arg1 : i32, i32
  }
}

module attributes {stable_mosaic.version = 11 : i64} {
  func.func @kernel(%arg0: i32, %arg1: i32, %arg2: i32, %arg3: memref<8x384xbf16, #tpu.memory_space<vmem>>, %arg4: memref<384x256xbf16, #tpu.memory_space<vmem>>, %arg5: memref<1x256xf32, #tpu.memory_space<vmem>>, %arg6: memref<1x256xf32, #tpu.memory_space<vmem>>, %arg7: memref<8x256xbf16, #tpu.memory_space<vmem>>, %arg8: memref<8x256xf32, #tpu.memory_space<vmem>>) attributes {dimension_semantics = [#tpu.dimension_semantics<parallel>, #tpu.dimension_semantics<parallel>, #tpu.dimension_semantics<arbitrary>], iteration_bounds = array<i64: 1, 1, 6>, scalar_prefetch = 0 : i64, scratch_operands = 1 : i64, tpu.core_type = #tpu.core_type<tc>, window_params = [{transform_indices = @transform_0, window_bounds = array<i64: 8, 384>}, {transform_indices = @transform_1, window_bounds = array<i64: 384, 256>}, {transform_indices = @transform_2, window_bounds = array<i64: 1, 256>}, {transform_indices = @transform_3, window_bounds = array<i64: 1, 256>}, {transform_indices = @transform_4, window_bounds = array<i64: 8, 256>}]} {
    %c0_i32 = arith.constant 0 : i32
    %0 = arith.cmpi eq, %arg2, %c0_i32 : i32
    %1 = arith.extui %0 : i1 to i32
    %c0_i32_0 = arith.constant 0 : i32
    %2 = arith.cmpi ne, %1, %c0_i32_0 : i32
    scf.if %2 {
      %cst_9 = arith.constant 0.000000e+00 : f32
      %12 = vector.broadcast %cst_9 : f32 to vector<8x256xf32>
      %c0_10 = arith.constant 0 : index
      %c0_11 = arith.constant 0 : index
      %13 = vector.load %arg8[%c0_10, %c0_11] : memref<8x256xf32, #tpu.memory_space<vmem>>, vector<8x256xf32>
      tpu.vector_store %arg8[%c0_10, %c0_11], %12 {strides = array<i32>} : memref<8x256xf32, #tpu.memory_space<vmem>>, vector<8x256xf32>,
    } else {
    }
    %c0 = arith.constant 0 : index
    %c0_1 = arith.constant 0 : index
    %3 = vector.load %arg8[%c0, %c0_1] : memref<8x256xf32, #tpu.memory_space<vmem>>, vector<8x256xf32>
    %c0_2 = arith.constant 0 : index
    %c0_3 = arith.constant 0 : index
    %4 = vector.load %arg3[%c0_2, %c0_3] : memref<8x384xbf16, #tpu.memory_space<vmem>>, vector<8x384xbf16>
    %c0_4 = arith.constant 0 : index
    %c0_5 = arith.constant 0 : index
    %5 = vector.load %arg4[%c0_4, %c0_5] : memref<384x256xbf16, #tpu.memory_space<vmem>>, vector<384x256xbf16>
    %cst = arith.constant dense<0.000000e+00> : vector<8x256xf32>
    %6 = tpu.matmul %4, %5, %cst {dimension_numbers = #tpu.dot_dimension_numbers<[1], [0], [0], [1], [0, 0, 1, 1], [], []>} : vector<8x384xbf16>, vector<384x256xbf16>, vector<8x256xf32> -> vector<8x256xf32>
    %7 = arith.addf %3, %6 : vector<8x256xf32>
    %c0_6 = arith.constant 0 : index
    %c0_7 = arith.constant 0 : index
    %8 = vector.load %arg8[%c0_6, %c0_7] : memref<8x256xf32, #tpu.memory_space<vmem>>, vector<8x256xf32>
    tpu.vector_store %arg8[%c0_6, %c0_7], %7 {strides = array<i32>} : memref<8x256xf32, #tpu.memory_space<vmem>>, vector<8x256xf32>,
    %c5_i32 = arith.constant 5 : i32
    %9 = arith.cmpi eq, %arg2, %c5_i32 : i32
    %10 = arith.extui %9 : i1 to i32
    %c0_i32_8 = arith.constant 0 : i32
    %11 = arith.cmpi ne, %10, %c0_i32_8 : i32
    scf.if %11 {
      %c0_9 = arith.constant 0 : index
      %c0_10 = arith.constant 0 : index
      %12 = vector.load %arg8[%c0_9, %c0_10] : memref<8x256xf32, #tpu.memory_space<vmem>>, vector<8x256xf32>
      %c0_11 = arith.constant 0 : index
      %c0_12 = arith.constant 0 : index
      %13 = vector.load %arg5[%c0_11, %c0_12] : memref<1x256xf32, #tpu.memory_space<vmem>>, vector<1x256xf32>
      %14 = vector.broadcast %13 : vector<1x256xf32> to vector<8x256xf32>
      %15 = arith.mulf %12, %14 : vector<8x256xf32>
      %c0_13 = arith.constant 0 : index
      %c0_14 = arith.constant 0 : index
      %16 = vector.load %arg6[%c0_13, %c0_14] : memref<1x256xf32, #tpu.memory_space<vmem>>, vector<1x256xf32>
      %17 = vector.broadcast %16 : vector<1x256xf32> to vector<8x256xf32>
      %18 = arith.addf %15, %17 : vector<8x256xf32>
      %cst_15 = arith.constant 0.000000e+00 : f32
      %19 = vector.broadcast %cst_15 : f32 to vector<8x256xf32>
      %20 = arith.maximumf %18, %19 : vector<8x256xf32>
      %21 = arith.truncf %20 : vector<8x256xf32> to vector<8x256xbf16>
      %c0_16 = arith.constant 0 : index
      %c0_17 = arith.constant 0 : index
      %22 = vector.load %arg7[%c0_16, %c0_17] : memref<8x256xbf16, #tpu.memory_space<vmem>>, vector<8x256xbf16>
      tpu.vector_store %arg7[%c0_16, %c0_17], %21 {strides = array<i32>} : memref<8x256xbf16, #tpu.memory_space<vmem>>, vector<8x256xbf16>,
    } else {
    }
    return
  }
  func.func @transform_0(%arg0: i32, %arg1: i32, %arg2: i32) -> (i32, i32) {
    %c0_i32 = arith.constant 0 : i32
    return %arg0, %arg2 : i32, i32
  }
  func.func @transform_1(%arg0: i32, %arg1: i32, %arg2: i32) -> (i32, i32) {
    %c0_i32 = arith.constant 0 : i32
    return %arg2, %arg1 : i32, i32
  }
  func.func @transform_2(%arg0: i32, %arg1: i32, %arg2: i32) -> (i32, i32) {
    %c0_i32 = arith.constant 0 : i32
    %c0_i32_0 = arith.constant 0 : i32
    return %c0_i32, %arg1 : i32, i32
  }
  func.func @transform_3(%arg0: i32, %arg1: i32, %arg2: i32) -> (i32, i32) {
    %c0_i32 = arith.constant 0 : i32
    %c0_i32_0 = arith.constant 0 : i32
    return %c0_i32, %arg1 : i32, i32
  }
  func.func @transform_4(%arg0: i32, %arg1: i32, %arg2: i32) -> (i32, i32) {
    %c0_i32 = arith.constant 0 : i32
    return %arg0, %arg1 : i32, i32
  }
}

module attributes {stable_mosaic.version = 11 : i64} {
  func.func @kernel(%arg0: i32, %arg1: i32, %arg2: i32, %arg3: memref<8x384xbf16, #tpu.memory_space<vmem>>, %arg4: memref<384x256xbf16, #tpu.memory_space<vmem>>, %arg5: memref<1x256xf32, #tpu.memory_space<vmem>>, %arg6: memref<1x256xf32, #tpu.memory_space<vmem>>, %arg7: memref<8x256xbf16, #tpu.memory_space<vmem>>, %arg8: memref<8x256xf32, #tpu.memory_space<vmem>>) attributes {dimension_semantics = [#tpu.dimension_semantics<parallel>, #tpu.dimension_semantics<parallel>, #tpu.dimension_semantics<arbitrary>], iteration_bounds = array<i64: 1, 2, 6>, scalar_prefetch = 0 : i64, scratch_operands = 1 : i64, tpu.core_type = #tpu.core_type<tc>, window_params = [{transform_indices = @transform_0, window_bounds = array<i64: 8, 384>}, {transform_indices = @transform_1, window_bounds = array<i64: 384, 256>}, {transform_indices = @transform_2, window_bounds = array<i64: 1, 256>}, {transform_indices = @transform_3, window_bounds = array<i64: 1, 256>}, {transform_indices = @transform_4, window_bounds = array<i64: 8, 256>}]} {
    %c0_i32 = arith.constant 0 : i32
    %0 = arith.cmpi eq, %arg2, %c0_i32 : i32
    %1 = arith.extui %0 : i1 to i32
    %c0_i32_0 = arith.constant 0 : i32
    %2 = arith.cmpi ne, %1, %c0_i32_0 : i32
    scf.if %2 {
      %cst_9 = arith.constant 0.000000e+00 : f32
      %12 = vector.broadcast %cst_9 : f32 to vector<8x256xf32>
      %c0_10 = arith.constant 0 : index
      %c0_11 = arith.constant 0 : index
      %13 = vector.load %arg8[%c0_10, %c0_11] : memref<8x256xf32, #tpu.memory_space<vmem>>, vector<8x256xf32>
      tpu.vector_store %arg8[%c0_10, %c0_11], %12 {strides = array<i32>} : memref<8x256xf32, #tpu.memory_space<vmem>>, vector<8x256xf32>,
    } else {
    }
    %c0 = arith.constant 0 : index
    %c0_1 = arith.constant 0 : index
    %3 = vector.load %arg8[%c0, %c0_1] : memref<8x256xf32, #tpu.memory_space<vmem>>, vector<8x256xf32>
    %c0_2 = arith.constant 0 : index
    %c0_3 = arith.constant 0 : index
    %4 = vector.load %arg3[%c0_2, %c0_3] : memref<8x384xbf16, #tpu.memory_space<vmem>>, vector<8x384xbf16>
    %c0_4 = arith.constant 0 : index
    %c0_5 = arith.constant 0 : index
    %5 = vector.load %arg4[%c0_4, %c0_5] : memref<384x256xbf16, #tpu.memory_space<vmem>>, vector<384x256xbf16>
    %cst = arith.constant dense<0.000000e+00> : vector<8x256xf32>
    %6 = tpu.matmul %4, %5, %cst {dimension_numbers = #tpu.dot_dimension_numbers<[1], [0], [0], [1], [0, 0, 1, 1], [], []>} : vector<8x384xbf16>, vector<384x256xbf16>, vector<8x256xf32> -> vector<8x256xf32>
    %7 = arith.addf %3, %6 : vector<8x256xf32>
    %c0_6 = arith.constant 0 : index
    %c0_7 = arith.constant 0 : index
    %8 = vector.load %arg8[%c0_6, %c0_7] : memref<8x256xf32, #tpu.memory_space<vmem>>, vector<8x256xf32>
    tpu.vector_store %arg8[%c0_6, %c0_7], %7 {strides = array<i32>} : memref<8x256xf32, #tpu.memory_space<vmem>>, vector<8x256xf32>,
    %c5_i32 = arith.constant 5 : i32
    %9 = arith.cmpi eq, %arg2, %c5_i32 : i32
    %10 = arith.extui %9 : i1 to i32
    %c0_i32_8 = arith.constant 0 : i32
    %11 = arith.cmpi ne, %10, %c0_i32_8 : i32
    scf.if %11 {
      %c0_9 = arith.constant 0 : index
      %c0_10 = arith.constant 0 : index
      %12 = vector.load %arg8[%c0_9, %c0_10] : memref<8x256xf32, #tpu.memory_space<vmem>>, vector<8x256xf32>
      %c0_11 = arith.constant 0 : index
      %c0_12 = arith.constant 0 : index
      %13 = vector.load %arg5[%c0_11, %c0_12] : memref<1x256xf32, #tpu.memory_space<vmem>>, vector<1x256xf32>
      %14 = vector.broadcast %13 : vector<1x256xf32> to vector<8x256xf32>
      %15 = arith.mulf %12, %14 : vector<8x256xf32>
      %c0_13 = arith.constant 0 : index
      %c0_14 = arith.constant 0 : index
      %16 = vector.load %arg6[%c0_13, %c0_14] : memref<1x256xf32, #tpu.memory_space<vmem>>, vector<1x256xf32>
      %17 = vector.broadcast %16 : vector<1x256xf32> to vector<8x256xf32>
      %18 = arith.addf %15, %17 : vector<8x256xf32>
      %cst_15 = arith.constant 0.000000e+00 : f32
      %19 = vector.broadcast %cst_15 : f32 to vector<8x256xf32>
      %20 = arith.maximumf %18, %19 : vector<8x256xf32>
      %21 = arith.truncf %20 : vector<8x256xf32> to vector<8x256xbf16>
      %c0_16 = arith.constant 0 : index
      %c0_17 = arith.constant 0 : index
      %22 = vector.load %arg7[%c0_16, %c0_17] : memref<8x256xbf16, #tpu.memory_space<vmem>>, vector<8x256xbf16>
      tpu.vector_store %arg7[%c0_16, %c0_17], %21 {strides = array<i32>} : memref<8x256xbf16, #tpu.memory_space<vmem>>, vector<8x256xbf16>,
    } else {
    }
    return
  }
  func.func @transform_0(%arg0: i32, %arg1: i32, %arg2: i32) -> (i32, i32) {
    %c0_i32 = arith.constant 0 : i32
    return %arg0, %arg2 : i32, i32
  }
  func.func @transform_1(%arg0: i32, %arg1: i32, %arg2: i32) -> (i32, i32) {
    %c0_i32 = arith.constant 0 : i32
    return %arg2, %arg1 : i32, i32
  }
  func.func @transform_2(%arg0: i32, %arg1: i32, %arg2: i32) -> (i32, i32) {
    %c0_i32 = arith.constant 0 : i32
    %c0_i32_0 = arith.constant 0 : i32
    return %c0_i32, %arg1 : i32, i32
  }
  func.func @transform_3(%arg0: i32, %arg1: i32, %arg2: i32) -> (i32, i32) {
    %c0_i32 = arith.constant 0 : i32
    %c0_i32_0 = arith.constant 0 : i32
    return %c0_i32, %arg1 : i32, i32
  }
  func.func @transform_4(%arg0: i32, %arg1: i32, %arg2: i32) -> (i32, i32) {
    %c0_i32 = arith.constant 0 : i32
    return %arg0, %arg1 : i32, i32
  }
}

module attributes {stable_mosaic.version = 11 : i64} {
  func.func @kernel(%arg0: i32, %arg1: i32, %arg2: i32, %arg3: memref<8x256xbf16, #tpu.memory_space<vmem>>, %arg4: memref<256x256xbf16, #tpu.memory_space<vmem>>, %arg5: memref<1x256xf32, #tpu.memory_space<vmem>>, %arg6: memref<1x256xf32, #tpu.memory_space<vmem>>, %arg7: memref<8x256xbf16, #tpu.memory_space<vmem>>, %arg8: memref<8x256xf32, #tpu.memory_space<vmem>>) attributes {dimension_semantics = [#tpu.dimension_semantics<parallel>, #tpu.dimension_semantics<parallel>, #tpu.dimension_semantics<arbitrary>], iteration_bounds = array<i64: 1, 2, 1>, scalar_prefetch = 0 : i64, scratch_operands = 1 : i64, tpu.core_type = #tpu.core_type<tc>, window_params = [{transform_indices = @transform_0, window_bounds = array<i64: 8, 256>}, {transform_indices = @transform_1, window_bounds = array<i64: 256, 256>}, {transform_indices = @transform_2, window_bounds = array<i64: 1, 256>}, {transform_indices = @transform_3, window_bounds = array<i64: 1, 256>}, {transform_indices = @transform_4, window_bounds = array<i64: 8, 256>}]} {
    %c0_i32 = arith.constant 0 : i32
    %0 = arith.cmpi eq, %arg2, %c0_i32 : i32
    %1 = arith.extui %0 : i1 to i32
    %c0_i32_0 = arith.constant 0 : i32
    %2 = arith.cmpi ne, %1, %c0_i32_0 : i32
    scf.if %2 {
      %cst_10 = arith.constant 0.000000e+00 : f32
      %12 = vector.broadcast %cst_10 : f32 to vector<8x256xf32>
      %c0_11 = arith.constant 0 : index
      %c0_12 = arith.constant 0 : index
      %13 = vector.load %arg8[%c0_11, %c0_12] : memref<8x256xf32, #tpu.memory_space<vmem>>, vector<8x256xf32>
      tpu.vector_store %arg8[%c0_11, %c0_12], %12 {strides = array<i32>} : memref<8x256xf32, #tpu.memory_space<vmem>>, vector<8x256xf32>,
    } else {
    }
    %c0 = arith.constant 0 : index
    %c0_1 = arith.constant 0 : index
    %3 = vector.load %arg8[%c0, %c0_1] : memref<8x256xf32, #tpu.memory_space<vmem>>, vector<8x256xf32>
    %c0_2 = arith.constant 0 : index
    %c0_3 = arith.constant 0 : index
    %4 = vector.load %arg3[%c0_2, %c0_3] : memref<8x256xbf16, #tpu.memory_space<vmem>>, vector<8x256xbf16>
    %c0_4 = arith.constant 0 : index
    %c0_5 = arith.constant 0 : index
    %5 = vector.load %arg4[%c0_4, %c0_5] : memref<256x256xbf16, #tpu.memory_space<vmem>>, vector<256x256xbf16>
    %cst = arith.constant dense<0.000000e+00> : vector<8x256xf32>
    %6 = tpu.matmul %4, %5, %cst {dimension_numbers = #tpu.dot_dimension_numbers<[1], [0], [0], [1], [0, 0, 1, 1], [], []>} : vector<8x256xbf16>, vector<256x256xbf16>, vector<8x256xf32> -> vector<8x256xf32>
    %7 = arith.addf %3, %6 : vector<8x256xf32>
    %c0_6 = arith.constant 0 : index
    %c0_7 = arith.constant 0 : index
    %8 = vector.load %arg8[%c0_6, %c0_7] : memref<8x256xf32, #tpu.memory_space<vmem>>, vector<8x256xf32>
    tpu.vector_store %arg8[%c0_6, %c0_7], %7 {strides = array<i32>} : memref<8x256xf32, #tpu.memory_space<vmem>>, vector<8x256xf32>,
    %c0_i32_8 = arith.constant 0 : i32
    %9 = arith.cmpi eq, %arg2, %c0_i32_8 : i32
    %10 = arith.extui %9 : i1 to i32
    %c0_i32_9 = arith.constant 0 : i32
    %11 = arith.cmpi ne, %10, %c0_i32_9 : i32
    scf.if %11 {
      %c0_10 = arith.constant 0 : index
      %c0_11 = arith.constant 0 : index
      %12 = vector.load %arg8[%c0_10, %c0_11] : memref<8x256xf32, #tpu.memory_space<vmem>>, vector<8x256xf32>
      %c0_12 = arith.constant 0 : index
      %c0_13 = arith.constant 0 : index
      %13 = vector.load %arg5[%c0_12, %c0_13] : memref<1x256xf32, #tpu.memory_space<vmem>>, vector<1x256xf32>
      %14 = vector.broadcast %13 : vector<1x256xf32> to vector<8x256xf32>
      %15 = arith.mulf %12, %14 : vector<8x256xf32>
      %c0_14 = arith.constant 0 : index
      %c0_15 = arith.constant 0 : index
      %16 = vector.load %arg6[%c0_14, %c0_15] : memref<1x256xf32, #tpu.memory_space<vmem>>, vector<1x256xf32>
      %17 = vector.broadcast %16 : vector<1x256xf32> to vector<8x256xf32>
      %18 = arith.addf %15, %17 : vector<8x256xf32>
      %19 = arith.truncf %18 : vector<8x256xf32> to vector<8x256xbf16>
      %c0_16 = arith.constant 0 : index
      %c0_17 = arith.constant 0 : index
      %20 = vector.load %arg7[%c0_16, %c0_17] : memref<8x256xbf16, #tpu.memory_space<vmem>>, vector<8x256xbf16>
      tpu.vector_store %arg7[%c0_16, %c0_17], %19 {strides = array<i32>} : memref<8x256xbf16, #tpu.memory_space<vmem>>, vector<8x256xbf16>,
    } else {
    }
    return
  }
  func.func @transform_0(%arg0: i32, %arg1: i32, %arg2: i32) -> (i32, i32) {
    %c0_i32 = arith.constant 0 : i32
    return %arg0, %arg2 : i32, i32
  }
  func.func @transform_1(%arg0: i32, %arg1: i32, %arg2: i32) -> (i32, i32) {
    %c0_i32 = arith.constant 0 : i32
    return %arg2, %arg1 : i32, i32
  }
  func.func @transform_2(%arg0: i32, %arg1: i32, %arg2: i32) -> (i32, i32) {
    %c0_i32 = arith.constant 0 : i32
    %c0_i32_0 = arith.constant 0 : i32
    return %c0_i32, %arg1 : i32, i32
  }
  func.func @transform_3(%arg0: i32, %arg1: i32, %arg2: i32) -> (i32, i32) {
    %c0_i32 = arith.constant 0 : i32
    %c0_i32_0 = arith.constant 0 : i32
    return %c0_i32, %arg1 : i32, i32
  }
  func.func @transform_4(%arg0: i32, %arg1: i32, %arg2: i32) -> (i32, i32) {
    %c0_i32 = arith.constant 0 : i32
    return %arg0, %arg1 : i32, i32
  }
}

module attributes {stable_mosaic.version = 11 : i64} {
  func.func @kernel(%arg0: i32, %arg1: i32, %arg2: i32, %arg3: memref<8x512xbf16, #tpu.memory_space<vmem>>, %arg4: memref<512x256xbf16, #tpu.memory_space<vmem>>, %arg5: memref<1x256xf32, #tpu.memory_space<vmem>>, %arg6: memref<1x256xf32, #tpu.memory_space<vmem>>, %arg7: memref<8x256xbf16, #tpu.memory_space<vmem>>, %arg8: memref<8x256xbf16, #tpu.memory_space<vmem>>, %arg9: memref<8x256xf32, #tpu.memory_space<vmem>>) attributes {dimension_semantics = [#tpu.dimension_semantics<parallel>, #tpu.dimension_semantics<parallel>, #tpu.dimension_semantics<arbitrary>], iteration_bounds = array<i64: 1, 2, 9>, scalar_prefetch = 0 : i64, scratch_operands = 1 : i64, tpu.core_type = #tpu.core_type<tc>, window_params = [{transform_indices = @transform_0, window_bounds = array<i64: 8, 512>}, {transform_indices = @transform_1, window_bounds = array<i64: 512, 256>}, {transform_indices = @transform_2, window_bounds = array<i64: 1, 256>}, {transform_indices = @transform_3, window_bounds = array<i64: 1, 256>}, {transform_indices = @transform_4, window_bounds = array<i64: 8, 256>}, {transform_indices = @transform_5, window_bounds = array<i64: 8, 256>}]} {
    %c0_i32 = arith.constant 0 : i32
    %0 = arith.cmpi eq, %arg2, %c0_i32 : i32
    %1 = arith.extui %0 : i1 to i32
    %c0_i32_0 = arith.constant 0 : i32
    %2 = arith.cmpi ne, %1, %c0_i32_0 : i32
    scf.if %2 {
      %cst_9 = arith.constant 0.000000e+00 : f32
      %12 = vector.broadcast %cst_9 : f32 to vector<8x256xf32>
      %c0_10 = arith.constant 0 : index
      %c0_11 = arith.constant 0 : index
      %13 = vector.load %arg9[%c0_10, %c0_11] : memref<8x256xf32, #tpu.memory_space<vmem>>, vector<8x256xf32>
      tpu.vector_store %arg9[%c0_10, %c0_11], %12 {strides = array<i32>} : memref<8x256xf32, #tpu.memory_space<vmem>>, vector<8x256xf32>,
    } else {
    }
    %c0 = arith.constant 0 : index
    %c0_1 = arith.constant 0 : index
    %3 = vector.load %arg9[%c0, %c0_1] : memref<8x256xf32, #tpu.memory_space<vmem>>, vector<8x256xf32>
    %c0_2 = arith.constant 0 : index
    %c0_3 = arith.constant 0 : index
    %4 = vector.load %arg3[%c0_2, %c0_3] : memref<8x512xbf16, #tpu.memory_space<vmem>>, vector<8x512xbf16>
    %c0_4 = arith.constant 0 : index
    %c0_5 = arith.constant 0 : index
    %5 = vector.load %arg4[%c0_4, %c0_5] : memref<512x256xbf16, #tpu.memory_space<vmem>>, vector<512x256xbf16>
    %cst = arith.constant dense<0.000000e+00> : vector<8x256xf32>
    %6 = tpu.matmul %4, %5, %cst {dimension_numbers = #tpu.dot_dimension_numbers<[1], [0], [0], [1], [0, 0, 1, 1], [], []>} : vector<8x512xbf16>, vector<512x256xbf16>, vector<8x256xf32> -> vector<8x256xf32>
    %7 = arith.addf %3, %6 : vector<8x256xf32>
    %c0_6 = arith.constant 0 : index
    %c0_7 = arith.constant 0 : index
    %8 = vector.load %arg9[%c0_6, %c0_7] : memref<8x256xf32, #tpu.memory_space<vmem>>, vector<8x256xf32>
    tpu.vector_store %arg9[%c0_6, %c0_7], %7 {strides = array<i32>} : memref<8x256xf32, #tpu.memory_space<vmem>>, vector<8x256xf32>,
    %c8_i32 = arith.constant 8 : i32
    %9 = arith.cmpi eq, %arg2, %c8_i32 : i32
    %10 = arith.extui %9 : i1 to i32
    %c0_i32_8 = arith.constant 0 : i32
    %11 = arith.cmpi ne, %10, %c0_i32_8 : i32
    scf.if %11 {
      %c0_9 = arith.constant 0 : index
      %c0_10 = arith.constant 0 : index
      %12 = vector.load %arg9[%c0_9, %c0_10] : memref<8x256xf32, #tpu.memory_space<vmem>>, vector<8x256xf32>
      %c0_11 = arith.constant 0 : index
      %c0_12 = arith.constant 0 : index
      %13 = vector.load %arg5[%c0_11, %c0_12] : memref<1x256xf32, #tpu.memory_space<vmem>>, vector<1x256xf32>
      %14 = vector.broadcast %13 : vector<1x256xf32> to vector<8x256xf32>
      %15 = arith.mulf %12, %14 : vector<8x256xf32>
      %c0_13 = arith.constant 0 : index
      %c0_14 = arith.constant 0 : index
      %16 = vector.load %arg6[%c0_13, %c0_14] : memref<1x256xf32, #tpu.memory_space<vmem>>, vector<1x256xf32>
      %17 = vector.broadcast %16 : vector<1x256xf32> to vector<8x256xf32>
      %18 = arith.addf %15, %17 : vector<8x256xf32>
      %c0_15 = arith.constant 0 : index
      %c0_16 = arith.constant 0 : index
      %19 = vector.load %arg7[%c0_15, %c0_16] : memref<8x256xbf16, #tpu.memory_space<vmem>>, vector<8x256xbf16>
      %20 = arith.extf %19 : vector<8x256xbf16> to vector<8x256xf32>
      %21 = arith.addf %18, %20 : vector<8x256xf32>
      %cst_17 = arith.constant 0.000000e+00 : f32
      %22 = vector.broadcast %cst_17 : f32 to vector<8x256xf32>
      %23 = arith.maximumf %21, %22 : vector<8x256xf32>
      %24 = arith.truncf %23 : vector<8x256xf32> to vector<8x256xbf16>
      %c0_18 = arith.constant 0 : index
      %c0_19 = arith.constant 0 : index
      %25 = vector.load %arg8[%c0_18, %c0_19] : memref<8x256xbf16, #tpu.memory_space<vmem>>, vector<8x256xbf16>
      tpu.vector_store %arg8[%c0_18, %c0_19], %24 {strides = array<i32>} : memref<8x256xbf16, #tpu.memory_space<vmem>>, vector<8x256xbf16>,
    } else {
    }
    return
  }
  func.func @transform_0(%arg0: i32, %arg1: i32, %arg2: i32) -> (i32, i32) {
    %c0_i32 = arith.constant 0 : i32
    return %arg0, %arg2 : i32, i32
  }
  func.func @transform_1(%arg0: i32, %arg1: i32, %arg2: i32) -> (i32, i32) {
    %c0_i32 = arith.constant 0 : i32
    return %arg2, %arg1 : i32, i32
  }
  func.func @transform_2(%arg0: i32, %arg1: i32, %arg2: i32) -> (i32, i32) {
    %c0_i32 = arith.constant 0 : i32
    %c0_i32_0 = arith.constant 0 : i32
    return %c0_i32, %arg1 : i32, i32
  }
  func.func @transform_3(%arg0: i32, %arg1: i32, %arg2: i32) -> (i32, i32) {
    %c0_i32 = arith.constant 0 : i32
    %c0_i32_0 = arith.constant 0 : i32
    return %c0_i32, %arg1 : i32, i32
  }
  func.func @transform_4(%arg0: i32, %arg1: i32, %arg2: i32) -> (i32, i32) {
    %c0_i32 = arith.constant 0 : i32
    return %arg0, %arg1 : i32, i32
  }
  func.func @transform_5(%arg0: i32, %arg1: i32, %arg2: i32) -> (i32, i32) {
    %c0_i32 = arith.constant 0 : i32
    return %arg0, %arg1 : i32, i32
  }
}

module attributes {stable_mosaic.version = 11 : i64} {
  func.func @kernel(%arg0: i32, %arg1: i32, %arg2: i32, %arg3: memref<8x512xbf16, #tpu.memory_space<vmem>>, %arg4: memref<512x256xbf16, #tpu.memory_space<vmem>>, %arg5: memref<1x256xf32, #tpu.memory_space<vmem>>, %arg6: memref<1x256xf32, #tpu.memory_space<vmem>>, %arg7: memref<8x256xbf16, #tpu.memory_space<vmem>>, %arg8: memref<8x256xf32, #tpu.memory_space<vmem>>) attributes {dimension_semantics = [#tpu.dimension_semantics<parallel>, #tpu.dimension_semantics<parallel>, #tpu.dimension_semantics<arbitrary>], iteration_bounds = array<i64: 1, 2, 9>, scalar_prefetch = 0 : i64, scratch_operands = 1 : i64, tpu.core_type = #tpu.core_type<tc>, window_params = [{transform_indices = @transform_0, window_bounds = array<i64: 8, 512>}, {transform_indices = @transform_1, window_bounds = array<i64: 512, 256>}, {transform_indices = @transform_2, window_bounds = array<i64: 1, 256>}, {transform_indices = @transform_3, window_bounds = array<i64: 1, 256>}, {transform_indices = @transform_4, window_bounds = array<i64: 8, 256>}]} {
    %c0_i32 = arith.constant 0 : i32
    %0 = arith.cmpi eq, %arg2, %c0_i32 : i32
    %1 = arith.extui %0 : i1 to i32
    %c0_i32_0 = arith.constant 0 : i32
    %2 = arith.cmpi ne, %1, %c0_i32_0 : i32
    scf.if %2 {
      %cst_9 = arith.constant 0.000000e+00 : f32
      %12 = vector.broadcast %cst_9 : f32 to vector<8x256xf32>
      %c0_10 = arith.constant 0 : index
      %c0_11 = arith.constant 0 : index
      %13 = vector.load %arg8[%c0_10, %c0_11] : memref<8x256xf32, #tpu.memory_space<vmem>>, vector<8x256xf32>
      tpu.vector_store %arg8[%c0_10, %c0_11], %12 {strides = array<i32>} : memref<8x256xf32, #tpu.memory_space<vmem>>, vector<8x256xf32>,
    } else {
    }
    %c0 = arith.constant 0 : index
    %c0_1 = arith.constant 0 : index
    %3 = vector.load %arg8[%c0, %c0_1] : memref<8x256xf32, #tpu.memory_space<vmem>>, vector<8x256xf32>
    %c0_2 = arith.constant 0 : index
    %c0_3 = arith.constant 0 : index
    %4 = vector.load %arg3[%c0_2, %c0_3] : memref<8x512xbf16, #tpu.memory_space<vmem>>, vector<8x512xbf16>
    %c0_4 = arith.constant 0 : index
    %c0_5 = arith.constant 0 : index
    %5 = vector.load %arg4[%c0_4, %c0_5] : memref<512x256xbf16, #tpu.memory_space<vmem>>, vector<512x256xbf16>
    %cst = arith.constant dense<0.000000e+00> : vector<8x256xf32>
    %6 = tpu.matmul %4, %5, %cst {dimension_numbers = #tpu.dot_dimension_numbers<[1], [0], [0], [1], [0, 0, 1, 1], [], []>} : vector<8x512xbf16>, vector<512x256xbf16>, vector<8x256xf32> -> vector<8x256xf32>
    %7 = arith.addf %3, %6 : vector<8x256xf32>
    %c0_6 = arith.constant 0 : index
    %c0_7 = arith.constant 0 : index
    %8 = vector.load %arg8[%c0_6, %c0_7] : memref<8x256xf32, #tpu.memory_space<vmem>>, vector<8x256xf32>
    tpu.vector_store %arg8[%c0_6, %c0_7], %7 {strides = array<i32>} : memref<8x256xf32, #tpu.memory_space<vmem>>, vector<8x256xf32>,
    %c8_i32 = arith.constant 8 : i32
    %9 = arith.cmpi eq, %arg2, %c8_i32 : i32
    %10 = arith.extui %9 : i1 to i32
    %c0_i32_8 = arith.constant 0 : i32
    %11 = arith.cmpi ne, %10, %c0_i32_8 : i32
    scf.if %11 {
      %c0_9 = arith.constant 0 : index
      %c0_10 = arith.constant 0 : index
      %12 = vector.load %arg8[%c0_9, %c0_10] : memref<8x256xf32, #tpu.memory_space<vmem>>, vector<8x256xf32>
      %c0_11 = arith.constant 0 : index
      %c0_12 = arith.constant 0 : index
      %13 = vector.load %arg5[%c0_11, %c0_12] : memref<1x256xf32, #tpu.memory_space<vmem>>, vector<1x256xf32>
      %14 = vector.broadcast %13 : vector<1x256xf32> to vector<8x256xf32>
      %15 = arith.mulf %12, %14 : vector<8x256xf32>
      %c0_13 = arith.constant 0 : index
      %c0_14 = arith.constant 0 : index
      %16 = vector.load %arg6[%c0_13, %c0_14] : memref<1x256xf32, #tpu.memory_space<vmem>>, vector<1x256xf32>
      %17 = vector.broadcast %16 : vector<1x256xf32> to vector<8x256xf32>
      %18 = arith.addf %15, %17 : vector<8x256xf32>
      %cst_15 = arith.constant 0.000000e+00 : f32
      %19 = vector.broadcast %cst_15 : f32 to vector<8x256xf32>
      %20 = arith.maximumf %18, %19 : vector<8x256xf32>
      %21 = arith.truncf %20 : vector<8x256xf32> to vector<8x256xbf16>
      %c0_16 = arith.constant 0 : index
      %c0_17 = arith.constant 0 : index
      %22 = vector.load %arg7[%c0_16, %c0_17] : memref<8x256xbf16, #tpu.memory_space<vmem>>, vector<8x256xbf16>
      tpu.vector_store %arg7[%c0_16, %c0_17], %21 {strides = array<i32>} : memref<8x256xbf16, #tpu.memory_space<vmem>>, vector<8x256xbf16>,
    } else {
    }
    return
  }
  func.func @transform_0(%arg0: i32, %arg1: i32, %arg2: i32) -> (i32, i32) {
    %c0_i32 = arith.constant 0 : i32
    return %arg0, %arg2 : i32, i32
  }
  func.func @transform_1(%arg0: i32, %arg1: i32, %arg2: i32) -> (i32, i32) {
    %c0_i32 = arith.constant 0 : i32
    return %arg2, %arg1 : i32, i32
  }
  func.func @transform_2(%arg0: i32, %arg1: i32, %arg2: i32) -> (i32, i32) {
    %c0_i32 = arith.constant 0 : i32
    %c0_i32_0 = arith.constant 0 : i32
    return %c0_i32, %arg1 : i32, i32
  }
  func.func @transform_3(%arg0: i32, %arg1: i32, %arg2: i32) -> (i32, i32) {
    %c0_i32 = arith.constant 0 : i32
    %c0_i32_0 = arith.constant 0 : i32
    return %c0_i32, %arg1 : i32, i32
  }
  func.func @transform_4(%arg0: i32, %arg1: i32, %arg2: i32) -> (i32, i32) {
    %c0_i32 = arith.constant 0 : i32
    return %arg0, %arg1 : i32, i32
  }
}

module attributes {stable_mosaic.version = 11 : i64} {
  func.func @kernel(%arg0: i32, %arg1: i32, %arg2: i32, %arg3: memref<8x512xbf16, #tpu.memory_space<vmem>>, %arg4: memref<512x128xbf16, #tpu.memory_space<vmem>>, %arg5: memref<1x128xf32, #tpu.memory_space<vmem>>, %arg6: memref<1x128xf32, #tpu.memory_space<vmem>>, %arg7: memref<8x128xf32, #tpu.memory_space<vmem>>, %arg8: memref<8x128xf32, #tpu.memory_space<vmem>>) attributes {dimension_semantics = [#tpu.dimension_semantics<parallel>, #tpu.dimension_semantics<parallel>, #tpu.dimension_semantics<arbitrary>], iteration_bounds = array<i64: 1, 1, 1>, scalar_prefetch = 0 : i64, scratch_operands = 1 : i64, tpu.core_type = #tpu.core_type<tc>, window_params = [{transform_indices = @transform_0, window_bounds = array<i64: 8, 512>}, {transform_indices = @transform_1, window_bounds = array<i64: 512, 128>}, {transform_indices = @transform_2, window_bounds = array<i64: 1, 128>}, {transform_indices = @transform_3, window_bounds = array<i64: 1, 128>}, {transform_indices = @transform_4, window_bounds = array<i64: 8, 128>}]} {
    %c0_i32 = arith.constant 0 : i32
    %0 = arith.cmpi eq, %arg2, %c0_i32 : i32
    %1 = arith.extui %0 : i1 to i32
    %c0_i32_0 = arith.constant 0 : i32
    %2 = arith.cmpi ne, %1, %c0_i32_0 : i32
    scf.if %2 {
      %cst_10 = arith.constant 0.000000e+00 : f32
      %12 = vector.broadcast %cst_10 : f32 to vector<8x128xf32>
      %c0_11 = arith.constant 0 : index
      %c0_12 = arith.constant 0 : index
      %13 = vector.load %arg8[%c0_11, %c0_12] : memref<8x128xf32, #tpu.memory_space<vmem>>, vector<8x128xf32>
      tpu.vector_store %arg8[%c0_11, %c0_12], %12 {strides = array<i32>} : memref<8x128xf32, #tpu.memory_space<vmem>>, vector<8x128xf32>,
    } else {
    }
    %c0 = arith.constant 0 : index
    %c0_1 = arith.constant 0 : index
    %3 = vector.load %arg8[%c0, %c0_1] : memref<8x128xf32, #tpu.memory_space<vmem>>, vector<8x128xf32>
    %c0_2 = arith.constant 0 : index
    %c0_3 = arith.constant 0 : index
    %4 = vector.load %arg3[%c0_2, %c0_3] : memref<8x512xbf16, #tpu.memory_space<vmem>>, vector<8x512xbf16>
    %c0_4 = arith.constant 0 : index
    %c0_5 = arith.constant 0 : index
    %5 = vector.load %arg4[%c0_4, %c0_5] : memref<512x128xbf16, #tpu.memory_space<vmem>>, vector<512x128xbf16>
    %cst = arith.constant dense<0.000000e+00> : vector<8x128xf32>
    %6 = tpu.matmul %4, %5, %cst {dimension_numbers = #tpu.dot_dimension_numbers<[1], [0], [0], [1], [0, 0, 1, 1], [], []>} : vector<8x512xbf16>, vector<512x128xbf16>, vector<8x128xf32> -> vector<8x128xf32>
    %7 = arith.addf %3, %6 : vector<8x128xf32>
    %c0_6 = arith.constant 0 : index
    %c0_7 = arith.constant 0 : index
    %8 = vector.load %arg8[%c0_6, %c0_7] : memref<8x128xf32, #tpu.memory_space<vmem>>, vector<8x128xf32>
    tpu.vector_store %arg8[%c0_6, %c0_7], %7 {strides = array<i32>} : memref<8x128xf32, #tpu.memory_space<vmem>>, vector<8x128xf32>,
    %c0_i32_8 = arith.constant 0 : i32
    %9 = arith.cmpi eq, %arg2, %c0_i32_8 : i32
    %10 = arith.extui %9 : i1 to i32
    %c0_i32_9 = arith.constant 0 : i32
    %11 = arith.cmpi ne, %10, %c0_i32_9 : i32
    scf.if %11 {
      %c0_10 = arith.constant 0 : index
      %c0_11 = arith.constant 0 : index
      %12 = vector.load %arg8[%c0_10, %c0_11] : memref<8x128xf32, #tpu.memory_space<vmem>>, vector<8x128xf32>
      %c0_12 = arith.constant 0 : index
      %c0_13 = arith.constant 0 : index
      %13 = vector.load %arg5[%c0_12, %c0_13] : memref<1x128xf32, #tpu.memory_space<vmem>>, vector<1x128xf32>
      %14 = vector.broadcast %13 : vector<1x128xf32> to vector<8x128xf32>
      %15 = arith.mulf %12, %14 : vector<8x128xf32>
      %c0_14 = arith.constant 0 : index
      %c0_15 = arith.constant 0 : index
      %16 = vector.load %arg6[%c0_14, %c0_15] : memref<1x128xf32, #tpu.memory_space<vmem>>, vector<1x128xf32>
      %17 = vector.broadcast %16 : vector<1x128xf32> to vector<8x128xf32>
      %18 = arith.addf %15, %17 : vector<8x128xf32>
      %c0_16 = arith.constant 0 : index
      %c0_17 = arith.constant 0 : index
      %19 = vector.load %arg7[%c0_16, %c0_17] : memref<8x128xf32, #tpu.memory_space<vmem>>, vector<8x128xf32>
      tpu.vector_store %arg7[%c0_16, %c0_17], %18 {strides = array<i32>} : memref<8x128xf32, #tpu.memory_space<vmem>>, vector<8x128xf32>,
    } else {
    }
    return
  }
  func.func @transform_0(%arg0: i32, %arg1: i32, %arg2: i32) -> (i32, i32) {
    %c0_i32 = arith.constant 0 : i32
    return %arg0, %arg2 : i32, i32
  }
  func.func @transform_1(%arg0: i32, %arg1: i32, %arg2: i32) -> (i32, i32) {
    %c0_i32 = arith.constant 0 : i32
    return %arg2, %arg1 : i32, i32
  }
  func.func @transform_2(%arg0: i32, %arg1: i32, %arg2: i32) -> (i32, i32) {
    %c0_i32 = arith.constant 0 : i32
    %c0_i32_0 = arith.constant 0 : i32
    return %c0_i32, %arg1 : i32, i32
  }
  func.func @transform_3(%arg0: i32, %arg1: i32, %arg2: i32) -> (i32, i32) {
    %c0_i32 = arith.constant 0 : i32
    %c0_i32_0 = arith.constant 0 : i32
    return %c0_i32, %arg1 : i32, i32
  }
  func.func @transform_4(%arg0: i32, %arg1: i32, %arg2: i32) -> (i32, i32) {
    %c0_i32 = arith.constant 0 : i32
    return %arg0, %arg1 : i32, i32
  }
}

</mosaic_0001>

<bundles_post_ra>
// kernel: resnet18_forward.22
= control target key start
LH: loop header
LB: loop body
LE: loop exit
PB: predicated region body
PF: predicated region fallthrough
CT: control target
= control target key end

     0   :  { %s1843_s15 = smov 0   ;;  %s1845_s16 = smov 0   ;;  %s2054_s0 = inlined_call_operand.vmem [shape: bf16[512,256], index: 0, kind: input, shape index: {}]   ;;  %s2055_s1 = inlined_call_operand.vmem [shape: bf16[256,128], index: 1, kind: input, shape index: {}]   ;;  %s2056_s2 = inlined_call_operand.vmem [shape: f32[1,128], index: 2, kind: input, shape index: {}]   ;;  %s2057_s3 = inlined_call_operand.vmem [shape: f32[1,128], index: 3, kind: input, shape index: {}]   ;;  %s2058_s4 = inlined_call_operand.vmem [shape: bf16[512,128], index: 4, kind: output, shape index: {}]  }
   0x1   :  { %s1847_s17 = smov 0  }
   0x2 LB: > { %s33_s18 = sadd.s32 1, %s1812_s16  ;;  %p1360_p0 = scmp.ge.s32.totalorder %s1816_s17, 1  ;;  %s1816_s17 = sphi %s1847_s17, %s14_s17   ;;  %s1812_s16 = sphi %s1845_s16, %s2060_s16   ;;  %s1808_s15 = sphi %s1843_s15, %s2059_s15  }
   0x3   : > { %p35_p1 = scmp.ge.s32.totalorder %s33_s18, 2  ;;  %p224_p2 = scmp.lt.s32.totalorder %s1816_s17, 3 }
   0x5   : > { %s2062_s18 = smov (%p35_p1, %s33_s18), 0  ;;  %p225_p3 = pnand %p1360_p0, %p224_p2 }
   0x6   : > { %v1730_v0 = vld [vmem:[%s2055_s1 + $0x40] sm:$0xff] (!%p225_p3)   ;;  %s1361_s21 = sshll.u32 (!%p225_p3), %s1808_s15, 5  ;;  %v1732_v2 = vld [vmem:[%s2055_s1 + $0x48] sm:$0xff] (!%p225_p3)   ;;  %v1734_v4 = vld [vmem:[%s2055_s1 + $0x50] sm:$0xff] (!%p225_p3)  }
   0x7   : > { %228 = sbr.rel (%p225_p3) target bundleno = 322 (0x142), region = 36  ;;  %v1731_v1 = vld [vmem:[%s2055_s1] sm:$0xff] (!%p225_p3)   ;;  %1578 = vmatprep.subr.bf16.mxu0 (!%p225_p3), %v1730_v0  ;;  %1690 = vmatprep.subr.bf16.mxu1 (!%p225_p3), %v1730_v0  ;;  %v1733_v3 = vld [vmem:[%s2055_s1 + $0x8] sm:$0xff] (!%p225_p3)   ;;  %p274_p4 = scmp.lt.s32.totalorder (!%p225_p3), %s1361_s21, 63  ;;  %v1735_v5 = vld [vmem:[%s2055_s1 + $0x10] sm:$0xff] (!%p225_p3)  }
   0x8   : > { %1579 = vmatpush3.bf16.msra.mxu0 (!%p225_p3), %v1731_v1  ;;  %1698 = vmatpush3.bf16.msra.mxu1 (!%p225_p3), %v1731_v1  ;;  %v1736_v6 = vld [vmem:[%s2055_s1 + $0x58] sm:$0xff] (!%p225_p3)   ;;  %v1738_v8 = vld [vmem:[%s2055_s1 + $0x60] sm:$0xff] (!%p225_p3)   ;;  %v1740_v10 = vld [vmem:[%s2055_s1 + $0x68] sm:$0xff] (!%p225_p3)  }
   0x9   : > { %1580 = vmatprep.subr.bf16.mxu0 (!%p225_p3), %v1732_v2  ;;  %1691 = vmatprep.subr.bf16.mxu1 (!%p225_p3), %v1732_v2  ;;  %v1737_v7 = vld [vmem:[%s2055_s1 + $0x18] sm:$0xff] (!%p225_p3)   ;;  %v1739_v9 = vld [vmem:[%s2055_s1 + $0x20] sm:$0xff] (!%p225_p3)   ;;  %v1741_v13 = vld [vmem:[%s2055_s1 + $0x28] sm:$0xff] (!%p225_p3)  }
   0xa   : > { %v1742_v14 = vld [vmem:[%s2055_s1 + $0x70] sm:$0xff] (!%p225_p3)   ;;  %v1744_v16 = vld [vmem:[%s2055_s1 + $0x78] sm:$0xff] (!%p225_p3)   ;;  %v1952_v51 = vld [vmem:[%s2056_s2] ss:$0 sm:$0xff] (!%p225_p3) }
   0xb   : > { %v1743_v15 = vld [vmem:[%s2055_s1 + $0x30] sm:$0xff] (!%p225_p3)   ;;  %v1745_v17 = vld [vmem:[%s2055_s1 + $0x38] sm:$0xff] (!%p225_p3)   ;;  %v1957_v57 = vld [vmem:[%s2057_s3] ss:$0 sm:$0xff] (!%p225_p3) }
   0xc   : > { %1581 = vmatpush3.bf16.msra.mxu0 (!%p225_p3), %v1733_v3  ;;  %1699 = vmatpush3.bf16.msra.mxu1 (!%p225_p3), %v1733_v3 }
   0xd   : > { %1582 = vmatprep.subr.bf16.mxu0 (!%p225_p3), %v1734_v4  ;;  %1692 = vmatprep.subr.bf16.mxu1 (!%p225_p3), %v1734_v4 }
   0xe   : > { %s2064_s21 = smov (!%p274_p4, %s1361_s21), 63 }
   0xf   : > { %s1450_s10 = sshll.u32 %s2064_s21, 3  ;;  %s1365_s12 = sshll.u32 %s2064_s21, 2 }
  0x10   : > { %1583 = vmatpush3.bf16.msra.mxu0 %v1735_v5  ;;  %1700 = vmatpush3.bf16.msra.mxu1 %v1735_v5  ;;  %s1894_s15 = scalar_lea.vmem %s2054_s0, %s1450_s10  ;;  %s1971_s21 = scalar_lea.vmem %s2058_s4, %s1365_s12 }
  0x11   : > { %1584 = vmatprep.subr.bf16.mxu0 %v1736_v6  ;;  %1693 = vmatprep.subr.bf16.mxu1 %v1736_v6  ;;  %v1748_v11 = vld [vmem:[%s1894_s15 + $0x4] ss:$8 sps:$4 sm:$0xff]   ;;  %v1746_v18 = vld [vmem:[%s1894_s15] ss:$8 sps:$4 sm:$0xff]   ;;  %v1752_v20 = vld [vmem:[%s1894_s15 + $0x14] ss:$8 sps:$4 sm:$0xff]  }
  0x12   : > { %v1751_v12 = vld [vmem:[%s1894_s15 + $0x84] ss:$8 sps:$4 sm:$0xff]   ;;  %729 = vmatprep.mubr.bf16.mxu0 %v1748_v11  ;;  %v1749_v19 = vld [vmem:[%s1894_s15 + $0x80] ss:$8 sps:$4 sm:$0xff]   ;;  %v1754_v21 = vld [vmem:[%s1894_s15 + $0x94] ss:$8 sps:$4 sm:$0xff]  }
  0x13   : > { %793 = vmatprep.mubr.bf16.mxu1 %v1751_v12  ;;  %v1756_v22 = vld [vmem:[%s1894_s15 + $0x10] ss:$8 sps:$4 sm:$0xff]   ;;  %v1758_v24 = vld [vmem:[%s1894_s15 + $0x24] ss:$8 sps:$4 sm:$0xff]   ;;  %v1762_v26 = vld [vmem:[%s1894_s15 + $0x20] ss:$8 sps:$4 sm:$0xff]  }
  0x14   : > { %1585 = vmatpush3.bf16.msra.mxu0 %v1737_v7  ;;  %1701 = vmatpush3.bf16.msra.mxu1 %v1737_v7  ;;  %v1757_v23 = vld [vmem:[%s1894_s15 + $0x90] ss:$8 sps:$4 sm:$0xff]   ;;  %v1760_v25 = vld [vmem:[%s1894_s15 + $0xa4] ss:$8 sps:$4 sm:$0xff]   ;;  %v1763_v27 = vld [vmem:[%s1894_s15 + $0xa0] ss:$8 sps:$4 sm:$0xff]  }
  0x15   : > { %1586 = vmatprep.subr.bf16.mxu0 %v1738_v8  ;;  %1694 = vmatprep.subr.bf16.mxu1 %v1738_v8  ;;  %v1764_v28 = vld [vmem:[%s1894_s15 + $0x34] ss:$8 sps:$4 sm:$0xff]   ;;  %v1768_v30 = vld [vmem:[%s1894_s15 + $0x30] ss:$8 sps:$4 sm:$0xff]   ;;  %v1770_v32 = vld [vmem:[%s1894_s15 + $0x44] ss:$8 sps:$4 sm:$0xff]  }
  0x16   : > { %v1766_v29 = vld [vmem:[%s1894_s15 + $0xb4] ss:$8 sps:$4 sm:$0xff]   ;;  %v1769_v31 = vld [vmem:[%s1894_s15 + $0xb0] ss:$8 sps:$4 sm:$0xff]   ;;  %v1772_v33 = vld [vmem:[%s1894_s15 + $0xc4] ss:$8 sps:$4 sm:$0xff]  }
  0x17   : > { %v1774_v34 = vld [vmem:[%s1894_s15 + $0x40] ss:$8 sps:$4 sm:$0xff]   ;;  %v1776_v36 = vld [vmem:[%s1894_s15 + $0x54] ss:$8 sps:$4 sm:$0xff]   ;;  %v1780_v38 = vld [vmem:[%s1894_s15 + $0x50] ss:$8 sps:$4 sm:$0xff]  }
  0x18   : > { %1587 = vmatpush3.bf16.msra.mxu0 %v1739_v9  ;;  %1702 = vmatpush3.bf16.msra.mxu1 %v1739_v9  ;;  %v1775_v35 = vld [vmem:[%s1894_s15 + $0xc0] ss:$8 sps:$4 sm:$0xff]   ;;  %v1778_v37 = vld [vmem:[%s1894_s15 + $0xd4] ss:$8 sps:$4 sm:$0xff]   ;;  %v1781_v39 = vld [vmem:[%s1894_s15 + $0xd0] ss:$8 sps:$4 sm:$0xff]  }
  0x19   : > { %1588 = vmatprep.subr.bf16.mxu0 %v1740_v10  ;;  %1695 = vmatprep.subr.bf16.mxu1 %v1740_v10  ;;  %v1782_v40 = vld [vmem:[%s1894_s15 + $0x64] ss:$8 sps:$4 sm:$0xff]   ;;  %v1786_v42 = vld [vmem:[%s1894_s15 + $0x60] ss:$8 sps:$4 sm:$0xff]   ;;  %v1788_v44 = vld [vmem:[%s1894_s15 + $0x74] ss:$8 sps:$4 sm:$0xff]  }
  0x1a   : > { %v1784_v41 = vld [vmem:[%s1894_s15 + $0xe4] ss:$8 sps:$4 sm:$0xff]   ;;  %v1787_v43 = vld [vmem:[%s1894_s15 + $0xe0] ss:$8 sps:$4 sm:$0xff]   ;;  %v1790_v45 = vld [vmem:[%s1894_s15 + $0xf4] ss:$8 sps:$4 sm:$0xff]  }
  0x1b   : > { %v1792_v46 = vld [vmem:[%s1894_s15 + $0x70] ss:$8 sps:$4 sm:$0xff]  }
  0x1c   : > { %1589 = vmatpush3.bf16.msra.mxu0 %v1741_v13  ;;  %1703 = vmatpush3.bf16.msra.mxu1 %v1741_v13  ;;  %v1793_v47 = vld [vmem:[%s1894_s15 + $0xf0] ss:$8 sps:$4 sm:$0xff]  }
  0x1d   : > { %1590 = vmatprep.subr.bf16.mxu0 %v1742_v14  ;;  %1696 = vmatprep.subr.bf16.mxu1 %v1742_v14 }
  0x20   : > { %1591 = vmatpush3.bf16.msra.mxu0 %v1743_v15  ;;  %1704 = vmatpush3.bf16.msra.mxu1 %v1743_v15 }
  0x21   : > { %1592 = vmatprep.subr.bf16.mxu0 %v1744_v16  ;;  %1697 = vmatprep.subr.bf16.mxu1 %v1744_v16 }
  0x24   : > { %1593 = vmatpush3.bf16.msra.mxu0 %v1745_v17  ;;  %1705 = vmatpush3.bf16.msra.mxu1 %v1745_v17 }
  0x27   : > { %730 = vmatmul.mubr.bf16.vlgmr.msra.gmra.mrb[0].mxu0 %v1746_v18  ;;  %794 = vmatmul.mubr.bf16.vlgmr.msra.gmra.mrb[0].mxu1 %v1749_v19 }
  0x28   : > { %737 = vmatprep.mubr.bf16.mxu0 %v1752_v20  ;;  %801 = vmatprep.mubr.bf16.mxu1 %v1754_v21 }
  0x2f   : > { %738 = vmatmul.mubr.bf16.gmra.mrb[4].mxu0 %v1756_v22  ;;  %802 = vmatmul.mubr.bf16.gmra.mrb[4].mxu1 %v1757_v23 }
  0x30   : > { %745 = vmatprep.mubr.bf16.mxu0 %v1758_v24  ;;  %809 = vmatprep.mubr.bf16.mxu1 %v1760_v25 }
  0x37   : > { %746 = vmatmul.mubr.bf16.gmra.mrb[8].mxu0 %v1762_v26  ;;  %810 = vmatmul.mubr.bf16.gmra.mrb[8].mxu1 %v1763_v27 }
  0x38   : > { %753 = vmatprep.mubr.bf16.mxu0 %v1764_v28  ;;  %817 = vmatprep.mubr.bf16.mxu1 %v1766_v29 }
  0x3f   : > { %754 = vmatmul.mubr.bf16.gmra.mrb[12].mxu0 %v1768_v30  ;;  %818 = vmatmul.mubr.bf16.gmra.mrb[12].mxu1 %v1769_v31 }
  0x40   : > { %761 = vmatprep.mubr.bf16.mxu0 %v1770_v32  ;;  %825 = vmatprep.mubr.bf16.mxu1 %v1772_v33 }
  0x47   : > { %762 = vmatmul.mubr.bf16.gmra.mrb[16].mxu0 %v1774_v34  ;;  %826 = vmatmul.mubr.bf16.gmra.mrb[16].mxu1 %v1775_v35 }
  0x48   : > { %769 = vmatprep.mubr.bf16.mxu0 %v1776_v36  ;;  %833 = vmatprep.mubr.bf16.mxu1 %v1778_v37 }
  0x4f   : > { %770 = vmatmul.mubr.bf16.gmra.mrb[20].mxu0 %v1780_v38  ;;  %834 = vmatmul.mubr.bf16.gmra.mrb[20].mxu1 %v1781_v39 }
  0x50   : > { %777 = vmatprep.mubr.bf16.mxu0 %v1782_v40  ;;  %841 = vmatprep.mubr.bf16.mxu1 %v1784_v41 }
  0x57   : > { %778 = vmatmul.mubr.bf16.gmra.mrb[24].mxu0 %v1786_v42  ;;  %842 = vmatmul.mubr.bf16.gmra.mrb[24].mxu1 %v1787_v43 }
  0x58   : > { %785 = vmatprep.mubr.bf16.mxu0 %v1788_v44  ;;  %849 = vmatprep.mubr.bf16.mxu1 %v1790_v45 }
  0x5f   : > { %786 = vmatmul.mubr.bf16.gmra.mrb[28].mxu0 %v1792_v46  ;;  %850 = vmatmul.mubr.bf16.gmra.mrb[28].mxu1 %v1793_v47 }
  0xfa   : > { %v1594_v48 = vpop.f32.mrb[0].mxu0  ;;  %v1642_v49 = vpop.f32.mrb[0].mxu1 }
  0xfb   : > { %v1595_v50 = vpop.f32.mrb[1].mxu0  ;;  %v1643_v52 = vpop.f32.mrb[1].mxu1 }
  0xfc   : > { %v1596_v53 = vadd.f32 %v1595_v50, %v1594_v48  ;;  %v1644_v54 = vadd.f32 %v1643_v52, %v1642_v49  ;;  %v1597_v55 = vpop.f32.mrb[2].mxu0  ;;  %v1645_v56 = vpop.f32.mrb[2].mxu1 }
  0xfd   : > { %v1598_v58 = vpop.f32.mrb[3].mxu0  ;;  %v1646_v59 = vpop.f32.mrb[3].mxu1 }
  0xfe   : > { %v964_v60 = vmul.f32 %v1596_v53, %v1952_v51  ;;  %v980_v61 = vmul.f32 %v1644_v54, %v1952_v51  ;;  %v1599_v62 = vadd.f32 %v1598_v58, %v1597_v55  ;;  %v1647_v63 = vadd.f32 %v1646_v59, %v1645_v56 }
 0x100   : > { %v1003_v0 = vadd.f32 %v1957_v57, %v964_v60  ;;  %v1019_v1 = vadd.f32 %v1957_v57, %v980_v61  ;;  %v965_v2 = vmul.f32 %v1599_v62, %v1952_v51  ;;  %v981_v3 = vmul.f32 %v1647_v63, %v1952_v51 }
 0x102   : > { %v1004_v4 = vadd.f32 %v1957_v57, %v965_v2  ;;  %v1020_v5 = vadd.f32 %v1957_v57, %v981_v3  ;;  %v1600_v6 = vpop.f32.mrb[4].mxu0  ;;  %v1648_v7 = vpop.f32.mrb[4].mxu1  ;;  %v1035_v8 = vmax.f32 %v1003_v0, 0.0  ;;  %v1051_v9 = vmax.f32 %v1019_v1, 0.0 }
 0x103   : > { %v1601_v10 = vpop.f32.mrb[5].mxu0  ;;  %v1649_v11 = vpop.f32.mrb[5].mxu1 }
 0x104   : > { %v1036_v12 = vmax.f32 %v1004_v4, 0.0  ;;  %v1052_v13 = vmax.f32 %v1020_v5, 0.0  ;;  %v1602_v14 = vadd.f32 %v1601_v10, %v1600_v6  ;;  %v1650_v15 = vadd.f32 %v1649_v11, %v1648_v7  ;;  %v1603_v16 = vpop.f32.mrb[6].mxu0  ;;  %v1651_v17 = vpop.f32.mrb[6].mxu1 }
 0x105   : > { %v1604_v18 = vpop.f32.mrb[7].mxu0  ;;  %v1652_v19 = vpop.f32.mrb[7].mxu1 }
 0x106   : > { %v1486_v20 = vpack.c.bf16 %v1036_v12, %v1035_v8  ;;  %v1526_v21 = vpack.c.bf16 %v1052_v13, %v1051_v9  ;;  %v966_v22 = vmul.f32 %v1602_v14, %v1952_v51  ;;  %v982_v23 = vmul.f32 %v1650_v15, %v1952_v51 }
 0x107   : > { %v1605_v24 = vadd.f32 %v1604_v18, %v1603_v16  ;;  %v1653_v25 = vadd.f32 %v1652_v19, %v1651_v17 }
 0x108   : > { %1487 = vst [vmem:[%s1971_s21] sm:$0xff] %v1486_v20   ;;  %1570 = vst [vmem:[%s1971_s21 + $0x40] sm:$0xff] %v1526_v21   ;;  %v1005_v26 = vadd.f32 %v1957_v57, %v966_v22  ;;  %v1021_v27 = vadd.f32 %v1957_v57, %v982_v23 }
 0x109   : > { %v967_v28 = vmul.f32 %v1605_v24, %v1952_v51  ;;  %v983_v29 = vmul.f32 %v1653_v25, %v1952_v51 }
 0x10a   : > { %v1606_v30 = vpop.f32.mrb[8].mxu0  ;;  %v1654_v31 = vpop.f32.mrb[8].mxu1  ;;  %v1037_v40 = vmax.f32 %v1005_v26, 0.0  ;;  %v1053_v41 = vmax.f32 %v1021_v27, 0.0 }
 0x10b   : > { %v1006_v32 = vadd.f32 %v1957_v57, %v967_v28  ;;  %v1022_v33 = vadd.f32 %v1957_v57, %v983_v29  ;;  %v1607_v34 = vpop.f32.mrb[9].mxu0  ;;  %v1655_v35 = vpop.f32.mrb[9].mxu1 }
 0x10c   : > { %v1608_v36 = vadd.f32 %v1607_v34, %v1606_v30  ;;  %v1656_v37 = vadd.f32 %v1655_v35, %v1654_v31  ;;  %v1609_v38 = vpop.f32.mrb[10].mxu0  ;;  %v1657_v39 = vpop.f32.mrb[10].mxu1 }
 0x10d   : > { %v1038_v42 = vmax.f32 %v1006_v32, 0.0  ;;  %v1054_v43 = vmax.f32 %v1022_v33, 0.0  ;;  %v1610_v44 = vpop.f32.mrb[11].mxu0  ;;  %v1658_v45 = vpop.f32.mrb[11].mxu1 }
 0x10e   : > { %v968_v46 = vmul.f32 %v1608_v36, %v1952_v51  ;;  %v984_v47 = vmul.f32 %v1656_v37, %v1952_v51  ;;  %v1611_v48 = vadd.f32 %v1610_v44, %v1609_v38  ;;  %v1659_v49 = vadd.f32 %v1658_v45, %v1657_v39 }
 0x10f   : > { %v1491_v50 = vpack.c.bf16 %v1038_v42, %v1037_v40  ;;  %v1531_v52 = vpack.c.bf16 %v1054_v43, %v1053_v41 }
 0x110   : > { %v1007_v53 = vadd.f32 %v1957_v57, %v968_v46  ;;  %v1023_v54 = vadd.f32 %v1957_v57, %v984_v47  ;;  %v969_v55 = vmul.f32 %v1611_v48, %v1952_v51  ;;  %v985_v56 = vmul.f32 %v1659_v49, %v1952_v51 }
 0x111   : > { %1563 = vst [vmem:[%s1971_s21 + $0x8] sm:$0xff] %v1491_v50   ;;  %1571 = vst [vmem:[%s1971_s21 + $0x48] sm:$0xff] %v1531_v52  }
 0x112   : > { %v1008_v58 = vadd.f32 %v1957_v57, %v969_v55  ;;  %v1024_v59 = vadd.f32 %v1957_v57, %v985_v56  ;;  %v1612_v60 = vpop.f32.mrb[12].mxu0  ;;  %v1660_v61 = vpop.f32.mrb[12].mxu1  ;;  %v1039_v62 = vmax.f32 %v1007_v53, 0.0  ;;  %v1055_v63 = vmax.f32 %v1023_v54, 0.0 }
 0x113   : > { %v1613_v0 = vpop.f32.mrb[13].mxu0  ;;  %v1661_v1 = vpop.f32.mrb[13].mxu1 }
 0x114   : > { %v1040_v2 = vmax.f32 %v1008_v58, 0.0  ;;  %v1056_v3 = vmax.f32 %v1024_v59, 0.0  ;;  %v1614_v4 = vadd.f32 %v1613_v0, %v1612_v60  ;;  %v1662_v5 = vadd.f32 %v1661_v1, %v1660_v61  ;;  %v1615_v6 = vpop.f32.mrb[14].mxu0  ;;  %v1663_v7 = vpop.f32.mrb[14].mxu1 }
 0x115   : > { %v1616_v8 = vpop.f32.mrb[15].mxu0  ;;  %v1664_v9 = vpop.f32.mrb[15].mxu1 }
 0x116   : > { %v1496_v10 = vpack.c.bf16 %v1040_v2, %v1039_v62  ;;  %v1536_v11 = vpack.c.bf16 %v1056_v3, %v1055_v63  ;;  %v970_v12 = vmul.f32 %v1614_v4, %v1952_v51  ;;  %v986_v13 = vmul.f32 %v1662_v5, %v1952_v51 }
 0x117   : > { %v1617_v14 = vadd.f32 %v1616_v8, %v1615_v6  ;;  %v1665_v15 = vadd.f32 %v1664_v9, %v1663_v7 }
 0x118   : > { %1564 = vst [vmem:[%s1971_s21 + $0x10] sm:$0xff] %v1496_v10   ;;  %1572 = vst [vmem:[%s1971_s21 + $0x50] sm:$0xff] %v1536_v11   ;;  %v1009_v16 = vadd.f32 %v1957_v57, %v970_v12  ;;  %v1025_v17 = vadd.f32 %v1957_v57, %v986_v13 }
 0x119   : > { %v971_v18 = vmul.f32 %v1617_v14, %v1952_v51  ;;  %v987_v19 = vmul.f32 %v1665_v15, %v1952_v51 }
 0x11a   : > { %v1618_v20 = vpop.f32.mrb[16].mxu0  ;;  %v1666_v21 = vpop.f32.mrb[16].mxu1  ;;  %v1041_v30 = vmax.f32 %v1009_v16, 0.0  ;;  %v1057_v31 = vmax.f32 %v1025_v17, 0.0 }
 0x11b   : > { %v1010_v22 = vadd.f32 %v1957_v57, %v971_v18  ;;  %v1026_v23 = vadd.f32 %v1957_v57, %v987_v19  ;;  %v1619_v24 = vpop.f32.mrb[17].mxu0  ;;  %v1667_v25 = vpop.f32.mrb[17].mxu1 }
 0x11c   : > { %v1620_v26 = vadd.f32 %v1619_v24, %v1618_v20  ;;  %v1668_v27 = vadd.f32 %v1667_v25, %v1666_v21  ;;  %v1621_v28 = vpop.f32.mrb[18].mxu0  ;;  %v1669_v29 = vpop.f32.mrb[18].mxu1 }
 0x11d   : > { %v1042_v32 = vmax.f32 %v1010_v22, 0.0  ;;  %v1058_v33 = vmax.f32 %v1026_v23, 0.0  ;;  %v1622_v34 = vpop.f32.mrb[19].mxu0  ;;  %v1670_v35 = vpop.f32.mrb[19].mxu1 }
 0x11e   : > { %v972_v36 = vmul.f32 %v1620_v26, %v1952_v51  ;;  %v988_v37 = vmul.f32 %v1668_v27, %v1952_v51  ;;  %v1623_v38 = vadd.f32 %v1622_v34, %v1621_v28  ;;  %v1671_v39 = vadd.f32 %v1670_v35, %v1669_v29 }
 0x11f   : > { %v1501_v40 = vpack.c.bf16 %v1042_v32, %v1041_v30  ;;  %v1541_v41 = vpack.c.bf16 %v1058_v33, %v1057_v31 }
 0x120   : > { %v1011_v42 = vadd.f32 %v1957_v57, %v972_v36  ;;  %v1027_v43 = vadd.f32 %v1957_v57, %v988_v37  ;;  %v973_v44 = vmul.f32 %v1623_v38, %v1952_v51  ;;  %v989_v45 = vmul.f32 %v1671_v39, %v1952_v51 }
 0x121   : > { %1565 = vst [vmem:[%s1971_s21 + $0x18] sm:$0xff] %v1501_v40   ;;  %1573 = vst [vmem:[%s1971_s21 + $0x58] sm:$0xff] %v1541_v41  }
 0x122   : > { %v1012_v46 = vadd.f32 %v1957_v57, %v973_v44  ;;  %v1028_v47 = vadd.f32 %v1957_v57, %v989_v45  ;;  %v1624_v48 = vpop.f32.mrb[20].mxu0  ;;  %v1672_v49 = vpop.f32.mrb[20].mxu1  ;;  %v1043_v50 = vmax.f32 %v1011_v42, 0.0  ;;  %v1059_v52 = vmax.f32 %v1027_v43, 0.0 }
 0x123   : > { %v1625_v53 = vpop.f32.mrb[21].mxu0  ;;  %v1673_v54 = vpop.f32.mrb[21].mxu1 }
 0x124   : > { %v1044_v55 = vmax.f32 %v1012_v46, 0.0  ;;  %v1060_v56 = vmax.f32 %v1028_v47, 0.0  ;;  %v1626_v58 = vadd.f32 %v1625_v53, %v1624_v48  ;;  %v1674_v59 = vadd.f32 %v1673_v54, %v1672_v49  ;;  %v1627_v60 = vpop.f32.mrb[22].mxu0  ;;  %v1675_v61 = vpop.f32.mrb[22].mxu1 }
 0x125   : > { %v1628_v62 = vpop.f32.mrb[23].mxu0  ;;  %v1676_v63 = vpop.f32.mrb[23].mxu1 }
 0x126   : > { %v1506_v0 = vpack.c.bf16 %v1044_v55, %v1043_v50  ;;  %v1546_v1 = vpack.c.bf16 %v1060_v56, %v1059_v52  ;;  %v974_v2 = vmul.f32 %v1626_v58, %v1952_v51  ;;  %v990_v3 = vmul.f32 %v1674_v59, %v1952_v51 }
 0x127   : > { %v1629_v4 = vadd.f32 %v1628_v62, %v1627_v60  ;;  %v1677_v5 = vadd.f32 %v1676_v63, %v1675_v61 }
 0x128   : > { %1566 = vst [vmem:[%s1971_s21 + $0x20] sm:$0xff] %v1506_v0   ;;  %1574 = vst [vmem:[%s1971_s21 + $0x60] sm:$0xff] %v1546_v1   ;;  %v1013_v6 = vadd.f32 %v1957_v57, %v974_v2  ;;  %v1029_v7 = vadd.f32 %v1957_v57, %v990_v3 }
 0x129   : > { %v975_v8 = vmul.f32 %v1629_v4, %v1952_v51  ;;  %v991_v9 = vmul.f32 %v1677_v5, %v1952_v51 }
 0x12a   : > { %v1630_v10 = vpop.f32.mrb[24].mxu0  ;;  %v1678_v11 = vpop.f32.mrb[24].mxu1  ;;  %v1045_v20 = vmax.f32 %v1013_v6, 0.0  ;;  %v1061_v21 = vmax.f32 %v1029_v7, 0.0 }
 0x12b   : > { %v1014_v12 = vadd.f32 %v1957_v57, %v975_v8  ;;  %v1030_v13 = vadd.f32 %v1957_v57, %v991_v9  ;;  %v1631_v14 = vpop.f32.mrb[25].mxu0  ;;  %v1679_v15 = vpop.f32.mrb[25].mxu1 }
 0x12c   : > { %v1632_v16 = vadd.f32 %v1631_v14, %v1630_v10  ;;  %v1680_v17 = vadd.f32 %v1679_v15, %v1678_v11  ;;  %v1633_v18 = vpop.f32.mrb[26].mxu0  ;;  %v1681_v19 = vpop.f32.mrb[26].mxu1 }
 0x12d   : > { %v1046_v22 = vmax.f32 %v1014_v12, 0.0  ;;  %v1062_v23 = vmax.f32 %v1030_v13, 0.0  ;;  %v1634_v24 = vpop.f32.mrb[27].mxu0  ;;  %v1682_v25 = vpop.f32.mrb[27].mxu1 }
 0x12e   : > { %v976_v26 = vmul.f32 %v1632_v16, %v1952_v51  ;;  %v992_v27 = vmul.f32 %v1680_v17, %v1952_v51  ;;  %v1635_v28 = vadd.f32 %v1634_v24, %v1633_v18  ;;  %v1683_v29 = vadd.f32 %v1682_v25, %v1681_v19 }
 0x12f   : > { %v1511_v30 = vpack.c.bf16 %v1046_v22, %v1045_v20  ;;  %v1551_v31 = vpack.c.bf16 %v1062_v23, %v1061_v21 }
 0x130   : > { %v1015_v32 = vadd.f32 %v1957_v57, %v976_v26  ;;  %v1031_v33 = vadd.f32 %v1957_v57, %v992_v27  ;;  %v977_v34 = vmul.f32 %v1635_v28, %v1952_v51  ;;  %v993_v35 = vmul.f32 %v1683_v29, %v1952_v51 }
 0x131   : > { %1567 = vst [vmem:[%s1971_s21 + $0x28] sm:$0xff] %v1511_v30   ;;  %1575 = vst [vmem:[%s1971_s21 + $0x68] sm:$0xff] %v1551_v31  }
 0x132   : > { %v1016_v36 = vadd.f32 %v1957_v57, %v977_v34  ;;  %v1032_v37 = vadd.f32 %v1957_v57, %v993_v35  ;;  %v1636_v38 = vpop.f32.mrb[28].mxu0  ;;  %v1684_v39 = vpop.f32.mrb[28].mxu1  ;;  %v1047_v40 = vmax.f32 %v1015_v32, 0.0  ;;  %v1063_v41 = vmax.f32 %v1031_v33, 0.0 }
 0x133   : > { %v1637_v42 = vpop.f32.mrb[29].mxu0  ;;  %v1685_v43 = vpop.f32.mrb[29].mxu1 }
 0x134   : > { %v1048_v44 = vmax.f32 %v1016_v36, 0.0  ;;  %v1064_v45 = vmax.f32 %v1032_v37, 0.0  ;;  %v1638_v46 = vadd.f32 %v1637_v42, %v1636_v38  ;;  %v1686_v47 = vadd.f32 %v1685_v43, %v1684_v39  ;;  %v1639_v48 = vpop.f32.mrb[30].mxu0  ;;  %v1687_v49 = vpop.f32.mrb[30].mxu1 }
 0x135   : > { %v1640_v50 = vpop.f32.mrb[31].mxu0  ;;  %v1688_v52 = vpop.f32.mrb[31].mxu1 }
 0x136   : > { %v1516_v53 = vpack.c.bf16 %v1048_v44, %v1047_v40  ;;  %v1556_v54 = vpack.c.bf16 %v1064_v45, %v1063_v41  ;;  %v978_v55 = vmul.f32 %v1638_v46, %v1952_v51  ;;  %v994_v56 = vmul.f32 %v1686_v47, %v1952_v51 }
 0x137   : > { %v1641_v58 = vadd.f32 %v1640_v50, %v1639_v48  ;;  %v1689_v59 = vadd.f32 %v1688_v52, %v1687_v49 }
 0x138   : > { %1568 = vst [vmem:[%s1971_s21 + $0x30] sm:$0xff] %v1516_v53   ;;  %1576 = vst [vmem:[%s1971_s21 + $0x70] sm:$0xff] %v1556_v54   ;;  %v1017_v60 = vadd.f32 %v1957_v57, %v978_v55  ;;  %v1033_v61 = vadd.f32 %v1957_v57, %v994_v56 }
 0x139   : > { %v979_v62 = vmul.f32 %v1641_v58, %v1952_v51  ;;  %v995_v63 = vmul.f32 %v1689_v59, %v1952_v51 }
 0x13a   : > { %v1049_v2 = vmax.f32 %v1017_v60, 0.0  ;;  %v1065_v3 = vmax.f32 %v1033_v61, 0.0 }
 0x13b   : > { %v1018_v0 = vadd.f32 %v1957_v57, %v979_v62  ;;  %v1034_v1 = vadd.f32 %v1957_v57, %v995_v63 }
 0x13d   : > { %v1050_v4 = vmax.f32 %v1018_v0, 0.0  ;;  %v1066_v5 = vmax.f32 %v1034_v1, 0.0 }
 0x13f   : > { %v1521_v6 = vpack.c.bf16 %v1050_v4, %v1049_v2  ;;  %v1561_v7 = vpack.c.bf16 %v1066_v5, %v1065_v3 }
 0x141   : > { %1569 = vst [vmem:[%s1971_s21 + $0x38] sm:$0xff] %v1521_v6   ;;  %1577 = vst [vmem:[%s1971_s21 + $0x78] sm:$0xff] %v1561_v7  }
 0x142 PF: > { %s14_s17 = sadd.s32 1, %s1816_s17   ;;  %s2059_s15 = smov %s1812_s16 }
 0x143   : > { %p11_p5 = scmp.ge.s32.totalorder %s14_s17, 4   ;;  %s2060_s16 = smov %s2062_s18 }
 0x145   :  { %13 = sbr.rel (!%p11_p5) target bundleno = 2 (0x2), region = 83 }

// kernel: resnet18_forward.23
= control target key start
LH: loop header
LB: loop body
LE: loop exit
PB: predicated region body
PF: predicated region fallthrough
CT: control target
= control target key end

     0   :  { %vm288_vm0 = vcmask 519168   ;;  %s943_s0 = inlined_call_operand.vmem [shape: bf16[9,128,64], index: 0, kind: input, shape index: {}]   ;;  %s944_s1 = inlined_call_operand.vmem [shape: bf16[128,64], index: 1, kind: output, shape index: {}]  }
   0x1   :  { %v8_v0 = vld [vmem:[%s943_s0] sm:$0xf]  ;;  %v9_v6 = vld [vmem:[%s943_s0 + $0x4] sm:$0xf]  ;;  %v10_v15 = vld [vmem:[%s943_s0 + $0x8] sm:$0xf] }
   0x2   :  { %v309_v1 = vld [vmem:[%s943_s0 + $0x40] sm:$0xf]  ;;  %v310_v7 = vld [vmem:[%s943_s0 + $0x44] sm:$0xf]  ;;  %v311_v16 = vld [vmem:[%s943_s0 + $0x48] sm:$0xf] }
   0x3   :  { %v325_v2 = vld [vmem:[%s943_s0 + $0x80] sm:$0xf]  ;;  %v41_v3 = vmax.bf16 %v309_v1, %v8_v0  ;;  %v326_v8 = vld [vmem:[%s943_s0 + $0x84] sm:$0xf]  ;;  %v42_v10 = vmax.bf16 %v310_v7, %v9_v6  ;;  %v327_v17 = vld [vmem:[%s943_s0 + $0x88] sm:$0xf]  ;;  %v43_v20 = vmax.bf16 %v311_v16, %v10_v15 }
   0x4   :  { %v341_v4 = vld [vmem:[%s943_s0 + $0xc0] sm:$0xf]  ;;  %v342_v13 = vld [vmem:[%s943_s0 + $0xc4] sm:$0xf]  ;;  %v343_v24 = vld [vmem:[%s943_s0 + $0xc8] sm:$0xf] }
   0x5   :  { %v74_v5 = vmax.bf16 %v325_v2, %v41_v3  ;;  %v357_v9 = vld [vmem:[%s943_s0 + $0x100] sm:$0xf]  ;;  %v75_v14 = vmax.bf16 %v326_v8, %v42_v10  ;;  %v358_v19 = vld [vmem:[%s943_s0 + $0x104] sm:$0xf]  ;;  %v76_v26 = vmax.bf16 %v327_v17, %v43_v20  ;;  %v11_v27 = vld [vmem:[%s943_s0 + $0xc] sm:$0xf] }
   0x6   :  { %v373_v12 = vld [vmem:[%s943_s0 + $0x140] sm:$0xf]  ;;  %v374_v23 = vld [vmem:[%s943_s0 + $0x144] sm:$0xf]  ;;  %v312_v28 = vld [vmem:[%s943_s0 + $0x4c] sm:$0xf] }
   0x7   :  { %v107_v11 = vmax.bf16 %v341_v4, %v74_v5  ;;  %v389_v21 = vld [vmem:[%s943_s0 + $0x180] sm:$0xf]  ;;  %v108_v22 = vmax.bf16 %v342_v13, %v75_v14  ;;  %v328_v29 = vld [vmem:[%s943_s0 + $0x8c] sm:$0xf]  ;;  %v359_v33 = vld [vmem:[%s943_s0 + $0x108] sm:$0xf]  ;;  %v44_v34 = vmax.bf16 %v312_v28, %v11_v27  ;;  %v109_v37 = vmax.bf16 %v343_v24, %v76_v26 }
   0x8   :  { %v405_v30 = vld [vmem:[%s943_s0 + $0x1c0] sm:$0xf]  ;;  %v390_v36 = vld [vmem:[%s943_s0 + $0x184] sm:$0xf]  ;;  %v375_v38 = vld [vmem:[%s943_s0 + $0x148] sm:$0xf] }
   0x9   :  { %v140_v18 = vmax.bf16 %v357_v9, %v107_v11  ;;  %v421_v31 = vld [vmem:[%s943_s0 + $0x200] sm:$0xf]  ;;  %v141_v32 = vmax.bf16 %v358_v19, %v108_v22  ;;  %v344_v39 = vld [vmem:[%s943_s0 + $0xcc] sm:$0xf]  ;;  %v77_v41 = vmax.bf16 %v328_v29, %v44_v34  ;;  %v12_v42 = vld [vmem:[%s943_s0 + $0x10] sm:$0xf]  ;;  %v142_v48 = vmax.bf16 %v359_v33, %v109_v37 }
   0xa   :  { %v313_v43 = vld [vmem:[%s943_s0 + $0x50] sm:$0xf]  ;;  %v406_v46 = vld [vmem:[%s943_s0 + $0x1c4] sm:$0xf]  ;;  %v360_v49 = vld [vmem:[%s943_s0 + $0x10c] sm:$0xf] }
   0xb   :  { %v173_v25 = vmax.bf16 %v373_v12, %v140_v18  ;;  %v174_v40 = vmax.bf16 %v374_v23, %v141_v32  ;;  %v329_v44 = vld [vmem:[%s943_s0 + $0x90] sm:$0xf]  ;;  %v422_v47 = vld [vmem:[%s943_s0 + $0x204] sm:$0xf]  ;;  %v45_v50 = vmax.bf16 %v313_v43, %v12_v42  ;;  %v391_v52 = vld [vmem:[%s943_s0 + $0x188] sm:$0xf]  ;;  %v110_v53 = vmax.bf16 %v344_v39, %v77_v41 }
   0xc   :  { %v376_v54 = vld [vmem:[%s943_s0 + $0x14c] sm:$0xf]  ;;  %v345_v55 = vld [vmem:[%s943_s0 + $0xd0] sm:$0xf]  ;;  %v175_v57 = vmax.bf16 %v375_v38, %v142_v48  ;;  %v13_v59 = vld [vmem:[%s943_s0 + $0x14] sm:$0xf] }
   0xd   :  { %v206_v35 = vmax.bf16 %v389_v21, %v173_v25  ;;  %v207_v51 = vmax.bf16 %v390_v36, %v174_v40  ;;  %v78_v58 = vmax.bf16 %v329_v44, %v45_v50  ;;  %v314_v60 = vld [vmem:[%s943_s0 + $0x54] sm:$0xf]  ;;  %v407_v63 = vld [vmem:[%s943_s0 + $0x1c8] sm:$0xf]  ;;  %v143_v1 = vmax.bf16 %v360_v49, %v110_v53  ;;  %v361_v2 = vld [vmem:[%s943_s0 + $0x110] sm:$0xf] }
   0xe   :  { %v330_v61 = vld [vmem:[%s943_s0 + $0x94] sm:$0xf]  ;;  %v423_v0 = vld [vmem:[%s943_s0 + $0x208] sm:$0xf]  ;;  %v46_v3 = vmax.bf16 %v314_v60, %v13_v59  ;;  %v208_v4 = vmax.bf16 %v391_v52, %v175_v57  ;;  %v392_v5 = vld [vmem:[%s943_s0 + $0x18c] sm:$0xf] }
   0xf   :  { %v239_v45 = vmax.bf16 %v405_v30, %v206_v35  ;;  %v240_v62 = vmax.bf16 %v406_v46, %v207_v51  ;;  %v111_v6 = vmax.bf16 %v345_v55, %v78_v58  ;;  %v377_v7 = vld [vmem:[%s943_s0 + $0x150] sm:$0xf]  ;;  %v346_v8 = vld [vmem:[%s943_s0 + $0xd4] sm:$0xf]  ;;  %v176_v10 = vmax.bf16 %v376_v54, %v143_v1  ;;  %v14_v12 = vld [vmem:[%s943_s0 + $0x18] sm:$0xf] }
  0x10   :  { %v79_v11 = vmax.bf16 %v330_v61, %v46_v3  ;;  %v315_v13 = vld [vmem:[%s943_s0 + $0x58] sm:$0xf]  ;;  %v241_v15 = vmax.bf16 %v407_v63, %v208_v4  ;;  %v408_v16 = vld [vmem:[%s943_s0 + $0x1cc] sm:$0xf]  ;;  %v362_v19 = vld [vmem:[%s943_s0 + $0x114] sm:$0xf] }
  0x11   :  { %v272_v56 = vmax.bf16 %v421_v31, %v239_v45  ;;  %v273_v9 = vmax.bf16 %v422_v47, %v240_v62  ;;  %v331_v14 = vld [vmem:[%s943_s0 + $0x98] sm:$0xf]  ;;  %v424_v17 = vld [vmem:[%s943_s0 + $0x20c] sm:$0xf]  ;;  %v144_v18 = vmax.bf16 %v361_v2, %v111_v6  ;;  %v47_v20 = vmax.bf16 %v315_v13, %v14_v12  ;;  %v393_v22 = vld [vmem:[%s943_s0 + $0x190] sm:$0xf] }
  0x12   :  { %v209_v21 = vmax.bf16 %v392_v5, %v176_v10  ;;  %v112_v23 = vmax.bf16 %v346_v8, %v79_v11  ;;  %v378_v24 = vld [vmem:[%s943_s0 + $0x154] sm:$0xf]  ;;  %v347_v25 = vld [vmem:[%s943_s0 + $0xd8] sm:$0xf]  ;;  %v274_v26 = vmax.bf16 %v423_v0, %v241_v15  ;;  %v15_v29 = vld [vmem:[%s943_s0 + $0x1c] sm:$0xf] }
  0x13   :  { %289 = vst.msk [vmem:[%s944_s1] sm:$0xf] %vm288_vm0, %v272_v56  ;;  %290 = vst.msk [vmem:[%s944_s1 + $0x4] sm:$0xf] %vm288_vm0, %v273_v9  ;;  %v177_v27 = vmax.bf16 %v377_v7, %v144_v18  ;;  %v80_v28 = vmax.bf16 %v331_v14, %v47_v20  ;;  %v316_v30 = vld [vmem:[%s943_s0 + $0x5c] sm:$0xf] }
  0x14   :  { %v332_v31 = vld [vmem:[%s943_s0 + $0x9c] sm:$0xf]  ;;  %v242_v32 = vmax.bf16 %v408_v16, %v209_v21  ;;  %v409_v33 = vld [vmem:[%s943_s0 + $0x1d0] sm:$0xf]  ;;  %v145_v35 = vmax.bf16 %v362_v19, %v112_v23  ;;  %v363_v36 = vld [vmem:[%s943_s0 + $0x118] sm:$0xf]  ;;  %v48_v37 = vmax.bf16 %v316_v30, %v15_v29 }
  0x15   :  { %v425_v34 = vld [vmem:[%s943_s0 + $0x210] sm:$0xf]  ;;  %291 = vst.msk [vmem:[%s944_s1 + $0x8] sm:$0xf] %vm288_vm0, %v274_v26  ;;  %v210_v38 = vmax.bf16 %v393_v22, %v177_v27  ;;  %v394_v39 = vld [vmem:[%s943_s0 + $0x194] sm:$0xf]  ;;  %v113_v40 = vmax.bf16 %v347_v25, %v80_v28 }
  0x16   :  { %v379_v41 = vld [vmem:[%s943_s0 + $0x158] sm:$0xf]  ;;  %v348_v42 = vld [vmem:[%s943_s0 + $0xdc] sm:$0xf]  ;;  %v275_v43 = vmax.bf16 %v424_v17, %v242_v32  ;;  %v178_v44 = vmax.bf16 %v378_v24, %v145_v35  ;;  %v81_v45 = vmax.bf16 %v332_v31, %v48_v37  ;;  %v16_v46 = vld [vmem:[%s943_s0 + $0x20] sm:$0xf] }
  0x17   :  { %v317_v47 = vld [vmem:[%s943_s0 + $0x60] sm:$0xf]  ;;  %v243_v49 = vmax.bf16 %v409_v33, %v210_v38  ;;  %v410_v50 = vld [vmem:[%s943_s0 + $0x1d4] sm:$0xf]  ;;  %v146_v52 = vmax.bf16 %v363_v36, %v113_v40  ;;  %v364_v53 = vld [vmem:[%s943_s0 + $0x11c] sm:$0xf] }
  0x18   :  { %v333_v48 = vld [vmem:[%s943_s0 + $0xa0] sm:$0xf]  ;;  %v426_v51 = vld [vmem:[%s943_s0 + $0x214] sm:$0xf]  ;;  %v49_v54 = vmax.bf16 %v317_v47, %v16_v46  ;;  %292 = vst.msk [vmem:[%s944_s1 + $0xc] sm:$0xf] %vm288_vm0, %v275_v43  ;;  %v211_v55 = vmax.bf16 %v394_v39, %v178_v44  ;;  %v114_v57 = vmax.bf16 %v348_v42, %v81_v45 }
  0x19   :  { %v395_v56 = vld [vmem:[%s943_s0 + $0x198] sm:$0xf]  ;;  %v380_v58 = vld [vmem:[%s943_s0 + $0x15c] sm:$0xf]  ;;  %v349_v59 = vld [vmem:[%s943_s0 + $0xe0] sm:$0xf]  ;;  %v276_v60 = vmax.bf16 %v425_v34, %v243_v49  ;;  %v179_v61 = vmax.bf16 %v379_v41, %v146_v52 }
  0x1a   :  { %v82_v62 = vmax.bf16 %v333_v48, %v49_v54  ;;  %v17_v63 = vld [vmem:[%s943_s0 + $0x24] sm:$0xf]  ;;  %v244_v2 = vmax.bf16 %v410_v50, %v211_v55  ;;  %v411_v3 = vld [vmem:[%s943_s0 + $0x1d8] sm:$0xf]  ;;  %v147_v5 = vmax.bf16 %v364_v53, %v114_v57  ;;  %v365_v6 = vld [vmem:[%s943_s0 + $0x120] sm:$0xf] }
  0x1b   :  { %v318_v0 = vld [vmem:[%s943_s0 + $0x64] sm:$0xf]  ;;  %v427_v4 = vld [vmem:[%s943_s0 + $0x218] sm:$0xf]  ;;  %293 = vst.msk [vmem:[%s944_s1 + $0x10] sm:$0xf] %vm288_vm0, %v276_v60  ;;  %v212_v8 = vmax.bf16 %v395_v56, %v179_v61 }
  0x1c   :  { %v334_v1 = vld [vmem:[%s943_s0 + $0xa4] sm:$0xf]  ;;  %v50_v7 = vmax.bf16 %v318_v0, %v17_v63  ;;  %v396_v9 = vld [vmem:[%s943_s0 + $0x19c] sm:$0xf]  ;;  %v115_v10 = vmax.bf16 %v349_v59, %v82_v62  ;;  %v381_v11 = vld [vmem:[%s943_s0 + $0x160] sm:$0xf]  ;;  %v277_v13 = vmax.bf16 %v426_v51, %v244_v2  ;;  %v180_v14 = vmax.bf16 %v380_v58, %v147_v5 }
  0x1d   :  { %v350_v12 = vld [vmem:[%s943_s0 + $0xe4] sm:$0xf]  ;;  %v18_v16 = vld [vmem:[%s943_s0 + $0x28] sm:$0xf]  ;;  %v245_v19 = vmax.bf16 %v411_v3, %v212_v8  ;;  %v412_v20 = vld [vmem:[%s943_s0 + $0x1dc] sm:$0xf] }
  0x1e   :  { %v83_v15 = vmax.bf16 %v334_v1, %v50_v7  ;;  %v319_v17 = vld [vmem:[%s943_s0 + $0x68] sm:$0xf]  ;;  %v428_v21 = vld [vmem:[%s943_s0 + $0x21c] sm:$0xf]  ;;  %v148_v22 = vmax.bf16 %v365_v6, %v115_v10  ;;  %v366_v23 = vld [vmem:[%s943_s0 + $0x124] sm:$0xf]  ;;  %v213_v25 = vmax.bf16 %v396_v9, %v180_v14 }
  0x1f   :  { %v335_v18 = vld [vmem:[%s943_s0 + $0xa8] sm:$0xf]  ;;  %v51_v24 = vmax.bf16 %v319_v17, %v18_v16  ;;  %294 = vst.msk [vmem:[%s944_s1 + $0x14] sm:$0xf] %vm288_vm0, %v277_v13  ;;  %v397_v26 = vld [vmem:[%s943_s0 + $0x1a0] sm:$0xf]  ;;  %v278_v30 = vmax.bf16 %v427_v4, %v245_v19 }
  0x20   :  { %v116_v27 = vmax.bf16 %v350_v12, %v83_v15  ;;  %v382_v28 = vld [vmem:[%s943_s0 + $0x164] sm:$0xf]  ;;  %v351_v29 = vld [vmem:[%s943_s0 + $0xe8] sm:$0xf]  ;;  %v181_v31 = vmax.bf16 %v381_v11, %v148_v22  ;;  %v19_v33 = vld [vmem:[%s943_s0 + $0x2c] sm:$0xf]  ;;  %v246_v36 = vmax.bf16 %v412_v20, %v213_v25 }
  0x21   :  { %v84_v32 = vmax.bf16 %v335_v18, %v51_v24  ;;  %v320_v34 = vld [vmem:[%s943_s0 + $0x6c] sm:$0xf]  ;;  %v413_v37 = vld [vmem:[%s943_s0 + $0x1e0] sm:$0xf]  ;;  %v367_v40 = vld [vmem:[%s943_s0 + $0x128] sm:$0xf] }
  0x22   :  { %v336_v35 = vld [vmem:[%s943_s0 + $0xac] sm:$0xf]  ;;  %v429_v38 = vld [vmem:[%s943_s0 + $0x220] sm:$0xf]  ;;  %v149_v39 = vmax.bf16 %v366_v23, %v116_v27  ;;  %v52_v41 = vmax.bf16 %v320_v34, %v19_v33  ;;  %295 = vst.msk [vmem:[%s944_s1 + $0x18] sm:$0xf] %vm288_vm0, %v278_v30  ;;  %v214_v42 = vmax.bf16 %v397_v26, %v181_v31  ;;  %v279_v47 = vmax.bf16 %v428_v21, %v246_v36 }
  0x23   :  { %v398_v43 = vld [vmem:[%s943_s0 + $0x1a4] sm:$0xf]  ;;  %v117_v44 = vmax.bf16 %v351_v29, %v84_v32  ;;  %v383_v45 = vld [vmem:[%s943_s0 + $0x168] sm:$0xf]  ;;  %v352_v46 = vld [vmem:[%s943_s0 + $0xec] sm:$0xf] }
  0x24   :  { %v182_v48 = vmax.bf16 %v382_v28, %v149_v39  ;;  %v85_v49 = vmax.bf16 %v336_v35, %v52_v41  ;;  %v20_v50 = vld [vmem:[%s943_s0 + $0x30] sm:$0xf]  ;;  %v247_v53 = vmax.bf16 %v413_v37, %v214_v42  ;;  %v414_v54 = vld [vmem:[%s943_s0 + $0x1e4] sm:$0xf]  ;;  %v368_v57 = vld [vmem:[%s943_s0 + $0x12c] sm:$0xf] }
  0x25   :  { %v321_v51 = vld [vmem:[%s943_s0 + $0x70] sm:$0xf]  ;;  %v430_v55 = vld [vmem:[%s943_s0 + $0x224] sm:$0xf]  ;;  %v150_v56 = vmax.bf16 %v367_v40, %v117_v44  ;;  %296 = vst.msk [vmem:[%s944_s1 + $0x1c] sm:$0xf] %vm288_vm0, %v279_v47 }
  0x26   :  { %v337_v52 = vld [vmem:[%s943_s0 + $0xb0] sm:$0xf]  ;;  %v53_v58 = vmax.bf16 %v321_v51, %v20_v50  ;;  %v215_v59 = vmax.bf16 %v398_v43, %v182_v48  ;;  %v399_v60 = vld [vmem:[%s943_s0 + $0x1a8] sm:$0xf]  ;;  %v118_v61 = vmax.bf16 %v352_v46, %v85_v49  ;;  %v384_v62 = vld [vmem:[%s943_s0 + $0x16c] sm:$0xf]  ;;  %v280_v0 = vmax.bf16 %v429_v38, %v247_v53 }
  0x27   :  { %v353_v63 = vld [vmem:[%s943_s0 + $0xf0] sm:$0xf]  ;;  %v183_v1 = vmax.bf16 %v383_v45, %v150_v56  ;;  %v21_v3 = vld [vmem:[%s943_s0 + $0x34] sm:$0xf]  ;;  %v415_v7 = vld [vmem:[%s943_s0 + $0x1e8] sm:$0xf] }
  0x28   :  { %v86_v2 = vmax.bf16 %v337_v52, %v53_v58  ;;  %v322_v4 = vld [vmem:[%s943_s0 + $0x74] sm:$0xf]  ;;  %v248_v6 = vmax.bf16 %v414_v54, %v215_v59  ;;  %v431_v8 = vld [vmem:[%s943_s0 + $0x228] sm:$0xf]  ;;  %v151_v9 = vmax.bf16 %v368_v57, %v118_v61  ;;  %v369_v10 = vld [vmem:[%s943_s0 + $0x130] sm:$0xf] }
  0x29   :  { %v338_v5 = vld [vmem:[%s943_s0 + $0xb4] sm:$0xf]  ;;  %v54_v11 = vmax.bf16 %v322_v4, %v21_v3  ;;  %297 = vst.msk [vmem:[%s944_s1 + $0x20] sm:$0xf] %vm288_vm0, %v280_v0  ;;  %v216_v12 = vmax.bf16 %v399_v60, %v183_v1  ;;  %v400_v13 = vld [vmem:[%s943_s0 + $0x1ac] sm:$0xf] }
  0x2a   :  { %v119_v14 = vmax.bf16 %v353_v63, %v86_v2  ;;  %v385_v15 = vld [vmem:[%s943_s0 + $0x170] sm:$0xf]  ;;  %v354_v16 = vld [vmem:[%s943_s0 + $0xf4] sm:$0xf]  ;;  %v281_v17 = vmax.bf16 %v430_v55, %v248_v6  ;;  %v184_v18 = vmax.bf16 %v384_v62, %v151_v9  ;;  %v22_v20 = vld [vmem:[%s943_s0 + $0x38] sm:$0xf] }
  0x2b   :  { %v87_v19 = vmax.bf16 %v338_v5, %v54_v11  ;;  %v323_v21 = vld [vmem:[%s943_s0 + $0x78] sm:$0xf]  ;;  %v249_v23 = vmax.bf16 %v415_v7, %v216_v12  ;;  %v416_v24 = vld [vmem:[%s943_s0 + $0x1ec] sm:$0xf]  ;;  %v370_v27 = vld [vmem:[%s943_s0 + $0x134] sm:$0xf] }
  0x2c   :  { %v339_v22 = vld [vmem:[%s943_s0 + $0xb8] sm:$0xf]  ;;  %v432_v25 = vld [vmem:[%s943_s0 + $0x22c] sm:$0xf]  ;;  %v152_v26 = vmax.bf16 %v369_v10, %v119_v14  ;;  %v55_v28 = vmax.bf16 %v323_v21, %v22_v20  ;;  %298 = vst.msk [vmem:[%s944_s1 + $0x24] sm:$0xf] %vm288_vm0, %v281_v17  ;;  %v217_v29 = vmax.bf16 %v400_v13, %v184_v18 }
  0x2d   :  { %v401_v30 = vld [vmem:[%s943_s0 + $0x1b0] sm:$0xf]  ;;  %v120_v31 = vmax.bf16 %v354_v16, %v87_v19  ;;  %v386_v32 = vld [vmem:[%s943_s0 + $0x174] sm:$0xf]  ;;  %v355_v33 = vld [vmem:[%s943_s0 + $0xf8] sm:$0xf]  ;;  %v282_v34 = vmax.bf16 %v431_v8, %v249_v23 }
  0x2e   :  { %v185_v35 = vmax.bf16 %v385_v15, %v152_v26  ;;  %v88_v36 = vmax.bf16 %v339_v22, %v55_v28  ;;  %v23_v37 = vld [vmem:[%s943_s0 + $0x3c] sm:$0xf]  ;;  %v250_v40 = vmax.bf16 %v416_v24, %v217_v29  ;;  %v417_v41 = vld [vmem:[%s943_s0 + $0x1f0] sm:$0xf]  ;;  %v371_v43 = vld [vmem:[%s943_s0 + $0x138] sm:$0xf] }
  0x2f   :  { %v324_v38 = vld [vmem:[%s943_s0 + $0x7c] sm:$0xf]  ;;  %v153_v42 = vmax.bf16 %v370_v27, %v120_v31  ;;  %299 = vst.msk [vmem:[%s944_s1 + $0x28] sm:$0xf] %vm288_vm0, %v282_v34  ;;  %v402_v46 = vld [vmem:[%s943_s0 + $0x1b4] sm:$0xf] }
  0x30   :  { %v340_v39 = vld [vmem:[%s943_s0 + $0xbc] sm:$0xf]  ;;  %v56_v44 = vmax.bf16 %v324_v38, %v23_v37  ;;  %v218_v45 = vmax.bf16 %v401_v30, %v185_v35  ;;  %v121_v47 = vmax.bf16 %v355_v33, %v88_v36  ;;  %v283_v49 = vmax.bf16 %v432_v25, %v250_v40  ;;  %v433_v50 = vld [vmem:[%s943_s0 + $0x230] sm:$0xf]  ;;  %v387_v52 = vld [vmem:[%s943_s0 + $0x178] sm:$0xf] }
  0x31   :  { %v356_v48 = vld [vmem:[%s943_s0 + $0xfc] sm:$0xf]  ;;  %v186_v51 = vmax.bf16 %v386_v32, %v153_v42  ;;  %v418_v55 = vld [vmem:[%s943_s0 + $0x1f4] sm:$0xf]  ;;  %v403_v59 = vld [vmem:[%s943_s0 + $0x1b8] sm:$0xf] }
  0x32   :  { %v89_v53 = vmax.bf16 %v340_v39, %v56_v44  ;;  %v251_v54 = vmax.bf16 %v417_v41, %v218_v45  ;;  %v154_v56 = vmax.bf16 %v371_v43, %v121_v47  ;;  %v372_v57 = vld [vmem:[%s943_s0 + $0x13c] sm:$0xf]  ;;  %300 = vst.msk [vmem:[%s944_s1 + $0x2c] sm:$0xf] %vm288_vm0, %v283_v49  ;;  %v434_v62 = vld [vmem:[%s943_s0 + $0x234] sm:$0xf] }
  0x33   :  { %v219_v58 = vmax.bf16 %v402_v46, %v186_v51  ;;  %v388_v0 = vld [vmem:[%s943_s0 + $0x17c] sm:$0xf]  ;;  %v419_v2 = vld [vmem:[%s943_s0 + $0x1f8] sm:$0xf] }
  0x34   :  { %v122_v60 = vmax.bf16 %v356_v48, %v89_v53  ;;  %v284_v61 = vmax.bf16 %v433_v50, %v251_v54  ;;  %v187_v63 = vmax.bf16 %v387_v52, %v154_v56  ;;  %v404_v5 = vld [vmem:[%s943_s0 + $0x1bc] sm:$0xf]  ;;  %v435_v7 = vld [vmem:[%s943_s0 + $0x238] sm:$0xf] }
  0x35   :  { %v252_v1 = vmax.bf16 %v418_v55, %v219_v58  ;;  %v420_v10 = vld [vmem:[%s943_s0 + $0x1fc] sm:$0xf] }
  0x36   :  { %v155_v3 = vmax.bf16 %v372_v57, %v122_v60  ;;  %301 = vst.msk [vmem:[%s944_s1 + $0x30] sm:$0xf] %vm288_vm0, %v284_v61  ;;  %v220_v4 = vmax.bf16 %v403_v59, %v187_v63  ;;  %v436_v13 = vld [vmem:[%s943_s0 + $0x23c] sm:$0xf] }
  0x37   :  { %v285_v6 = vmax.bf16 %v434_v62, %v252_v1 }
  0x38   :  { %v188_v8 = vmax.bf16 %v388_v0, %v155_v3  ;;  %v253_v9 = vmax.bf16 %v419_v2, %v220_v4 }
  0x39   :  { %302 = vst.msk [vmem:[%s944_s1 + $0x34] sm:$0xf] %vm288_vm0, %v285_v6 }
  0x3a   :  { %v221_v11 = vmax.bf16 %v404_v5, %v188_v8  ;;  %v286_v12 = vmax.bf16 %v435_v7, %v253_v9 }
  0x3c   :  { %v254_v14 = vmax.bf16 %v420_v10, %v221_v11  ;;  %303 = vst.msk [vmem:[%s944_s1 + $0x38] sm:$0xf] %vm288_vm0, %v286_v12 }
  0x3e   :  { %v287_v15 = vmax.bf16 %v436_v13, %v254_v14 }
  0x40   :  { %304 = vst.msk [vmem:[%s944_s1 + $0x3c] sm:$0xf] %vm288_vm0, %v287_v15 }

// kernel: resnet18_forward.24
= control target key start
LH: loop header
LB: loop body
LE: loop exit
PB: predicated region body
PF: predicated region fallthrough
CT: control target
= control target key end

     0   :  { %s1273_s15 = smov 0   ;;  %s1275_s16 = smov 0   ;;  %s1444_s0 = inlined_call_operand.vmem [shape: bf16[128,640], index: 0, kind: input, shape index: {}]   ;;  %s1445_s1 = inlined_call_operand.vmem [shape: bf16[640,128], index: 1, kind: input, shape index: {}]   ;;  %s1446_s2 = inlined_call_operand.vmem [shape: f32[1,128], index: 2, kind: input, shape index: {}]   ;;  %s1447_s3 = inlined_call_operand.vmem [shape: f32[1,128], index: 3, kind: input, shape index: {}]   ;;  %s1448_s4 = inlined_call_operand.vmem [shape: bf16[128,128], index: 4, kind: output, shape index: {}]  }
   0x1   :  { %s1277_s17 = smov 0   ;;  %s1279_s18 = smov 0  }
   0x2   :  { %s1281_s19 = smov 0  }
   0x3 LB: > { %s26_s20 = sadd.s32 1, %s1241_s18  ;;  %p49_p1 = scmp.ne.s32.totalorder %s1233_s16, %s1229_s15  ;;  %s1245_s19 = sphi %s1281_s19, %s14_s19   ;;  %s1241_s18 = sphi %s1279_s18, %s1452_s18   ;;  %s1237_s17 = sphi %s1277_s17, %s1451_s17   ;;  %s1233_s16 = sphi %s1275_s16, %s1450_s16   ;;  %s1229_s15 = sphi %s1273_s15, %s1449_s15  }
   0x4   : > { %p27_p0 = scmp.ge.s32.totalorder %s26_s20, 5  ;;  %p50_p2 = scmp.eq.s32.totalorder %s1245_s19, 0 }
   0x5   : > { %s42_s22 = sadd.s32 1, %s1233_s16  ;;  %p976_p5 = scmp.ge.s32.totalorder %s1245_s19, 5 }
   0x6   : > { %s1454_s20 = smov (%p27_p0, %s26_s20), 0  ;;  %p51_p3 = por %p50_p2, %p49_p1 }
   0x7   : > { %s38_s21 = ssub.s32 %s1241_s18, %s1454_s20  ;;  %195 = sbr.rel (%p976_p5) target bundleno = 28 (0x1c), region = 24 }
   0x8   : > { %p40_p4 = scmp.eq.s32.totalorder %s38_s21, 0 }
   0xa   : > { %s1308_s23 = scalar_select %p40_p4, %s1233_s16, %s42_s22  }
   0xe   : > { %198 = sbr.rel (!%p51_p3) target bundleno = 28 (0x1c), region = 28  ;;  %s200_s24 = sand.u32 (%p51_p3), 1, %s1233_s16  }
   0xf   : > { %s978_s25 = sshll.u32 (%p51_p3), %s1241_s18, 2  ;;  %s977_s26 = sshll.u32 (%p51_p3), %s200_s24, 6 }
  0x10   : > { %s1316_s29 = scalar_lea.vmem (%p51_p3), %s1444_s0, %s978_s25  ;;  %s202_s30 = scalar_lea.vmem (%p51_p3), [#allocation3], %s977_s26 }
  0x11   : > { %v223_v0 = vld [vmem:[%s1316_s29] sm:$0xf] (%p51_p3)  ;;  %v225_v1 = vld [vmem:[%s1316_s29 + $0x14] sm:$0xf] (%p51_p3)  ;;  %v227_v2 = vld [vmem:[%s1316_s29 + $0x28] sm:$0xf] (%p51_p3) }
  0x12   : > { %224 = vst [vmem:[%s202_s30] sm:$0xf] (%p51_p3), %v223_v0  ;;  %226 = vst [vmem:[%s202_s30 + $0x4] sm:$0xf] (%p51_p3), %v225_v1  ;;  %v229_v3 = vld [vmem:[%s1316_s29 + $0x3c] sm:$0xf] (%p51_p3) }
  0x13   : > { %v231_v4 = vld [vmem:[%s1316_s29 + $0x50] sm:$0xf] (%p51_p3)  ;;  %228 = vst [vmem:[%s202_s30 + $0x8] sm:$0xf] (%p51_p3), %v227_v2  ;;  %230 = vst [vmem:[%s202_s30 + $0xc] sm:$0xf] (%p51_p3), %v229_v3 }
  0x14   : > { %232 = vst [vmem:[%s202_s30 + $0x10] sm:$0xf] (%p51_p3), %v231_v4  ;;  %v233_v5 = vld [vmem:[%s1316_s29 + $0x64] sm:$0xf] (%p51_p3)  ;;  %v235_v6 = vld [vmem:[%s1316_s29 + $0x78] sm:$0xf] (%p51_p3) }
  0x15   : > { %v237_v7 = vld [vmem:[%s1316_s29 + $0x8c] sm:$0xf]  ;;  %234 = vst [vmem:[%s202_s30 + $0x14] sm:$0xf] %v233_v5  ;;  %236 = vst [vmem:[%s202_s30 + $0x18] sm:$0xf] %v235_v6 }
  0x16   : > { %238 = vst [vmem:[%s202_s30 + $0x1c] sm:$0xf] %v237_v7  ;;  %v239_v8 = vld [vmem:[%s1316_s29 + $0xa0] sm:$0xf]  ;;  %v241_v9 = vld [vmem:[%s1316_s29 + $0xb4] sm:$0xf] }
  0x17   : > { %v243_v10 = vld [vmem:[%s1316_s29 + $0xc8] sm:$0xf]  ;;  %240 = vst [vmem:[%s202_s30 + $0x20] sm:$0xf] %v239_v8  ;;  %242 = vst [vmem:[%s202_s30 + $0x24] sm:$0xf] %v241_v9 }
  0x18   : > { %244 = vst [vmem:[%s202_s30 + $0x28] sm:$0xf] %v243_v10  ;;  %v245_v11 = vld [vmem:[%s1316_s29 + $0xdc] sm:$0xf]  ;;  %v247_v12 = vld [vmem:[%s1316_s29 + $0xf0] sm:$0xf] }
  0x19   : > { %v249_v13 = vld [vmem:[%s1316_s29 + $0x104] sm:$0xf]  ;;  %246 = vst [vmem:[%s202_s30 + $0x2c] sm:$0xf] %v245_v11  ;;  %248 = vst [vmem:[%s202_s30 + $0x30] sm:$0xf] %v247_v12 }
  0x1a   : > { %250 = vst [vmem:[%s202_s30 + $0x34] sm:$0xf] %v249_v13  ;;  %v251_v14 = vld [vmem:[%s1316_s29 + $0x118] sm:$0xf]  ;;  %v253_v15 = vld [vmem:[%s1316_s29 + $0x12c] sm:$0xf] }
  0x1b   : > { %252 = vst [vmem:[%s202_s30 + $0x38] sm:$0xf] %v251_v14  ;;  %254 = vst [vmem:[%s202_s30 + $0x3c] sm:$0xf] %v253_v15 }
  0x1c PF: > { %p979_p6 = scmp.ge.s32.totalorder %s1245_s19, 1  ;;  %p320_p7 = scmp.lt.s32.totalorder %s1245_s19, 6 }
  0x1e   : > { %p321_p8 = pnand %p979_p6, %p320_p7 }
  0x1f   : > { %s327_s5 = sand.u32 (!%p321_p8), 1, %s1229_s15   ;;  %s981_s6 = sshll.u32 (!%p321_p8), %s1237_s17, 4 }
  0x20   : > { %324 = sbr.rel (%p321_p8) target bundleno = 325 (0x145), region = 73  ;;  %s980_s7 = sshll.u32 (!%p321_p8), %s327_s5, 6 }
  0x21   : > { %p371_p9 = scmp.lt.s32.totalorder (!%p321_p8), %s981_s6, 79  ;;  %s1343_s12 = scalar_lea.vmem (!%p321_p8), [#allocation3], %s980_s7 }
  0x22   : > { %p983_p10 = scmp.ne.s32.totalorder (!%p321_p8), %s1237_s17, 0 }
  0x27   : > { %s1456_s6 = smov (!%p371_p9, %s981_s6), 79  ;;  %398 = sbr.rel (%p983_p10) target bundleno = 49 (0x31), region = 81 }
  0x28   : > { %s982_s8 = sshll.u32 %s1456_s6, 2  ;;  %v1247_v16 = vmov (!%p983_p10), 0.0  }
  0x29   : > { %s1341_s11 = scalar_lea.vmem %s1445_s1, %s982_s8  ;;  %399 = vst [vmem:[#allocation2] sm:$0xff] (!%p983_p10), %v1247_v16  ;;  %400 = vst [vmem:[#allocation2 + $0x8] sm:$0xff] (!%p983_p10), %v1247_v16 }
  0x2a   : > { %401 = vst [vmem:[#allocation2 + $0x10] sm:$0xff] (!%p983_p10), %v1247_v16  ;;  %402 = vst [vmem:[#allocation2 + $0x18] sm:$0xff] (!%p983_p10), %v1247_v16 }
  0x2b   : > { %403 = vst [vmem:[#allocation2 + $0x20] sm:$0xff] (!%p983_p10), %v1247_v16  ;;  %404 = vst [vmem:[#allocation2 + $0x28] sm:$0xff] (!%p983_p10), %v1247_v16 }
  0x2c   : > { %405 = vst [vmem:[#allocation2 + $0x30] sm:$0xff] (!%p983_p10), %v1247_v16  ;;  %406 = vst [vmem:[#allocation2 + $0x38] sm:$0xff] (!%p983_p10), %v1247_v16 }
  0x2d   : > { %407 = vst [vmem:[#allocation2 + $0x40] sm:$0xff] (!%p983_p10), %v1247_v16  ;;  %408 = vst [vmem:[#allocation2 + $0x48] sm:$0xff] (!%p983_p10), %v1247_v16 }
  0x2e   : > { %409 = vst [vmem:[#allocation2 + $0x50] sm:$0xff] %v1247_v16  ;;  %410 = vst [vmem:[#allocation2 + $0x58] sm:$0xff] %v1247_v16 }
  0x2f   : > { %411 = vst [vmem:[#allocation2 + $0x60] sm:$0xff] %v1247_v16  ;;  %412 = vst [vmem:[#allocation2 + $0x68] sm:$0xff] %v1247_v16 }
  0x30   : > { %413 = vst [vmem:[#allocation2 + $0x70] sm:$0xff] %v1247_v16  ;;  %414 = vst [vmem:[#allocation2 + $0x78] sm:$0xff] %v1247_v16 }
  0x31 PF: > { %v1191_v17 = vld [vmem:[%s1341_s11] sm:$0xff]   ;;  %v1192_v18 = vld [vmem:[%s1341_s11 + $0x8] sm:$0xff]   ;;  %v1193_v19 = vld [vmem:[%s1341_s11 + $0x10] sm:$0xff]   ;;  %p1000_p11 = scmp.ne.s32.totalorder %s1237_s17, 4 }
  0x32   : > { %1102 = vmatprep.subr.bf16.mxu0 %v1191_v17  ;;  %1134 = vmatprep.subr.bf16.mxu1 %v1191_v17  ;;  %v1194_v20 = vld [vmem:[%s1341_s11 + $0x18] sm:$0xff]   ;;  %v1199_v21 = vld [vmem:[%s1343_s12] sm:$0xff]   ;;  %v1196_v24 = vld [vmem:[%s1341_s11 + $0x28] sm:$0xff]  }
  0x33   : > { %1103 = vmatpush3.bf16.msra.mxu0 %v1191_v17  ;;  %1142 = vmatpush3.bf16.msra.mxu1 %v1191_v17  ;;  %v1200_v22 = vld [vmem:[%s1343_s12 + $0x20] sm:$0xff]   ;;  %v1197_v25 = vld [vmem:[%s1341_s11 + $0x30] sm:$0xff]   ;;  %v1198_v26 = vld [vmem:[%s1341_s11 + $0x38] sm:$0xff]  }
  0x34   : > { %1104 = vmatprep.subr.bf16.mxu0 %v1192_v18  ;;  %1135 = vmatprep.subr.bf16.mxu1 %v1192_v18  ;;  %v1195_v23 = vld [vmem:[%s1341_s11 + $0x20] sm:$0xff]   ;;  %v1201_v27 = vld [vmem:[%s1343_s12 + $0x8] sm:$0xff]   ;;  %v1203_v29 = vld [vmem:[%s1343_s12 + $0x10] sm:$0xff]  }
  0x35   : > { %1118 = vmatprep.mubr.bf16.mxu0 %v1199_v21  ;;  %1126 = vmatprep.mubr.bf16.mxu1 %v1200_v22  ;;  %v1202_v28 = vld [vmem:[%s1343_s12 + $0x28] sm:$0xff]   ;;  %v1204_v30 = vld [vmem:[%s1343_s12 + $0x30] sm:$0xff]   ;;  %v1205_v31 = vld [vmem:[%s1343_s12 + $0x18] sm:$0xff]  }
  0x36   : > { %v1206_v32 = vld [vmem:[%s1343_s12 + $0x38] sm:$0xff]   ;;  %v417_v33 = vld [vmem:[#allocation2 + $0x10] sm:$0xff]  ;;  %v415_v35 = vld [vmem:[#allocation2] sm:$0xff] }
  0x37   : > { %1105 = vmatpush3.bf16.msra.mxu0 %v1192_v18  ;;  %1143 = vmatpush3.bf16.msra.mxu1 %v1192_v18  ;;  %v425_v34 = vld [vmem:[#allocation2 + $0x50] sm:$0xff]  ;;  %v423_v36 = vld [vmem:[#allocation2 + $0x40] sm:$0xff]  ;;  %v418_v39 = vld [vmem:[#allocation2 + $0x18] sm:$0xff] }
  0x38   : > { %1106 = vmatprep.subr.bf16.mxu0 %v1193_v19  ;;  %1136 = vmatprep.subr.bf16.mxu1 %v1193_v19  ;;  %v426_v40 = vld [vmem:[#allocation2 + $0x58] sm:$0xff]  ;;  %v416_v45 = vld [vmem:[#allocation2 + $0x8] sm:$0xff]  ;;  %v421_v57 = vld [vmem:[#allocation2 + $0x30] sm:$0xff] }
  0x39   : > { %v424_v46 = vld [vmem:[#allocation2 + $0x48] sm:$0xff]  ;;  %v429_v58 = vld [vmem:[#allocation2 + $0x70] sm:$0xff]  ;;  %v419_v59 = vld [vmem:[#allocation2 + $0x20] sm:$0xff] }
  0x3a   : > { %v427_v60 = vld [vmem:[#allocation2 + $0x60] sm:$0xff]  ;;  %v422_v63 = vld [vmem:[#allocation2 + $0x38] sm:$0xff]  ;;  %v420_v5 = vld [vmem:[#allocation2 + $0x28] sm:$0xff] }
  0x3b   : > { %1107 = vmatpush3.bf16.msra.mxu0 %v1193_v19  ;;  %1144 = vmatpush3.bf16.msra.mxu1 %v1193_v19  ;;  %v430_v0 = vld [vmem:[#allocation2 + $0x78] sm:$0xff]  ;;  %v428_v6 = vld [vmem:[#allocation2 + $0x68] sm:$0xff]  ;;  %v1366_v19 = vld [vmem:[%s1446_s2] ss:$0 sm:$0xff] (!%p1000_p11) }
  0x3c   : > { %1108 = vmatprep.subr.bf16.mxu0 %v1194_v20  ;;  %1137 = vmatprep.subr.bf16.mxu1 %v1194_v20  ;;  %v1373_v22 = vld [vmem:[%s1447_s3] ss:$0 sm:$0xff] (!%p1000_p11) }
  0x3f   : > { %1109 = vmatpush3.bf16.msra.mxu0 %v1194_v20  ;;  %1145 = vmatpush3.bf16.msra.mxu1 %v1194_v20 }
  0x40   : > { %1110 = vmatprep.subr.bf16.mxu0 %v1195_v23  ;;  %1138 = vmatprep.subr.bf16.mxu1 %v1195_v23 }
  0x43   : > { %1111 = vmatpush3.bf16.msra.mxu0 %v1195_v23  ;;  %1146 = vmatpush3.bf16.msra.mxu1 %v1195_v23 }
  0x44   : > { %1112 = vmatprep.subr.bf16.mxu0 %v1196_v24  ;;  %1139 = vmatprep.subr.bf16.mxu1 %v1196_v24 }
  0x47   : > { %1113 = vmatpush3.bf16.msra.mxu0 %v1196_v24  ;;  %1147 = vmatpush3.bf16.msra.mxu1 %v1196_v24 }
  0x48   : > { %1114 = vmatprep.subr.bf16.mxu0 %v1197_v25  ;;  %1140 = vmatprep.subr.bf16.mxu1 %v1197_v25 }
  0x4b   : > { %1115 = vmatpush3.bf16.msra.mxu0 %v1197_v25  ;;  %1148 = vmatpush3.bf16.msra.mxu1 %v1197_v25 }
  0x4c   : > { %1116 = vmatprep.subr.bf16.mxu0 %v1198_v26  ;;  %1141 = vmatprep.subr.bf16.mxu1 %v1198_v26 }
  0x4f   : > { %1117 = vmatpush3.bf16.msra.mxu0 %v1198_v26  ;;  %1149 = vmatpush3.bf16.msra.mxu1 %v1198_v26 }
  0x52   : > { %1119 = vmatmul.mubr.bf16.vlgmr.msra.gmra.mrb[0].mxu0 %v1201_v27  ;;  %1127 = vmatmul.mubr.bf16.vlgmr.msra.gmra.mrb[0].mxu1 %v1202_v28 }
  0x53   : > { %1122 = vmatprep.mubr.bf16.mxu0 %v1203_v29  ;;  %1130 = vmatprep.mubr.bf16.mxu1 %v1204_v30 }
  0x5a   : > { %1123 = vmatmul.mubr.bf16.gmra.mrb[4].mxu0 %v1205_v31  ;;  %1131 = vmatmul.mubr.bf16.gmra.mrb[4].mxu1 %v1206_v32 }
 0x125   : > { %v1120_v37 = vpop.f32.mrb[0].mxu0  ;;  %v1128_v38 = vpop.f32.mrb[0].mxu1 }
 0x126   : > { %v658_v41 = vadd.f32 %v1120_v37, %v417_v33  ;;  %v666_v42 = vadd.f32 %v1128_v38, %v425_v34  ;;  %v593_v43 = vpop.f32.mrb[1].mxu0  ;;  %v625_v44 = vpop.f32.mrb[1].mxu1 }
 0x127   : > { %v656_v47 = vadd.f32 %v593_v43, %v415_v35  ;;  %v664_v48 = vadd.f32 %v625_v44, %v423_v36  ;;  %v1121_v49 = vpop.f32.mrb[2].mxu0  ;;  %v1129_v50 = vpop.f32.mrb[2].mxu1 }
 0x128   : > { %674 = vst [vmem:[#allocation2 + $0x10] sm:$0xff] %v658_v41  ;;  %682 = vst [vmem:[#allocation2 + $0x50] sm:$0xff] %v666_v42  ;;  %v659_v51 = vadd.f32 %v1121_v49, %v418_v39  ;;  %v667_v52 = vadd.f32 %v1129_v50, %v426_v40  ;;  %v596_v53 = vpop.f32.mrb[3].mxu0  ;;  %v628_v54 = vpop.f32.mrb[3].mxu1 }
 0x129   : > { %672 = vst [vmem:[#allocation2] sm:$0xff] %v656_v47  ;;  %680 = vst [vmem:[#allocation2 + $0x40] sm:$0xff] %v664_v48  ;;  %v657_v55 = vadd.f32 %v596_v53, %v416_v45  ;;  %v665_v56 = vadd.f32 %v628_v54, %v424_v46 }
 0x12a   : > { %675 = vst [vmem:[#allocation2 + $0x18] sm:$0xff] %v659_v51  ;;  %683 = vst [vmem:[#allocation2 + $0x58] sm:$0xff] %v667_v52 }
 0x12b   : > { %673 = vst [vmem:[#allocation2 + $0x8] sm:$0xff] %v657_v55  ;;  %681 = vst [vmem:[#allocation2 + $0x48] sm:$0xff] %v665_v56 }
 0x12d   : > { %v1124_v61 = vpop.f32.mrb[4].mxu0  ;;  %v1132_v62 = vpop.f32.mrb[4].mxu1  ;;  %691 = sbr.rel (%p1000_p11) target bundleno = 325 (0x145), region = 85 }
 0x12e   : > { %v662_v1 = vadd.f32 %v1124_v61, %v421_v57  ;;  %v670_v2 = vadd.f32 %v1132_v62, %v429_v58  ;;  %v609_v3 = vpop.f32.mrb[5].mxu0  ;;  %v641_v4 = vpop.f32.mrb[5].mxu1 }
 0x12f   : > { %v660_v7 = vadd.f32 %v609_v3, %v419_v59  ;;  %v668_v8 = vadd.f32 %v641_v4, %v427_v60  ;;  %v1125_v9 = vpop.f32.mrb[6].mxu0  ;;  %v1133_v10 = vpop.f32.mrb[6].mxu1  ;;  %v694_v23 = vld [vmem:[#allocation2 + $0x10] sm:$0xff] (!%p1000_p11) }
 0x130   : > { %678 = vst [vmem:[#allocation2 + $0x30] sm:$0xff] %v662_v1  ;;  %686 = vst [vmem:[#allocation2 + $0x70] sm:$0xff] %v670_v2  ;;  %v663_v11 = vadd.f32 %v1125_v9, %v422_v63  ;;  %v671_v12 = vadd.f32 %v1133_v10, %v430_v0  ;;  %v612_v13 = vpop.f32.mrb[7].mxu0  ;;  %v644_v14 = vpop.f32.mrb[7].mxu1  ;;  %v692_v17 = vld [vmem:[#allocation2] sm:$0xff] (!%p1000_p11)  ;;  %v717_v25 = vmul.f32 (!%p1000_p11), %v1366_v19, %v694_v23  ;;  %v702_v49 = vld [vmem:[#allocation2 + $0x50] sm:$0xff] (!%p1000_p11) }
 0x131   : > { %676 = vst [vmem:[#allocation2 + $0x20] sm:$0xff] %v660_v7  ;;  %684 = vst [vmem:[#allocation2 + $0x60] sm:$0xff] %v668_v8  ;;  %v661_v15 = vadd.f32 %v612_v13, %v420_v5  ;;  %v669_v16 = vadd.f32 %v644_v14, %v428_v6  ;;  %v715_v20 = vmul.f32 (!%p1000_p11), %v1366_v19, %v692_v17  ;;  %v695_v24 = vld [vmem:[#allocation2 + $0x18] sm:$0xff] (!%p1000_p11)  ;;  %v700_v39 = vld [vmem:[#allocation2 + $0x40] sm:$0xff] (!%p1000_p11) }
 0x132   : > { %679 = vst [vmem:[#allocation2 + $0x38] sm:$0xff] %v663_v11  ;;  %687 = vst [vmem:[#allocation2 + $0x78] sm:$0xff] %v671_v12  ;;  %v693_v18 = vld [vmem:[#allocation2 + $0x8] sm:$0xff] (!%p1000_p11)  ;;  %v718_v26 = vmul.f32 (!%p1000_p11), %v1366_v19, %v695_v24  ;;  %v740_v35 = vadd.f32 (!%p1000_p11), %v1373_v22, %v717_v25  ;;  %v703_v50 = vld [vmem:[#allocation2 + $0x58] sm:$0xff] (!%p1000_p11)  ;;  %v723_v54 = vmul.f32 (!%p1000_p11), %v1366_v19, %v700_v39 }
 0x133   : > { %677 = vst [vmem:[#allocation2 + $0x28] sm:$0xff] %v661_v15  ;;  %685 = vst [vmem:[#allocation2 + $0x68] sm:$0xff] %v669_v16  ;;  %v716_v21 = vmul.f32 (!%p1000_p11), %v1366_v19, %v693_v18  ;;  %v738_v30 = vadd.f32 (!%p1000_p11), %v1373_v22, %v715_v20  ;;  %v701_v44 = vld [vmem:[#allocation2 + $0x48] sm:$0xff] (!%p1000_p11)  ;;  %v725_v0 = vmul.f32 (!%p1000_p11), %v1366_v19, %v702_v49 }
 0x134   : > { %v741_v36 = vadd.f32 %v1373_v22, %v718_v26  ;;  %v756_v45 = vmax.f32 %v740_v35, 0.0  ;;  %v724_v60 = vmul.f32 %v1366_v19, %v701_v44  ;;  %v746_v63 = vadd.f32 %v1373_v22, %v723_v54 }
 0x135   : > { %v739_v31 = vadd.f32 %v1373_v22, %v716_v21  ;;  %v754_v40 = vmax.f32 %v738_v30, 0.0  ;;  %v726_v1 = vmul.f32 %v1366_v19, %v703_v50  ;;  %v748_v8 = vadd.f32 %v1373_v22, %v725_v0 }
 0x136   : > { %v757_v46 = vmax.f32 %v741_v36, 0.0  ;;  %v747_v4 = vadd.f32 %v1373_v22, %v724_v60  ;;  %v762_v7 = vmax.f32 %v746_v63, 0.0 }
 0x137   : > { %v698_v29 = vld [vmem:[#allocation2 + $0x30] sm:$0xff]  ;;  %v755_v41 = vmax.f32 %v739_v31, 0.0  ;;  %v749_v9 = vadd.f32 %v1373_v22, %v726_v1  ;;  %v764_v15 = vmax.f32 %v748_v8, 0.0 }
 0x138   : > { %v696_v27 = vld [vmem:[#allocation2 + $0x20] sm:$0xff]  ;;  %v721_v37 = vmul.f32 %v1366_v19, %v698_v29  ;;  %v1047_v57 = vpack.c.bf16 %v757_v46, %v756_v45  ;;  %v706_v61 = vld [vmem:[#allocation2 + $0x70] sm:$0xff]  ;;  %v763_v11 = vmax.f32 %v747_v4, 0.0 }
 0x139   : > { %v719_v32 = vmul.f32 %v1366_v19, %v696_v27  ;;  %v699_v34 = vld [vmem:[#allocation2 + $0x38] sm:$0xff]  ;;  %v1042_v51 = vpack.c.bf16 %v755_v41, %v754_v40  ;;  %v704_v55 = vld [vmem:[#allocation2 + $0x60] sm:$0xff]  ;;  %v729_v10 = vmul.f32 %v1366_v19, %v706_v61  ;;  %v765_v16 = vmax.f32 %v749_v9, 0.0 }
 0x13a   : > { %v697_v28 = vld [vmem:[#allocation2 + $0x28] sm:$0xff]  ;;  %v722_v38 = vmul.f32 %v1366_v19, %v699_v34  ;;  %v744_v47 = vadd.f32 %v1373_v22, %v721_v37  ;;  %v707_v2 = vld [vmem:[#allocation2 + $0x78] sm:$0xff]  ;;  %1079 = vst [vmem:[%s1448_s4 + $0x8] sm:$0xff] %v1047_v57   ;;  %v727_v5 = vmul.f32 %v1366_v19, %v704_v55  ;;  %v1062_v18 = vpack.c.bf16 %v763_v11, %v762_v7 }
 0x13b   : > { %v720_v33 = vmul.f32 %v1366_v19, %v697_v28  ;;  %v742_v42 = vadd.f32 %v1373_v22, %v719_v32  ;;  %v705_v56 = vld [vmem:[#allocation2 + $0x68] sm:$0xff]  ;;  %1043 = vst [vmem:[%s1448_s4] sm:$0xff] %v1042_v51   ;;  %v730_v14 = vmul.f32 %v1366_v19, %v707_v2  ;;  %v752_v17 = vadd.f32 %v1373_v22, %v729_v10 }
 0x13c   : > { %v745_v48 = vadd.f32 %v1373_v22, %v722_v38  ;;  %v760_v58 = vmax.f32 %v744_v47, 0.0  ;;  %v728_v6 = vmul.f32 %v1366_v19, %v705_v56  ;;  %v750_v12 = vadd.f32 %v1373_v22, %v727_v5  ;;  %1082 = vst [vmem:[%s1448_s4 + $0x20] sm:$0xff] %v1062_v18  }
 0x13d   : > { %v743_v43 = vadd.f32 %v1373_v22, %v720_v33  ;;  %v758_v52 = vmax.f32 %v742_v42, 0.0  ;;  %v753_v23 = vadd.f32 %v1373_v22, %v730_v14  ;;  %v1067_v24 = vpack.c.bf16 %v765_v16, %v764_v15 }
 0x13e   : > { %v761_v59 = vmax.f32 %v745_v48, 0.0  ;;  %v751_v13 = vadd.f32 %v1373_v22, %v728_v6  ;;  %v766_v20 = vmax.f32 %v750_v12, 0.0  ;;  %v768_v25 = vmax.f32 %v752_v17, 0.0 }
 0x13f   : > { %v759_v53 = vmax.f32 %v743_v43, 0.0  ;;  %v769_v27 = vmax.f32 %v753_v23, 0.0  ;;  %1083 = vst [vmem:[%s1448_s4 + $0x28] sm:$0xff] %v1067_v24  }
 0x140   : > { %v1057_v3 = vpack.c.bf16 %v761_v59, %v760_v58  ;;  %v767_v21 = vmax.f32 %v751_v13, 0.0 }
 0x141   : > { %v1052_v62 = vpack.c.bf16 %v759_v53, %v758_v52  ;;  %v1077_v19 = vpack.c.bf16 %v769_v27, %v768_v25 }
 0x142   : > { %1081 = vst [vmem:[%s1448_s4 + $0x18] sm:$0xff] %v1057_v3   ;;  %v1072_v26 = vpack.c.bf16 %v767_v21, %v766_v20 }
 0x143   : > { %1080 = vst [vmem:[%s1448_s4 + $0x10] sm:$0xff] %v1052_v62   ;;  %1085 = vst [vmem:[%s1448_s4 + $0x38] sm:$0xff] %v1077_v19  }
 0x144   : > { %1084 = vst [vmem:[%s1448_s4 + $0x30] sm:$0xff] %v1072_v26  }
 0x145 PF: > { %s14_s19 = sadd.s32 1, %s1245_s19   ;;  %s1449_s15 = smov %s1233_s16 }
 0x146   : > { %p11_p12 = scmp.ge.s32.totalorder %s14_s19, 7   ;;  %s1450_s16 = smov %s1308_s23 }
 0x147   : > { %s1451_s17 = smov %s1241_s18  ;;  %s1452_s18 = smov %s1454_s20 }
 0x148   :  { %13 = sbr.rel (!%p11_p12) target bundleno = 3 (0x3), region = 129 }

// kernel: resnet18_forward.25
= control target key start
LH: loop header
LB: loop body
LE: loop exit
PB: predicated region body
PF: predicated region fallthrough
CT: control target
= control target key end

     0   :  { %s1444_s18 = smov 0   ;;  %s1446_s19 = smov 0   ;;  %s1639_s0 = inlined_call_operand.vmem [shape: bf16[128,640], index: 0, kind: input, shape index: {}]   ;;  %s1640_s1 = inlined_call_operand.vmem [shape: bf16[640,128], index: 1, kind: input, shape index: {}]   ;;  %s1641_s2 = inlined_call_operand.vmem [shape: f32[1,128], index: 2, kind: input, shape index: {}]   ;;  %s1642_s3 = inlined_call_operand.vmem [shape: f32[1,128], index: 3, kind: input, shape index: {}]   ;;  %s1643_s4 = inlined_call_operand.vmem [shape: bf16[128,128], index: 4, kind: input, shape index: {}]   ;;  %s1644_s5 = inlined_call_operand.vmem [shape: bf16[128,128], index: 5, kind: output, shape index: {}]  }
   0x1   :  { %s1448_s20 = smov 0   ;;  %s1450_s21 = smov 0  }
   0x2   :  { %s1452_s22 = smov 0  }
   0x3 LB: > { %s27_s23 = sadd.s32 1, %s1407_s21  ;;  %p50_p1 = scmp.ne.s32.totalorder %s1399_s19, %s1395_s18  ;;  %s1411_s22 = sphi %s1452_s22, %s15_s22   ;;  %s1407_s21 = sphi %s1450_s21, %s1648_s21   ;;  %s1403_s20 = sphi %s1448_s20, %s1647_s20   ;;  %s1399_s19 = sphi %s1446_s19, %s1646_s19   ;;  %s1395_s18 = sphi %s1444_s18, %s1645_s18  }
   0x4   : > { %p28_p0 = scmp.ge.s32.totalorder %s27_s23, 5  ;;  %p51_p2 = scmp.eq.s32.totalorder %s1411_s22, 0 }
   0x5   : > { %s43_s25 = sadd.s32 1, %s1399_s19  ;;  %p1103_p5 = scmp.ge.s32.totalorder %s1411_s22, 5 }
   0x6   : > { %s1650_s23 = smov (%p28_p0, %s27_s23), 0  ;;  %p52_p3 = por %p51_p2, %p50_p1 }
   0x7   : > { %s39_s24 = ssub.s32 %s1407_s21, %s1650_s23  ;;  %236 = sbr.rel (%p1103_p5) target bundleno = 28 (0x1c), region = 28 }
   0x8   : > { %p41_p4 = scmp.eq.s32.totalorder %s39_s24, 0 }
   0xa   : > { %s1479_s26 = scalar_select %p41_p4, %s1399_s19, %s43_s25  }
   0xe   : > { %239 = sbr.rel (!%p52_p3) target bundleno = 28 (0x1c), region = 32  ;;  %s241_s27 = sand.u32 (%p52_p3), 1, %s1399_s19  }
   0xf   : > { %s1105_s28 = sshll.u32 (%p52_p3), %s1407_s21, 2  ;;  %s1104_s29 = sshll.u32 (%p52_p3), %s241_s27, 6 }
  0x10   : > { %s1487_s7 = scalar_lea.vmem (%p52_p3), %s1639_s0, %s1105_s28  ;;  %s243_s8 = scalar_lea.vmem (%p52_p3), [#allocation3], %s1104_s29 }
  0x11   : > { %v264_v0 = vld [vmem:[%s1487_s7] sm:$0xf] (%p52_p3)  ;;  %v266_v1 = vld [vmem:[%s1487_s7 + $0x14] sm:$0xf] (%p52_p3)  ;;  %v268_v2 = vld [vmem:[%s1487_s7 + $0x28] sm:$0xf] (%p52_p3) }
  0x12   : > { %265 = vst [vmem:[%s243_s8] sm:$0xf] (%p52_p3), %v264_v0  ;;  %267 = vst [vmem:[%s243_s8 + $0x4] sm:$0xf] (%p52_p3), %v266_v1  ;;  %v270_v3 = vld [vmem:[%s1487_s7 + $0x3c] sm:$0xf] (%p52_p3) }
  0x13   : > { %v272_v4 = vld [vmem:[%s1487_s7 + $0x50] sm:$0xf] (%p52_p3)  ;;  %269 = vst [vmem:[%s243_s8 + $0x8] sm:$0xf] (%p52_p3), %v268_v2  ;;  %271 = vst [vmem:[%s243_s8 + $0xc] sm:$0xf] (%p52_p3), %v270_v3 }
  0x14   : > { %273 = vst [vmem:[%s243_s8 + $0x10] sm:$0xf] (%p52_p3), %v272_v4  ;;  %v274_v5 = vld [vmem:[%s1487_s7 + $0x64] sm:$0xf] (%p52_p3)  ;;  %v276_v6 = vld [vmem:[%s1487_s7 + $0x78] sm:$0xf] (%p52_p3) }
  0x15   : > { %v278_v7 = vld [vmem:[%s1487_s7 + $0x8c] sm:$0xf]  ;;  %275 = vst [vmem:[%s243_s8 + $0x14] sm:$0xf] %v274_v5  ;;  %277 = vst [vmem:[%s243_s8 + $0x18] sm:$0xf] %v276_v6 }
  0x16   : > { %279 = vst [vmem:[%s243_s8 + $0x1c] sm:$0xf] %v278_v7  ;;  %v280_v8 = vld [vmem:[%s1487_s7 + $0xa0] sm:$0xf]  ;;  %v282_v9 = vld [vmem:[%s1487_s7 + $0xb4] sm:$0xf] }
  0x17   : > { %v284_v10 = vld [vmem:[%s1487_s7 + $0xc8] sm:$0xf]  ;;  %281 = vst [vmem:[%s243_s8 + $0x20] sm:$0xf] %v280_v8  ;;  %283 = vst [vmem:[%s243_s8 + $0x24] sm:$0xf] %v282_v9 }
  0x18   : > { %285 = vst [vmem:[%s243_s8 + $0x28] sm:$0xf] %v284_v10  ;;  %v286_v11 = vld [vmem:[%s1487_s7 + $0xdc] sm:$0xf]  ;;  %v288_v12 = vld [vmem:[%s1487_s7 + $0xf0] sm:$0xf] }
  0x19   : > { %v290_v13 = vld [vmem:[%s1487_s7 + $0x104] sm:$0xf]  ;;  %287 = vst [vmem:[%s243_s8 + $0x2c] sm:$0xf] %v286_v11  ;;  %289 = vst [vmem:[%s243_s8 + $0x30] sm:$0xf] %v288_v12 }
  0x1a   : > { %291 = vst [vmem:[%s243_s8 + $0x34] sm:$0xf] %v290_v13  ;;  %v292_v14 = vld [vmem:[%s1487_s7 + $0x118] sm:$0xf]  ;;  %v294_v15 = vld [vmem:[%s1487_s7 + $0x12c] sm:$0xf] }
  0x1b   : > { %293 = vst [vmem:[%s243_s8 + $0x38] sm:$0xf] %v292_v14  ;;  %295 = vst [vmem:[%s243_s8 + $0x3c] sm:$0xf] %v294_v15 }
  0x1c PF: > { %p1106_p6 = scmp.ge.s32.totalorder %s1411_s22, 1  ;;  %p361_p7 = scmp.lt.s32.totalorder %s1411_s22, 6 }
  0x1e   : > { %p362_p8 = pnand %p1106_p6, %p361_p7 }
  0x1f   : > { %s368_s9 = sand.u32 (!%p362_p8), 1, %s1395_s18   ;;  %s1108_s10 = sshll.u32 (!%p362_p8), %s1403_s20, 4 }
  0x20   : > { %365 = sbr.rel (%p362_p8) target bundleno = 332 (0x14c), region = 77  ;;  %s1107_s11 = sshll.u32 (!%p362_p8), %s368_s9, 6 }
  0x21   : > { %p422_p9 = scmp.lt.s32.totalorder (!%p362_p8), %s1108_s10, 79  ;;  %s1514_s16 = scalar_lea.vmem (!%p362_p8), [#allocation3], %s1107_s11 }
  0x22   : > { %p1110_p10 = scmp.ne.s32.totalorder (!%p362_p8), %s1403_s20, 0 }
  0x27   : > { %s1652_s10 = smov (!%p422_p9, %s1108_s10), 79  ;;  %458 = sbr.rel (%p1110_p10) target bundleno = 49 (0x31), region = 85 }
  0x28   : > { %s1109_s12 = sshll.u32 %s1652_s10, 2  ;;  %v1413_v16 = vmov (!%p1110_p10), 0.0  }
  0x29   : > { %s1512_s15 = scalar_lea.vmem %s1640_s1, %s1109_s12  ;;  %459 = vst [vmem:[#allocation2] sm:$0xff] (!%p1110_p10), %v1413_v16  ;;  %460 = vst [vmem:[#allocation2 + $0x8] sm:$0xff] (!%p1110_p10), %v1413_v16 }
  0x2a   : > { %461 = vst [vmem:[#allocation2 + $0x10] sm:$0xff] (!%p1110_p10), %v1413_v16  ;;  %462 = vst [vmem:[#allocation2 + $0x18] sm:$0xff] (!%p1110_p10), %v1413_v16 }
  0x2b   : > { %463 = vst [vmem:[#allocation2 + $0x20] sm:$0xff] (!%p1110_p10), %v1413_v16  ;;  %464 = vst [vmem:[#allocation2 + $0x28] sm:$0xff] (!%p1110_p10), %v1413_v16 }
  0x2c   : > { %465 = vst [vmem:[#allocation2 + $0x30] sm:$0xff] (!%p1110_p10), %v1413_v16  ;;  %466 = vst [vmem:[#allocation2 + $0x38] sm:$0xff] (!%p1110_p10), %v1413_v16 }
  0x2d   : > { %467 = vst [vmem:[#allocation2 + $0x40] sm:$0xff] (!%p1110_p10), %v1413_v16  ;;  %468 = vst [vmem:[#allocation2 + $0x48] sm:$0xff] (!%p1110_p10), %v1413_v16 }
  0x2e   : > { %469 = vst [vmem:[#allocation2 + $0x50] sm:$0xff] %v1413_v16  ;;  %470 = vst [vmem:[#allocation2 + $0x58] sm:$0xff] %v1413_v16 }
  0x2f   : > { %471 = vst [vmem:[#allocation2 + $0x60] sm:$0xff] %v1413_v16  ;;  %472 = vst [vmem:[#allocation2 + $0x68] sm:$0xff] %v1413_v16 }
  0x30   : > { %473 = vst [vmem:[#allocation2 + $0x70] sm:$0xff] %v1413_v16  ;;  %474 = vst [vmem:[#allocation2 + $0x78] sm:$0xff] %v1413_v16 }
  0x31 PF: > { %v1357_v17 = vld [vmem:[%s1512_s15] sm:$0xff]   ;;  %v1358_v18 = vld [vmem:[%s1512_s15 + $0x8] sm:$0xff]   ;;  %v1359_v19 = vld [vmem:[%s1512_s15 + $0x10] sm:$0xff]   ;;  %p1127_p11 = scmp.ne.s32.totalorder %s1403_s20, 4 }
  0x32   : > { %1268 = vmatprep.subr.bf16.mxu0 %v1357_v17  ;;  %1300 = vmatprep.subr.bf16.mxu1 %v1357_v17  ;;  %v1360_v20 = vld [vmem:[%s1512_s15 + $0x18] sm:$0xff]   ;;  %v1365_v21 = vld [vmem:[%s1514_s16] sm:$0xff]   ;;  %v1362_v24 = vld [vmem:[%s1512_s15 + $0x28] sm:$0xff]  }
  0x33   : > { %1269 = vmatpush3.bf16.msra.mxu0 %v1357_v17  ;;  %1308 = vmatpush3.bf16.msra.mxu1 %v1357_v17  ;;  %v1366_v22 = vld [vmem:[%s1514_s16 + $0x20] sm:$0xff]   ;;  %v1363_v25 = vld [vmem:[%s1512_s15 + $0x30] sm:$0xff]   ;;  %v1364_v26 = vld [vmem:[%s1512_s15 + $0x38] sm:$0xff]  }
  0x34   : > { %1270 = vmatprep.subr.bf16.mxu0 %v1358_v18  ;;  %1301 = vmatprep.subr.bf16.mxu1 %v1358_v18  ;;  %v1361_v23 = vld [vmem:[%s1512_s15 + $0x20] sm:$0xff]   ;;  %v1367_v27 = vld [vmem:[%s1514_s16 + $0x8] sm:$0xff]   ;;  %v1369_v29 = vld [vmem:[%s1514_s16 + $0x10] sm:$0xff]  }
  0x35   : > { %1284 = vmatprep.mubr.bf16.mxu0 %v1365_v21  ;;  %1292 = vmatprep.mubr.bf16.mxu1 %v1366_v22  ;;  %v1368_v28 = vld [vmem:[%s1514_s16 + $0x28] sm:$0xff]   ;;  %v1370_v30 = vld [vmem:[%s1514_s16 + $0x30] sm:$0xff]   ;;  %v1371_v31 = vld [vmem:[%s1514_s16 + $0x18] sm:$0xff]  }
  0x36   : > { %v1372_v32 = vld [vmem:[%s1514_s16 + $0x38] sm:$0xff]   ;;  %v477_v33 = vld [vmem:[#allocation2 + $0x10] sm:$0xff]  ;;  %v475_v35 = vld [vmem:[#allocation2] sm:$0xff] }
  0x37   : > { %1271 = vmatpush3.bf16.msra.mxu0 %v1358_v18  ;;  %1309 = vmatpush3.bf16.msra.mxu1 %v1358_v18  ;;  %v485_v34 = vld [vmem:[#allocation2 + $0x50] sm:$0xff]  ;;  %v483_v36 = vld [vmem:[#allocation2 + $0x40] sm:$0xff]  ;;  %v478_v39 = vld [vmem:[#allocation2 + $0x18] sm:$0xff] }
  0x38   : > { %1272 = vmatprep.subr.bf16.mxu0 %v1359_v19  ;;  %1302 = vmatprep.subr.bf16.mxu1 %v1359_v19  ;;  %v486_v40 = vld [vmem:[#allocation2 + $0x58] sm:$0xff]  ;;  %v476_v45 = vld [vmem:[#allocation2 + $0x8] sm:$0xff]  ;;  %v481_v57 = vld [vmem:[#allocation2 + $0x30] sm:$0xff] }
  0x39   : > { %v484_v46 = vld [vmem:[#allocation2 + $0x48] sm:$0xff]  ;;  %v489_v58 = vld [vmem:[#allocation2 + $0x70] sm:$0xff]  ;;  %v479_v59 = vld [vmem:[#allocation2 + $0x20] sm:$0xff] }
  0x3a   : > { %v487_v60 = vld [vmem:[#allocation2 + $0x60] sm:$0xff]  ;;  %v482_v63 = vld [vmem:[#allocation2 + $0x38] sm:$0xff]  ;;  %v480_v5 = vld [vmem:[#allocation2 + $0x28] sm:$0xff] }
  0x3b   : > { %1273 = vmatpush3.bf16.msra.mxu0 %v1359_v19  ;;  %1310 = vmatpush3.bf16.msra.mxu1 %v1359_v19  ;;  %v490_v0 = vld [vmem:[#allocation2 + $0x78] sm:$0xff]  ;;  %v488_v6 = vld [vmem:[#allocation2 + $0x68] sm:$0xff]  ;;  %v1537_v19 = vld [vmem:[%s1641_s2] ss:$0 sm:$0xff] (!%p1127_p11) }
  0x3c   : > { %1274 = vmatprep.subr.bf16.mxu0 %v1360_v20  ;;  %1303 = vmatprep.subr.bf16.mxu1 %v1360_v20  ;;  %v1544_v22 = vld [vmem:[%s1642_s3] ss:$0 sm:$0xff] (!%p1127_p11) }
  0x3f   : > { %1275 = vmatpush3.bf16.msra.mxu0 %v1360_v20  ;;  %1311 = vmatpush3.bf16.msra.mxu1 %v1360_v20 }
  0x40   : > { %1276 = vmatprep.subr.bf16.mxu0 %v1361_v23  ;;  %1304 = vmatprep.subr.bf16.mxu1 %v1361_v23 }
  0x43   : > { %1277 = vmatpush3.bf16.msra.mxu0 %v1361_v23  ;;  %1312 = vmatpush3.bf16.msra.mxu1 %v1361_v23  ;;  %v1167_v23 = vld [vmem:[%s1643_s4] sm:$0xff] (!%p1127_p11)  }
  0x44   : > { %1278 = vmatprep.subr.bf16.mxu0 %v1362_v24  ;;  %1305 = vmatprep.subr.bf16.mxu1 %v1362_v24 }
  0x47   : > { %1279 = vmatpush3.bf16.msra.mxu0 %v1362_v24  ;;  %1313 = vmatpush3.bf16.msra.mxu1 %v1362_v24 }
  0x48   : > { %1280 = vmatprep.subr.bf16.mxu0 %v1363_v25  ;;  %1306 = vmatprep.subr.bf16.mxu1 %v1363_v25 }
  0x4b   : > { %1281 = vmatpush3.bf16.msra.mxu0 %v1363_v25  ;;  %1314 = vmatpush3.bf16.msra.mxu1 %v1363_v25  ;;  %v1168_v25 = vunpack.c.l.bf16 (!%p1127_p11), %v1167_v23 }
  0x4c   : > { %1282 = vmatprep.subr.bf16.mxu0 %v1364_v26  ;;  %1307 = vmatprep.subr.bf16.mxu1 %v1364_v26 }
  0x4f   : > { %1283 = vmatpush3.bf16.msra.mxu0 %v1364_v26  ;;  %1315 = vmatpush3.bf16.msra.mxu1 %v1364_v26  ;;  %v1169_v26 = vunpack.c.h.bf16 (!%p1127_p11), %v1167_v23 }
  0x52   : > { %1285 = vmatmul.mubr.bf16.vlgmr.msra.gmra.mrb[0].mxu0 %v1367_v27  ;;  %1293 = vmatmul.mubr.bf16.vlgmr.msra.gmra.mrb[0].mxu1 %v1368_v28 }
  0x53   : > { %1288 = vmatprep.mubr.bf16.mxu0 %v1369_v29  ;;  %1296 = vmatprep.mubr.bf16.mxu1 %v1370_v30  ;;  %v1238_v29 = vld [vmem:[%s1643_s4 + $0x8] sm:$0xff] (!%p1127_p11)  }
  0x5a   : > { %1289 = vmatmul.mubr.bf16.gmra.mrb[4].mxu0 %v1371_v31  ;;  %1297 = vmatmul.mubr.bf16.gmra.mrb[4].mxu1 %v1372_v32 }
 0x125   : > { %v1286_v37 = vpop.f32.mrb[0].mxu0  ;;  %v1294_v38 = vpop.f32.mrb[0].mxu1 }
 0x126   : > { %v718_v41 = vadd.f32 %v1286_v37, %v477_v33  ;;  %v726_v42 = vadd.f32 %v1294_v38, %v485_v34  ;;  %v653_v43 = vpop.f32.mrb[1].mxu0  ;;  %v685_v44 = vpop.f32.mrb[1].mxu1  ;;  %v1172_v34 = vunpack.c.l.bf16 (!%p1127_p11), %v1238_v29  ;;  %v1173_v38 = vunpack.c.h.bf16 (!%p1127_p11), %v1238_v29 }
 0x127   : > { %v716_v47 = vadd.f32 %v653_v43, %v475_v35  ;;  %v724_v48 = vadd.f32 %v685_v44, %v483_v36  ;;  %v1287_v49 = vpop.f32.mrb[2].mxu0  ;;  %v1295_v50 = vpop.f32.mrb[2].mxu1  ;;  %v1239_v36 = vld [vmem:[%s1643_s4 + $0x10] sm:$0xff] (!%p1127_p11)  }
 0x128   : > { %734 = vst [vmem:[#allocation2 + $0x10] sm:$0xff] %v718_v41  ;;  %742 = vst [vmem:[#allocation2 + $0x50] sm:$0xff] %v726_v42  ;;  %v719_v51 = vadd.f32 %v1287_v49, %v478_v39  ;;  %v727_v52 = vadd.f32 %v1295_v50, %v486_v40  ;;  %v656_v53 = vpop.f32.mrb[3].mxu0  ;;  %v688_v54 = vpop.f32.mrb[3].mxu1  ;;  %v1177_v50 = vunpack.c.h.bf16 (!%p1127_p11), %v1239_v36 }
 0x129   : > { %732 = vst [vmem:[#allocation2] sm:$0xff] %v716_v47  ;;  %740 = vst [vmem:[#allocation2 + $0x40] sm:$0xff] %v724_v48  ;;  %v717_v55 = vadd.f32 %v656_v53, %v476_v45  ;;  %v725_v56 = vadd.f32 %v688_v54, %v484_v46  ;;  %v1176_v45 = vunpack.c.l.bf16 (!%p1127_p11), %v1239_v36 }
 0x12a   : > { %735 = vst [vmem:[#allocation2 + $0x18] sm:$0xff] %v719_v51  ;;  %743 = vst [vmem:[#allocation2 + $0x58] sm:$0xff] %v727_v52  ;;  %v1240_v51 = vld [vmem:[%s1643_s4 + $0x18] sm:$0xff] (!%p1127_p11)  }
 0x12b   : > { %733 = vst [vmem:[#allocation2 + $0x8] sm:$0xff] %v717_v55  ;;  %741 = vst [vmem:[#allocation2 + $0x48] sm:$0xff] %v725_v56 }
 0x12d   : > { %v1290_v61 = vpop.f32.mrb[4].mxu0  ;;  %v1298_v62 = vpop.f32.mrb[4].mxu1  ;;  %751 = sbr.rel (%p1127_p11) target bundleno = 332 (0x14c), region = 89 }
 0x12e   : > { %v722_v1 = vadd.f32 %v1290_v61, %v481_v57  ;;  %v730_v2 = vadd.f32 %v1298_v62, %v489_v58  ;;  %v669_v3 = vpop.f32.mrb[5].mxu0  ;;  %v701_v4 = vpop.f32.mrb[5].mxu1 }
 0x12f   : > { %v720_v7 = vadd.f32 %v669_v3, %v479_v59  ;;  %v728_v8 = vadd.f32 %v701_v4, %v487_v60  ;;  %v1291_v9 = vpop.f32.mrb[6].mxu0  ;;  %v1299_v10 = vpop.f32.mrb[6].mxu1  ;;  %v754_v24 = vld [vmem:[#allocation2 + $0x10] sm:$0xff] (!%p1127_p11) }
 0x130   : > { %738 = vst [vmem:[#allocation2 + $0x30] sm:$0xff] %v722_v1  ;;  %746 = vst [vmem:[#allocation2 + $0x70] sm:$0xff] %v730_v2  ;;  %v723_v11 = vadd.f32 %v1291_v9, %v482_v63  ;;  %v731_v12 = vadd.f32 %v1299_v10, %v490_v0  ;;  %v672_v13 = vpop.f32.mrb[7].mxu0  ;;  %v704_v14 = vpop.f32.mrb[7].mxu1  ;;  %v752_v17 = vld [vmem:[#allocation2] sm:$0xff] (!%p1127_p11)  ;;  %v777_v28 = vmul.f32 (!%p1127_p11), %v1537_v19, %v754_v24  ;;  %v1180_v1 = vunpack.c.l.bf16 (!%p1127_p11), %v1240_v51 }
 0x131   : > { %736 = vst [vmem:[#allocation2 + $0x20] sm:$0xff] %v720_v7  ;;  %744 = vst [vmem:[#allocation2 + $0x60] sm:$0xff] %v728_v8  ;;  %v721_v15 = vadd.f32 %v672_v13, %v480_v5  ;;  %v729_v16 = vadd.f32 %v704_v14, %v488_v6  ;;  %v775_v20 = vmul.f32 (!%p1127_p11), %v1537_v19, %v752_v17  ;;  %v755_v27 = vld [vmem:[#allocation2 + $0x18] sm:$0xff] (!%p1127_p11)  ;;  %v760_v60 = vld [vmem:[#allocation2 + $0x40] sm:$0xff] (!%p1127_p11)  ;;  %v1181_v6 = vunpack.c.h.bf16 (!%p1127_p11), %v1240_v51 }
 0x132   : > { %739 = vst [vmem:[#allocation2 + $0x38] sm:$0xff] %v723_v11  ;;  %747 = vst [vmem:[#allocation2 + $0x78] sm:$0xff] %v731_v12  ;;  %v753_v18 = vld [vmem:[#allocation2 + $0x8] sm:$0xff] (!%p1127_p11)  ;;  %v778_v33 = vmul.f32 (!%p1127_p11), %v1537_v19, %v755_v27  ;;  %v800_v37 = vadd.f32 (!%p1127_p11), %v1544_v22, %v777_v28  ;;  %v1241_v2 = vld [vmem:[%s1643_s4 + $0x20] sm:$0xff] (!%p1127_p11)   ;;  %v783_v10 = vmul.f32 (!%p1127_p11), %v1537_v19, %v760_v60 }
 0x133   : > { %737 = vst [vmem:[#allocation2 + $0x28] sm:$0xff] %v721_v15  ;;  %745 = vst [vmem:[#allocation2 + $0x68] sm:$0xff] %v729_v16  ;;  %v776_v21 = vmul.f32 (!%p1127_p11), %v1537_v19, %v753_v18  ;;  %v798_v31 = vadd.f32 (!%p1127_p11), %v1544_v22, %v775_v20  ;;  %v761_v61 = vld [vmem:[#allocation2 + $0x48] sm:$0xff] (!%p1127_p11)  ;;  %v762_v7 = vld [vmem:[#allocation2 + $0x50] sm:$0xff] (!%p1127_p11)  ;;  %v1184_v16 = vunpack.c.l.bf16 (!%p1127_p11), %v1241_v2  ;;  %v1185_v17 = vunpack.c.h.bf16 (!%p1127_p11), %v1241_v2 }
 0x134   : > { %v801_v44 = vadd.f32 %v1544_v22, %v778_v33  ;;  %v848_v47 = vadd.f32 %v1172_v34, %v800_v37  ;;  %v784_v11 = vmul.f32 %v1537_v19, %v761_v61  ;;  %v763_v12 = vld [vmem:[#allocation2 + $0x58] sm:$0xff]  ;;  %v1242_v13 = vld [vmem:[%s1643_s4 + $0x28] sm:$0xff]   ;;  %v785_v24 = vmul.f32 %v1537_v19, %v762_v7 }
 0x135   : > { %v799_v32 = vadd.f32 %v1544_v22, %v776_v21  ;;  %v846_v42 = vadd.f32 %v1168_v25, %v798_v31  ;;  %v806_v21 = vadd.f32 %v1544_v22, %v783_v10  ;;  %v786_v28 = vmul.f32 %v1537_v19, %v763_v12 }
 0x136   : > { %v849_v54 = vadd.f32 %v1173_v38, %v801_v44  ;;  %v864_v56 = vmax.f32 %v848_v47, 0.0  ;;  %v807_v23 = vadd.f32 %v1544_v22, %v784_v11  ;;  %v1188_v29 = vunpack.c.l.bf16 %v1242_v13 }
 0x137   : > { %v758_v41 = vld [vmem:[#allocation2 + $0x30] sm:$0xff]  ;;  %v847_v43 = vadd.f32 %v1169_v26, %v799_v32  ;;  %v862_v52 = vmax.f32 %v846_v42, 0.0  ;;  %v854_v31 = vadd.f32 %v1184_v16, %v806_v21  ;;  %v808_v33 = vadd.f32 %v1544_v22, %v785_v24 }
 0x138   : > { %v756_v30 = vld [vmem:[#allocation2 + $0x20] sm:$0xff]  ;;  %v781_v55 = vmul.f32 %v1537_v19, %v758_v41  ;;  %v865_v63 = vmax.f32 %v849_v54, 0.0  ;;  %v1243_v26 = vld [vmem:[%s1643_s4 + $0x30] sm:$0xff]   ;;  %v855_v32 = vadd.f32 %v1185_v17, %v807_v23  ;;  %v809_v37 = vadd.f32 %v1544_v22, %v786_v28 }
 0x139   : > { %v779_v39 = vmul.f32 %v1537_v19, %v756_v30  ;;  %v759_v46 = vld [vmem:[#allocation2 + $0x38] sm:$0xff]  ;;  %v863_v53 = vmax.f32 %v847_v43, 0.0  ;;  %v764_v18 = vld [vmem:[#allocation2 + $0x60] sm:$0xff]  ;;  %v1189_v30 = vunpack.c.h.bf16 %v1242_v13  ;;  %v870_v41 = vmax.f32 %v854_v31, 0.0 }
 0x13a   : > { %v757_v35 = vld [vmem:[#allocation2 + $0x28] sm:$0xff]  ;;  %v782_v59 = vmul.f32 %v1537_v19, %v759_v46  ;;  %v804_v0 = vadd.f32 %v1544_v22, %v781_v55  ;;  %v1206_v8 = vpack.c.bf16 %v865_v63, %v864_v56  ;;  %v787_v34 = vmul.f32 %v1537_v19, %v764_v18 }
 0x13b   : > { %v780_v40 = vmul.f32 %v1537_v19, %v757_v35  ;;  %v802_v48 = vadd.f32 %v1544_v22, %v779_v39  ;;  %v1201_v62 = vpack.c.bf16 %v863_v53, %v862_v52  ;;  %v765_v25 = vld [vmem:[#allocation2 + $0x68] sm:$0xff]  ;;  %v766_v35 = vld [vmem:[#allocation2 + $0x70] sm:$0xff]  ;;  %v1192_v39 = vunpack.c.l.bf16 %v1243_v26 }
 0x13c   : > { %v805_v5 = vadd.f32 %v1544_v22, %v782_v59  ;;  %v852_v9 = vadd.f32 %v1180_v1, %v804_v0  ;;  %1245 = vst [vmem:[%s1644_s5 + $0x8] sm:$0xff] %v1206_v8   ;;  %v788_v38 = vmul.f32 %v1537_v19, %v765_v25  ;;  %v871_v42 = vmax.f32 %v855_v32, 0.0 }
 0x13d   : > { %v803_v49 = vadd.f32 %v1544_v22, %v780_v40  ;;  %v850_v57 = vadd.f32 %v1176_v45, %v802_v48  ;;  %1202 = vst [vmem:[%s1644_s5] sm:$0xff] %v1201_v62   ;;  %v767_v40 = vld [vmem:[#allocation2 + $0x78] sm:$0xff]  ;;  %v856_v43 = vadd.f32 %v1188_v29, %v808_v33  ;;  %v810_v44 = vadd.f32 %v1544_v22, %v787_v34 }
 0x13e   : > { %v853_v15 = vadd.f32 %v1181_v6, %v805_v5  ;;  %v868_v20 = vmax.f32 %v852_v9, 0.0  ;;  %v1244_v45 = vld [vmem:[%s1643_s4 + $0x38] sm:$0xff]   ;;  %v857_v46 = vadd.f32 %v1189_v30, %v809_v37  ;;  %v811_v47 = vadd.f32 %v1544_v22, %v788_v38 }
 0x13f   : > { %v851_v58 = vadd.f32 %v1177_v50, %v803_v49  ;;  %v866_v3 = vmax.f32 %v850_v57, 0.0  ;;  %v1193_v48 = vunpack.c.h.bf16 %v1243_v26  ;;  %v789_v49 = vmul.f32 %v1537_v19, %v766_v35 }
 0x140   : > { %v869_v27 = vmax.f32 %v853_v15, 0.0  ;;  %v1221_v50 = vpack.c.bf16 %v871_v42, %v870_v41  ;;  %v872_v51 = vmax.f32 %v856_v43, 0.0  ;;  %v858_v52 = vadd.f32 %v1192_v39, %v810_v44 }
 0x141   : > { %v867_v4 = vmax.f32 %v851_v58, 0.0  ;;  %v790_v53 = vmul.f32 %v1537_v19, %v767_v40  ;;  %v873_v54 = vmax.f32 %v857_v46, 0.0  ;;  %v859_v55 = vadd.f32 %v1193_v48, %v811_v47 }
 0x142   : > { %v1216_v36 = vpack.c.bf16 %v869_v27, %v868_v20  ;;  %v812_v56 = vadd.f32 %v1544_v22, %v789_v49  ;;  %v1196_v57 = vunpack.c.l.bf16 %v1244_v45  ;;  %1248 = vst [vmem:[%s1644_s5 + $0x20] sm:$0xff] %v1221_v50   ;;  %v874_v58 = vmax.f32 %v858_v52, 0.0 }
 0x143   : > { %v1211_v14 = vpack.c.bf16 %v867_v4, %v866_v3  ;;  %v813_v59 = vadd.f32 %v1544_v22, %v790_v53  ;;  %v1197_v60 = vunpack.c.h.bf16 %v1244_v45  ;;  %v1226_v61 = vpack.c.bf16 %v873_v54, %v872_v51 }
 0x144   : > { %1247 = vst [vmem:[%s1644_s5 + $0x18] sm:$0xff] %v1216_v36   ;;  %v875_v62 = vmax.f32 %v859_v55, 0.0  ;;  %v860_v63 = vadd.f32 %v1196_v57, %v812_v56 }
 0x145   : > { %1246 = vst [vmem:[%s1644_s5 + $0x10] sm:$0xff] %v1211_v14   ;;  %v861_v0 = vadd.f32 %v1197_v60, %v813_v59  ;;  %1249 = vst [vmem:[%s1644_s5 + $0x28] sm:$0xff] %v1226_v61  }
 0x146   : > { %v1231_v19 = vpack.c.bf16 %v875_v62, %v874_v58  ;;  %v876_v1 = vmax.f32 %v860_v63, 0.0 }
 0x147   : > { %v877_v2 = vmax.f32 %v861_v0, 0.0 }
 0x148   : > { %1250 = vst [vmem:[%s1644_s5 + $0x30] sm:$0xff] %v1231_v19  }
 0x149   : > { %v1236_v3 = vpack.c.bf16 %v877_v2, %v876_v1 }
 0x14b   : > { %1251 = vst [vmem:[%s1644_s5 + $0x38] sm:$0xff] %v1236_v3  }
 0x14c PF: > { %s15_s22 = sadd.s32 1, %s1411_s22   ;;  %s1645_s18 = smov %s1399_s19 }
 0x14d   : > { %p12_p12 = scmp.ge.s32.totalorder %s15_s22, 7   ;;  %s1646_s19 = smov %s1479_s26 }
 0x14e   : > { %s1647_s20 = smov %s1407_s21  ;;  %s1648_s21 = smov %s1650_s23 }
 0x14f   :  { %14 = sbr.rel (!%p12_p12) target bundleno = 3 (0x3), region = 136 }

// kernel: resnet18_forward.28
= control target key start
LH: loop header
LB: loop body
LE: loop exit
PB: predicated region body
PF: predicated region fallthrough
CT: control target
= control target key end

     0   :  { %s867_s15 = smov 0   ;;  %s869_s16 = smov 0   ;;  %s963_s0 = inlined_call_operand.vmem [shape: bf16[32,640], index: 0, kind: input, shape index: {}]   ;;  %s964_s1 = inlined_call_operand.vmem [shape: bf16[640,128], index: 1, kind: input, shape index: {}]   ;;  %s965_s2 = inlined_call_operand.vmem [shape: f32[1,128], index: 2, kind: input, shape index: {}]   ;;  %s966_s3 = inlined_call_operand.vmem [shape: f32[1,128], index: 3, kind: input, shape index: {}]   ;;  %s967_s4 = inlined_call_operand.vmem [shape: bf16[32,128], index: 4, kind: output, shape index: {}]  }
   0x1   :  { %s871_s17 = smov 0   ;;  %s873_s18 = smov 0  }
   0x2   :  { %s875_s19 = smov 0  }
   0x3 LB: > { %s26_s20 = sadd.s32 1, %s835_s18  ;;  %p49_p1 = scmp.ne.s32.totalorder %s827_s16, %s823_s15  ;;  %s839_s19 = sphi %s875_s19, %s14_s19   ;;  %s835_s18 = sphi %s873_s18, %s971_s18   ;;  %s831_s17 = sphi %s871_s17, %s970_s17   ;;  %s827_s16 = sphi %s869_s16, %s969_s16   ;;  %s823_s15 = sphi %s867_s15, %s968_s15  }
   0x4   : > { %p27_p0 = scmp.ge.s32.totalorder %s26_s20, 5  ;;  %p50_p2 = scmp.eq.s32.totalorder %s839_s19, 0 }
   0x5   : > { %s42_s22 = sadd.s32 1, %s827_s16  ;;  %p676_p5 = scmp.ge.s32.totalorder %s839_s19, 5 }
   0x6   : > { %s973_s20 = smov (%p27_p0, %s26_s20), 0  ;;  %p51_p3 = por %p50_p2, %p49_p1 }
   0x7   : > { %s38_s21 = ssub.s32 %s835_s18, %s973_s20  ;;  %195 = sbr.rel (%p676_p5) target bundleno = 21 (0x15), region = 24 }
   0x8   : > { %p40_p4 = scmp.eq.s32.totalorder %s38_s21, 0 }
   0xa   : > { %s902_s23 = scalar_select %p40_p4, %s827_s16, %s42_s22  }
   0xe   : > { %198 = sbr.rel (!%p51_p3) target bundleno = 21 (0x15), region = 28  ;;  %s200_s24 = sand.u32 (%p51_p3), 1, %s827_s16  }
   0xf   : > { %s678_s25 = sshll.u32 (%p51_p3), %s835_s18, 2  ;;  %s677_s26 = sshll.u32 (%p51_p3), %s200_s24, 4 }
  0x10   : > { %s207_s29 = scalar_lea.vmem (%p51_p3), %s963_s0, %s678_s25  ;;  %s202_s30 = scalar_lea.vmem (%p51_p3), [#allocation3], %s677_s26 }
  0x11   : > { %v223_v0 = vld [vmem:[%s207_s29] sm:$0xf] (%p51_p3)  ;;  %v225_v1 = vld [vmem:[%s207_s29 + $0x14] sm:$0xf] (%p51_p3)  ;;  %v227_v2 = vld [vmem:[%s207_s29 + $0x28] sm:$0xf] (%p51_p3) }
  0x12   : > { %224 = vst [vmem:[%s202_s30] sm:$0xf] (%p51_p3), %v223_v0  ;;  %226 = vst [vmem:[%s202_s30 + $0x4] sm:$0xf] (%p51_p3), %v225_v1  ;;  %v229_v3 = vld [vmem:[%s207_s29 + $0x3c] sm:$0xf] (%p51_p3) }
  0x13   : > { %228 = vst [vmem:[%s202_s30 + $0x8] sm:$0xf] (%p51_p3), %v227_v2  ;;  %230 = vst [vmem:[%s202_s30 + $0xc] sm:$0xf] (%p51_p3), %v229_v3 }
  0x15 PF: > { %p679_p6 = scmp.ge.s32.totalorder %s839_s19, 1  ;;  %p272_p7 = scmp.lt.s32.totalorder %s839_s19, 6 }
  0x17   : > { %p273_p8 = pnand %p679_p6, %p272_p7 }
  0x18   : > { %s279_s5 = sand.u32 (!%p273_p8), 1, %s823_s15   ;;  %s681_s6 = sshll.u32 (!%p273_p8), %s831_s17, 4 }
  0x19   : > { %276 = sbr.rel (%p273_p8) target bundleno = 306 (0x132), region = 73  ;;  %s914_s7 = sshll.u32 (!%p273_p8), %s279_s5, 4 }
  0x1a   : > { %p323_p9 = scmp.lt.s32.totalorder (!%p273_p8), %s681_s6, 79  ;;  %s281_s12 = scalar_lea.vmem (!%p273_p8), [#allocation3], %s914_s7 }
  0x1b   : > { %p683_p10 = scmp.ne.s32.totalorder (!%p273_p8), %s831_s17, 0 }
  0x20   : > { %s975_s6 = smov (!%p323_p9, %s681_s6), 79  ;;  %350 = sbr.rel (%p683_p10) target bundleno = 39 (0x27), region = 81 }
  0x21   : > { %s682_s8 = sshll.u32 %s975_s6, 2  ;;  %v841_v4 = vmov (!%p683_p10), 0.0  }
  0x22   : > { %s919_s11 = scalar_lea.vmem %s964_s1, %s682_s8  ;;  %351 = vst [vmem:[#allocation2] sm:$0xff] (!%p683_p10), %v841_v4  ;;  %352 = vst [vmem:[#allocation2 + $0x8] sm:$0xff] (!%p683_p10), %v841_v4 }
  0x23   : > { %353 = vst [vmem:[#allocation2 + $0x10] sm:$0xff] (!%p683_p10), %v841_v4  ;;  %354 = vst [vmem:[#allocation2 + $0x18] sm:$0xff] (!%p683_p10), %v841_v4 }
  0x27 PF: > { %v791_v5 = vld [vmem:[%s919_s11] sm:$0xff]   ;;  %v792_v6 = vld [vmem:[%s919_s11 + $0x8] sm:$0xff]   ;;  %v793_v7 = vld [vmem:[%s919_s11 + $0x10] sm:$0xff]   ;;  %p694_p11 = scmp.ne.s32.totalorder %s831_s17, 4 }
  0x28   : > { %730 = vmatprep.subr.bf16.mxu0 %v791_v5  ;;  %v794_v8 = vld [vmem:[%s919_s11 + $0x18] sm:$0xff]   ;;  %v799_v9 = vld [vmem:[%s281_s12] sm:$0xff]   ;;  %v796_v11 = vld [vmem:[%s919_s11 + $0x28] sm:$0xff]  }
  0x29   : > { %731 = vmatpush3.bf16.msra.mxu0 %v791_v5  ;;  %746 = vmatprep.mubr.bf16.mxu0 %v799_v9  ;;  %v795_v10 = vld [vmem:[%s919_s11 + $0x20] sm:$0xff]   ;;  %v797_v12 = vld [vmem:[%s919_s11 + $0x30] sm:$0xff]   ;;  %v798_v13 = vld [vmem:[%s919_s11 + $0x38] sm:$0xff]  }
  0x2a   : > { %732 = vmatprep.subr.bf16.mxu0 %v792_v6  ;;  %v800_v14 = vld [vmem:[%s281_s12 + $0x8] sm:$0xff]   ;;  %v357_v15 = vld [vmem:[#allocation2 + $0x10] sm:$0xff]  ;;  %v355_v16 = vld [vmem:[#allocation2] sm:$0xff] }
  0x2b   : > { %v358_v18 = vld [vmem:[#allocation2 + $0x18] sm:$0xff]  ;;  %v356_v21 = vld [vmem:[#allocation2 + $0x8] sm:$0xff]  ;;  %v695_v29 = vld [vmem:[%s965_s2] ss:$0 sm:$0xff] (!%p694_p11) }
  0x2c   : > { %v696_v32 = vld [vmem:[%s966_s3] ss:$0 sm:$0xff] (!%p694_p11) }
  0x2d   : > { %733 = vmatpush3.bf16.msra.mxu0 %v792_v6 }
  0x2e   : > { %734 = vmatprep.subr.bf16.mxu0 %v793_v7 }
  0x31   : > { %735 = vmatpush3.bf16.msra.mxu0 %v793_v7 }
  0x32   : > { %736 = vmatprep.subr.bf16.mxu0 %v794_v8 }
  0x35   : > { %737 = vmatpush3.bf16.msra.mxu0 %v794_v8 }
  0x36   : > { %738 = vmatprep.subr.bf16.mxu0 %v795_v10 }
  0x39   : > { %739 = vmatpush3.bf16.msra.mxu0 %v795_v10 }
  0x3a   : > { %740 = vmatprep.subr.bf16.mxu0 %v796_v11 }
  0x3d   : > { %741 = vmatpush3.bf16.msra.mxu0 %v796_v11 }
  0x3e   : > { %742 = vmatprep.subr.bf16.mxu0 %v797_v12 }
  0x41   : > { %743 = vmatpush3.bf16.msra.mxu0 %v797_v12 }
  0x42   : > { %744 = vmatprep.subr.bf16.mxu0 %v798_v13 }
  0x45   : > { %745 = vmatpush3.bf16.msra.mxu0 %v798_v13 }
  0x48   : > { %747 = vmatmul.mubr.bf16.vlgmr.msra.gmra.mrb[0].mxu0 %v800_v14 }
 0x11b   : > { %v748_v17 = vpop.f32.mrb[0].mxu0  ;;  %499 = sbr.rel (%p694_p11) target bundleno = 306 (0x132), region = 85 }
 0x11c   : > { %v490_v19 = vadd.f32 %v748_v17, %v357_v15  ;;  %v473_v20 = vpop.f32.mrb[1].mxu0 }
 0x11d   : > { %v488_v22 = vadd.f32 %v473_v20, %v355_v16  ;;  %v749_v23 = vpop.f32.mrb[2].mxu0 }
 0x11e   : > { %494 = vst [vmem:[#allocation2 + $0x10] sm:$0xff] %v490_v19  ;;  %v491_v24 = vadd.f32 %v749_v23, %v358_v18  ;;  %v476_v25 = vpop.f32.mrb[3].mxu0 }
 0x11f   : > { %492 = vst [vmem:[#allocation2] sm:$0xff] %v488_v22  ;;  %v489_v26 = vadd.f32 %v476_v25, %v356_v21 }
 0x120   : > { %495 = vst [vmem:[#allocation2 + $0x18] sm:$0xff] %v491_v24 }
 0x121   : > { %493 = vst [vmem:[#allocation2 + $0x8] sm:$0xff] %v489_v26 }
 0x125   : > { %v502_v33 = vld [vmem:[#allocation2 + $0x10] sm:$0xff] }
 0x126   : > { %v500_v27 = vld [vmem:[#allocation2] sm:$0xff]  ;;  %v513_v35 = vmul.f32 %v695_v29, %v502_v33 }
 0x127   : > { %v511_v30 = vmul.f32 %v695_v29, %v500_v27  ;;  %v503_v34 = vld [vmem:[#allocation2 + $0x18] sm:$0xff] }
 0x128   : > { %v501_v28 = vld [vmem:[#allocation2 + $0x8] sm:$0xff]  ;;  %v514_v36 = vmul.f32 %v695_v29, %v503_v34  ;;  %v524_v39 = vadd.f32 %v696_v32, %v513_v35 }
 0x129   : > { %v512_v31 = vmul.f32 %v695_v29, %v501_v28  ;;  %v522_v37 = vadd.f32 %v696_v32, %v511_v30 }
 0x12a   : > { %v525_v40 = vadd.f32 %v696_v32, %v514_v36  ;;  %v528_v43 = vmax.f32 %v524_v39, 0.0 }
 0x12b   : > { %v523_v38 = vadd.f32 %v696_v32, %v512_v31  ;;  %v526_v41 = vmax.f32 %v522_v37, 0.0 }
 0x12c   : > { %v529_v44 = vmax.f32 %v525_v40, 0.0 }
 0x12d   : > { %v527_v42 = vmax.f32 %v523_v38, 0.0 }
 0x12e   : > { %v717_v46 = vpack.c.bf16 %v529_v44, %v528_v43 }
 0x12f   : > { %v712_v45 = vpack.c.bf16 %v527_v42, %v526_v41 }
 0x130   : > { %719 = vst [vmem:[%s967_s4 + $0x8] sm:$0xff] %v717_v46  }
 0x131   : > { %713 = vst [vmem:[%s967_s4] sm:$0xff] %v712_v45  }
 0x132 PF: > { %s14_s19 = sadd.s32 1, %s839_s19   ;;  %s968_s15 = smov %s827_s16 }
 0x133   : > { %p11_p12 = scmp.ge.s32.totalorder %s14_s19, 7   ;;  %s969_s16 = smov %s902_s23 }
 0x134   : > { %s970_s17 = smov %s835_s18  ;;  %s971_s18 = smov %s973_s20 }
 0x135   :  { %13 = sbr.rel (!%p11_p12) target bundleno = 3 (0x3), region = 129 }

// kernel: resnet18_forward.29
= control target key start
LH: loop header
LB: loop body
LE: loop exit
PB: predicated region body
PF: predicated region fallthrough
CT: control target
= control target key end

     0   :  { %s358_s1 = inlined_call_operand.vmem [shape: bf16[128,128], index: 1, kind: input, shape index: {}]   ;;  %s359_s0 = inlined_call_operand.vmem [shape: bf16[32,128], index: 0, kind: input, shape index: {}]   ;;  %s360_s2 = inlined_call_operand.vmem [shape: f32[1,128], index: 2, kind: input, shape index: {}]   ;;  %s361_s3 = inlined_call_operand.vmem [shape: f32[1,128], index: 3, kind: input, shape index: {}]   ;;  %s362_s4 = inlined_call_operand.vmem [shape: bf16[32,128], index: 4, kind: output, shape index: {}]  }
   0x1   :  { %v281_v0 = vld [vmem:[%s358_s1] sm:$0xff]   ;;  %v282_v1 = vld [vmem:[%s358_s1 + $0x8] sm:$0xff]   ;;  %v283_v2 = vld [vmem:[%s358_s1 + $0x10] sm:$0xff]  }
   0x2   :  { %261 = vmatprep.subr.bf16.mxu0 %v281_v0  ;;  %v284_v3 = vld [vmem:[%s358_s1 + $0x18] sm:$0xff]   ;;  %v289_v4 = vld [vmem:[%s359_s0] sm:$0xff]   ;;  %v286_v6 = vld [vmem:[%s358_s1 + $0x28] sm:$0xff]  }
   0x3   :  { %262 = vmatpush3.bf16.msra.mxu0 %v281_v0  ;;  %277 = vmatprep.mubr.bf16.mxu0 %v289_v4  ;;  %v285_v5 = vld [vmem:[%s358_s1 + $0x20] sm:$0xff]   ;;  %v287_v7 = vld [vmem:[%s358_s1 + $0x30] sm:$0xff]   ;;  %v288_v8 = vld [vmem:[%s358_s1 + $0x38] sm:$0xff]  }
   0x4   :  { %263 = vmatprep.subr.bf16.mxu0 %v282_v1  ;;  %v290_v9 = vld [vmem:[%s359_s0 + $0x8] sm:$0xff]   ;;  %v230_v10 = vld [vmem:[%s360_s2] ss:$0 sm:$0xff] }
   0x5   :  { %v231_v14 = vld [vmem:[%s361_s3] ss:$0 sm:$0xff] }
   0x7   :  { %264 = vmatpush3.bf16.msra.mxu0 %v282_v1 }
   0x8   :  { %265 = vmatprep.subr.bf16.mxu0 %v283_v2 }
   0xb   :  { %266 = vmatpush3.bf16.msra.mxu0 %v283_v2 }
   0xc   :  { %267 = vmatprep.subr.bf16.mxu0 %v284_v3 }
   0xf   :  { %268 = vmatpush3.bf16.msra.mxu0 %v284_v3 }
  0x10   :  { %269 = vmatprep.subr.bf16.mxu0 %v285_v5 }
  0x13   :  { %270 = vmatpush3.bf16.msra.mxu0 %v285_v5 }
  0x14   :  { %271 = vmatprep.subr.bf16.mxu0 %v286_v6 }
  0x17   :  { %272 = vmatpush3.bf16.msra.mxu0 %v286_v6 }
  0x18   :  { %273 = vmatprep.subr.bf16.mxu0 %v287_v7 }
  0x1b   :  { %274 = vmatpush3.bf16.msra.mxu0 %v287_v7 }
  0x1c   :  { %275 = vmatprep.subr.bf16.mxu0 %v288_v8 }
  0x1f   :  { %276 = vmatpush3.bf16.msra.mxu0 %v288_v8 }
  0x22   :  { %278 = vmatmul.mubr.bf16.vlgmr.msra.gmra.mrb[0].mxu0 %v290_v9 }
  0xf5   :  { %v279_v11 = vpop.f32.mrb[0].mxu0 }
  0xf6   :  { %v183_v12 = vmul.f32 %v279_v11, %v230_v10  ;;  %v144_v13 = vpop.f32.mrb[1].mxu0 }
  0xf7   :  { %v181_v15 = vmul.f32 %v230_v10, %v144_v13  ;;  %v280_v16 = vpop.f32.mrb[2].mxu0 }
  0xf8   :  { %v184_v17 = vmul.f32 %v280_v16, %v230_v10  ;;  %v147_v18 = vpop.f32.mrb[3].mxu0  ;;  %v194_v20 = vadd.f32 %v231_v14, %v183_v12 }
  0xf9   :  { %v182_v19 = vmul.f32 %v230_v10, %v147_v18  ;;  %v192_v22 = vadd.f32 %v231_v14, %v181_v15 }
  0xfa   :  { %v195_v21 = vadd.f32 %v231_v14, %v184_v17 }
  0xfb   :  { %v193_v23 = vadd.f32 %v231_v14, %v182_v19 }
  0xfc   :  { %v248_v24 = vpack.c.bf16 %v195_v21, %v194_v20 }
  0xfd   :  { %v243_v25 = vpack.c.bf16 %v193_v23, %v192_v22 }
  0xfe   :  { %250 = vst [vmem:[%s362_s4 + $0x8] sm:$0xff] %v248_v24  }
  0xff   :  { %244 = vst [vmem:[%s362_s4] sm:$0xff] %v243_v25  }

// kernel: resnet18_forward.30
= control target key start
LH: loop header
LB: loop body
LE: loop exit
PB: predicated region body
PF: predicated region fallthrough
CT: control target
= control target key end

     0   :  { %s1247_s18 = smov 0   ;;  %s1249_s19 = smov 0   ;;  %s1366_s0 = inlined_call_operand.vmem [shape: bf16[32,1152], index: 0, kind: input, shape index: {}]   ;;  %s1367_s1 = inlined_call_operand.vmem [shape: bf16[1152,128], index: 1, kind: input, shape index: {}]   ;;  %s1368_s2 = inlined_call_operand.vmem [shape: f32[1,128], index: 2, kind: input, shape index: {}]   ;;  %s1369_s3 = inlined_call_operand.vmem [shape: f32[1,128], index: 3, kind: input, shape index: {}]   ;;  %s1370_s4 = inlined_call_operand.vmem [shape: bf16[32,128], index: 4, kind: input, shape index: {}]   ;;  %s1371_s5 = inlined_call_operand.vmem [shape: bf16[32,128], index: 5, kind: output, shape index: {}]  }
   0x1   :  { %s1251_s20 = smov 0   ;;  %s1253_s21 = smov 0  }
   0x2   :  { %s1255_s22 = smov 0  }
   0x3 LB: > { %s27_s23 = sadd.s32 1, %s1210_s21  ;;  %p50_p1 = scmp.ne.s32.totalorder %s1202_s19, %s1198_s18  ;;  %s1214_s22 = sphi %s1255_s22, %s15_s22   ;;  %s1210_s21 = sphi %s1253_s21, %s1375_s21   ;;  %s1206_s20 = sphi %s1251_s20, %s1374_s20   ;;  %s1202_s19 = sphi %s1249_s19, %s1373_s19   ;;  %s1198_s18 = sphi %s1247_s18, %s1372_s18  }
   0x4   : > { %p28_p0 = scmp.ge.s32.totalorder %s27_s23, 3  ;;  %p51_p2 = scmp.eq.s32.totalorder %s1214_s22, 0 }
   0x5   : > { %s43_s25 = sadd.s32 1, %s1202_s19  ;;  %p964_p5 = scmp.ge.s32.totalorder %s1214_s22, 3 }
   0x6   : > { %s1377_s23 = smov (%p28_p0, %s27_s23), 0  ;;  %p52_p3 = por %p51_p2, %p50_p1 }
   0x7   : > { %s39_s24 = ssub.s32 %s1210_s21, %s1377_s23  ;;  %236 = sbr.rel (%p964_p5) target bundleno = 23 (0x17), region = 28 }
   0x8   : > { %p41_p4 = scmp.eq.s32.totalorder %s39_s24, 0 }
   0xa   : > { %s1282_s26 = scalar_select %p41_p4, %s1202_s19, %s43_s25  }
   0xe   : > { %239 = sbr.rel (!%p52_p3) target bundleno = 23 (0x17), region = 32  ;;  %s241_s27 = sand.u32 (%p52_p3), 1, %s1202_s19  }
   0xf   : > { %s1018_s28 = smul.u32 (%p52_p3), 12, %s1210_s21 }
  0x10   : > { %s1101_s29 = smul.u32 (%p52_p3), 48, %s241_s27 }
  0x11   : > { %s249_s7 = scalar_lea.vmem (%p52_p3), %s1366_s0, %s1018_s28 }
  0x12   : > { %v264_v0 = vld [vmem:[%s249_s7] sm:$0xff] (%p52_p3)  ;;  %v268_v2 = vld [vmem:[%s249_s7 + $0x48] sm:$0xff] (%p52_p3)  ;;  %s243_s8 = scalar_lea.vmem (%p52_p3), [#allocation3], %s1101_s29  ;;  %v970_v6 = vld [vmem:[%s249_s7 + $0x50] sm:$0xf] (%p52_p3) }
  0x13   : > { %v266_v1 = vld [vmem:[%s249_s7 + $0x24] sm:$0xff] (%p52_p3)  ;;  %265 = vst [vmem:[%s243_s8] sm:$0xff] (%p52_p3), %v264_v0  ;;  %269 = vst [vmem:[%s243_s8 + $0x18] sm:$0xff] (%p52_p3), %v268_v2  ;;  %v270_v3 = vld [vmem:[%s249_s7 + $0x6c] sm:$0xff] (%p52_p3) }
  0x14   : > { %267 = vst [vmem:[%s243_s8 + $0xc] sm:$0xff] (%p52_p3), %v266_v1  ;;  %v966_v4 = vld [vmem:[%s249_s7 + $0x8] sm:$0xf] (%p52_p3)  ;;  %v968_v5 = vld [vmem:[%s249_s7 + $0x2c] sm:$0xf] (%p52_p3)  ;;  %271 = vst [vmem:[%s243_s8 + $0x24] sm:$0xff] (%p52_p3), %v270_v3 }
  0x15   : > { %967 = vst [vmem:[%s243_s8 + $0x8] sm:$0xf] %v966_v4  ;;  %969 = vst [vmem:[%s243_s8 + $0x14] sm:$0xf] %v968_v5  ;;  %v972_v7 = vld [vmem:[%s249_s7 + $0x74] sm:$0xf] }
  0x16   : > { %971 = vst [vmem:[%s243_s8 + $0x20] sm:$0xf] %v970_v6  ;;  %973 = vst [vmem:[%s243_s8 + $0x2c] sm:$0xf] %v972_v7 }
  0x17 PF: > { %p974_p6 = scmp.ge.s32.totalorder %s1214_s22, 1  ;;  %p303_p7 = scmp.lt.s32.totalorder %s1214_s22, 4 }
  0x19   : > { %p304_p8 = pnand %p974_p6, %p303_p7 }
  0x1a   : > { %s310_s9 = sand.u32 (!%p304_p8), 1, %s1198_s18   ;;  %s364_s10 = smul.u32 (!%p304_p8), 48, %s1206_s20 }
  0x1b   : > { %307 = sbr.rel (%p304_p8) target bundleno = 322 (0x142), region = 62  ;;  %p976_p10 = scmp.ne.s32.totalorder (!%p304_p8), %s1206_s20, 0 }
  0x1c   : > { %s1102_s11 = smul.u32 (!%p304_p8), 48, %s310_s9  ;;  %p365_p9 = scmp.lt.s32.totalorder (!%p304_p8), %s364_s10, 143 }
  0x1e   : > { %s1299_s16 = scalar_lea.vmem (!%p304_p8), [#allocation3], %s1102_s11 }
  0x22   : > { %s1379_s10 = smov (!%p365_p9, %s364_s10), 143  ;;  %401 = sbr.rel (%p976_p10) target bundleno = 41 (0x29), region = 70 }
  0x23   : > { %s975_s12 = sshll.u32 %s1379_s10, 2  ;;  %v1216_v8 = vmov (!%p976_p10), 0.0  }
  0x24   : > { %s1297_s15 = scalar_lea.vmem %s1367_s1, %s975_s12  ;;  %402 = vst [vmem:[#allocation2] sm:$0xff] (!%p976_p10), %v1216_v8  ;;  %403 = vst [vmem:[#allocation2 + $0x8] sm:$0xff] (!%p976_p10), %v1216_v8 }
  0x25   : > { %404 = vst [vmem:[#allocation2 + $0x10] sm:$0xff] (!%p976_p10), %v1216_v8  ;;  %405 = vst [vmem:[#allocation2 + $0x18] sm:$0xff] (!%p976_p10), %v1216_v8 }
  0x29 PF: > { %v1144_v9 = vld [vmem:[%s1297_s15 + $0x40] sm:$0xff]   ;;  %v1147_v12 = vld [vmem:[%s1297_s15 + $0x48] sm:$0xff]   ;;  %v1150_v15 = vld [vmem:[%s1297_s15 + $0x50] sm:$0xff]   ;;  %p1007_p11 = scmp.ne.s32.totalorder %s1206_s20, 2 }
  0x2a   : > { %v1145_v10 = vld [vmem:[%s1297_s15] sm:$0xff]   ;;  %1043 = vmatprep.subr.bf16.mxu0 %v1144_v9  ;;  %v1148_v13 = vld [vmem:[%s1297_s15 + $0x8] sm:$0xff]   ;;  %v1151_v16 = vld [vmem:[%s1297_s15 + $0x10] sm:$0xff]  }
  0x2b   : > { %v1146_v11 = vld [vmem:[%s1297_s15 + $0x80] sm:$0xff]   ;;  %1044 = vmatpush3.bf16.msra.mxu0 %v1145_v10  ;;  %v1149_v14 = vld [vmem:[%s1297_s15 + $0x88] sm:$0xff]   ;;  %v1152_v17 = vld [vmem:[%s1297_s15 + $0x90] sm:$0xff]  }
  0x2c   : > { %1081 = vmatprep.subr.bf16.mxu1 %v1146_v11  ;;  %1045 = vmatprep.subr.bf16.mxu0 %v1147_v12  ;;  %v1153_v18 = vld [vmem:[%s1297_s15 + $0x58] sm:$0xff]   ;;  %v1156_v21 = vld [vmem:[%s1297_s15 + $0x60] sm:$0xff]   ;;  %v1159_v24 = vld [vmem:[%s1297_s15 + $0x68] sm:$0xff]  }
  0x2d   : > { %1082 = vmatpush3.bf16.msra.mxu1 %v1146_v11  ;;  %v1154_v19 = vld [vmem:[%s1297_s15 + $0x18] sm:$0xff]   ;;  %v1158_v22 = vld [vmem:[%s1297_s15 + $0xa0] sm:$0xff]   ;;  %v1161_v25 = vld [vmem:[%s1297_s15 + $0xa8] sm:$0xff]  }
  0x2e   : > { %1083 = vmatprep.subr.bf16.mxu1 %v1149_v14  ;;  %v1155_v20 = vld [vmem:[%s1297_s15 + $0x98] sm:$0xff]   ;;  %v1157_v23 = vld [vmem:[%s1297_s15 + $0x20] sm:$0xff]   ;;  %v1160_v26 = vld [vmem:[%s1297_s15 + $0x28] sm:$0xff]  }
  0x2f   : > { %1046 = vmatpush3.bf16.msra.mxu0 %v1148_v13  ;;  %v1162_v27 = vld [vmem:[%s1297_s15 + $0x70] sm:$0xff]   ;;  %v1165_v30 = vld [vmem:[%s1297_s15 + $0x78] sm:$0xff]   ;;  %v406_v45 = vld [vmem:[#allocation2] sm:$0xff] }
  0x30   : > { %1047 = vmatprep.subr.bf16.mxu0 %v1150_v15  ;;  %v1163_v28 = vld [vmem:[%s1297_s15 + $0x30] sm:$0xff]   ;;  %v1167_v31 = vld [vmem:[%s1297_s15 + $0xb8] sm:$0xff]   ;;  %v407_v50 = vld [vmem:[#allocation2 + $0x8] sm:$0xff] }
  0x31   : > { %1084 = vmatpush3.bf16.msra.mxu1 %v1149_v14  ;;  %v1164_v29 = vld [vmem:[%s1297_s15 + $0xb0] sm:$0xff]   ;;  %v1166_v34 = vld [vmem:[%s1297_s15 + $0x38] sm:$0xff]   ;;  %v1008_v5 = vld [vmem:[%s1368_s2] ss:$0 sm:$0xff] (!%p1007_p11) }
  0x32   : > { %1085 = vmatprep.subr.bf16.mxu1 %v1152_v17  ;;  %v1170_v32 = vld [vmem:[%s1299_s16 + $0x4] ss:$12 sps:$4 sm:$0xff]   ;;  %v1171_v33 = vld [vmem:[%s1299_s16 + $0x8] ss:$12 sps:$4 sm:$0xff]   ;;  %v1168_v35 = vld [vmem:[%s1299_s16] ss:$12 sps:$4 sm:$0xff]  }
  0x33   : > { %1048 = vmatpush3.bf16.msra.mxu0 %v1151_v16  ;;  %674 = vmatprep.mubr.bf16.mxu0 %v1170_v32  ;;  %v1173_v36 = vld [vmem:[%s1299_s16 + $0x1c] ss:$12 sps:$4 sm:$0xff]   ;;  %v1172_v37 = vld [vmem:[%s1299_s16 + $0x20] ss:$12 sps:$4 sm:$0xff]   ;;  %v1175_v38 = vld [vmem:[%s1299_s16 + $0x18] ss:$12 sps:$4 sm:$0xff]  }
  0x34   : > { %1049 = vmatprep.subr.bf16.mxu0 %v1153_v18  ;;  %1097 = vmatprep.mubr.bf16.mxu1 %v1171_v33  ;;  %v408_v59 = vld [vmem:[#allocation2 + $0x10] sm:$0xff]  ;;  %v409_v63 = vld [vmem:[#allocation2 + $0x18] sm:$0xff]  ;;  %v1009_v8 = vld [vmem:[%s1369_s3] ss:$0 sm:$0xff] (!%p1007_p11) }
  0x35   : > { %1086 = vmatpush3.bf16.msra.mxu1 %v1152_v17  ;;  %v1024_v9 = vld [vmem:[%s1370_s4] sm:$0xff] (!%p1007_p11)   ;;  %v1041_v15 = vld [vmem:[%s1370_s4 + $0x8] sm:$0xff] (!%p1007_p11)  }
  0x36   : > { %1087 = vmatprep.subr.bf16.mxu1 %v1155_v20  ;;  %v1025_v11 = vunpack.c.l.bf16 (!%p1007_p11), %v1024_v9  ;;  %v1026_v12 = vunpack.c.h.bf16 (!%p1007_p11), %v1024_v9 }
  0x37   : > { %1050 = vmatpush3.bf16.msra.mxu0 %v1154_v19  ;;  %v1029_v19 = vunpack.c.l.bf16 (!%p1007_p11), %v1041_v15 }
  0x38   : > { %1051 = vmatprep.subr.bf16.mxu0 %v1156_v21  ;;  %v1030_v21 = vunpack.c.h.bf16 (!%p1007_p11), %v1041_v15 }
  0x39   : > { %1088 = vmatpush3.bf16.msra.mxu1 %v1155_v20 }
  0x3a   : > { %1089 = vmatprep.subr.bf16.mxu1 %v1158_v22 }
  0x3b   : > { %1052 = vmatpush3.bf16.msra.mxu0 %v1157_v23 }
  0x3c   : > { %1053 = vmatprep.subr.bf16.mxu0 %v1159_v24 }
  0x3d   : > { %1090 = vmatpush3.bf16.msra.mxu1 %v1158_v22 }
  0x3e   : > { %1091 = vmatprep.subr.bf16.mxu1 %v1161_v25 }
  0x3f   : > { %1054 = vmatpush3.bf16.msra.mxu0 %v1160_v26 }
  0x40   : > { %1055 = vmatprep.subr.bf16.mxu0 %v1162_v27 }
  0x41   : > { %1092 = vmatpush3.bf16.msra.mxu1 %v1161_v25 }
  0x42   : > { %1093 = vmatprep.subr.bf16.mxu1 %v1164_v29 }
  0x43   : > { %1056 = vmatpush3.bf16.msra.mxu0 %v1163_v28 }
  0x44   : > { %1057 = vmatprep.subr.bf16.mxu0 %v1165_v30 }
  0x45   : > { %1094 = vmatpush3.bf16.msra.mxu1 %v1164_v29 }
  0x46   : > { %1095 = vmatprep.subr.bf16.mxu1 %v1167_v31 }
  0x47   : > { %1058 = vmatpush3.bf16.msra.mxu0 %v1166_v34 }
  0x49   : > { %1096 = vmatpush3.bf16.msra.mxu1 %v1167_v31 }
  0x4a   : > { %675 = vmatmul.mubr.bf16.vlgmr.msra.gmra.mrb[0].mxu0 %v1168_v35 }
  0x4b   : > { %682 = vmatprep.mubr.bf16.mxu0 %v1173_v36 }
  0x4c   : > { %1098 = vmatmul.mubr.bf16.vlgmr.msra.gmra.mrb[0].mxu1 %v1172_v37 }
  0x52   : > { %683 = vmatmul.mubr.bf16.gmra.mrb[4].mxu0 %v1175_v38 }
 0x11d   : > { %v1059_v39 = vpop.f32.mrb[0].mxu0 }
 0x11e   : > { %v1060_v40 = vpop.f32.mrb[1].mxu0 }
 0x11f   : > { %v1061_v41 = vadd.f32 %v1060_v40, %v1059_v39  ;;  %v1062_v42 = vpop.f32.mrb[2].mxu0  ;;  %v1099_v43 = vpop.f32.mrb[0].mxu1 }
 0x120   : > { %v1063_v44 = vpop.f32.mrb[3].mxu0  ;;  %v725_v46 = vpop.f32.mrb[1].mxu1 }
 0x121   : > { %v1064_v47 = vadd.f32 %v1063_v44, %v1062_v42  ;;  %v726_v48 = vadd.f32 %v1061_v41, %v725_v46  ;;  %v1100_v49 = vpop.f32.mrb[2].mxu1 }
 0x122   : > { %v728_v51 = vpop.f32.mrb[3].mxu1 }
 0x123   : > { %v740_v52 = vadd.f32 %v726_v48, %v406_v45  ;;  %v729_v53 = vadd.f32 %v1064_v47, %v728_v51 }
 0x125   : > { %744 = vst [vmem:[#allocation2] sm:$0xff] %v740_v52  ;;  %v741_v54 = vadd.f32 %v729_v53, %v407_v50  ;;  %v1065_v55 = vpop.f32.mrb[4].mxu0 }
 0x126   : > { %v1066_v56 = vpop.f32.mrb[5].mxu0 }
 0x127   : > { %745 = vst [vmem:[#allocation2 + $0x8] sm:$0xff] %v741_v54  ;;  %v1067_v57 = vadd.f32 %v1066_v56, %v1065_v55  ;;  %v1068_v58 = vpop.f32.mrb[6].mxu0 }
 0x128   : > { %v1069_v60 = vpop.f32.mrb[7].mxu0 }
 0x129   : > { %v734_v61 = vadd.f32 %v1099_v43, %v1067_v57  ;;  %v1070_v62 = vadd.f32 %v1069_v60, %v1068_v58  ;;  %751 = sbr.rel (%p1007_p11) target bundleno = 322 (0x142), region = 74 }
 0x12b   : > { %v742_v0 = vadd.f32 %v734_v61, %v408_v59  ;;  %v737_v1 = vadd.f32 %v1100_v49, %v1070_v62 }
 0x12c   : > { %v752_v3 = vld [vmem:[#allocation2] sm:$0xff] (!%p1007_p11) }
 0x12d   : > { %746 = vst [vmem:[#allocation2 + $0x10] sm:$0xff] %v742_v0  ;;  %v743_v2 = vadd.f32 %v737_v1, %v409_v63  ;;  %v763_v6 = vmul.f32 (!%p1007_p11), %v1008_v5, %v752_v3 }
 0x12e   : > { %v753_v4 = vld [vmem:[#allocation2 + $0x8] sm:$0xff] (!%p1007_p11) }
 0x12f   : > { %747 = vst [vmem:[#allocation2 + $0x18] sm:$0xff] %v743_v2  ;;  %v764_v7 = vmul.f32 (!%p1007_p11), %v1008_v5, %v753_v4  ;;  %v774_v16 = vadd.f32 (!%p1007_p11), %v1009_v8, %v763_v6 }
 0x131   : > { %v775_v17 = vadd.f32 %v1009_v8, %v764_v7  ;;  %v786_v22 = vadd.f32 %v1025_v11, %v774_v16 }
 0x133   : > { %v787_v23 = vadd.f32 %v1026_v12, %v775_v17  ;;  %v790_v26 = vmax.f32 %v786_v22, 0.0 }
 0x134   : > { %v754_v10 = vld [vmem:[#allocation2 + $0x10] sm:$0xff] }
 0x135   : > { %v765_v14 = vmul.f32 %v1008_v5, %v754_v10  ;;  %v791_v27 = vmax.f32 %v787_v23, 0.0 }
 0x136   : > { %v755_v13 = vld [vmem:[#allocation2 + $0x18] sm:$0xff] }
 0x137   : > { %v766_v18 = vmul.f32 %v1008_v5, %v755_v13  ;;  %v776_v20 = vadd.f32 %v1009_v8, %v765_v14  ;;  %v1034_v30 = vpack.c.bf16 %v791_v27, %v790_v26 }
 0x139   : > { %v777_v24 = vadd.f32 %v1009_v8, %v766_v18  ;;  %v788_v25 = vadd.f32 %v1029_v19, %v776_v20  ;;  %1035 = vst [vmem:[%s1371_s5] sm:$0xff] %v1034_v30  }
 0x13b   : > { %v789_v28 = vadd.f32 %v1030_v21, %v777_v24  ;;  %v792_v29 = vmax.f32 %v788_v25, 0.0 }
 0x13d   : > { %v793_v31 = vmax.f32 %v789_v28, 0.0 }
 0x13f   : > { %v1039_v32 = vpack.c.bf16 %v793_v31, %v792_v29 }
 0x141   : > { %1042 = vst [vmem:[%s1371_s5 + $0x8] sm:$0xff] %v1039_v32  }
 0x142 PF: > { %s15_s22 = sadd.s32 1, %s1214_s22   ;;  %s1372_s18 = smov %s1202_s19 }
 0x143   : > { %p12_p12 = scmp.ge.s32.totalorder %s15_s22, 5   ;;  %s1373_s19 = smov %s1282_s26 }
 0x144   : > { %s1374_s20 = smov %s1210_s21  ;;  %s1375_s21 = smov %s1377_s23 }
 0x145   :  { %14 = sbr.rel (!%p12_p12) target bundleno = 3 (0x3), region = 127 }

// kernel: resnet18_forward.31
= control target key start
LH: loop header
LB: loop body
LE: loop exit
PB: predicated region body
PF: predicated region fallthrough
CT: control target
= control target key end

     0   :  { %s1142_s15 = smov 0   ;;  %s1144_s16 = smov 0   ;;  %s1255_s0 = inlined_call_operand.vmem [shape: bf16[32,1152], index: 0, kind: input, shape index: {}]   ;;  %s1256_s1 = inlined_call_operand.vmem [shape: bf16[1152,128], index: 1, kind: input, shape index: {}]   ;;  %s1257_s2 = inlined_call_operand.vmem [shape: f32[1,128], index: 2, kind: input, shape index: {}]   ;;  %s1258_s3 = inlined_call_operand.vmem [shape: f32[1,128], index: 3, kind: input, shape index: {}]   ;;  %s1259_s4 = inlined_call_operand.vmem [shape: bf16[32,128], index: 4, kind: output, shape index: {}]  }
   0x1   :  { %s1146_s17 = smov 0   ;;  %s1148_s18 = smov 0  }
   0x2   :  { %s1150_s19 = smov 0  }
   0x3 LB: > { %s26_s20 = sadd.s32 1, %s1110_s18  ;;  %p49_p1 = scmp.ne.s32.totalorder %s1102_s16, %s1098_s15  ;;  %s1114_s19 = sphi %s1150_s19, %s14_s19   ;;  %s1110_s18 = sphi %s1148_s18, %s1263_s18   ;;  %s1106_s17 = sphi %s1146_s17, %s1262_s17   ;;  %s1102_s16 = sphi %s1144_s16, %s1261_s16   ;;  %s1098_s15 = sphi %s1142_s15, %s1260_s15  }
   0x4   : > { %p27_p0 = scmp.ge.s32.totalorder %s26_s20, 3  ;;  %p50_p2 = scmp.eq.s32.totalorder %s1114_s19, 0 }
   0x5   : > { %s42_s22 = sadd.s32 1, %s1102_s16  ;;  %p873_p5 = scmp.ge.s32.totalorder %s1114_s19, 3 }
   0x6   : > { %s1265_s20 = smov (%p27_p0, %s26_s20), 0  ;;  %p51_p3 = por %p50_p2, %p49_p1 }
   0x7   : > { %s38_s21 = ssub.s32 %s1110_s18, %s1265_s20  ;;  %195 = sbr.rel (%p873_p5) target bundleno = 23 (0x17), region = 24 }
   0x8   : > { %p40_p4 = scmp.eq.s32.totalorder %s38_s21, 0 }
   0xa   : > { %s1177_s23 = scalar_select %p40_p4, %s1102_s16, %s42_s22  }
   0xe   : > { %198 = sbr.rel (!%p51_p3) target bundleno = 23 (0x17), region = 28  ;;  %s200_s24 = sand.u32 (%p51_p3), 1, %s1102_s16  }
   0xf   : > { %s927_s25 = smul.u32 (%p51_p3), 12, %s1110_s18 }
  0x10   : > { %s1001_s26 = smul.u32 (%p51_p3), 48, %s200_s24 }
  0x11   : > { %s208_s29 = scalar_lea.vmem (%p51_p3), %s1255_s0, %s927_s25 }
  0x12   : > { %v223_v0 = vld [vmem:[%s208_s29] sm:$0xff] (%p51_p3)  ;;  %v227_v2 = vld [vmem:[%s208_s29 + $0x48] sm:$0xff] (%p51_p3)  ;;  %s202_s30 = scalar_lea.vmem (%p51_p3), [#allocation3], %s1001_s26  ;;  %v879_v6 = vld [vmem:[%s208_s29 + $0x50] sm:$0xf] (%p51_p3) }
  0x13   : > { %v225_v1 = vld [vmem:[%s208_s29 + $0x24] sm:$0xff] (%p51_p3)  ;;  %224 = vst [vmem:[%s202_s30] sm:$0xff] (%p51_p3), %v223_v0  ;;  %228 = vst [vmem:[%s202_s30 + $0x18] sm:$0xff] (%p51_p3), %v227_v2  ;;  %v229_v3 = vld [vmem:[%s208_s29 + $0x6c] sm:$0xff] (%p51_p3) }
  0x14   : > { %226 = vst [vmem:[%s202_s30 + $0xc] sm:$0xff] (%p51_p3), %v225_v1  ;;  %v875_v4 = vld [vmem:[%s208_s29 + $0x8] sm:$0xf] (%p51_p3)  ;;  %v877_v5 = vld [vmem:[%s208_s29 + $0x2c] sm:$0xf] (%p51_p3)  ;;  %230 = vst [vmem:[%s202_s30 + $0x24] sm:$0xff] (%p51_p3), %v229_v3 }
  0x15   : > { %876 = vst [vmem:[%s202_s30 + $0x8] sm:$0xf] %v875_v4  ;;  %878 = vst [vmem:[%s202_s30 + $0x14] sm:$0xf] %v877_v5  ;;  %v881_v7 = vld [vmem:[%s208_s29 + $0x74] sm:$0xf] }
  0x16   : > { %880 = vst [vmem:[%s202_s30 + $0x20] sm:$0xf] %v879_v6  ;;  %882 = vst [vmem:[%s202_s30 + $0x2c] sm:$0xf] %v881_v7 }
  0x17 PF: > { %p883_p6 = scmp.ge.s32.totalorder %s1114_s19, 1  ;;  %p262_p7 = scmp.lt.s32.totalorder %s1114_s19, 4 }
  0x19   : > { %p263_p8 = pnand %p883_p6, %p262_p7 }
  0x1a   : > { %s269_s5 = sand.u32 (!%p263_p8), 1, %s1098_s15   ;;  %s313_s6 = smul.u32 (!%p263_p8), 48, %s1106_s17 }
  0x1b   : > { %266 = sbr.rel (%p263_p8) target bundleno = 320 (0x140), region = 58  ;;  %p885_p10 = scmp.ne.s32.totalorder (!%p263_p8), %s1106_s17, 0 }
  0x1c   : > { %s1002_s7 = smul.u32 (!%p263_p8), 48, %s269_s5  ;;  %p314_p9 = scmp.lt.s32.totalorder (!%p263_p8), %s313_s6, 143 }
  0x1e   : > { %s1194_s12 = scalar_lea.vmem (!%p263_p8), [#allocation3], %s1002_s7 }
  0x22   : > { %s1267_s6 = smov (!%p314_p9, %s313_s6), 143  ;;  %341 = sbr.rel (%p885_p10) target bundleno = 41 (0x29), region = 66 }
  0x23   : > { %s884_s8 = sshll.u32 %s1267_s6, 2  ;;  %v1116_v8 = vmov (!%p885_p10), 0.0  }
  0x24   : > { %s1192_s11 = scalar_lea.vmem %s1256_s1, %s884_s8  ;;  %342 = vst [vmem:[#allocation2] sm:$0xff] (!%p885_p10), %v1116_v8  ;;  %343 = vst [vmem:[#allocation2 + $0x8] sm:$0xff] (!%p885_p10), %v1116_v8 }
  0x25   : > { %344 = vst [vmem:[#allocation2 + $0x10] sm:$0xff] (!%p885_p10), %v1116_v8  ;;  %345 = vst [vmem:[#allocation2 + $0x18] sm:$0xff] (!%p885_p10), %v1116_v8 }
  0x29 PF: > { %v1044_v9 = vld [vmem:[%s1192_s11 + $0x40] sm:$0xff]   ;;  %v1047_v12 = vld [vmem:[%s1192_s11 + $0x48] sm:$0xff]   ;;  %v1050_v15 = vld [vmem:[%s1192_s11 + $0x50] sm:$0xff]   ;;  %p916_p11 = scmp.ne.s32.totalorder %s1106_s17, 2 }
  0x2a   : > { %v1045_v10 = vld [vmem:[%s1192_s11] sm:$0xff]   ;;  %943 = vmatprep.subr.bf16.mxu0 %v1044_v9  ;;  %v1048_v13 = vld [vmem:[%s1192_s11 + $0x8] sm:$0xff]   ;;  %v1051_v16 = vld [vmem:[%s1192_s11 + $0x10] sm:$0xff]  }
  0x2b   : > { %v1046_v11 = vld [vmem:[%s1192_s11 + $0x80] sm:$0xff]   ;;  %944 = vmatpush3.bf16.msra.mxu0 %v1045_v10  ;;  %v1049_v14 = vld [vmem:[%s1192_s11 + $0x88] sm:$0xff]   ;;  %v1052_v17 = vld [vmem:[%s1192_s11 + $0x90] sm:$0xff]  }
  0x2c   : > { %981 = vmatprep.subr.bf16.mxu1 %v1046_v11  ;;  %945 = vmatprep.subr.bf16.mxu0 %v1047_v12  ;;  %v1053_v18 = vld [vmem:[%s1192_s11 + $0x58] sm:$0xff]   ;;  %v1056_v21 = vld [vmem:[%s1192_s11 + $0x60] sm:$0xff]   ;;  %v1059_v24 = vld [vmem:[%s1192_s11 + $0x68] sm:$0xff]  }
  0x2d   : > { %982 = vmatpush3.bf16.msra.mxu1 %v1046_v11  ;;  %v1054_v19 = vld [vmem:[%s1192_s11 + $0x18] sm:$0xff]   ;;  %v1058_v22 = vld [vmem:[%s1192_s11 + $0xa0] sm:$0xff]   ;;  %v1061_v25 = vld [vmem:[%s1192_s11 + $0xa8] sm:$0xff]  }
  0x2e   : > { %983 = vmatprep.subr.bf16.mxu1 %v1049_v14  ;;  %v1055_v20 = vld [vmem:[%s1192_s11 + $0x98] sm:$0xff]   ;;  %v1057_v23 = vld [vmem:[%s1192_s11 + $0x20] sm:$0xff]   ;;  %v1060_v26 = vld [vmem:[%s1192_s11 + $0x28] sm:$0xff]  }
  0x2f   : > { %946 = vmatpush3.bf16.msra.mxu0 %v1048_v13  ;;  %v1062_v27 = vld [vmem:[%s1192_s11 + $0x70] sm:$0xff]   ;;  %v1065_v30 = vld [vmem:[%s1192_s11 + $0x78] sm:$0xff]   ;;  %v346_v45 = vld [vmem:[#allocation2] sm:$0xff] }
  0x30   : > { %947 = vmatprep.subr.bf16.mxu0 %v1050_v15  ;;  %v1063_v28 = vld [vmem:[%s1192_s11 + $0x30] sm:$0xff]   ;;  %v1067_v31 = vld [vmem:[%s1192_s11 + $0xb8] sm:$0xff]   ;;  %v347_v50 = vld [vmem:[#allocation2 + $0x8] sm:$0xff] }
  0x31   : > { %984 = vmatpush3.bf16.msra.mxu1 %v1049_v14  ;;  %v1064_v29 = vld [vmem:[%s1192_s11 + $0xb0] sm:$0xff]   ;;  %v1066_v34 = vld [vmem:[%s1192_s11 + $0x38] sm:$0xff]   ;;  %v917_v5 = vld [vmem:[%s1257_s2] ss:$0 sm:$0xff] (!%p916_p11) }
  0x32   : > { %985 = vmatprep.subr.bf16.mxu1 %v1052_v17  ;;  %v1070_v32 = vld [vmem:[%s1194_s12 + $0x4] ss:$12 sps:$4 sm:$0xff]   ;;  %v1071_v33 = vld [vmem:[%s1194_s12 + $0x8] ss:$12 sps:$4 sm:$0xff]   ;;  %v1068_v35 = vld [vmem:[%s1194_s12] ss:$12 sps:$4 sm:$0xff]  }
  0x33   : > { %948 = vmatpush3.bf16.msra.mxu0 %v1051_v16  ;;  %614 = vmatprep.mubr.bf16.mxu0 %v1070_v32  ;;  %v1073_v36 = vld [vmem:[%s1194_s12 + $0x1c] ss:$12 sps:$4 sm:$0xff]   ;;  %v1072_v37 = vld [vmem:[%s1194_s12 + $0x20] ss:$12 sps:$4 sm:$0xff]   ;;  %v1075_v38 = vld [vmem:[%s1194_s12 + $0x18] ss:$12 sps:$4 sm:$0xff]  }
  0x34   : > { %949 = vmatprep.subr.bf16.mxu0 %v1053_v18  ;;  %997 = vmatprep.mubr.bf16.mxu1 %v1071_v33  ;;  %v348_v59 = vld [vmem:[#allocation2 + $0x10] sm:$0xff]  ;;  %v349_v63 = vld [vmem:[#allocation2 + $0x18] sm:$0xff]  ;;  %v918_v8 = vld [vmem:[%s1258_s3] ss:$0 sm:$0xff] (!%p916_p11) }
  0x35   : > { %986 = vmatpush3.bf16.msra.mxu1 %v1052_v17 }
  0x36   : > { %987 = vmatprep.subr.bf16.mxu1 %v1055_v20 }
  0x37   : > { %950 = vmatpush3.bf16.msra.mxu0 %v1054_v19 }
  0x38   : > { %951 = vmatprep.subr.bf16.mxu0 %v1056_v21 }
  0x39   : > { %988 = vmatpush3.bf16.msra.mxu1 %v1055_v20 }
  0x3a   : > { %989 = vmatprep.subr.bf16.mxu1 %v1058_v22 }
  0x3b   : > { %952 = vmatpush3.bf16.msra.mxu0 %v1057_v23 }
  0x3c   : > { %953 = vmatprep.subr.bf16.mxu0 %v1059_v24 }
  0x3d   : > { %990 = vmatpush3.bf16.msra.mxu1 %v1058_v22 }
  0x3e   : > { %991 = vmatprep.subr.bf16.mxu1 %v1061_v25 }
  0x3f   : > { %954 = vmatpush3.bf16.msra.mxu0 %v1060_v26 }
  0x40   : > { %955 = vmatprep.subr.bf16.mxu0 %v1062_v27 }
  0x41   : > { %992 = vmatpush3.bf16.msra.mxu1 %v1061_v25 }
  0x42   : > { %993 = vmatprep.subr.bf16.mxu1 %v1064_v29 }
  0x43   : > { %956 = vmatpush3.bf16.msra.mxu0 %v1063_v28 }
  0x44   : > { %957 = vmatprep.subr.bf16.mxu0 %v1065_v30 }
  0x45   : > { %994 = vmatpush3.bf16.msra.mxu1 %v1064_v29 }
  0x46   : > { %995 = vmatprep.subr.bf16.mxu1 %v1067_v31 }
  0x47   : > { %958 = vmatpush3.bf16.msra.mxu0 %v1066_v34 }
  0x49   : > { %996 = vmatpush3.bf16.msra.mxu1 %v1067_v31 }
  0x4a   : > { %615 = vmatmul.mubr.bf16.vlgmr.msra.gmra.mrb[0].mxu0 %v1068_v35 }
  0x4b   : > { %622 = vmatprep.mubr.bf16.mxu0 %v1073_v36 }
  0x4c   : > { %998 = vmatmul.mubr.bf16.vlgmr.msra.gmra.mrb[0].mxu1 %v1072_v37 }
  0x52   : > { %623 = vmatmul.mubr.bf16.gmra.mrb[4].mxu0 %v1075_v38 }
 0x11d   : > { %v959_v39 = vpop.f32.mrb[0].mxu0 }
 0x11e   : > { %v960_v40 = vpop.f32.mrb[1].mxu0 }
 0x11f   : > { %v961_v41 = vadd.f32 %v960_v40, %v959_v39  ;;  %v962_v42 = vpop.f32.mrb[2].mxu0  ;;  %v999_v43 = vpop.f32.mrb[0].mxu1 }
 0x120   : > { %v963_v44 = vpop.f32.mrb[3].mxu0  ;;  %v665_v46 = vpop.f32.mrb[1].mxu1 }
 0x121   : > { %v964_v47 = vadd.f32 %v963_v44, %v962_v42  ;;  %v666_v48 = vadd.f32 %v961_v41, %v665_v46  ;;  %v1000_v49 = vpop.f32.mrb[2].mxu1 }
 0x122   : > { %v668_v51 = vpop.f32.mrb[3].mxu1 }
 0x123   : > { %v680_v52 = vadd.f32 %v666_v48, %v346_v45  ;;  %v669_v53 = vadd.f32 %v964_v47, %v668_v51 }
 0x125   : > { %684 = vst [vmem:[#allocation2] sm:$0xff] %v680_v52  ;;  %v681_v54 = vadd.f32 %v669_v53, %v347_v50  ;;  %v965_v55 = vpop.f32.mrb[4].mxu0 }
 0x126   : > { %v966_v56 = vpop.f32.mrb[5].mxu0 }
 0x127   : > { %685 = vst [vmem:[#allocation2 + $0x8] sm:$0xff] %v681_v54  ;;  %v967_v57 = vadd.f32 %v966_v56, %v965_v55  ;;  %v968_v58 = vpop.f32.mrb[6].mxu0 }
 0x128   : > { %v969_v60 = vpop.f32.mrb[7].mxu0 }
 0x129   : > { %v674_v61 = vadd.f32 %v999_v43, %v967_v57  ;;  %v970_v62 = vadd.f32 %v969_v60, %v968_v58  ;;  %691 = sbr.rel (%p916_p11) target bundleno = 320 (0x140), region = 70 }
 0x12b   : > { %v682_v0 = vadd.f32 %v674_v61, %v348_v59  ;;  %v677_v1 = vadd.f32 %v1000_v49, %v970_v62 }
 0x12c   : > { %v692_v3 = vld [vmem:[#allocation2] sm:$0xff] (!%p916_p11) }
 0x12d   : > { %686 = vst [vmem:[#allocation2 + $0x10] sm:$0xff] %v682_v0  ;;  %v683_v2 = vadd.f32 %v677_v1, %v349_v63  ;;  %v703_v6 = vmul.f32 (!%p916_p11), %v917_v5, %v692_v3 }
 0x12e   : > { %v693_v4 = vld [vmem:[#allocation2 + $0x8] sm:$0xff] (!%p916_p11) }
 0x12f   : > { %687 = vst [vmem:[#allocation2 + $0x18] sm:$0xff] %v683_v2  ;;  %v704_v7 = vmul.f32 (!%p916_p11), %v917_v5, %v693_v4  ;;  %v714_v13 = vadd.f32 (!%p916_p11), %v918_v8, %v703_v6 }
 0x131   : > { %v715_v14 = vadd.f32 %v918_v8, %v704_v7  ;;  %v718_v17 = vmax.f32 %v714_v13, 0.0 }
 0x133   : > { %v719_v18 = vmax.f32 %v715_v14, 0.0 }
 0x134   : > { %v694_v9 = vld [vmem:[#allocation2 + $0x10] sm:$0xff] }
 0x135   : > { %v705_v11 = vmul.f32 %v917_v5, %v694_v9  ;;  %v935_v21 = vpack.c.bf16 %v719_v18, %v718_v17 }
 0x136   : > { %v695_v10 = vld [vmem:[#allocation2 + $0x18] sm:$0xff] }
 0x137   : > { %v706_v12 = vmul.f32 %v917_v5, %v695_v10  ;;  %v716_v15 = vadd.f32 %v918_v8, %v705_v11  ;;  %936 = vst [vmem:[%s1259_s4] sm:$0xff] %v935_v21  }
 0x139   : > { %v717_v16 = vadd.f32 %v918_v8, %v706_v12  ;;  %v720_v19 = vmax.f32 %v716_v15, 0.0 }
 0x13b   : > { %v721_v20 = vmax.f32 %v717_v16, 0.0 }
 0x13d   : > { %v940_v22 = vpack.c.bf16 %v721_v20, %v720_v19 }
 0x13f   : > { %942 = vst [vmem:[%s1259_s4 + $0x8] sm:$0xff] %v940_v22  }
 0x140 PF: > { %s14_s19 = sadd.s32 1, %s1114_s19   ;;  %s1260_s15 = smov %s1102_s16 }
 0x141   : > { %p11_p12 = scmp.ge.s32.totalorder %s14_s19, 5   ;;  %s1261_s16 = smov %s1177_s23 }
 0x142   : > { %s1262_s17 = smov %s1110_s18  ;;  %s1263_s18 = smov %s1265_s20 }
 0x143   :  { %13 = sbr.rel (!%p11_p12) target bundleno = 3 (0x3), region = 120 }

// kernel: resnet18_forward.33
= control target key start
LH: loop header
LB: loop body
LE: loop exit
PB: predicated region body
PF: predicated region fallthrough
CT: control target
= control target key end

     0   :  { %s1114_s15 = smov 0   ;;  %s1116_s16 = smov 0   ;;  %s1216_s0 = inlined_call_operand.vmem [shape: bf16[8,1152], index: 0, kind: input, shape index: {}]   ;;  %s1217_s1 = inlined_call_operand.vmem [shape: bf16[1152,256], index: 1, kind: input, shape index: {}]   ;;  %s1218_s2 = inlined_call_operand.vmem [shape: f32[1,256], index: 2, kind: input, shape index: {}]   ;;  %s1219_s3 = inlined_call_operand.vmem [shape: f32[1,256], index: 3, kind: input, shape index: {}]   ;;  %s1220_s4 = inlined_call_operand.vmem [shape: bf16[8,256], index: 4, kind: output, shape index: {}]  }
   0x1   :  { %s1118_s17 = smov 0  }
   0x2 LB: > { %s26_s18 = sadd.s32 1, %s1081_s16  ;;  %p898_p0 = scmp.ge.s32.totalorder %s1085_s17, 1  ;;  %s1085_s17 = sphi %s1118_s17, %s14_s17   ;;  %s1081_s16 = sphi %s1116_s16, %s1222_s16   ;;  %s1077_s15 = sphi %s1114_s15, %s1221_s15  }
   0x3   : > { %p27_p1 = scmp.ge.s32.totalorder %s26_s18, 3  ;;  %p229_p2 = scmp.lt.s32.totalorder %s1085_s17, 4 }
   0x5   : > { %s1224_s18 = smov (%p27_p1, %s26_s18), 0  ;;  %p230_p3 = pnand %p898_p0, %p229_p2 }
   0x6   : > { %s281_s19 = smul.u32 (!%p230_p3), 3, %s1077_s15  ;;  %p902_p6 = scmp.ne.s32.totalorder (!%p230_p3), %s1077_s15, 0 }
   0x7   : > { %233 = sbr.rel (%p230_p3) target bundleno = 323 (0x143), region = 36 }
   0x8   : > { %s291_s20 = smul.u32 (!%p230_p3), 48, %s1077_s15  ;;  %p284_p4 = scmp.lt.s32.totalorder (!%p230_p3), %s281_s19, 8 }
   0xa   : > { %p293_p5 = scmp.lt.s32.totalorder (!%p230_p3), %s291_s20, 143 }
   0xe   : > { %s1226_s19 = smov (!%p284_p4, %s281_s19), 8  ;;  %s1228_s20 = smov (!%p293_p5, %s291_s20), 143 }
   0xf   : > { %s899_s21 = sshll.u32 %s1226_s19, 2  ;;  %s960_s25 = sshll.u32 %s1228_s20, 3  ;;  %v1087_v0 = vmov (!%p902_p6), 0.0  }
  0x10   : > { %s1139_s24 = scalar_lea.vmem %s1216_s0, %s899_s21  ;;  %s1144_s28 = scalar_lea.vmem %s1217_s1, %s960_s25  ;;  %328 = vst [vmem:[#allocation2] sm:$0xff] (!%p902_p6), %v1087_v0  ;;  %329 = vst [vmem:[#allocation2 + $0x8] sm:$0xff] (!%p902_p6), %v1087_v0 }
  0x11   : > { %327 = sbr.rel (%p902_p6) target bundleno = 24 (0x18), region = 40 }
  0x18 PF: > { %v988_v1 = vld [vmem:[%s1144_s28 + $0x4] ss:$8 sps:$4 sm:$0xff]   ;;  %v990_v2 = vld [vmem:[%s1144_s28] ss:$8 sps:$4 sm:$0xff]   ;;  %v1088_v3 = vmov 0   ;;  %p954_p7 = scmp.ne.s32.totalorder %s1077_s15, 2 }
  0x19   : > { %706 = vmatprep.mubr.bf16.mxu1 %v1088_v3  ;;  %633 = vmatprep.subr.bf16.mxu0 %v988_v1  ;;  %v991_v4 = vld [vmem:[%s1144_s28 + $0x14] ss:$8 sps:$4 sm:$0xff]   ;;  %v993_v5 = vld [vmem:[%s1144_s28 + $0x10] ss:$8 sps:$4 sm:$0xff]   ;;  %v994_v6 = vld [vmem:[%s1144_s28 + $0x24] ss:$8 sps:$4 sm:$0xff]  }
  0x1a   : > { %634 = vmatpush1.bf16.msra.mxu0 %v990_v2  ;;  %v996_v7 = vld [vmem:[%s1144_s28 + $0x20] ss:$8 sps:$4 sm:$0xff]   ;;  %v997_v8 = vld [vmem:[%s1144_s28 + $0x34] ss:$8 sps:$4 sm:$0xff]   ;;  %v999_v9 = vld [vmem:[%s1144_s28 + $0x30] ss:$8 sps:$4 sm:$0xff]  }
  0x1b   : > { %635 = vmatprep.subr.bf16.mxu0 %v991_v4  ;;  %v1012_v10 = vld [vmem:[%s1144_s28 + $0x104] ss:$8 sps:$4 sm:$0xff]   ;;  %v1014_v11 = vld [vmem:[%s1144_s28 + $0x100] ss:$8 sps:$4 sm:$0xff]   ;;  %v1018_v13 = vld [vmem:[%s1144_s28 + $0x114] ss:$8 sps:$4 sm:$0xff]   ;;  %v727_v4 = vlaneseq (!%p954_p7) }
  0x1c   : > { %v1000_v12 = vld [vmem:[%s1144_s28 + $0x44] ss:$8 sps:$4 sm:$0xff]   ;;  %674 = vmatprep.subr.bf16.mxu1 %v1012_v10  ;;  %v1020_v14 = vld [vmem:[%s1144_s28 + $0x110] ss:$8 sps:$4 sm:$0xff]   ;;  %v1002_v15 = vld [vmem:[%s1144_s28 + $0x40] ss:$8 sps:$4 sm:$0xff]  }
  0x1d   : > { %675 = vmatpush1.bf16.msra.mxu1 %v1014_v11  ;;  %v1003_v16 = vld [vmem:[%s1144_s28 + $0x54] ss:$8 sps:$4 sm:$0xff]   ;;  %v1024_v17 = vld [vmem:[%s1144_s28 + $0x124] ss:$8 sps:$4 sm:$0xff]   ;;  %v1026_v18 = vld [vmem:[%s1144_s28 + $0x120] ss:$8 sps:$4 sm:$0xff]  }
  0x1e   : > { %636 = vmatpush1.bf16.msra.mxu0 %v993_v5  ;;  %676 = vmatprep.subr.bf16.mxu1 %v1018_v13  ;;  %v1005_v19 = vld [vmem:[%s1144_s28 + $0x50] ss:$8 sps:$4 sm:$0xff]   ;;  %v1030_v20 = vld [vmem:[%s1144_s28 + $0x134] ss:$8 sps:$4 sm:$0xff]   ;;  %v1006_v21 = vld [vmem:[%s1144_s28 + $0x64] ss:$8 sps:$4 sm:$0xff]  }
  0x1f   : > { %637 = vmatprep.subr.bf16.mxu0 %v994_v6  ;;  %v1032_v22 = vld [vmem:[%s1144_s28 + $0x130] ss:$8 sps:$4 sm:$0xff]   ;;  %v1008_v23 = vld [vmem:[%s1144_s28 + $0x60] ss:$8 sps:$4 sm:$0xff]   ;;  %v1036_v24 = vld [vmem:[%s1144_s28 + $0x144] ss:$8 sps:$4 sm:$0xff]  }
  0x20   : > { %v1009_v25 = vld [vmem:[%s1144_s28 + $0x74] ss:$8 sps:$4 sm:$0xff]   ;;  %v1038_v26 = vld [vmem:[%s1144_s28 + $0x140] ss:$8 sps:$4 sm:$0xff]   ;;  %v1011_v27 = vld [vmem:[%s1144_s28 + $0x70] ss:$8 sps:$4 sm:$0xff]  }
  0x21   : > { %677 = vmatpush1.bf16.msra.mxu1 %v1020_v14  ;;  %v1042_v28 = vld [vmem:[%s1144_s28 + $0x154] ss:$8 sps:$4 sm:$0xff]   ;;  %v1015_v29 = vld [vmem:[%s1144_s28 + $0x84] ss:$8 sps:$4 sm:$0xff]   ;;  %v1044_v30 = vld [vmem:[%s1144_s28 + $0x150] ss:$8 sps:$4 sm:$0xff]  }
  0x22   : > { %638 = vmatpush1.bf16.msra.mxu0 %v996_v7  ;;  %678 = vmatprep.subr.bf16.mxu1 %v1024_v17  ;;  %v1017_v31 = vld [vmem:[%s1144_s28 + $0x80] ss:$8 sps:$4 sm:$0xff]   ;;  %v1048_v32 = vld [vmem:[%s1144_s28 + $0x164] ss:$8 sps:$4 sm:$0xff]   ;;  %v1021_v33 = vld [vmem:[%s1144_s28 + $0x94] ss:$8 sps:$4 sm:$0xff]  }
  0x23   : > { %639 = vmatprep.subr.bf16.mxu0 %v997_v8  ;;  %v332_v34 = vld [vmem:[%s1139_s24] sm:$0xff]  ;;  %v1023_v37 = vld [vmem:[%s1144_s28 + $0x90] ss:$8 sps:$4 sm:$0xff]   ;;  %v1054_v38 = vld [vmem:[%s1144_s28 + $0x174] ss:$8 sps:$4 sm:$0xff]   ;;  %v728_v5 = vshrl.u32 (!%p954_p7), %v727_v4, 7 }
  0x24   : > { %v904_v35 = vcombine.high %v332_v34, %v332_v34  ;;  %v1050_v36 = vld [vmem:[%s1144_s28 + $0x160] ss:$8 sps:$4 sm:$0xff]   ;;  %v1027_v39 = vld [vmem:[%s1144_s28 + $0xa4] ss:$8 sps:$4 sm:$0xff]   ;;  %v1056_v40 = vld [vmem:[%s1144_s28 + $0x170] ss:$8 sps:$4 sm:$0xff]   ;;  %v903_v53 = vcombine.low %v332_v34, %v332_v34 }
  0x25   : > { %679 = vmatpush1.bf16.msra.mxu1 %v1026_v18  ;;  %v1029_v41 = vld [vmem:[%s1144_s28 + $0xa0] ss:$8 sps:$4 sm:$0xff]   ;;  %v1033_v42 = vld [vmem:[%s1144_s28 + $0xb4] ss:$8 sps:$4 sm:$0xff]   ;;  %v1035_v44 = vld [vmem:[%s1144_s28 + $0xb0] ss:$8 sps:$4 sm:$0xff]  }
  0x26   : > { %640 = vmatpush1.bf16.msra.mxu0 %v999_v9  ;;  %680 = vmatprep.subr.bf16.mxu1 %v1030_v20  ;;  %v1060_v43 = vld [vmem:[%s1139_s24 + $0x8] ss:$0 sps:$4 sm:$0xff]   ;;  %v1039_v45 = vld [vmem:[%s1144_s28 + $0xc4] ss:$8 sps:$4 sm:$0xff]   ;;  %v1045_v47 = vld [vmem:[%s1144_s28 + $0xd4] ss:$8 sps:$4 sm:$0xff]  }
  0x27   : > { %641 = vmatprep.subr.bf16.mxu0 %v1000_v12  ;;  %665 = vmatprep.mubr.bf16.mxu0 %v904_v35  ;;  %v1041_v46 = vld [vmem:[%s1144_s28 + $0xc0] ss:$8 sps:$4 sm:$0xff]   ;;  %v1047_v48 = vld [vmem:[%s1144_s28 + $0xd0] ss:$8 sps:$4 sm:$0xff]   ;;  %v1051_v49 = vld [vmem:[%s1144_s28 + $0xe4] ss:$8 sps:$4 sm:$0xff]  }
  0x28   : > { %v1053_v50 = vld [vmem:[%s1144_s28 + $0xe0] ss:$8 sps:$4 sm:$0xff]   ;;  %v1057_v51 = vld [vmem:[%s1144_s28 + $0xf4] ss:$8 sps:$4 sm:$0xff]   ;;  %v1059_v52 = vld [vmem:[%s1144_s28 + $0xf0] ss:$8 sps:$4 sm:$0xff]  }
  0x29   : > { %681 = vmatpush1.bf16.msra.mxu1 %v1032_v22  ;;  %v330_v58 = vld [vmem:[#allocation2] sm:$0xff]  ;;  %v331_v61 = vld [vmem:[#allocation2 + $0x8] sm:$0xff]  ;;  %v729_v8 = vsub.s32 (!%p954_p7), 0, %v728_v5  ;;  %v733_v9 = vsub.s32 (!%p954_p7), 1, %v728_v5 }
  0x2a   : > { %642 = vmatpush1.bf16.msra.mxu0 %v1002_v15  ;;  %682 = vmatprep.subr.bf16.mxu1 %v1036_v24  ;;  %v725_v6 = vld [vmem:[%s1218_s2] sm:$0x3] (!%p954_p7) }
  0x2b   : > { %643 = vmatprep.subr.bf16.mxu0 %v1003_v16  ;;  %v739_v7 = vld [vmem:[%s1219_s3] sm:$0x3] (!%p954_p7)  ;;  %v730_v12 = vrot.slane (!%p954_p7), %v725_v6, %v729_v8  ;;  %v734_v13 = vrot.slane (!%p954_p7), %v725_v6, %v733_v9 }
  0x2c   : > { %v744_v14 = vrot.slane (!%p954_p7), %v739_v7, %v729_v8  ;;  %v748_v15 = vrot.slane (!%p954_p7), %v739_v7, %v733_v9 }
  0x2d   : > { %683 = vmatpush1.bf16.msra.mxu1 %v1038_v26 }
  0x2e   : > { %644 = vmatpush1.bf16.msra.mxu0 %v1005_v19  ;;  %684 = vmatprep.subr.bf16.mxu1 %v1042_v28 }
  0x2f   : > { %645 = vmatprep.subr.bf16.mxu0 %v1006_v21 }
  0x31   : > { %685 = vmatpush1.bf16.msra.mxu1 %v1044_v30 }
  0x32   : > { %646 = vmatpush1.bf16.msra.mxu0 %v1008_v23  ;;  %686 = vmatprep.subr.bf16.mxu1 %v1048_v32 }
  0x33   : > { %647 = vmatprep.subr.bf16.mxu0 %v1009_v25 }
  0x35   : > { %687 = vmatpush1.bf16.msra.mxu1 %v1050_v36 }
  0x36   : > { %648 = vmatpush1.bf16.msra.mxu0 %v1011_v27  ;;  %688 = vmatprep.subr.bf16.mxu1 %v1054_v38 }
  0x37   : > { %649 = vmatprep.subr.bf16.mxu0 %v1015_v29 }
  0x39   : > { %689 = vmatpush1.bf16.msra.mxu1 %v1056_v40 }
  0x3a   : > { %650 = vmatpush1.bf16.msra.mxu0 %v1017_v31 }
  0x3b   : > { %651 = vmatprep.subr.bf16.mxu0 %v1021_v33 }
  0x3c   : > { %707 = vmatmul.mubr.bf16.vlgmr.msra.gmra.mrb[0].mxu1 %v1060_v43 }
  0x3e   : > { %652 = vmatpush1.bf16.msra.mxu0 %v1023_v37 }
  0x3f   : > { %653 = vmatprep.subr.bf16.mxu0 %v1027_v39 }
  0x42   : > { %654 = vmatpush1.bf16.msra.mxu0 %v1029_v41 }
  0x43   : > { %655 = vmatprep.subr.bf16.mxu0 %v1033_v42 }
  0x46   : > { %656 = vmatpush1.bf16.msra.mxu0 %v1035_v44 }
  0x47   : > { %657 = vmatprep.subr.bf16.mxu0 %v1039_v45 }
  0x4a   : > { %658 = vmatpush1.bf16.msra.mxu0 %v1041_v46 }
  0x4b   : > { %659 = vmatprep.subr.bf16.mxu0 %v1045_v47 }
  0x4e   : > { %660 = vmatpush1.bf16.msra.mxu0 %v1047_v48 }
  0x4f   : > { %661 = vmatprep.subr.bf16.mxu0 %v1051_v49 }
  0x52   : > { %662 = vmatpush1.bf16.msra.mxu0 %v1053_v50 }
  0x53   : > { %663 = vmatprep.subr.bf16.mxu0 %v1057_v51 }
  0x56   : > { %664 = vmatpush1.bf16.msra.mxu0 %v1059_v52 }
  0x59   : > { %666 = vmatmul.mubr.bf16.vlgmr.msra.gmra.mrb[0].mxu0 %v903_v53 }
 0x10f   : > { %v708_v54 = vpop.f32.mrb[0].mxu1 }
 0x110   : > { %v710_v55 = vpop.f32.mrb[1].mxu1 }
 0x111   : > { %v712_v56 = vpop.f32.mrb[2].mxu1 }
 0x112   : > { %v713_v57 = vpop.f32.mrb[3].mxu1 }
 0x12c   : > { %v667_v59 = vpop.f32.mrb[0].mxu0  ;;  %722 = sbr.rel (%p954_p7) target bundleno = 323 (0x143), region = 44 }
 0x12d   : > { %v709_v60 = vadd.f32 %v708_v54, %v667_v59  ;;  %v669_v62 = vpop.f32.mrb[1].mxu0 }
 0x12e   : > { %v711_v63 = vadd.f32 %v710_v55, %v669_v62  ;;  %v671_v0 = vpop.f32.mrb[2].mxu0 }
 0x12f   : > { %v715_v1 = vadd.f32 %v709_v60, %v330_v58  ;;  %v672_v2 = vpop.f32.mrb[3].mxu0 }
 0x130   : > { %v716_v3 = vadd.f32 %v711_v63, %v331_v61 }
 0x131   : > { %717 = vst [vmem:[#allocation2] sm:$0xff] %v715_v1 }
 0x132   : > { %718 = vst [vmem:[#allocation2 + $0x8] sm:$0xff] %v716_v3 }
 0x138   : > { %v723_v10 = vld [vmem:[#allocation2] sm:$0xff] }
 0x139   : > { %v724_v11 = vld [vmem:[#allocation2 + $0x8] sm:$0xff]  ;;  %v737_v16 = vmul.f32 %v730_v12, %v723_v10 }
 0x13a   : > { %v738_v17 = vmul.f32 %v734_v13, %v724_v11 }
 0x13b   : > { %v751_v18 = vadd.f32 %v744_v14, %v737_v16 }
 0x13c   : > { %v752_v19 = vadd.f32 %v748_v15, %v738_v17 }
 0x13d   : > { %v753_v20 = vmax.f32 %v751_v18, 0.0 }
 0x13e   : > { %v754_v21 = vmax.f32 %v752_v19, 0.0 }
 0x140   : > { %v961_v22 = vpack.c.bf16 %v754_v21, %v753_v20 }
 0x142   : > { %763 = vst [vmem:[%s1220_s4] sm:$0xff] %v961_v22 }
 0x143 PF: > { %s14_s17 = sadd.s32 1, %s1085_s17   ;;  %s1221_s15 = smov %s1081_s16 }
 0x144   : > { %p11_p8 = scmp.ge.s32.totalorder %s14_s17, 5   ;;  %s1222_s16 = smov %s1224_s18 }
 0x146   :  { %13 = sbr.rel (!%p11_p8) target bundleno = 2 (0x2), region = 83 }

// kernel: resnet18_forward.34
= control target key start
LH: loop header
LB: loop body
LE: loop exit
PB: predicated region body
PF: predicated region fallthrough
CT: control target
= control target key end

     0   :  { %v257_v1 = vmov 0   ;;  %v175_v18 = vlaneseq  ;;  %s343_s1 = inlined_call_operand.vmem [shape: bf16[128,256], index: 1, kind: input, shape index: {}]   ;;  %s344_s0 = inlined_call_operand.vmem [shape: bf16[8,128], index: 0, kind: input, shape index: {}]   ;;  %s345_s2 = inlined_call_operand.vmem [shape: f32[1,256], index: 2, kind: input, shape index: {}]   ;;  %s346_s3 = inlined_call_operand.vmem [shape: f32[1,256], index: 3, kind: input, shape index: {}]   ;;  %s347_s4 = inlined_call_operand.vmem [shape: bf16[8,256], index: 4, kind: output, shape index: {}]  }
   0x1   :  { %v233_v0 = vld [vmem:[%s343_s1 + $0x4] ss:$8 sps:$4 sm:$0xff]   ;;  %155 = vmatprep.mubr.bf16.mxu0 %v257_v1  ;;  %v235_v2 = vld [vmem:[%s343_s1] ss:$8 sps:$4 sm:$0xff]   ;;  %v236_v3 = vld [vmem:[%s343_s1 + $0x14] ss:$8 sps:$4 sm:$0xff]  }
   0x2   :  { %123 = vmatprep.subr.bf16.mxu0 %v233_v0  ;;  %v238_v4 = vld [vmem:[%s343_s1 + $0x10] ss:$8 sps:$4 sm:$0xff]   ;;  %v239_v5 = vld [vmem:[%s343_s1 + $0x24] ss:$8 sps:$4 sm:$0xff]   ;;  %v241_v6 = vld [vmem:[%s343_s1 + $0x20] ss:$8 sps:$4 sm:$0xff]  }
   0x3   :  { %124 = vmatpush1.bf16.msra.mxu0 %v235_v2  ;;  %v242_v7 = vld [vmem:[%s343_s1 + $0x34] ss:$8 sps:$4 sm:$0xff]   ;;  %v244_v8 = vld [vmem:[%s343_s1 + $0x30] ss:$8 sps:$4 sm:$0xff]   ;;  %v245_v9 = vld [vmem:[%s343_s1 + $0x44] ss:$8 sps:$4 sm:$0xff]  }
   0x4   :  { %125 = vmatprep.subr.bf16.mxu0 %v236_v3  ;;  %v247_v10 = vld [vmem:[%s343_s1 + $0x40] ss:$8 sps:$4 sm:$0xff]   ;;  %v248_v11 = vld [vmem:[%s343_s1 + $0x54] ss:$8 sps:$4 sm:$0xff]   ;;  %v250_v12 = vld [vmem:[%s343_s1 + $0x50] ss:$8 sps:$4 sm:$0xff]  }
   0x5   :  { %v251_v13 = vld [vmem:[%s343_s1 + $0x64] ss:$8 sps:$4 sm:$0xff]   ;;  %v253_v14 = vld [vmem:[%s343_s1 + $0x60] ss:$8 sps:$4 sm:$0xff]   ;;  %v254_v15 = vld [vmem:[%s343_s1 + $0x74] ss:$8 sps:$4 sm:$0xff]  }
   0x6   :  { %v256_v16 = vld [vmem:[%s343_s1 + $0x70] ss:$8 sps:$4 sm:$0xff]   ;;  %v26_v17 = vld [vmem:[%s344_s0] sm:$0xf]  ;;  %v176_v19 = vshrl.u32 %v175_v18, 7 }
   0x7   :  { %126 = vmatpush1.bf16.msra.mxu0 %v238_v4  ;;  %v173_v21 = vld [vmem:[%s345_s2] sm:$0x3] }
   0x8   :  { %127 = vmatprep.subr.bf16.mxu0 %v239_v5  ;;  %v177_v20 = vsub.s32 0, %v176_v19  ;;  %v181_v22 = vsub.s32 1, %v176_v19  ;;  %v187_v23 = vld [vmem:[%s346_s3] sm:$0x3] }
   0xa   :  { %v178_v24 = vrot.slane %v173_v21, %v177_v20  ;;  %v182_v25 = vrot.slane %v173_v21, %v181_v22  ;;  %v192_v26 = vrot.slane %v187_v23, %v177_v20  ;;  %v196_v28 = vrot.slane %v187_v23, %v181_v22 }
   0xb   :  { %128 = vmatpush1.bf16.msra.mxu0 %v241_v6 }
   0xc   :  { %129 = vmatprep.subr.bf16.mxu0 %v242_v7 }
   0xf   :  { %130 = vmatpush1.bf16.msra.mxu0 %v244_v8 }
  0x10   :  { %131 = vmatprep.subr.bf16.mxu0 %v245_v9 }
  0x13   :  { %132 = vmatpush1.bf16.msra.mxu0 %v247_v10 }
  0x14   :  { %133 = vmatprep.subr.bf16.mxu0 %v248_v11 }
  0x17   :  { %134 = vmatpush1.bf16.msra.mxu0 %v250_v12 }
  0x18   :  { %135 = vmatprep.subr.bf16.mxu0 %v251_v13 }
  0x1b   :  { %136 = vmatpush1.bf16.msra.mxu0 %v253_v14 }
  0x1c   :  { %137 = vmatprep.subr.bf16.mxu0 %v254_v15 }
  0x1f   :  { %138 = vmatpush1.bf16.msra.mxu0 %v256_v16 }
  0x22   :  { %156 = vmatmul.mubr.bf16.vlgmr.msra.gmra.mrb[0].mxu0 %v26_v17 }
  0xf5   :  { %v157_v27 = vpop.f32.mrb[0].mxu0 }
  0xf6   :  { %v185_v29 = vmul.f32 %v178_v24, %v157_v27  ;;  %v159_v30 = vpop.f32.mrb[1].mxu0 }
  0xf7   :  { %v186_v31 = vmul.f32 %v182_v25, %v159_v30  ;;  %v161_v32 = vpop.f32.mrb[2].mxu0 }
  0xf8   :  { %v199_v33 = vadd.f32 %v192_v26, %v185_v29  ;;  %v162_v34 = vpop.f32.mrb[3].mxu0 }
  0xf9   :  { %v200_v35 = vadd.f32 %v196_v28, %v186_v31 }
  0xfb   :  { %v231_v36 = vpack.c.bf16 %v200_v35, %v199_v33 }
  0xfd   :  { %209 = vst [vmem:[%s347_s4] sm:$0xff] %v231_v36 }

// kernel: resnet18_forward.35
= control target key start
LH: loop header
LB: loop body
LE: loop exit
PB: predicated region body
PF: predicated region fallthrough
CT: control target
= control target key end

     0   :  { %s1209_s18 = smov 0   ;;  %s1211_s19 = smov 0   ;;  %s1314_s0 = inlined_call_operand.vmem [shape: bf16[8,2304], index: 0, kind: input, shape index: {}]   ;;  %s1315_s1 = inlined_call_operand.vmem [shape: bf16[2304,256], index: 1, kind: input, shape index: {}]   ;;  %s1316_s2 = inlined_call_operand.vmem [shape: f32[1,256], index: 2, kind: input, shape index: {}]   ;;  %s1317_s3 = inlined_call_operand.vmem [shape: f32[1,256], index: 3, kind: input, shape index: {}]   ;;  %s1318_s4 = inlined_call_operand.vmem [shape: bf16[8,256], index: 4, kind: input, shape index: {}]   ;;  %s1319_s5 = inlined_call_operand.vmem [shape: bf16[8,256], index: 5, kind: output, shape index: {}]  }
   0x1   :  { %s1213_s20 = smov 0  }
   0x2 LB: > { %s27_s21 = sadd.s32 1, %s1171_s19  ;;  %p988_p0 = scmp.ge.s32.totalorder %s1175_s20, 1  ;;  %s1175_s20 = sphi %s1213_s20, %s15_s20   ;;  %s1171_s19 = sphi %s1211_s19, %s1321_s19   ;;  %s1167_s18 = sphi %s1209_s18, %s1320_s18  }
   0x3   : > { %p28_p1 = scmp.ge.s32.totalorder %s27_s21, 6  ;;  %p271_p2 = scmp.lt.s32.totalorder %s1175_s20, 7 }
   0x5   : > { %s1323_s21 = smov (%p28_p1, %s27_s21), 0  ;;  %p272_p3 = pnand %p988_p0, %p271_p2 }
   0x6   : > { %s334_s22 = smul.u32 (!%p272_p3), 3, %s1167_s18  ;;  %p992_p6 = scmp.ne.s32.totalorder (!%p272_p3), %s1167_s18, 0 }
   0x7   : > { %275 = sbr.rel (%p272_p3) target bundleno = 325 (0x145), region = 40 }
   0x8   : > { %s344_s23 = smul.u32 (!%p272_p3), 48, %s1167_s18  ;;  %p337_p4 = scmp.lt.s32.totalorder (!%p272_p3), %s334_s22, 17 }
   0xa   : > { %p346_p5 = scmp.lt.s32.totalorder (!%p272_p3), %s344_s23, 287 }
   0xe   : > { %s1325_s22 = smov (!%p337_p4, %s334_s22), 17  ;;  %s1327_s23 = smov (!%p346_p5, %s344_s23), 287 }
   0xf   : > { %s989_s24 = sshll.u32 %s1325_s22, 2  ;;  %s1050_s28 = sshll.u32 %s1327_s23, 3  ;;  %v1177_v0 = vmov (!%p992_p6), 0.0  }
  0x10   : > { %s1234_s27 = scalar_lea.vmem %s1314_s0, %s989_s24  ;;  %s1239_s6 = scalar_lea.vmem %s1315_s1, %s1050_s28  ;;  %391 = vst [vmem:[#allocation2] sm:$0xff] (!%p992_p6), %v1177_v0  ;;  %392 = vst [vmem:[#allocation2 + $0x8] sm:$0xff] (!%p992_p6), %v1177_v0 }
  0x11   : > { %390 = sbr.rel (%p992_p6) target bundleno = 24 (0x18), region = 44 }
  0x18 PF: > { %v1078_v1 = vld [vmem:[%s1239_s6 + $0x4] ss:$8 sps:$4 sm:$0xff]   ;;  %v1080_v2 = vld [vmem:[%s1239_s6] ss:$8 sps:$4 sm:$0xff]   ;;  %v1178_v3 = vmov 0   ;;  %p1044_p7 = scmp.ne.s32.totalorder %s1167_s18, 5 }
  0x19   : > { %769 = vmatprep.mubr.bf16.mxu1 %v1178_v3  ;;  %696 = vmatprep.subr.bf16.mxu0 %v1078_v1  ;;  %v1081_v4 = vld [vmem:[%s1239_s6 + $0x14] ss:$8 sps:$4 sm:$0xff]   ;;  %v1083_v5 = vld [vmem:[%s1239_s6 + $0x10] ss:$8 sps:$4 sm:$0xff]   ;;  %v1084_v6 = vld [vmem:[%s1239_s6 + $0x24] ss:$8 sps:$4 sm:$0xff]  }
  0x1a   : > { %697 = vmatpush1.bf16.msra.mxu0 %v1080_v2  ;;  %v1086_v7 = vld [vmem:[%s1239_s6 + $0x20] ss:$8 sps:$4 sm:$0xff]   ;;  %v1087_v8 = vld [vmem:[%s1239_s6 + $0x34] ss:$8 sps:$4 sm:$0xff]   ;;  %v1089_v9 = vld [vmem:[%s1239_s6 + $0x30] ss:$8 sps:$4 sm:$0xff]  }
  0x1b   : > { %698 = vmatprep.subr.bf16.mxu0 %v1081_v4  ;;  %v1102_v10 = vld [vmem:[%s1239_s6 + $0x104] ss:$8 sps:$4 sm:$0xff]   ;;  %v1104_v11 = vld [vmem:[%s1239_s6 + $0x100] ss:$8 sps:$4 sm:$0xff]   ;;  %v1108_v13 = vld [vmem:[%s1239_s6 + $0x114] ss:$8 sps:$4 sm:$0xff]   ;;  %v790_v4 = vlaneseq (!%p1044_p7) }
  0x1c   : > { %v1090_v12 = vld [vmem:[%s1239_s6 + $0x44] ss:$8 sps:$4 sm:$0xff]   ;;  %737 = vmatprep.subr.bf16.mxu1 %v1102_v10  ;;  %v1110_v14 = vld [vmem:[%s1239_s6 + $0x110] ss:$8 sps:$4 sm:$0xff]   ;;  %v1092_v15 = vld [vmem:[%s1239_s6 + $0x40] ss:$8 sps:$4 sm:$0xff]  }
  0x1d   : > { %738 = vmatpush1.bf16.msra.mxu1 %v1104_v11  ;;  %v1093_v16 = vld [vmem:[%s1239_s6 + $0x54] ss:$8 sps:$4 sm:$0xff]   ;;  %v1114_v17 = vld [vmem:[%s1239_s6 + $0x124] ss:$8 sps:$4 sm:$0xff]   ;;  %v1116_v18 = vld [vmem:[%s1239_s6 + $0x120] ss:$8 sps:$4 sm:$0xff]  }
  0x1e   : > { %699 = vmatpush1.bf16.msra.mxu0 %v1083_v5  ;;  %739 = vmatprep.subr.bf16.mxu1 %v1108_v13  ;;  %v1095_v19 = vld [vmem:[%s1239_s6 + $0x50] ss:$8 sps:$4 sm:$0xff]   ;;  %v1120_v20 = vld [vmem:[%s1239_s6 + $0x134] ss:$8 sps:$4 sm:$0xff]   ;;  %v1096_v21 = vld [vmem:[%s1239_s6 + $0x64] ss:$8 sps:$4 sm:$0xff]  }
  0x1f   : > { %700 = vmatprep.subr.bf16.mxu0 %v1084_v6  ;;  %v1122_v22 = vld [vmem:[%s1239_s6 + $0x130] ss:$8 sps:$4 sm:$0xff]   ;;  %v1098_v23 = vld [vmem:[%s1239_s6 + $0x60] ss:$8 sps:$4 sm:$0xff]   ;;  %v1126_v24 = vld [vmem:[%s1239_s6 + $0x144] ss:$8 sps:$4 sm:$0xff]  }
  0x20   : > { %v1099_v25 = vld [vmem:[%s1239_s6 + $0x74] ss:$8 sps:$4 sm:$0xff]   ;;  %v1128_v26 = vld [vmem:[%s1239_s6 + $0x140] ss:$8 sps:$4 sm:$0xff]   ;;  %v1101_v27 = vld [vmem:[%s1239_s6 + $0x70] ss:$8 sps:$4 sm:$0xff]  }
  0x21   : > { %740 = vmatpush1.bf16.msra.mxu1 %v1110_v14  ;;  %v1132_v28 = vld [vmem:[%s1239_s6 + $0x154] ss:$8 sps:$4 sm:$0xff]   ;;  %v1105_v29 = vld [vmem:[%s1239_s6 + $0x84] ss:$8 sps:$4 sm:$0xff]   ;;  %v1134_v30 = vld [vmem:[%s1239_s6 + $0x150] ss:$8 sps:$4 sm:$0xff]  }
  0x22   : > { %701 = vmatpush1.bf16.msra.mxu0 %v1086_v7  ;;  %741 = vmatprep.subr.bf16.mxu1 %v1114_v17  ;;  %v1107_v31 = vld [vmem:[%s1239_s6 + $0x80] ss:$8 sps:$4 sm:$0xff]   ;;  %v1138_v32 = vld [vmem:[%s1239_s6 + $0x164] ss:$8 sps:$4 sm:$0xff]   ;;  %v1111_v33 = vld [vmem:[%s1239_s6 + $0x94] ss:$8 sps:$4 sm:$0xff]  }
  0x23   : > { %702 = vmatprep.subr.bf16.mxu0 %v1087_v8  ;;  %v395_v34 = vld [vmem:[%s1234_s27] sm:$0xff]  ;;  %v1113_v37 = vld [vmem:[%s1239_s6 + $0x90] ss:$8 sps:$4 sm:$0xff]   ;;  %v1144_v38 = vld [vmem:[%s1239_s6 + $0x174] ss:$8 sps:$4 sm:$0xff]   ;;  %v791_v5 = vshrl.u32 (!%p1044_p7), %v790_v4, 7 }
  0x24   : > { %v994_v35 = vcombine.high %v395_v34, %v395_v34  ;;  %v1140_v36 = vld [vmem:[%s1239_s6 + $0x160] ss:$8 sps:$4 sm:$0xff]   ;;  %v1117_v39 = vld [vmem:[%s1239_s6 + $0xa4] ss:$8 sps:$4 sm:$0xff]   ;;  %v1146_v40 = vld [vmem:[%s1239_s6 + $0x170] ss:$8 sps:$4 sm:$0xff]   ;;  %v993_v53 = vcombine.low %v395_v34, %v395_v34 }
  0x25   : > { %742 = vmatpush1.bf16.msra.mxu1 %v1116_v18  ;;  %v1119_v41 = vld [vmem:[%s1239_s6 + $0xa0] ss:$8 sps:$4 sm:$0xff]   ;;  %v1123_v42 = vld [vmem:[%s1239_s6 + $0xb4] ss:$8 sps:$4 sm:$0xff]   ;;  %v1125_v44 = vld [vmem:[%s1239_s6 + $0xb0] ss:$8 sps:$4 sm:$0xff]  }
  0x26   : > { %703 = vmatpush1.bf16.msra.mxu0 %v1089_v9  ;;  %743 = vmatprep.subr.bf16.mxu1 %v1120_v20  ;;  %v1150_v43 = vld [vmem:[%s1234_s27 + $0x8] ss:$0 sps:$4 sm:$0xff]   ;;  %v1129_v45 = vld [vmem:[%s1239_s6 + $0xc4] ss:$8 sps:$4 sm:$0xff]   ;;  %v1135_v47 = vld [vmem:[%s1239_s6 + $0xd4] ss:$8 sps:$4 sm:$0xff]  }
  0x27   : > { %704 = vmatprep.subr.bf16.mxu0 %v1090_v12  ;;  %728 = vmatprep.mubr.bf16.mxu0 %v994_v35  ;;  %v1131_v46 = vld [vmem:[%s1239_s6 + $0xc0] ss:$8 sps:$4 sm:$0xff]   ;;  %v1137_v48 = vld [vmem:[%s1239_s6 + $0xd0] ss:$8 sps:$4 sm:$0xff]   ;;  %v1141_v49 = vld [vmem:[%s1239_s6 + $0xe4] ss:$8 sps:$4 sm:$0xff]  }
  0x28   : > { %v1143_v50 = vld [vmem:[%s1239_s6 + $0xe0] ss:$8 sps:$4 sm:$0xff]   ;;  %v1147_v51 = vld [vmem:[%s1239_s6 + $0xf4] ss:$8 sps:$4 sm:$0xff]   ;;  %v1149_v52 = vld [vmem:[%s1239_s6 + $0xf0] ss:$8 sps:$4 sm:$0xff]  }
  0x29   : > { %744 = vmatpush1.bf16.msra.mxu1 %v1122_v22  ;;  %v393_v58 = vld [vmem:[#allocation2] sm:$0xff]  ;;  %v394_v61 = vld [vmem:[#allocation2 + $0x8] sm:$0xff]  ;;  %v792_v8 = vsub.s32 (!%p1044_p7), 0, %v791_v5  ;;  %v796_v9 = vsub.s32 (!%p1044_p7), 1, %v791_v5 }
  0x2a   : > { %705 = vmatpush1.bf16.msra.mxu0 %v1092_v15  ;;  %745 = vmatprep.subr.bf16.mxu1 %v1126_v24  ;;  %v788_v6 = vld [vmem:[%s1316_s2] sm:$0x3] (!%p1044_p7) }
  0x2b   : > { %706 = vmatprep.subr.bf16.mxu0 %v1093_v16  ;;  %v802_v7 = vld [vmem:[%s1317_s3] sm:$0x3] (!%p1044_p7)  ;;  %v793_v13 = vrot.slane (!%p1044_p7), %v788_v6, %v792_v8  ;;  %v797_v14 = vrot.slane (!%p1044_p7), %v788_v6, %v796_v9 }
  0x2c   : > { %v816_v12 = vld [vmem:[%s1318_s4] sm:$0xff] (!%p1044_p7)  ;;  %v807_v15 = vrot.slane (!%p1044_p7), %v802_v7, %v792_v8  ;;  %v811_v16 = vrot.slane (!%p1044_p7), %v802_v7, %v796_v9 }
  0x2d   : > { %746 = vmatpush1.bf16.msra.mxu1 %v1128_v26  ;;  %v818_v20 = vunpack.c.h.bf16 (!%p1044_p7), %v816_v12 }
  0x2e   : > { %707 = vmatpush1.bf16.msra.mxu0 %v1095_v19  ;;  %747 = vmatprep.subr.bf16.mxu1 %v1132_v28  ;;  %v817_v19 = vunpack.c.l.bf16 (!%p1044_p7), %v816_v12 }
  0x2f   : > { %708 = vmatprep.subr.bf16.mxu0 %v1096_v21 }
  0x31   : > { %748 = vmatpush1.bf16.msra.mxu1 %v1134_v30 }
  0x32   : > { %709 = vmatpush1.bf16.msra.mxu0 %v1098_v23  ;;  %749 = vmatprep.subr.bf16.mxu1 %v1138_v32 }
  0x33   : > { %710 = vmatprep.subr.bf16.mxu0 %v1099_v25 }
  0x35   : > { %750 = vmatpush1.bf16.msra.mxu1 %v1140_v36 }
  0x36   : > { %711 = vmatpush1.bf16.msra.mxu0 %v1101_v27  ;;  %751 = vmatprep.subr.bf16.mxu1 %v1144_v38 }
  0x37   : > { %712 = vmatprep.subr.bf16.mxu0 %v1105_v29 }
  0x39   : > { %752 = vmatpush1.bf16.msra.mxu1 %v1146_v40 }
  0x3a   : > { %713 = vmatpush1.bf16.msra.mxu0 %v1107_v31 }
  0x3b   : > { %714 = vmatprep.subr.bf16.mxu0 %v1111_v33 }
  0x3c   : > { %770 = vmatmul.mubr.bf16.vlgmr.msra.gmra.mrb[0].mxu1 %v1150_v43 }
  0x3e   : > { %715 = vmatpush1.bf16.msra.mxu0 %v1113_v37 }
  0x3f   : > { %716 = vmatprep.subr.bf16.mxu0 %v1117_v39 }
  0x42   : > { %717 = vmatpush1.bf16.msra.mxu0 %v1119_v41 }
  0x43   : > { %718 = vmatprep.subr.bf16.mxu0 %v1123_v42 }
  0x46   : > { %719 = vmatpush1.bf16.msra.mxu0 %v1125_v44 }
  0x47   : > { %720 = vmatprep.subr.bf16.mxu0 %v1129_v45 }
  0x4a   : > { %721 = vmatpush1.bf16.msra.mxu0 %v1131_v46 }
  0x4b   : > { %722 = vmatprep.subr.bf16.mxu0 %v1135_v47 }
  0x4e   : > { %723 = vmatpush1.bf16.msra.mxu0 %v1137_v48 }
  0x4f   : > { %724 = vmatprep.subr.bf16.mxu0 %v1141_v49 }
  0x52   : > { %725 = vmatpush1.bf16.msra.mxu0 %v1143_v50 }
  0x53   : > { %726 = vmatprep.subr.bf16.mxu0 %v1147_v51 }
  0x56   : > { %727 = vmatpush1.bf16.msra.mxu0 %v1149_v52 }
  0x59   : > { %729 = vmatmul.mubr.bf16.vlgmr.msra.gmra.mrb[0].mxu0 %v993_v53 }
 0x10f   : > { %v771_v54 = vpop.f32.mrb[0].mxu1 }
 0x110   : > { %v773_v55 = vpop.f32.mrb[1].mxu1 }
 0x111   : > { %v775_v56 = vpop.f32.mrb[2].mxu1 }
 0x112   : > { %v776_v57 = vpop.f32.mrb[3].mxu1 }
 0x12c   : > { %v730_v59 = vpop.f32.mrb[0].mxu0  ;;  %785 = sbr.rel (%p1044_p7) target bundleno = 325 (0x145), region = 48 }
 0x12d   : > { %v772_v60 = vadd.f32 %v771_v54, %v730_v59  ;;  %v732_v62 = vpop.f32.mrb[1].mxu0 }
 0x12e   : > { %v774_v63 = vadd.f32 %v773_v55, %v732_v62  ;;  %v734_v0 = vpop.f32.mrb[2].mxu0 }
 0x12f   : > { %v778_v1 = vadd.f32 %v772_v60, %v393_v58  ;;  %v735_v2 = vpop.f32.mrb[3].mxu0 }
 0x130   : > { %v779_v3 = vadd.f32 %v774_v63, %v394_v61 }
 0x131   : > { %780 = vst [vmem:[#allocation2] sm:$0xff] %v778_v1 }
 0x132   : > { %781 = vst [vmem:[#allocation2 + $0x8] sm:$0xff] %v779_v3 }
 0x138   : > { %v786_v10 = vld [vmem:[#allocation2] sm:$0xff] }
 0x139   : > { %v787_v11 = vld [vmem:[#allocation2 + $0x8] sm:$0xff]  ;;  %v800_v17 = vmul.f32 %v793_v13, %v786_v10 }
 0x13a   : > { %v801_v18 = vmul.f32 %v797_v14, %v787_v11 }
 0x13b   : > { %v814_v21 = vadd.f32 %v807_v15, %v800_v17 }
 0x13c   : > { %v815_v22 = vadd.f32 %v811_v16, %v801_v18 }
 0x13d   : > { %v819_v23 = vadd.f32 %v817_v19, %v814_v21 }
 0x13e   : > { %v820_v24 = vadd.f32 %v818_v20, %v815_v22 }
 0x13f   : > { %v821_v25 = vmax.f32 %v819_v23, 0.0 }
 0x140   : > { %v822_v26 = vmax.f32 %v820_v24, 0.0 }
 0x142   : > { %v1051_v27 = vpack.c.bf16 %v822_v26, %v821_v25 }
 0x144   : > { %831 = vst [vmem:[%s1319_s5] sm:$0xff] %v1051_v27 }
 0x145 PF: > { %s15_s20 = sadd.s32 1, %s1175_s20   ;;  %s1320_s18 = smov %s1171_s19 }
 0x146   : > { %p12_p8 = scmp.ge.s32.totalorder %s15_s20, 8   ;;  %s1321_s19 = smov %s1323_s21 }
 0x148   :  { %14 = sbr.rel (!%p12_p8) target bundleno = 2 (0x2), region = 90 }

// kernel: resnet18_forward.36
= control target key start
LH: loop header
LB: loop body
LE: loop exit
PB: predicated region body
PF: predicated region fallthrough
CT: control target
= control target key end

     0   :  { %s1114_s15 = smov 0   ;;  %s1116_s16 = smov 0   ;;  %s1216_s0 = inlined_call_operand.vmem [shape: bf16[8,2304], index: 0, kind: input, shape index: {}]   ;;  %s1217_s1 = inlined_call_operand.vmem [shape: bf16[2304,256], index: 1, kind: input, shape index: {}]   ;;  %s1218_s2 = inlined_call_operand.vmem [shape: f32[1,256], index: 2, kind: input, shape index: {}]   ;;  %s1219_s3 = inlined_call_operand.vmem [shape: f32[1,256], index: 3, kind: input, shape index: {}]   ;;  %s1220_s4 = inlined_call_operand.vmem [shape: bf16[8,256], index: 4, kind: output, shape index: {}]  }
   0x1   :  { %s1118_s17 = smov 0  }
   0x2 LB: > { %s26_s18 = sadd.s32 1, %s1081_s16  ;;  %p898_p0 = scmp.ge.s32.totalorder %s1085_s17, 1  ;;  %s1085_s17 = sphi %s1118_s17, %s14_s17   ;;  %s1081_s16 = sphi %s1116_s16, %s1222_s16   ;;  %s1077_s15 = sphi %s1114_s15, %s1221_s15  }
   0x3   : > { %p27_p1 = scmp.ge.s32.totalorder %s26_s18, 6  ;;  %p229_p2 = scmp.lt.s32.totalorder %s1085_s17, 7 }
   0x5   : > { %s1224_s18 = smov (%p27_p1, %s26_s18), 0  ;;  %p230_p3 = pnand %p898_p0, %p229_p2 }
   0x6   : > { %s281_s19 = smul.u32 (!%p230_p3), 3, %s1077_s15  ;;  %p902_p6 = scmp.ne.s32.totalorder (!%p230_p3), %s1077_s15, 0 }
   0x7   : > { %233 = sbr.rel (%p230_p3) target bundleno = 323 (0x143), region = 36 }
   0x8   : > { %s291_s20 = smul.u32 (!%p230_p3), 48, %s1077_s15  ;;  %p284_p4 = scmp.lt.s32.totalorder (!%p230_p3), %s281_s19, 17 }
   0xa   : > { %p293_p5 = scmp.lt.s32.totalorder (!%p230_p3), %s291_s20, 287 }
   0xe   : > { %s1226_s19 = smov (!%p284_p4, %s281_s19), 17  ;;  %s1228_s20 = smov (!%p293_p5, %s291_s20), 287 }
   0xf   : > { %s899_s21 = sshll.u32 %s1226_s19, 2  ;;  %s960_s25 = sshll.u32 %s1228_s20, 3  ;;  %v1087_v0 = vmov (!%p902_p6), 0.0  }
  0x10   : > { %s1139_s24 = scalar_lea.vmem %s1216_s0, %s899_s21  ;;  %s1144_s28 = scalar_lea.vmem %s1217_s1, %s960_s25  ;;  %328 = vst [vmem:[#allocation2] sm:$0xff] (!%p902_p6), %v1087_v0  ;;  %329 = vst [vmem:[#allocation2 + $0x8] sm:$0xff] (!%p902_p6), %v1087_v0 }
  0x11   : > { %327 = sbr.rel (%p902_p6) target bundleno = 24 (0x18), region = 40 }
  0x18 PF: > { %v988_v1 = vld [vmem:[%s1144_s28 + $0x4] ss:$8 sps:$4 sm:$0xff]   ;;  %v990_v2 = vld [vmem:[%s1144_s28] ss:$8 sps:$4 sm:$0xff]   ;;  %v1088_v3 = vmov 0   ;;  %p954_p7 = scmp.ne.s32.totalorder %s1077_s15, 5 }
  0x19   : > { %706 = vmatprep.mubr.bf16.mxu1 %v1088_v3  ;;  %633 = vmatprep.subr.bf16.mxu0 %v988_v1  ;;  %v991_v4 = vld [vmem:[%s1144_s28 + $0x14] ss:$8 sps:$4 sm:$0xff]   ;;  %v993_v5 = vld [vmem:[%s1144_s28 + $0x10] ss:$8 sps:$4 sm:$0xff]   ;;  %v994_v6 = vld [vmem:[%s1144_s28 + $0x24] ss:$8 sps:$4 sm:$0xff]  }
  0x1a   : > { %634 = vmatpush1.bf16.msra.mxu0 %v990_v2  ;;  %v996_v7 = vld [vmem:[%s1144_s28 + $0x20] ss:$8 sps:$4 sm:$0xff]   ;;  %v997_v8 = vld [vmem:[%s1144_s28 + $0x34] ss:$8 sps:$4 sm:$0xff]   ;;  %v999_v9 = vld [vmem:[%s1144_s28 + $0x30] ss:$8 sps:$4 sm:$0xff]  }
  0x1b   : > { %635 = vmatprep.subr.bf16.mxu0 %v991_v4  ;;  %v1012_v10 = vld [vmem:[%s1144_s28 + $0x104] ss:$8 sps:$4 sm:$0xff]   ;;  %v1014_v11 = vld [vmem:[%s1144_s28 + $0x100] ss:$8 sps:$4 sm:$0xff]   ;;  %v1018_v13 = vld [vmem:[%s1144_s28 + $0x114] ss:$8 sps:$4 sm:$0xff]   ;;  %v727_v4 = vlaneseq (!%p954_p7) }
  0x1c   : > { %v1000_v12 = vld [vmem:[%s1144_s28 + $0x44] ss:$8 sps:$4 sm:$0xff]   ;;  %674 = vmatprep.subr.bf16.mxu1 %v1012_v10  ;;  %v1020_v14 = vld [vmem:[%s1144_s28 + $0x110] ss:$8 sps:$4 sm:$0xff]   ;;  %v1002_v15 = vld [vmem:[%s1144_s28 + $0x40] ss:$8 sps:$4 sm:$0xff]  }
  0x1d   : > { %675 = vmatpush1.bf16.msra.mxu1 %v1014_v11  ;;  %v1003_v16 = vld [vmem:[%s1144_s28 + $0x54] ss:$8 sps:$4 sm:$0xff]   ;;  %v1024_v17 = vld [vmem:[%s1144_s28 + $0x124] ss:$8 sps:$4 sm:$0xff]   ;;  %v1026_v18 = vld [vmem:[%s1144_s28 + $0x120] ss:$8 sps:$4 sm:$0xff]  }
  0x1e   : > { %636 = vmatpush1.bf16.msra.mxu0 %v993_v5  ;;  %676 = vmatprep.subr.bf16.mxu1 %v1018_v13  ;;  %v1005_v19 = vld [vmem:[%s1144_s28 + $0x50] ss:$8 sps:$4 sm:$0xff]   ;;  %v1030_v20 = vld [vmem:[%s1144_s28 + $0x134] ss:$8 sps:$4 sm:$0xff]   ;;  %v1006_v21 = vld [vmem:[%s1144_s28 + $0x64] ss:$8 sps:$4 sm:$0xff]  }
  0x1f   : > { %637 = vmatprep.subr.bf16.mxu0 %v994_v6  ;;  %v1032_v22 = vld [vmem:[%s1144_s28 + $0x130] ss:$8 sps:$4 sm:$0xff]   ;;  %v1008_v23 = vld [vmem:[%s1144_s28 + $0x60] ss:$8 sps:$4 sm:$0xff]   ;;  %v1036_v24 = vld [vmem:[%s1144_s28 + $0x144] ss:$8 sps:$4 sm:$0xff]  }
  0x20   : > { %v1009_v25 = vld [vmem:[%s1144_s28 + $0x74] ss:$8 sps:$4 sm:$0xff]   ;;  %v1038_v26 = vld [vmem:[%s1144_s28 + $0x140] ss:$8 sps:$4 sm:$0xff]   ;;  %v1011_v27 = vld [vmem:[%s1144_s28 + $0x70] ss:$8 sps:$4 sm:$0xff]  }
  0x21   : > { %677 = vmatpush1.bf16.msra.mxu1 %v1020_v14  ;;  %v1042_v28 = vld [vmem:[%s1144_s28 + $0x154] ss:$8 sps:$4 sm:$0xff]   ;;  %v1015_v29 = vld [vmem:[%s1144_s28 + $0x84] ss:$8 sps:$4 sm:$0xff]   ;;  %v1044_v30 = vld [vmem:[%s1144_s28 + $0x150] ss:$8 sps:$4 sm:$0xff]  }
  0x22   : > { %638 = vmatpush1.bf16.msra.mxu0 %v996_v7  ;;  %678 = vmatprep.subr.bf16.mxu1 %v1024_v17  ;;  %v1017_v31 = vld [vmem:[%s1144_s28 + $0x80] ss:$8 sps:$4 sm:$0xff]   ;;  %v1048_v32 = vld [vmem:[%s1144_s28 + $0x164] ss:$8 sps:$4 sm:$0xff]   ;;  %v1021_v33 = vld [vmem:[%s1144_s28 + $0x94] ss:$8 sps:$4 sm:$0xff]  }
  0x23   : > { %639 = vmatprep.subr.bf16.mxu0 %v997_v8  ;;  %v332_v34 = vld [vmem:[%s1139_s24] sm:$0xff]  ;;  %v1023_v37 = vld [vmem:[%s1144_s28 + $0x90] ss:$8 sps:$4 sm:$0xff]   ;;  %v1054_v38 = vld [vmem:[%s1144_s28 + $0x174] ss:$8 sps:$4 sm:$0xff]   ;;  %v728_v5 = vshrl.u32 (!%p954_p7), %v727_v4, 7 }
  0x24   : > { %v904_v35 = vcombine.high %v332_v34, %v332_v34  ;;  %v1050_v36 = vld [vmem:[%s1144_s28 + $0x160] ss:$8 sps:$4 sm:$0xff]   ;;  %v1027_v39 = vld [vmem:[%s1144_s28 + $0xa4] ss:$8 sps:$4 sm:$0xff]   ;;  %v1056_v40 = vld [vmem:[%s1144_s28 + $0x170] ss:$8 sps:$4 sm:$0xff]   ;;  %v903_v53 = vcombine.low %v332_v34, %v332_v34 }
  0x25   : > { %679 = vmatpush1.bf16.msra.mxu1 %v1026_v18  ;;  %v1029_v41 = vld [vmem:[%s1144_s28 + $0xa0] ss:$8 sps:$4 sm:$0xff]   ;;  %v1033_v42 = vld [vmem:[%s1144_s28 + $0xb4] ss:$8 sps:$4 sm:$0xff]   ;;  %v1035_v44 = vld [vmem:[%s1144_s28 + $0xb0] ss:$8 sps:$4 sm:$0xff]  }
  0x26   : > { %640 = vmatpush1.bf16.msra.mxu0 %v999_v9  ;;  %680 = vmatprep.subr.bf16.mxu1 %v1030_v20  ;;  %v1060_v43 = vld [vmem:[%s1139_s24 + $0x8] ss:$0 sps:$4 sm:$0xff]   ;;  %v1039_v45 = vld [vmem:[%s1144_s28 + $0xc4] ss:$8 sps:$4 sm:$0xff]   ;;  %v1045_v47 = vld [vmem:[%s1144_s28 + $0xd4] ss:$8 sps:$4 sm:$0xff]  }
  0x27   : > { %641 = vmatprep.subr.bf16.mxu0 %v1000_v12  ;;  %665 = vmatprep.mubr.bf16.mxu0 %v904_v35  ;;  %v1041_v46 = vld [vmem:[%s1144_s28 + $0xc0] ss:$8 sps:$4 sm:$0xff]   ;;  %v1047_v48 = vld [vmem:[%s1144_s28 + $0xd0] ss:$8 sps:$4 sm:$0xff]   ;;  %v1051_v49 = vld [vmem:[%s1144_s28 + $0xe4] ss:$8 sps:$4 sm:$0xff]  }
  0x28   : > { %v1053_v50 = vld [vmem:[%s1144_s28 + $0xe0] ss:$8 sps:$4 sm:$0xff]   ;;  %v1057_v51 = vld [vmem:[%s1144_s28 + $0xf4] ss:$8 sps:$4 sm:$0xff]   ;;  %v1059_v52 = vld [vmem:[%s1144_s28 + $0xf0] ss:$8 sps:$4 sm:$0xff]  }
  0x29   : > { %681 = vmatpush1.bf16.msra.mxu1 %v1032_v22  ;;  %v330_v58 = vld [vmem:[#allocation2] sm:$0xff]  ;;  %v331_v61 = vld [vmem:[#allocation2 + $0x8] sm:$0xff]  ;;  %v729_v8 = vsub.s32 (!%p954_p7), 0, %v728_v5  ;;  %v733_v9 = vsub.s32 (!%p954_p7), 1, %v728_v5 }
  0x2a   : > { %642 = vmatpush1.bf16.msra.mxu0 %v1002_v15  ;;  %682 = vmatprep.subr.bf16.mxu1 %v1036_v24  ;;  %v725_v6 = vld [vmem:[%s1218_s2] sm:$0x3] (!%p954_p7) }
  0x2b   : > { %643 = vmatprep.subr.bf16.mxu0 %v1003_v16  ;;  %v739_v7 = vld [vmem:[%s1219_s3] sm:$0x3] (!%p954_p7)  ;;  %v730_v12 = vrot.slane (!%p954_p7), %v725_v6, %v729_v8  ;;  %v734_v13 = vrot.slane (!%p954_p7), %v725_v6, %v733_v9 }
  0x2c   : > { %v744_v14 = vrot.slane (!%p954_p7), %v739_v7, %v729_v8  ;;  %v748_v15 = vrot.slane (!%p954_p7), %v739_v7, %v733_v9 }
  0x2d   : > { %683 = vmatpush1.bf16.msra.mxu1 %v1038_v26 }
  0x2e   : > { %644 = vmatpush1.bf16.msra.mxu0 %v1005_v19  ;;  %684 = vmatprep.subr.bf16.mxu1 %v1042_v28 }
  0x2f   : > { %645 = vmatprep.subr.bf16.mxu0 %v1006_v21 }
  0x31   : > { %685 = vmatpush1.bf16.msra.mxu1 %v1044_v30 }
  0x32   : > { %646 = vmatpush1.bf16.msra.mxu0 %v1008_v23  ;;  %686 = vmatprep.subr.bf16.mxu1 %v1048_v32 }
  0x33   : > { %647 = vmatprep.subr.bf16.mxu0 %v1009_v25 }
  0x35   : > { %687 = vmatpush1.bf16.msra.mxu1 %v1050_v36 }
  0x36   : > { %648 = vmatpush1.bf16.msra.mxu0 %v1011_v27  ;;  %688 = vmatprep.subr.bf16.mxu1 %v1054_v38 }
  0x37   : > { %649 = vmatprep.subr.bf16.mxu0 %v1015_v29 }
  0x39   : > { %689 = vmatpush1.bf16.msra.mxu1 %v1056_v40 }
  0x3a   : > { %650 = vmatpush1.bf16.msra.mxu0 %v1017_v31 }
  0x3b   : > { %651 = vmatprep.subr.bf16.mxu0 %v1021_v33 }
  0x3c   : > { %707 = vmatmul.mubr.bf16.vlgmr.msra.gmra.mrb[0].mxu1 %v1060_v43 }
  0x3e   : > { %652 = vmatpush1.bf16.msra.mxu0 %v1023_v37 }
  0x3f   : > { %653 = vmatprep.subr.bf16.mxu0 %v1027_v39 }
  0x42   : > { %654 = vmatpush1.bf16.msra.mxu0 %v1029_v41 }
  0x43   : > { %655 = vmatprep.subr.bf16.mxu0 %v1033_v42 }
  0x46   : > { %656 = vmatpush1.bf16.msra.mxu0 %v1035_v44 }
  0x47   : > { %657 = vmatprep.subr.bf16.mxu0 %v1039_v45 }
  0x4a   : > { %658 = vmatpush1.bf16.msra.mxu0 %v1041_v46 }
  0x4b   : > { %659 = vmatprep.subr.bf16.mxu0 %v1045_v47 }
  0x4e   : > { %660 = vmatpush1.bf16.msra.mxu0 %v1047_v48 }
  0x4f   : > { %661 = vmatprep.subr.bf16.mxu0 %v1051_v49 }
  0x52   : > { %662 = vmatpush1.bf16.msra.mxu0 %v1053_v50 }
  0x53   : > { %663 = vmatprep.subr.bf16.mxu0 %v1057_v51 }
  0x56   : > { %664 = vmatpush1.bf16.msra.mxu0 %v1059_v52 }
  0x59   : > { %666 = vmatmul.mubr.bf16.vlgmr.msra.gmra.mrb[0].mxu0 %v903_v53 }
 0x10f   : > { %v708_v54 = vpop.f32.mrb[0].mxu1 }
 0x110   : > { %v710_v55 = vpop.f32.mrb[1].mxu1 }
 0x111   : > { %v712_v56 = vpop.f32.mrb[2].mxu1 }
 0x112   : > { %v713_v57 = vpop.f32.mrb[3].mxu1 }
 0x12c   : > { %v667_v59 = vpop.f32.mrb[0].mxu0  ;;  %722 = sbr.rel (%p954_p7) target bundleno = 323 (0x143), region = 44 }
 0x12d   : > { %v709_v60 = vadd.f32 %v708_v54, %v667_v59  ;;  %v669_v62 = vpop.f32.mrb[1].mxu0 }
 0x12e   : > { %v711_v63 = vadd.f32 %v710_v55, %v669_v62  ;;  %v671_v0 = vpop.f32.mrb[2].mxu0 }
 0x12f   : > { %v715_v1 = vadd.f32 %v709_v60, %v330_v58  ;;  %v672_v2 = vpop.f32.mrb[3].mxu0 }
 0x130   : > { %v716_v3 = vadd.f32 %v711_v63, %v331_v61 }
 0x131   : > { %717 = vst [vmem:[#allocation2] sm:$0xff] %v715_v1 }
 0x132   : > { %718 = vst [vmem:[#allocation2 + $0x8] sm:$0xff] %v716_v3 }
 0x138   : > { %v723_v10 = vld [vmem:[#allocation2] sm:$0xff] }
 0x139   : > { %v724_v11 = vld [vmem:[#allocation2 + $0x8] sm:$0xff]  ;;  %v737_v16 = vmul.f32 %v730_v12, %v723_v10 }
 0x13a   : > { %v738_v17 = vmul.f32 %v734_v13, %v724_v11 }
 0x13b   : > { %v751_v18 = vadd.f32 %v744_v14, %v737_v16 }
 0x13c   : > { %v752_v19 = vadd.f32 %v748_v15, %v738_v17 }
 0x13d   : > { %v753_v20 = vmax.f32 %v751_v18, 0.0 }
 0x13e   : > { %v754_v21 = vmax.f32 %v752_v19, 0.0 }
 0x140   : > { %v961_v22 = vpack.c.bf16 %v754_v21, %v753_v20 }
 0x142   : > { %763 = vst [vmem:[%s1220_s4] sm:$0xff] %v961_v22 }
 0x143 PF: > { %s14_s17 = sadd.s32 1, %s1085_s17   ;;  %s1221_s15 = smov %s1081_s16 }
 0x144   : > { %p11_p8 = scmp.ge.s32.totalorder %s14_s17, 8   ;;  %s1222_s16 = smov %s1224_s18 }
 0x146   :  { %13 = sbr.rel (!%p11_p8) target bundleno = 2 (0x2), region = 83 }

// kernel: resnet18_forward.38
= control target key start
LH: loop header
LB: loop body
LE: loop exit
PB: predicated region body
PF: predicated region fallthrough
CT: control target
= control target key end

     0   :  { %s1394_s15 = smov 0   ;;  %s1396_s16 = smov 0   ;;  %s1666_s0 = inlined_call_operand.vmem [shape: bf16[8,2304], index: 0, kind: input, shape index: {}]   ;;  %s1667_s1 = inlined_call_operand.vmem [shape: bf16[2304,512], index: 1, kind: input, shape index: {}]   ;;  %s1668_s2 = inlined_call_operand.vmem [shape: f32[1,512], index: 2, kind: input, shape index: {}]   ;;  %s1669_s3 = inlined_call_operand.vmem [shape: f32[1,512], index: 3, kind: input, shape index: {}]   ;;  %s1670_s4 = inlined_call_operand.vmem [shape: bf16[8,512], index: 4, kind: output, shape index: {}]  }
   0x1   :  { %s1398_s17 = smov 0   ;;  %s1400_s18 = smov 0  }
   0x2   :  { %s1402_s19 = smov 0   ;;  %s1404_s20 = smov 0  }
   0x3   :  { %s1406_s21 = smov 0  }
   0x4 LB: > { %s26_s22 = sadd.s32 1, %s1357_s19  ;;  %s29_s23 = sadd.s32 1, %s1361_s20  ;;  %s1365_s21 = sphi %s1406_s21, %s14_s21   ;;  %s1361_s20 = sphi %s1404_s20, %s1676_s20   ;;  %s1357_s19 = sphi %s1402_s19, %s1675_s19   ;;  %s1353_s18 = sphi %s1400_s18, %s1674_s18   ;;  %s1349_s17 = sphi %s1398_s17, %s1673_s17   ;;  %s1345_s16 = sphi %s1396_s16, %s1672_s16   ;;  %s1341_s15 = sphi %s1394_s15, %s1671_s15  }
   0x5   : > { %p27_p0 = scmp.ge.s32.totalorder %s26_s22, 6  ;;  %p77_p1 = scmp.ne.s32.totalorder %s1345_s16, %s1341_s15 }
   0x6   : > { %p78_p2 = scmp.eq.s32.totalorder %s1365_s21, 0  ;;  %s70_s27 = sadd.s32 1, %s1345_s16 }
   0x7   : > { %s1678_s22 = smov (%p27_p0, %s26_s22), 0  ;;  %s1680_s23 = smov (!%p27_p0, %s29_s23), %s1361_s20 }
   0x8   : > { %p79_p3 = por %p78_p2, %p77_p1  ;;  %p31_p4 = scmp.ge.s32.totalorder %s1680_s23, 2 }
   0x9   : > { %s65_s24 = ssub.s32 %s1357_s19, %s1678_s22  ;;  %p1108_p6 = scmp.ge.s32.totalorder %s1365_s21, 12 }
   0xa   : > { %s1682_s23 = smov (%p31_p4, %s1680_s23), 0 }
   0xb   : > { %s66_s25 = ssub.s32 %s1361_s20, %s1682_s23  ;;  %183 = sbr.rel (%p1108_p6) target bundleno = 50 (0x32), region = 16 }
   0xc   : > { %s67_s26 = sor.u32 %s66_s25, %s65_s24 }
   0xd   : > { %p68_p5 = scmp.eq.s32.totalorder %s67_s26, 0 }
   0xf   : > { %s1445_s28 = scalar_select %p68_p5, %s1345_s16, %s70_s27  }
  0x12   : > { %199 = sbr.rel (!%p79_p3) target bundleno = 50 (0x32), region = 24  ;;  %s201_s29 = sand.u32 (%p79_p3), 1, %s1345_s16  }
  0x13   : > { %s1176_s30 = smul.u32 (%p79_p3), 384, %s201_s29  ;;  %s1109_s5 = sshll.u32 (%p79_p3), %s1361_s20, 1 }
  0x14   : > { %s1174_s6 = smul.u32 (%p79_p3), 192, %s1357_s19 }
  0x15   : > { %s1459_s12 = scalar_lea.vmem (%p79_p3), [#allocation3], %s1176_s30 }
  0x16   : > { %s207_s7 = sadd.s32 (%p79_p3), %s1174_s6, %s1109_s5 }
  0x17   : > { %s1111_s8 = sshll.u32 (%p79_p3), %s207_s7, 2 }
  0x18   : > { %s1454_s11 = scalar_lea.vmem (%p79_p3), %s1667_s1, %s1111_s8 }
  0x19   : > { %v331_v0 = vld [vmem:[%s1454_s11] sm:$0xff]  ;;  %v333_v1 = vld [vmem:[%s1454_s11 + $0x10] sm:$0xff] }
  0x1a   : > { %v335_v2 = vld [vmem:[%s1454_s11 + $0x20] sm:$0xff]  ;;  %332 = vst [vmem:[%s1459_s12] sm:$0xff] %v331_v0  ;;  %334 = vst [vmem:[%s1459_s12 + $0x8] sm:$0xff] %v333_v1  ;;  %v337_v3 = vld [vmem:[%s1454_s11 + $0x30] sm:$0xff] }
  0x1b   : > { %336 = vst [vmem:[%s1459_s12 + $0x10] sm:$0xff] %v335_v2  ;;  %v339_v4 = vld [vmem:[%s1454_s11 + $0x40] sm:$0xff]  ;;  %v341_v5 = vld [vmem:[%s1454_s11 + $0x50] sm:$0xff]  ;;  %338 = vst [vmem:[%s1459_s12 + $0x18] sm:$0xff] %v337_v3 }
  0x1c   : > { %340 = vst [vmem:[%s1459_s12 + $0x20] sm:$0xff] %v339_v4  ;;  %342 = vst [vmem:[%s1459_s12 + $0x28] sm:$0xff] %v341_v5  ;;  %v343_v6 = vld [vmem:[%s1454_s11 + $0x60] sm:$0xff]  ;;  %v345_v7 = vld [vmem:[%s1454_s11 + $0x70] sm:$0xff] }
  0x1d   : > { %v347_v8 = vld [vmem:[%s1454_s11 + $0x80] sm:$0xff]  ;;  %344 = vst [vmem:[%s1459_s12 + $0x30] sm:$0xff] %v343_v6  ;;  %346 = vst [vmem:[%s1459_s12 + $0x38] sm:$0xff] %v345_v7  ;;  %v349_v9 = vld [vmem:[%s1454_s11 + $0x90] sm:$0xff] }
  0x1e   : > { %348 = vst [vmem:[%s1459_s12 + $0x40] sm:$0xff] %v347_v8  ;;  %v351_v10 = vld [vmem:[%s1454_s11 + $0xa0] sm:$0xff]  ;;  %v353_v11 = vld [vmem:[%s1454_s11 + $0xb0] sm:$0xff]  ;;  %350 = vst [vmem:[%s1459_s12 + $0x48] sm:$0xff] %v349_v9 }
  0x1f   : > { %352 = vst [vmem:[%s1459_s12 + $0x50] sm:$0xff] %v351_v10  ;;  %354 = vst [vmem:[%s1459_s12 + $0x58] sm:$0xff] %v353_v11  ;;  %v355_v12 = vld [vmem:[%s1454_s11 + $0xc0] sm:$0xff]  ;;  %v357_v13 = vld [vmem:[%s1454_s11 + $0xd0] sm:$0xff] }
  0x20   : > { %v359_v14 = vld [vmem:[%s1454_s11 + $0xe0] sm:$0xff]  ;;  %356 = vst [vmem:[%s1459_s12 + $0x60] sm:$0xff] %v355_v12  ;;  %358 = vst [vmem:[%s1459_s12 + $0x68] sm:$0xff] %v357_v13  ;;  %v361_v15 = vld [vmem:[%s1454_s11 + $0xf0] sm:$0xff] }
  0x21   : > { %360 = vst [vmem:[%s1459_s12 + $0x70] sm:$0xff] %v359_v14  ;;  %v363_v16 = vld [vmem:[%s1454_s11 + $0x100] sm:$0xff]  ;;  %v365_v17 = vld [vmem:[%s1454_s11 + $0x110] sm:$0xff]  ;;  %362 = vst [vmem:[%s1459_s12 + $0x78] sm:$0xff] %v361_v15 }
  0x22   : > { %364 = vst [vmem:[%s1459_s12 + $0x80] sm:$0xff] %v363_v16  ;;  %366 = vst [vmem:[%s1459_s12 + $0x88] sm:$0xff] %v365_v17  ;;  %v367_v18 = vld [vmem:[%s1454_s11 + $0x120] sm:$0xff]  ;;  %v369_v19 = vld [vmem:[%s1454_s11 + $0x130] sm:$0xff] }
  0x23   : > { %v371_v20 = vld [vmem:[%s1454_s11 + $0x140] sm:$0xff]  ;;  %368 = vst [vmem:[%s1459_s12 + $0x90] sm:$0xff] %v367_v18  ;;  %370 = vst [vmem:[%s1459_s12 + $0x98] sm:$0xff] %v369_v19  ;;  %v373_v21 = vld [vmem:[%s1454_s11 + $0x150] sm:$0xff] }
  0x24   : > { %372 = vst [vmem:[%s1459_s12 + $0xa0] sm:$0xff] %v371_v20  ;;  %v375_v22 = vld [vmem:[%s1454_s11 + $0x160] sm:$0xff]  ;;  %v377_v23 = vld [vmem:[%s1454_s11 + $0x170] sm:$0xff]  ;;  %374 = vst [vmem:[%s1459_s12 + $0xa8] sm:$0xff] %v373_v21 }
  0x25   : > { %376 = vst [vmem:[%s1459_s12 + $0xb0] sm:$0xff] %v375_v22  ;;  %378 = vst [vmem:[%s1459_s12 + $0xb8] sm:$0xff] %v377_v23  ;;  %v379_v24 = vld [vmem:[%s1454_s11 + $0x180] sm:$0xff]  ;;  %v381_v25 = vld [vmem:[%s1454_s11 + $0x190] sm:$0xff] }
  0x26   : > { %v383_v26 = vld [vmem:[%s1454_s11 + $0x1a0] sm:$0xff]  ;;  %380 = vst [vmem:[%s1459_s12 + $0xc0] sm:$0xff] %v379_v24  ;;  %382 = vst [vmem:[%s1459_s12 + $0xc8] sm:$0xff] %v381_v25  ;;  %v385_v27 = vld [vmem:[%s1454_s11 + $0x1b0] sm:$0xff] }
  0x27   : > { %384 = vst [vmem:[%s1459_s12 + $0xd0] sm:$0xff] %v383_v26  ;;  %v387_v28 = vld [vmem:[%s1454_s11 + $0x1c0] sm:$0xff]  ;;  %v389_v29 = vld [vmem:[%s1454_s11 + $0x1d0] sm:$0xff]  ;;  %386 = vst [vmem:[%s1459_s12 + $0xd8] sm:$0xff] %v385_v27 }
  0x28   : > { %388 = vst [vmem:[%s1459_s12 + $0xe0] sm:$0xff] %v387_v28  ;;  %390 = vst [vmem:[%s1459_s12 + $0xe8] sm:$0xff] %v389_v29  ;;  %v391_v30 = vld [vmem:[%s1454_s11 + $0x1e0] sm:$0xff]  ;;  %v393_v31 = vld [vmem:[%s1454_s11 + $0x1f0] sm:$0xff] }
  0x29   : > { %v395_v32 = vld [vmem:[%s1454_s11 + $0x200] sm:$0xff]  ;;  %392 = vst [vmem:[%s1459_s12 + $0xf0] sm:$0xff] %v391_v30  ;;  %394 = vst [vmem:[%s1459_s12 + $0xf8] sm:$0xff] %v393_v31  ;;  %v397_v33 = vld [vmem:[%s1454_s11 + $0x210] sm:$0xff] }
  0x2a   : > { %396 = vst [vmem:[%s1459_s12 + $0x100] sm:$0xff] %v395_v32  ;;  %v399_v34 = vld [vmem:[%s1454_s11 + $0x220] sm:$0xff]  ;;  %v401_v35 = vld [vmem:[%s1454_s11 + $0x230] sm:$0xff]  ;;  %398 = vst [vmem:[%s1459_s12 + $0x108] sm:$0xff] %v397_v33 }
  0x2b   : > { %400 = vst [vmem:[%s1459_s12 + $0x110] sm:$0xff] %v399_v34  ;;  %402 = vst [vmem:[%s1459_s12 + $0x118] sm:$0xff] %v401_v35  ;;  %v403_v36 = vld [vmem:[%s1454_s11 + $0x240] sm:$0xff]  ;;  %v405_v37 = vld [vmem:[%s1454_s11 + $0x250] sm:$0xff] }
  0x2c   : > { %v407_v38 = vld [vmem:[%s1454_s11 + $0x260] sm:$0xff]  ;;  %404 = vst [vmem:[%s1459_s12 + $0x120] sm:$0xff] %v403_v36  ;;  %406 = vst [vmem:[%s1459_s12 + $0x128] sm:$0xff] %v405_v37  ;;  %v409_v39 = vld [vmem:[%s1454_s11 + $0x270] sm:$0xff] }
  0x2d   : > { %408 = vst [vmem:[%s1459_s12 + $0x130] sm:$0xff] %v407_v38  ;;  %v411_v40 = vld [vmem:[%s1454_s11 + $0x280] sm:$0xff]  ;;  %v413_v41 = vld [vmem:[%s1454_s11 + $0x290] sm:$0xff]  ;;  %410 = vst [vmem:[%s1459_s12 + $0x138] sm:$0xff] %v409_v39 }
  0x2e   : > { %412 = vst [vmem:[%s1459_s12 + $0x140] sm:$0xff] %v411_v40  ;;  %414 = vst [vmem:[%s1459_s12 + $0x148] sm:$0xff] %v413_v41  ;;  %v415_v42 = vld [vmem:[%s1454_s11 + $0x2a0] sm:$0xff]  ;;  %v417_v43 = vld [vmem:[%s1454_s11 + $0x2b0] sm:$0xff] }
  0x2f   : > { %v419_v44 = vld [vmem:[%s1454_s11 + $0x2c0] sm:$0xff]  ;;  %416 = vst [vmem:[%s1459_s12 + $0x150] sm:$0xff] %v415_v42  ;;  %418 = vst [vmem:[%s1459_s12 + $0x158] sm:$0xff] %v417_v43  ;;  %v421_v45 = vld [vmem:[%s1454_s11 + $0x2d0] sm:$0xff] }
  0x30   : > { %420 = vst [vmem:[%s1459_s12 + $0x160] sm:$0xff] %v419_v44  ;;  %v423_v46 = vld [vmem:[%s1454_s11 + $0x2e0] sm:$0xff]  ;;  %v425_v47 = vld [vmem:[%s1454_s11 + $0x2f0] sm:$0xff]  ;;  %422 = vst [vmem:[%s1459_s12 + $0x168] sm:$0xff] %v421_v45 }
  0x31   : > { %424 = vst [vmem:[%s1459_s12 + $0x170] sm:$0xff] %v423_v46  ;;  %426 = vst [vmem:[%s1459_s12 + $0x178] sm:$0xff] %v425_v47 }
  0x32 PF: > { %p1112_p7 = scmp.ge.s32.totalorder %s1365_s21, 1  ;;  %p447_p8 = scmp.lt.s32.totalorder %s1365_s21, 13 }
  0x34   : > { %p448_p9 = pnand %p1112_p7, %p447_p8 }
  0x35   : > { %s454_s13 = sand.u32 (!%p448_p9), 1, %s1341_s15   ;;  %s500_s14 = smul.u32 (!%p448_p9), 3, %s1349_s17 }
  0x36   : > { %451 = sbr.rel (%p448_p9) target bundleno = 370 (0x172), region = 70  ;;  %s1114_s25 = sshll.u32 (!%p448_p9), %s1353_s18, 1 }
  0x37   : > { %s1177_s24 = smul.u32 (!%p448_p9), 384, %s454_s13  ;;  %p503_p10 = scmp.lt.s32.totalorder (!%p448_p9), %s500_s14, 17 }
  0x38   : > { %p513_p11 = scmp.lt.s32.totalorder (!%p448_p9), %s1114_s25, 3  ;;  %p1118_p12 = scmp.ne.s32.totalorder (!%p448_p9), %s1349_s17, 0 }
  0x39   : > { %s1580_s13 = scalar_lea.vmem (!%p448_p9), [#allocation3], %s1177_s24 }
  0x3d   : > { %s1684_s14 = smov (!%p503_p10, %s500_s14), 17  ;;  %s1686_s25 = smov (!%p513_p11, %s1114_s25), 3 }
  0x3e   : > { %s1113_s26 = sshll.u32 %s1684_s14, 2  ;;  %s515_s15 = scalar_lea.vmem %s1668_s2, %s1686_s25  ;;  %v1367_v48 = vmov (!%p1118_p12), 0.0  }
  0x3f   : > { %s1564_s30 = scalar_lea.vmem %s1666_s0, %s1113_s26  ;;  %s520_s8 = scalar_lea.vmem %s1669_s3, %s1686_s25  ;;  %537 = vst [vmem:[#allocation2] sm:$0xff] (!%p1118_p12), %v1367_v48  ;;  %538 = vst [vmem:[#allocation2 + $0x8] sm:$0xff] (!%p1118_p12), %v1367_v48 }
  0x40   : > { %s1117_s9 = sshll.u32 %s1686_s25, 2  ;;  %536 = sbr.rel (%p1118_p12) target bundleno = 71 (0x47), region = 78 }
  0x41   : > { %s1578_s12 = scalar_lea.vmem %s1670_s4, %s1117_s9 }
  0x47 PF: > { %v1236_v49 = vld [vmem:[%s1580_s13 + $0x4] ss:$8 sps:$4 sm:$0xff]   ;;  %v1238_v50 = vld [vmem:[%s1580_s13] ss:$8 sps:$4 sm:$0xff]   ;;  %v1368_v51 = vmov 0   ;;  %v541_v18 = vld [vmem:[%s1564_s30] sm:$0xff] }
  0x48   : > { %915 = vmatprep.mubr.bf16.mxu1 %v1368_v51  ;;  %842 = vmatprep.subr.bf16.mxu0 %v1236_v49  ;;  %v1239_v52 = vld [vmem:[%s1580_s13 + $0x14] ss:$8 sps:$4 sm:$0xff]   ;;  %v1241_v53 = vld [vmem:[%s1580_s13 + $0x10] ss:$8 sps:$4 sm:$0xff]   ;;  %v1242_v54 = vld [vmem:[%s1580_s13 + $0x24] ss:$8 sps:$4 sm:$0xff]   ;;  %v1120_v19 = vcombine.high %v541_v18, %v541_v18  ;;  %v1119_v37 = vcombine.low %v541_v18, %v541_v18 }
  0x49   : > { %843 = vmatpush1.bf16.msra.mxu0 %v1238_v50  ;;  %v1244_v55 = vld [vmem:[%s1580_s13 + $0x20] ss:$8 sps:$4 sm:$0xff]   ;;  %v1245_v56 = vld [vmem:[%s1580_s13 + $0x34] ss:$8 sps:$4 sm:$0xff]   ;;  %v1247_v57 = vld [vmem:[%s1580_s13 + $0x30] ss:$8 sps:$4 sm:$0xff]  }
  0x4a   : > { %844 = vmatprep.subr.bf16.mxu0 %v1239_v52  ;;  %v1260_v58 = vld [vmem:[%s1580_s13 + $0x104] ss:$8 sps:$4 sm:$0xff]   ;;  %v1262_v59 = vld [vmem:[%s1580_s13 + $0x100] ss:$8 sps:$4 sm:$0xff]   ;;  %v1266_v61 = vld [vmem:[%s1580_s13 + $0x114] ss:$8 sps:$4 sm:$0xff]   ;;  %874 = vmatprep.mubr.bf16.mxu0 %v1120_v19 }
  0x4b   : > { %v1248_v60 = vld [vmem:[%s1580_s13 + $0x44] ss:$8 sps:$4 sm:$0xff]   ;;  %883 = vmatprep.subr.bf16.mxu1 %v1260_v58  ;;  %v1268_v62 = vld [vmem:[%s1580_s13 + $0x110] ss:$8 sps:$4 sm:$0xff]   ;;  %v1250_v63 = vld [vmem:[%s1580_s13 + $0x40] ss:$8 sps:$4 sm:$0xff]  }
  0x4c   : > { %884 = vmatpush1.bf16.msra.mxu1 %v1262_v59  ;;  %v1251_v0 = vld [vmem:[%s1580_s13 + $0x54] ss:$8 sps:$4 sm:$0xff]   ;;  %v1272_v1 = vld [vmem:[%s1580_s13 + $0x124] ss:$8 sps:$4 sm:$0xff]   ;;  %v1274_v2 = vld [vmem:[%s1580_s13 + $0x120] ss:$8 sps:$4 sm:$0xff]  }
  0x4d   : > { %845 = vmatpush1.bf16.msra.mxu0 %v1241_v53  ;;  %885 = vmatprep.subr.bf16.mxu1 %v1266_v61  ;;  %v1253_v3 = vld [vmem:[%s1580_s13 + $0x50] ss:$8 sps:$4 sm:$0xff]   ;;  %v1278_v4 = vld [vmem:[%s1580_s13 + $0x134] ss:$8 sps:$4 sm:$0xff]   ;;  %v1254_v5 = vld [vmem:[%s1580_s13 + $0x64] ss:$8 sps:$4 sm:$0xff]  }
  0x4e   : > { %846 = vmatprep.subr.bf16.mxu0 %v1242_v54  ;;  %v1280_v6 = vld [vmem:[%s1580_s13 + $0x130] ss:$8 sps:$4 sm:$0xff]   ;;  %v1256_v7 = vld [vmem:[%s1580_s13 + $0x60] ss:$8 sps:$4 sm:$0xff]   ;;  %v1284_v8 = vld [vmem:[%s1580_s13 + $0x144] ss:$8 sps:$4 sm:$0xff]  }
  0x4f   : > { %v1257_v9 = vld [vmem:[%s1580_s13 + $0x74] ss:$8 sps:$4 sm:$0xff]   ;;  %v1286_v10 = vld [vmem:[%s1580_s13 + $0x140] ss:$8 sps:$4 sm:$0xff]   ;;  %v1259_v11 = vld [vmem:[%s1580_s13 + $0x70] ss:$8 sps:$4 sm:$0xff]  }
  0x50   : > { %886 = vmatpush1.bf16.msra.mxu1 %v1268_v62  ;;  %v1290_v12 = vld [vmem:[%s1580_s13 + $0x154] ss:$8 sps:$4 sm:$0xff]   ;;  %v1263_v13 = vld [vmem:[%s1580_s13 + $0x84] ss:$8 sps:$4 sm:$0xff]   ;;  %v1292_v14 = vld [vmem:[%s1580_s13 + $0x150] ss:$8 sps:$4 sm:$0xff]  }
  0x51   : > { %847 = vmatpush1.bf16.msra.mxu0 %v1244_v55  ;;  %887 = vmatprep.subr.bf16.mxu1 %v1272_v1  ;;  %v1265_v15 = vld [vmem:[%s1580_s13 + $0x80] ss:$8 sps:$4 sm:$0xff]   ;;  %v1296_v16 = vld [vmem:[%s1580_s13 + $0x164] ss:$8 sps:$4 sm:$0xff]   ;;  %v1269_v17 = vld [vmem:[%s1580_s13 + $0x94] ss:$8 sps:$4 sm:$0xff]  }
  0x52   : > { %848 = vmatprep.subr.bf16.mxu0 %v1245_v56  ;;  %v1298_v20 = vld [vmem:[%s1580_s13 + $0x160] ss:$8 sps:$4 sm:$0xff]   ;;  %v1271_v21 = vld [vmem:[%s1580_s13 + $0x90] ss:$8 sps:$4 sm:$0xff]   ;;  %v1302_v22 = vld [vmem:[%s1580_s13 + $0x174] ss:$8 sps:$4 sm:$0xff]  }
  0x53   : > { %v1275_v23 = vld [vmem:[%s1580_s13 + $0xa4] ss:$8 sps:$4 sm:$0xff]   ;;  %v1304_v24 = vld [vmem:[%s1580_s13 + $0x170] ss:$8 sps:$4 sm:$0xff]   ;;  %v1277_v25 = vld [vmem:[%s1580_s13 + $0xa0] ss:$8 sps:$4 sm:$0xff]  }
  0x54   : > { %888 = vmatpush1.bf16.msra.mxu1 %v1274_v2  ;;  %v1281_v26 = vld [vmem:[%s1580_s13 + $0xb4] ss:$8 sps:$4 sm:$0xff]   ;;  %v1308_v27 = vld [vmem:[%s1564_s30 + $0x8] ss:$0 sps:$4 sm:$0xff]   ;;  %v1287_v29 = vld [vmem:[%s1580_s13 + $0xc4] ss:$8 sps:$4 sm:$0xff]  }
  0x55   : > { %849 = vmatpush1.bf16.msra.mxu0 %v1247_v57  ;;  %889 = vmatprep.subr.bf16.mxu1 %v1278_v4  ;;  %v1283_v28 = vld [vmem:[%s1580_s13 + $0xb0] ss:$8 sps:$4 sm:$0xff]   ;;  %v1289_v30 = vld [vmem:[%s1580_s13 + $0xc0] ss:$8 sps:$4 sm:$0xff]   ;;  %v1293_v31 = vld [vmem:[%s1580_s13 + $0xd4] ss:$8 sps:$4 sm:$0xff]  }
  0x56   : > { %850 = vmatprep.subr.bf16.mxu0 %v1248_v60  ;;  %v1295_v32 = vld [vmem:[%s1580_s13 + $0xd0] ss:$8 sps:$4 sm:$0xff]   ;;  %v1299_v33 = vld [vmem:[%s1580_s13 + $0xe4] ss:$8 sps:$4 sm:$0xff]   ;;  %v1301_v34 = vld [vmem:[%s1580_s13 + $0xe0] ss:$8 sps:$4 sm:$0xff]  }
  0x57   : > { %v1305_v35 = vld [vmem:[%s1580_s13 + $0xf4] ss:$8 sps:$4 sm:$0xff]   ;;  %v1307_v36 = vld [vmem:[%s1580_s13 + $0xf0] ss:$8 sps:$4 sm:$0xff]   ;;  %p1170_p13 = scmp.ne.s32.totalorder %s1349_s17, 5 }
  0x58   : > { %890 = vmatpush1.bf16.msra.mxu1 %v1280_v6  ;;  %v539_v42 = vld [vmem:[#allocation2] sm:$0xff]  ;;  %v540_v45 = vld [vmem:[#allocation2 + $0x8] sm:$0xff]  ;;  %v936_v52 = vlaneseq (!%p1170_p13) }
  0x59   : > { %851 = vmatpush1.bf16.msra.mxu0 %v1250_v63  ;;  %891 = vmatprep.subr.bf16.mxu1 %v1284_v8  ;;  %v934_v54 = vld [vmem:[%s515_s15] sm:$0x3] (!%p1170_p13) }
  0x5a   : > { %852 = vmatprep.subr.bf16.mxu0 %v1251_v0  ;;  %v937_v53 = vshrl.u32 (!%p1170_p13), %v936_v52, 7  ;;  %v948_v55 = vld [vmem:[%s520_s8] sm:$0x3] (!%p1170_p13) }
  0x5c   : > { %892 = vmatpush1.bf16.msra.mxu1 %v1286_v10  ;;  %v938_v56 = vsub.s32 (!%p1170_p13), 0, %v937_v53  ;;  %v942_v57 = vsub.s32 (!%p1170_p13), 1, %v937_v53 }
  0x5d   : > { %853 = vmatpush1.bf16.msra.mxu0 %v1253_v3  ;;  %893 = vmatprep.subr.bf16.mxu1 %v1290_v12 }
  0x5e   : > { %854 = vmatprep.subr.bf16.mxu0 %v1254_v5  ;;  %v939_v60 = vrot.slane (!%p1170_p13), %v934_v54, %v938_v56  ;;  %v943_v61 = vrot.slane (!%p1170_p13), %v934_v54, %v942_v57  ;;  %v953_v62 = vrot.slane (!%p1170_p13), %v948_v55, %v938_v56  ;;  %v957_v63 = vrot.slane (!%p1170_p13), %v948_v55, %v942_v57 }
  0x60   : > { %894 = vmatpush1.bf16.msra.mxu1 %v1292_v14 }
  0x61   : > { %855 = vmatpush1.bf16.msra.mxu0 %v1256_v7  ;;  %895 = vmatprep.subr.bf16.mxu1 %v1296_v16 }
  0x62   : > { %856 = vmatprep.subr.bf16.mxu0 %v1257_v9 }
  0x64   : > { %896 = vmatpush1.bf16.msra.mxu1 %v1298_v20 }
  0x65   : > { %857 = vmatpush1.bf16.msra.mxu0 %v1259_v11  ;;  %897 = vmatprep.subr.bf16.mxu1 %v1302_v22 }
  0x66   : > { %858 = vmatprep.subr.bf16.mxu0 %v1263_v13 }
  0x68   : > { %898 = vmatpush1.bf16.msra.mxu1 %v1304_v24 }
  0x69   : > { %859 = vmatpush1.bf16.msra.mxu0 %v1265_v15 }
  0x6a   : > { %860 = vmatprep.subr.bf16.mxu0 %v1269_v17 }
  0x6b   : > { %916 = vmatmul.mubr.bf16.vlgmr.msra.gmra.mrb[0].mxu1 %v1308_v27 }
  0x6d   : > { %861 = vmatpush1.bf16.msra.mxu0 %v1271_v21 }
  0x6e   : > { %862 = vmatprep.subr.bf16.mxu0 %v1275_v23 }
  0x71   : > { %863 = vmatpush1.bf16.msra.mxu0 %v1277_v25 }
  0x72   : > { %864 = vmatprep.subr.bf16.mxu0 %v1281_v26 }
  0x75   : > { %865 = vmatpush1.bf16.msra.mxu0 %v1283_v28 }
  0x76   : > { %866 = vmatprep.subr.bf16.mxu0 %v1287_v29 }
  0x79   : > { %867 = vmatpush1.bf16.msra.mxu0 %v1289_v30 }
  0x7a   : > { %868 = vmatprep.subr.bf16.mxu0 %v1293_v31 }
  0x7d   : > { %869 = vmatpush1.bf16.msra.mxu0 %v1295_v32 }
  0x7e   : > { %870 = vmatprep.subr.bf16.mxu0 %v1299_v33 }
  0x81   : > { %871 = vmatpush1.bf16.msra.mxu0 %v1301_v34 }
  0x82   : > { %872 = vmatprep.subr.bf16.mxu0 %v1305_v35 }
  0x85   : > { %873 = vmatpush1.bf16.msra.mxu0 %v1307_v36 }
  0x88   : > { %875 = vmatmul.mubr.bf16.vlgmr.msra.gmra.mrb[0].mxu0 %v1119_v37 }
 0x13e   : > { %v917_v38 = vpop.f32.mrb[0].mxu1 }
 0x13f   : > { %v919_v39 = vpop.f32.mrb[1].mxu1 }
 0x140   : > { %v921_v40 = vpop.f32.mrb[2].mxu1 }
 0x141   : > { %v922_v41 = vpop.f32.mrb[3].mxu1 }
 0x15b   : > { %v876_v43 = vpop.f32.mrb[0].mxu0  ;;  %931 = sbr.rel (%p1170_p13) target bundleno = 370 (0x172), region = 82 }
 0x15c   : > { %v918_v44 = vadd.f32 %v917_v38, %v876_v43  ;;  %v878_v46 = vpop.f32.mrb[1].mxu0 }
 0x15d   : > { %v920_v47 = vadd.f32 %v919_v39, %v878_v46  ;;  %v880_v48 = vpop.f32.mrb[2].mxu0 }
 0x15e   : > { %v924_v49 = vadd.f32 %v918_v44, %v539_v42  ;;  %v881_v50 = vpop.f32.mrb[3].mxu0 }
 0x15f   : > { %v925_v51 = vadd.f32 %v920_v47, %v540_v45 }
 0x160   : > { %926 = vst [vmem:[#allocation2] sm:$0xff] %v924_v49 }
 0x161   : > { %927 = vst [vmem:[#allocation2 + $0x8] sm:$0xff] %v925_v51 }
 0x167   : > { %v932_v58 = vld [vmem:[#allocation2] sm:$0xff] }
 0x168   : > { %v933_v59 = vld [vmem:[#allocation2 + $0x8] sm:$0xff]  ;;  %v946_v0 = vmul.f32 %v939_v60, %v932_v58 }
 0x169   : > { %v947_v1 = vmul.f32 %v943_v61, %v933_v59 }
 0x16a   : > { %v960_v2 = vadd.f32 %v953_v62, %v946_v0 }
 0x16b   : > { %v961_v3 = vadd.f32 %v957_v63, %v947_v1 }
 0x16c   : > { %v962_v4 = vmax.f32 %v960_v2, 0.0 }
 0x16d   : > { %v963_v5 = vmax.f32 %v961_v3, 0.0 }
 0x16f   : > { %v1175_v6 = vpack.c.bf16 %v963_v5, %v962_v4 }
 0x171   : > { %972 = vst [vmem:[%s1578_s12] sm:$0xff] %v1175_v6 }
 0x172 PF: > { %s14_s21 = sadd.s32 1, %s1365_s21   ;;  %s1671_s15 = smov %s1345_s16 }
 0x173   : > { %p11_p0 = scmp.ge.s32.totalorder %s14_s21, 14   ;;  %s1672_s16 = smov %s1445_s28 }
 0x174   : > { %s1673_s17 = smov %s1357_s19  ;;  %s1674_s18 = smov %s1361_s20 }
 0x175   : > { %s1675_s19 = smov %s1678_s22  ;;  %s1676_s20 = smov %s1682_s23 }
 0x176   :  { %13 = sbr.rel (!%p11_p0) target bundleno = 4 (0x4), region = 126 }

// kernel: resnet18_forward.39
= control target key start
LH: loop header
LB: loop body
LE: loop exit
PB: predicated region body
PF: predicated region fallthrough
CT: control target
= control target key end

     0   :  { %s1103_s15 = smov 0   ;;  %s1105_s16 = smov 0   ;;  %s1285_s0 = inlined_call_operand.vmem [shape: bf16[8,256], index: 0, kind: input, shape index: {}]   ;;  %s1286_s1 = inlined_call_operand.vmem [shape: bf16[256,512], index: 1, kind: input, shape index: {}]   ;;  %s1287_s2 = inlined_call_operand.vmem [shape: f32[1,512], index: 2, kind: input, shape index: {}]   ;;  %s1288_s3 = inlined_call_operand.vmem [shape: f32[1,512], index: 3, kind: input, shape index: {}]   ;;  %s1289_s4 = inlined_call_operand.vmem [shape: bf16[8,512], index: 4, kind: output, shape index: {}]  }
   0x1   :  { %s1107_s17 = smov 0   ;;  %s1109_s18 = smov 0  }
   0x2   :  { %s1111_s19 = smov 0  }
   0x3 LB: > { %s29_s20 = sadd.s32 1, %s1072_s18  ;;  %p77_p1 = scmp.ne.s32.totalorder %s1064_s16, %s1060_s15  ;;  %s1076_s19 = sphi %s1111_s19, %s14_s19   ;;  %s1072_s18 = sphi %s1109_s18, %s1293_s18   ;;  %s1068_s17 = sphi %s1107_s17, %s1292_s17   ;;  %s1064_s16 = sphi %s1105_s16, %s1291_s16   ;;  %s1060_s15 = sphi %s1103_s15, %s1290_s15  }
   0x4   : > { %p31_p0 = scmp.ge.s32.totalorder %s29_s20, 2  ;;  %p78_p2 = scmp.eq.s32.totalorder %s1076_s19, 0 }
   0x5   : > { %s70_s22 = sadd.s32 1, %s1064_s16  ;;  %p899_p5 = scmp.ge.s32.totalorder %s1076_s19, 2 }
   0x6   : > { %s1295_s20 = smov (%p31_p0, %s29_s20), 0  ;;  %p79_p3 = por %p78_p2, %p77_p1 }
   0x7   : > { %s66_s21 = ssub.s32 %s1072_s18, %s1295_s20  ;;  %196 = sbr.rel (%p899_p5) target bundleno = 34 (0x22), region = 20 }
   0x8   : > { %p68_p4 = scmp.eq.s32.totalorder %s66_s21, 0 }
   0xa   : > { %s1138_s23 = scalar_select %p68_p4, %s1064_s16, %s70_s22  }
   0xe   : > { %199 = sbr.rel (!%p79_p3) target bundleno = 34 (0x22), region = 24  ;;  %s201_s24 = sand.u32 (%p79_p3), 1, %s1064_s16  }
   0xf   : > { %s946_s25 = sshll.u32 (%p79_p3), %s1072_s18, 3  ;;  %s900_s26 = sshll.u32 (%p79_p3), %s201_s24, 8 }
  0x10   : > { %s1146_s29 = scalar_lea.vmem (%p79_p3), %s1286_s1, %s946_s25  ;;  %s1151_s30 = scalar_lea.vmem (%p79_p3), [#allocation3], %s900_s26 }
  0x11   : > { %v299_v0 = vld [vmem:[%s1146_s29] sm:$0xff] (%p79_p3)  ;;  %v301_v1 = vld [vmem:[%s1146_s29 + $0x10] sm:$0xff] (%p79_p3) }
  0x12   : > { %v303_v2 = vld [vmem:[%s1146_s29 + $0x20] sm:$0xff] (%p79_p3)  ;;  %300 = vst [vmem:[%s1151_s30] sm:$0xff] (%p79_p3), %v299_v0  ;;  %302 = vst [vmem:[%s1151_s30 + $0x8] sm:$0xff] (%p79_p3), %v301_v1  ;;  %v305_v3 = vld [vmem:[%s1146_s29 + $0x30] sm:$0xff] (%p79_p3) }
  0x13   : > { %304 = vst [vmem:[%s1151_s30 + $0x10] sm:$0xff] (%p79_p3), %v303_v2  ;;  %v307_v4 = vld [vmem:[%s1146_s29 + $0x40] sm:$0xff] (%p79_p3)  ;;  %v309_v5 = vld [vmem:[%s1146_s29 + $0x50] sm:$0xff] (%p79_p3)  ;;  %306 = vst [vmem:[%s1151_s30 + $0x18] sm:$0xff] (%p79_p3), %v305_v3 }
  0x14   : > { %308 = vst [vmem:[%s1151_s30 + $0x20] sm:$0xff] (%p79_p3), %v307_v4  ;;  %310 = vst [vmem:[%s1151_s30 + $0x28] sm:$0xff] (%p79_p3), %v309_v5  ;;  %v311_v6 = vld [vmem:[%s1146_s29 + $0x60] sm:$0xff] (%p79_p3)  ;;  %v313_v7 = vld [vmem:[%s1146_s29 + $0x70] sm:$0xff] (%p79_p3) }
  0x15   : > { %v315_v8 = vld [vmem:[%s1146_s29 + $0x80] sm:$0xff]  ;;  %312 = vst [vmem:[%s1151_s30 + $0x30] sm:$0xff] %v311_v6  ;;  %314 = vst [vmem:[%s1151_s30 + $0x38] sm:$0xff] %v313_v7  ;;  %v317_v9 = vld [vmem:[%s1146_s29 + $0x90] sm:$0xff] }
  0x16   : > { %316 = vst [vmem:[%s1151_s30 + $0x40] sm:$0xff] %v315_v8  ;;  %v319_v10 = vld [vmem:[%s1146_s29 + $0xa0] sm:$0xff]  ;;  %v321_v11 = vld [vmem:[%s1146_s29 + $0xb0] sm:$0xff]  ;;  %318 = vst [vmem:[%s1151_s30 + $0x48] sm:$0xff] %v317_v9 }
  0x17   : > { %320 = vst [vmem:[%s1151_s30 + $0x50] sm:$0xff] %v319_v10  ;;  %322 = vst [vmem:[%s1151_s30 + $0x58] sm:$0xff] %v321_v11  ;;  %v323_v12 = vld [vmem:[%s1146_s29 + $0xc0] sm:$0xff]  ;;  %v325_v13 = vld [vmem:[%s1146_s29 + $0xd0] sm:$0xff] }
  0x18   : > { %v327_v14 = vld [vmem:[%s1146_s29 + $0xe0] sm:$0xff]  ;;  %324 = vst [vmem:[%s1151_s30 + $0x60] sm:$0xff] %v323_v12  ;;  %326 = vst [vmem:[%s1151_s30 + $0x68] sm:$0xff] %v325_v13  ;;  %v329_v15 = vld [vmem:[%s1146_s29 + $0xf0] sm:$0xff] }
  0x19   : > { %328 = vst [vmem:[%s1151_s30 + $0x70] sm:$0xff] %v327_v14  ;;  %v331_v16 = vld [vmem:[%s1146_s29 + $0x100] sm:$0xff]  ;;  %v333_v17 = vld [vmem:[%s1146_s29 + $0x110] sm:$0xff]  ;;  %330 = vst [vmem:[%s1151_s30 + $0x78] sm:$0xff] %v329_v15 }
  0x1a   : > { %332 = vst [vmem:[%s1151_s30 + $0x80] sm:$0xff] %v331_v16  ;;  %334 = vst [vmem:[%s1151_s30 + $0x88] sm:$0xff] %v333_v17  ;;  %v335_v18 = vld [vmem:[%s1146_s29 + $0x120] sm:$0xff]  ;;  %v337_v19 = vld [vmem:[%s1146_s29 + $0x130] sm:$0xff] }
  0x1b   : > { %v339_v20 = vld [vmem:[%s1146_s29 + $0x140] sm:$0xff]  ;;  %336 = vst [vmem:[%s1151_s30 + $0x90] sm:$0xff] %v335_v18  ;;  %338 = vst [vmem:[%s1151_s30 + $0x98] sm:$0xff] %v337_v19  ;;  %v341_v21 = vld [vmem:[%s1146_s29 + $0x150] sm:$0xff] }
  0x1c   : > { %340 = vst [vmem:[%s1151_s30 + $0xa0] sm:$0xff] %v339_v20  ;;  %v343_v22 = vld [vmem:[%s1146_s29 + $0x160] sm:$0xff]  ;;  %v345_v23 = vld [vmem:[%s1146_s29 + $0x170] sm:$0xff]  ;;  %342 = vst [vmem:[%s1151_s30 + $0xa8] sm:$0xff] %v341_v21 }
  0x1d   : > { %344 = vst [vmem:[%s1151_s30 + $0xb0] sm:$0xff] %v343_v22  ;;  %346 = vst [vmem:[%s1151_s30 + $0xb8] sm:$0xff] %v345_v23  ;;  %v347_v24 = vld [vmem:[%s1146_s29 + $0x180] sm:$0xff]  ;;  %v349_v25 = vld [vmem:[%s1146_s29 + $0x190] sm:$0xff] }
  0x1e   : > { %v351_v26 = vld [vmem:[%s1146_s29 + $0x1a0] sm:$0xff]  ;;  %348 = vst [vmem:[%s1151_s30 + $0xc0] sm:$0xff] %v347_v24  ;;  %350 = vst [vmem:[%s1151_s30 + $0xc8] sm:$0xff] %v349_v25  ;;  %v353_v27 = vld [vmem:[%s1146_s29 + $0x1b0] sm:$0xff] }
  0x1f   : > { %352 = vst [vmem:[%s1151_s30 + $0xd0] sm:$0xff] %v351_v26  ;;  %v355_v28 = vld [vmem:[%s1146_s29 + $0x1c0] sm:$0xff]  ;;  %v357_v29 = vld [vmem:[%s1146_s29 + $0x1d0] sm:$0xff]  ;;  %354 = vst [vmem:[%s1151_s30 + $0xd8] sm:$0xff] %v353_v27 }
  0x20   : > { %356 = vst [vmem:[%s1151_s30 + $0xe0] sm:$0xff] %v355_v28  ;;  %358 = vst [vmem:[%s1151_s30 + $0xe8] sm:$0xff] %v357_v29  ;;  %v359_v30 = vld [vmem:[%s1146_s29 + $0x1e0] sm:$0xff]  ;;  %v361_v31 = vld [vmem:[%s1146_s29 + $0x1f0] sm:$0xff] }
  0x21   : > { %360 = vst [vmem:[%s1151_s30 + $0xf0] sm:$0xff] %v359_v30  ;;  %362 = vst [vmem:[%s1151_s30 + $0xf8] sm:$0xff] %v361_v31 }
  0x22 PF: > { %p903_p6 = scmp.ge.s32.totalorder %s1076_s19, 1  ;;  %p383_p7 = scmp.lt.s32.totalorder %s1076_s19, 3 }
  0x24   : > { %p384_p8 = pnand %p903_p6, %p383_p7 }
  0x25   : > { %s390_s5 = sand.u32 (!%p384_p8), 1, %s1060_s15   ;;  %v1220_v32 = vld [vmem:[%s1285_s0] sm:$0xff] (!%p384_p8)  ;;  %s905_s10 = sshll.u32 (!%p384_p8), %s1068_s17, 1  ;;  %v728_v3 = vlaneseq (!%p384_p8) }
  0x26   : > { %387 = sbr.rel (%p384_p8) target bundleno = 325 (0x145), region = 70  ;;  %s904_s8 = sshll.u32 (!%p384_p8), %s390_s5, 8  ;;  %v910_v33 = vcombine.high (!%p384_p8), %v1220_v32, %v1220_v32  ;;  %v909_v2 = vcombine.low (!%p384_p8), %v1220_v32, %v1220_v32 }
  0x27   : > { %s1224_s9 = scalar_lea.vmem (!%p384_p8), [#allocation3], %s904_s8  ;;  %p449_p9 = scmp.lt.s32.totalorder (!%p384_p8), %s905_s10, 3  ;;  %v729_v4 = vshrl.u32 (!%p384_p8), %v728_v3, 7 }
  0x28   : > { %v988_v34 = vld [vmem:[%s1224_s9 + $0x4] ss:$8 sps:$4 sm:$0xff] (!%p384_p8)   ;;  %708 = vmatprep.mubr.bf16.mxu0 (!%p384_p8), %v910_v33  ;;  %v990_v35 = vld [vmem:[%s1224_s9] ss:$8 sps:$4 sm:$0xff] (!%p384_p8)   ;;  %v991_v36 = vld [vmem:[%s1224_s9 + $0x14] ss:$8 sps:$4 sm:$0xff] (!%p384_p8)  }
  0x29   : > { %676 = vmatprep.subr.bf16.mxu0 (!%p384_p8), %v988_v34  ;;  %v993_v37 = vld [vmem:[%s1224_s9 + $0x10] ss:$8 sps:$4 sm:$0xff] (!%p384_p8)   ;;  %v994_v38 = vld [vmem:[%s1224_s9 + $0x24] ss:$8 sps:$4 sm:$0xff] (!%p384_p8)   ;;  %v996_v39 = vld [vmem:[%s1224_s9 + $0x20] ss:$8 sps:$4 sm:$0xff] (!%p384_p8)  }
  0x2a   : > { %677 = vmatpush1.bf16.msra.mxu0 (!%p384_p8), %v990_v35  ;;  %v997_v40 = vld [vmem:[%s1224_s9 + $0x34] ss:$8 sps:$4 sm:$0xff] (!%p384_p8)   ;;  %v999_v41 = vld [vmem:[%s1224_s9 + $0x30] ss:$8 sps:$4 sm:$0xff] (!%p384_p8)   ;;  %v1000_v42 = vld [vmem:[%s1224_s9 + $0x44] ss:$8 sps:$4 sm:$0xff] (!%p384_p8)  }
  0x2b   : > { %678 = vmatprep.subr.bf16.mxu0 (!%p384_p8), %v991_v36  ;;  %v1002_v43 = vld [vmem:[%s1224_s9 + $0x40] ss:$8 sps:$4 sm:$0xff] (!%p384_p8)   ;;  %v1003_v44 = vld [vmem:[%s1224_s9 + $0x54] ss:$8 sps:$4 sm:$0xff] (!%p384_p8)   ;;  %v1005_v45 = vld [vmem:[%s1224_s9 + $0x50] ss:$8 sps:$4 sm:$0xff] (!%p384_p8)  }
  0x2c   : > { %v1006_v46 = vld [vmem:[%s1224_s9 + $0x64] ss:$8 sps:$4 sm:$0xff] (!%p384_p8)   ;;  %v1008_v47 = vld [vmem:[%s1224_s9 + $0x60] ss:$8 sps:$4 sm:$0xff] (!%p384_p8)   ;;  %v1009_v48 = vld [vmem:[%s1224_s9 + $0x74] ss:$8 sps:$4 sm:$0xff] (!%p384_p8)  }
  0x2d   : > { %v1011_v49 = vld [vmem:[%s1224_s9 + $0x70] ss:$8 sps:$4 sm:$0xff]   ;;  %v1012_v50 = vld [vmem:[%s1224_s9 + $0x84] ss:$8 sps:$4 sm:$0xff]   ;;  %v1014_v51 = vld [vmem:[%s1224_s9 + $0x80] ss:$8 sps:$4 sm:$0xff]  }
  0x2e   : > { %679 = vmatpush1.bf16.msra.mxu0 %v993_v37  ;;  %v1015_v52 = vld [vmem:[%s1224_s9 + $0x94] ss:$8 sps:$4 sm:$0xff]   ;;  %v1017_v53 = vld [vmem:[%s1224_s9 + $0x90] ss:$8 sps:$4 sm:$0xff]   ;;  %v1018_v54 = vld [vmem:[%s1224_s9 + $0xa4] ss:$8 sps:$4 sm:$0xff]  }
  0x2f   : > { %680 = vmatprep.subr.bf16.mxu0 %v994_v38  ;;  %v1020_v55 = vld [vmem:[%s1224_s9 + $0xa0] ss:$8 sps:$4 sm:$0xff]   ;;  %v1021_v56 = vld [vmem:[%s1224_s9 + $0xb4] ss:$8 sps:$4 sm:$0xff]   ;;  %v1023_v57 = vld [vmem:[%s1224_s9 + $0xb0] ss:$8 sps:$4 sm:$0xff]  }
  0x30   : > { %v1024_v58 = vld [vmem:[%s1224_s9 + $0xc4] ss:$8 sps:$4 sm:$0xff]   ;;  %v1026_v59 = vld [vmem:[%s1224_s9 + $0xc0] ss:$8 sps:$4 sm:$0xff]   ;;  %v1027_v60 = vld [vmem:[%s1224_s9 + $0xd4] ss:$8 sps:$4 sm:$0xff]  }
  0x31   : > { %v1029_v61 = vld [vmem:[%s1224_s9 + $0xd0] ss:$8 sps:$4 sm:$0xff]   ;;  %v1030_v62 = vld [vmem:[%s1224_s9 + $0xe4] ss:$8 sps:$4 sm:$0xff]   ;;  %v1032_v63 = vld [vmem:[%s1224_s9 + $0xe0] ss:$8 sps:$4 sm:$0xff]  }
  0x32   : > { %681 = vmatpush1.bf16.msra.mxu0 %v996_v39  ;;  %v1033_v0 = vld [vmem:[%s1224_s9 + $0xf4] ss:$8 sps:$4 sm:$0xff]   ;;  %v1035_v1 = vld [vmem:[%s1224_s9 + $0xf0] ss:$8 sps:$4 sm:$0xff]   ;;  %s1297_s10 = smov (!%p449_p9, %s905_s10), 3  ;;  %v730_v5 = vsub.s32 0, %v729_v4 }
  0x33   : > { %682 = vmatprep.subr.bf16.mxu0 %v997_v40  ;;  %s451_s13 = scalar_lea.vmem %s1287_s2, %s1297_s10  ;;  %s456_s21 = scalar_lea.vmem %s1288_s3, %s1297_s10  ;;  %v734_v7 = vsub.s32 1, %v729_v4 }
  0x34   : > { %v726_v6 = vld [vmem:[%s451_s13] sm:$0x3]  ;;  %s908_s17 = sshll.u32 %s1297_s10, 2 }
  0x35   : > { %v740_v8 = vld [vmem:[%s456_s21] sm:$0x3]  ;;  %v731_v9 = vrot.slane %v726_v6, %v730_v5  ;;  %v735_v10 = vrot.slane %v726_v6, %v734_v7  ;;  %s466_s25 = scalar_lea.vmem %s1289_s4, %s908_s17 }
  0x36   : > { %683 = vmatpush1.bf16.msra.mxu0 %v999_v41  ;;  %v745_v11 = vrot.slane %v740_v8, %v730_v5  ;;  %v749_v13 = vrot.slane %v740_v8, %v734_v7 }
  0x37   : > { %684 = vmatprep.subr.bf16.mxu0 %v1000_v42 }
  0x3a   : > { %685 = vmatpush1.bf16.msra.mxu0 %v1002_v43 }
  0x3b   : > { %686 = vmatprep.subr.bf16.mxu0 %v1003_v44 }
  0x3e   : > { %687 = vmatpush1.bf16.msra.mxu0 %v1005_v45 }
  0x3f   : > { %688 = vmatprep.subr.bf16.mxu0 %v1006_v46 }
  0x42   : > { %689 = vmatpush1.bf16.msra.mxu0 %v1008_v47 }
  0x43   : > { %690 = vmatprep.subr.bf16.mxu0 %v1009_v48 }
  0x46   : > { %691 = vmatpush1.bf16.msra.mxu0 %v1011_v49 }
  0x47   : > { %692 = vmatprep.subr.bf16.mxu0 %v1012_v50 }
  0x4a   : > { %693 = vmatpush1.bf16.msra.mxu0 %v1014_v51 }
  0x4b   : > { %694 = vmatprep.subr.bf16.mxu0 %v1015_v52 }
  0x4e   : > { %695 = vmatpush1.bf16.msra.mxu0 %v1017_v53 }
  0x4f   : > { %696 = vmatprep.subr.bf16.mxu0 %v1018_v54 }
  0x52   : > { %697 = vmatpush1.bf16.msra.mxu0 %v1020_v55 }
  0x53   : > { %698 = vmatprep.subr.bf16.mxu0 %v1021_v56 }
  0x56   : > { %699 = vmatpush1.bf16.msra.mxu0 %v1023_v57 }
  0x57   : > { %700 = vmatprep.subr.bf16.mxu0 %v1024_v58 }
  0x5a   : > { %701 = vmatpush1.bf16.msra.mxu0 %v1026_v59 }
  0x5b   : > { %702 = vmatprep.subr.bf16.mxu0 %v1027_v60 }
  0x5e   : > { %703 = vmatpush1.bf16.msra.mxu0 %v1029_v61 }
  0x5f   : > { %704 = vmatprep.subr.bf16.mxu0 %v1030_v62 }
  0x62   : > { %705 = vmatpush1.bf16.msra.mxu0 %v1032_v63 }
  0x63   : > { %706 = vmatprep.subr.bf16.mxu0 %v1033_v0 }
  0x66   : > { %707 = vmatpush1.bf16.msra.mxu0 %v1035_v1 }
  0x69   : > { %709 = vmatmul.mubr.bf16.vlgmr.msra.gmra.mrb[0].mxu0 %v909_v2 }
 0x13c   : > { %v710_v12 = vpop.f32.mrb[0].mxu0 }
 0x13d   : > { %v738_v14 = vmul.f32 %v731_v9, %v710_v12  ;;  %v712_v15 = vpop.f32.mrb[1].mxu0 }
 0x13e   : > { %v739_v16 = vmul.f32 %v735_v10, %v712_v15  ;;  %v714_v17 = vpop.f32.mrb[2].mxu0 }
 0x13f   : > { %v752_v18 = vadd.f32 %v745_v11, %v738_v14  ;;  %v715_v19 = vpop.f32.mrb[3].mxu0 }
 0x140   : > { %v753_v20 = vadd.f32 %v749_v13, %v739_v16 }
 0x142   : > { %v947_v21 = vpack.c.bf16 %v753_v20, %v752_v18 }
 0x144   : > { %762 = vst [vmem:[%s466_s25] sm:$0xff] %v947_v21 }
 0x145 PF: > { %s14_s19 = sadd.s32 1, %s1076_s19   ;;  %s1290_s15 = smov %s1064_s16 }
 0x146   : > { %p11_p10 = scmp.ge.s32.totalorder %s14_s19, 4   ;;  %s1291_s16 = smov %s1138_s23 }
 0x147   : > { %s1292_s17 = smov %s1072_s18  ;;  %s1293_s18 = smov %s1295_s20 }
 0x148   :  { %13 = sbr.rel (!%p11_p10) target bundleno = 3 (0x3), region = 126 }

// kernel: resnet18_forward.41
= control target key start
LH: loop header
LB: loop body
LE: loop exit
PB: predicated region body
PF: predicated region fallthrough
CT: control target
= control target key end

     0   :  { %s1598_s15 = smov 0   ;;  %s1600_s16 = smov 0   ;;  %s1918_s0 = inlined_call_operand.vmem [shape: bf16[8,4608], index: 0, kind: input, shape index: {}]   ;;  %s1919_s1 = inlined_call_operand.vmem [shape: bf16[4608,512], index: 1, kind: input, shape index: {}]   ;;  %s1920_s2 = inlined_call_operand.vmem [shape: f32[1,512], index: 2, kind: input, shape index: {}]   ;;  %s1921_s3 = inlined_call_operand.vmem [shape: f32[1,512], index: 3, kind: input, shape index: {}]   ;;  %s1922_s4 = inlined_call_operand.vmem [shape: bf16[8,512], index: 4, kind: output, shape index: {}]  }
   0x1   :  { %s1602_s17 = smov 0   ;;  %s1604_s18 = smov 0  }
   0x2   :  { %s1606_s19 = smov 0   ;;  %s1608_s20 = smov 0  }
   0x3   :  { %s1610_s21 = smov 0  }
   0x4 LB: > { %s26_s22 = sadd.s32 1, %s1562_s19  ;;  %s29_s23 = sadd.s32 1, %s1566_s20  ;;  %s1570_s21 = sphi %s1610_s21, %s14_s21   ;;  %s1566_s20 = sphi %s1608_s20, %s1928_s20   ;;  %s1562_s19 = sphi %s1606_s19, %s1927_s19   ;;  %s1558_s18 = sphi %s1604_s18, %s1926_s18   ;;  %s1554_s17 = sphi %s1602_s17, %s1925_s17   ;;  %s1550_s16 = sphi %s1600_s16, %s1924_s16   ;;  %s1546_s15 = sphi %s1598_s15, %s1923_s15  }
   0x5   : > { %p27_p0 = scmp.ge.s32.totalorder %s26_s22, 9  ;;  %p77_p1 = scmp.ne.s32.totalorder %s1550_s16, %s1546_s15 }
   0x6   : > { %p78_p2 = scmp.eq.s32.totalorder %s1570_s21, 0  ;;  %s70_s27 = sadd.s32 1, %s1550_s16 }
   0x7   : > { %s1930_s22 = smov (%p27_p0, %s26_s22), 0  ;;  %s1932_s23 = smov (!%p27_p0, %s29_s23), %s1566_s20 }
   0x8   : > { %p79_p3 = por %p78_p2, %p77_p1  ;;  %p31_p4 = scmp.ge.s32.totalorder %s1932_s23, 2 }
   0x9   : > { %s65_s24 = ssub.s32 %s1562_s19, %s1930_s22  ;;  %p1270_p6 = scmp.ge.s32.totalorder %s1570_s21, 18 }
   0xa   : > { %s1934_s23 = smov (%p31_p4, %s1932_s23), 0 }
   0xb   : > { %s66_s25 = ssub.s32 %s1566_s20, %s1934_s23  ;;  %183 = sbr.rel (%p1270_p6) target bundleno = 57 (0x39), region = 16 }
   0xc   : > { %s67_s26 = sor.u32 %s66_s25, %s65_s24 }
   0xd   : > { %p68_p5 = scmp.eq.s32.totalorder %s67_s26, 0 }
   0xf   : > { %s1649_s28 = scalar_select %p68_p5, %s1550_s16, %s70_s27  }
  0x12   : > { %199 = sbr.rel (!%p79_p3) target bundleno = 57 (0x39), region = 24  ;;  %s201_s29 = sand.u32 (%p79_p3), 1, %s1550_s16  }
  0x13   : > { %s1273_s30 = sshll.u32 (%p79_p3), %s1566_s20, 1  ;;  %s1271_s5 = sshll.u32 (%p79_p3), %s201_s29, 9 }
  0x14   : > { %s1357_s6 = sshll.u32 (%p79_p3), %s1562_s19, 8  ;;  %s1663_s12 = scalar_lea.vmem (%p79_p3), [#allocation3], %s1271_s5 }
  0x15   : > { %s207_s7 = sadd.s32 (%p79_p3), %s1357_s6, %s1273_s30 }
  0x16   : > { %s1275_s8 = sshll.u32 (%p79_p3), %s207_s7, 2 }
  0x17   : > { %s1658_s11 = scalar_lea.vmem (%p79_p3), %s1919_s1, %s1275_s8 }
  0x18   : > { %v363_v0 = vld [vmem:[%s1658_s11] sm:$0xff] (%p79_p3)  ;;  %v365_v1 = vld [vmem:[%s1658_s11 + $0x10] sm:$0xff] (%p79_p3) }
  0x19   : > { %v367_v2 = vld [vmem:[%s1658_s11 + $0x20] sm:$0xff]  ;;  %364 = vst [vmem:[%s1663_s12] sm:$0xff] %v363_v0  ;;  %366 = vst [vmem:[%s1663_s12 + $0x8] sm:$0xff] %v365_v1  ;;  %v369_v3 = vld [vmem:[%s1658_s11 + $0x30] sm:$0xff] }
  0x1a   : > { %368 = vst [vmem:[%s1663_s12 + $0x10] sm:$0xff] %v367_v2  ;;  %v371_v4 = vld [vmem:[%s1658_s11 + $0x40] sm:$0xff]  ;;  %v373_v5 = vld [vmem:[%s1658_s11 + $0x50] sm:$0xff]  ;;  %370 = vst [vmem:[%s1663_s12 + $0x18] sm:$0xff] %v369_v3 }
  0x1b   : > { %372 = vst [vmem:[%s1663_s12 + $0x20] sm:$0xff] %v371_v4  ;;  %374 = vst [vmem:[%s1663_s12 + $0x28] sm:$0xff] %v373_v5  ;;  %v375_v6 = vld [vmem:[%s1658_s11 + $0x60] sm:$0xff]  ;;  %v377_v7 = vld [vmem:[%s1658_s11 + $0x70] sm:$0xff] }
  0x1c   : > { %v379_v8 = vld [vmem:[%s1658_s11 + $0x80] sm:$0xff]  ;;  %376 = vst [vmem:[%s1663_s12 + $0x30] sm:$0xff] %v375_v6  ;;  %378 = vst [vmem:[%s1663_s12 + $0x38] sm:$0xff] %v377_v7  ;;  %v381_v9 = vld [vmem:[%s1658_s11 + $0x90] sm:$0xff] }
  0x1d   : > { %380 = vst [vmem:[%s1663_s12 + $0x40] sm:$0xff] %v379_v8  ;;  %v383_v10 = vld [vmem:[%s1658_s11 + $0xa0] sm:$0xff]  ;;  %v385_v11 = vld [vmem:[%s1658_s11 + $0xb0] sm:$0xff]  ;;  %382 = vst [vmem:[%s1663_s12 + $0x48] sm:$0xff] %v381_v9 }
  0x1e   : > { %384 = vst [vmem:[%s1663_s12 + $0x50] sm:$0xff] %v383_v10  ;;  %386 = vst [vmem:[%s1663_s12 + $0x58] sm:$0xff] %v385_v11  ;;  %v387_v12 = vld [vmem:[%s1658_s11 + $0xc0] sm:$0xff]  ;;  %v389_v13 = vld [vmem:[%s1658_s11 + $0xd0] sm:$0xff] }
  0x1f   : > { %v391_v14 = vld [vmem:[%s1658_s11 + $0xe0] sm:$0xff]  ;;  %388 = vst [vmem:[%s1663_s12 + $0x60] sm:$0xff] %v387_v12  ;;  %390 = vst [vmem:[%s1663_s12 + $0x68] sm:$0xff] %v389_v13  ;;  %v393_v15 = vld [vmem:[%s1658_s11 + $0xf0] sm:$0xff] }
  0x20   : > { %392 = vst [vmem:[%s1663_s12 + $0x70] sm:$0xff] %v391_v14  ;;  %v395_v16 = vld [vmem:[%s1658_s11 + $0x100] sm:$0xff]  ;;  %v397_v17 = vld [vmem:[%s1658_s11 + $0x110] sm:$0xff]  ;;  %394 = vst [vmem:[%s1663_s12 + $0x78] sm:$0xff] %v393_v15 }
  0x21   : > { %396 = vst [vmem:[%s1663_s12 + $0x80] sm:$0xff] %v395_v16  ;;  %398 = vst [vmem:[%s1663_s12 + $0x88] sm:$0xff] %v397_v17  ;;  %v399_v18 = vld [vmem:[%s1658_s11 + $0x120] sm:$0xff]  ;;  %v401_v19 = vld [vmem:[%s1658_s11 + $0x130] sm:$0xff] }
  0x22   : > { %v403_v20 = vld [vmem:[%s1658_s11 + $0x140] sm:$0xff]  ;;  %400 = vst [vmem:[%s1663_s12 + $0x90] sm:$0xff] %v399_v18  ;;  %402 = vst [vmem:[%s1663_s12 + $0x98] sm:$0xff] %v401_v19  ;;  %v405_v21 = vld [vmem:[%s1658_s11 + $0x150] sm:$0xff] }
  0x23   : > { %404 = vst [vmem:[%s1663_s12 + $0xa0] sm:$0xff] %v403_v20  ;;  %v407_v22 = vld [vmem:[%s1658_s11 + $0x160] sm:$0xff]  ;;  %v409_v23 = vld [vmem:[%s1658_s11 + $0x170] sm:$0xff]  ;;  %406 = vst [vmem:[%s1663_s12 + $0xa8] sm:$0xff] %v405_v21 }
  0x24   : > { %408 = vst [vmem:[%s1663_s12 + $0xb0] sm:$0xff] %v407_v22  ;;  %410 = vst [vmem:[%s1663_s12 + $0xb8] sm:$0xff] %v409_v23  ;;  %v411_v24 = vld [vmem:[%s1658_s11 + $0x180] sm:$0xff]  ;;  %v413_v25 = vld [vmem:[%s1658_s11 + $0x190] sm:$0xff] }
  0x25   : > { %v415_v26 = vld [vmem:[%s1658_s11 + $0x1a0] sm:$0xff]  ;;  %412 = vst [vmem:[%s1663_s12 + $0xc0] sm:$0xff] %v411_v24  ;;  %414 = vst [vmem:[%s1663_s12 + $0xc8] sm:$0xff] %v413_v25  ;;  %v417_v27 = vld [vmem:[%s1658_s11 + $0x1b0] sm:$0xff] }
  0x26   : > { %416 = vst [vmem:[%s1663_s12 + $0xd0] sm:$0xff] %v415_v26  ;;  %v419_v28 = vld [vmem:[%s1658_s11 + $0x1c0] sm:$0xff]  ;;  %v421_v29 = vld [vmem:[%s1658_s11 + $0x1d0] sm:$0xff]  ;;  %418 = vst [vmem:[%s1663_s12 + $0xd8] sm:$0xff] %v417_v27 }
  0x27   : > { %420 = vst [vmem:[%s1663_s12 + $0xe0] sm:$0xff] %v419_v28  ;;  %422 = vst [vmem:[%s1663_s12 + $0xe8] sm:$0xff] %v421_v29  ;;  %v423_v30 = vld [vmem:[%s1658_s11 + $0x1e0] sm:$0xff]  ;;  %v425_v31 = vld [vmem:[%s1658_s11 + $0x1f0] sm:$0xff] }
  0x28   : > { %v427_v32 = vld [vmem:[%s1658_s11 + $0x200] sm:$0xff]  ;;  %424 = vst [vmem:[%s1663_s12 + $0xf0] sm:$0xff] %v423_v30  ;;  %426 = vst [vmem:[%s1663_s12 + $0xf8] sm:$0xff] %v425_v31  ;;  %v429_v33 = vld [vmem:[%s1658_s11 + $0x210] sm:$0xff] }
  0x29   : > { %428 = vst [vmem:[%s1663_s12 + $0x100] sm:$0xff] %v427_v32  ;;  %v431_v34 = vld [vmem:[%s1658_s11 + $0x220] sm:$0xff]  ;;  %v433_v35 = vld [vmem:[%s1658_s11 + $0x230] sm:$0xff]  ;;  %430 = vst [vmem:[%s1663_s12 + $0x108] sm:$0xff] %v429_v33 }
  0x2a   : > { %432 = vst [vmem:[%s1663_s12 + $0x110] sm:$0xff] %v431_v34  ;;  %434 = vst [vmem:[%s1663_s12 + $0x118] sm:$0xff] %v433_v35  ;;  %v435_v36 = vld [vmem:[%s1658_s11 + $0x240] sm:$0xff]  ;;  %v437_v37 = vld [vmem:[%s1658_s11 + $0x250] sm:$0xff] }
  0x2b   : > { %v439_v38 = vld [vmem:[%s1658_s11 + $0x260] sm:$0xff]  ;;  %436 = vst [vmem:[%s1663_s12 + $0x120] sm:$0xff] %v435_v36  ;;  %438 = vst [vmem:[%s1663_s12 + $0x128] sm:$0xff] %v437_v37  ;;  %v441_v39 = vld [vmem:[%s1658_s11 + $0x270] sm:$0xff] }
  0x2c   : > { %440 = vst [vmem:[%s1663_s12 + $0x130] sm:$0xff] %v439_v38  ;;  %v443_v40 = vld [vmem:[%s1658_s11 + $0x280] sm:$0xff]  ;;  %v445_v41 = vld [vmem:[%s1658_s11 + $0x290] sm:$0xff]  ;;  %442 = vst [vmem:[%s1663_s12 + $0x138] sm:$0xff] %v441_v39 }
  0x2d   : > { %444 = vst [vmem:[%s1663_s12 + $0x140] sm:$0xff] %v443_v40  ;;  %446 = vst [vmem:[%s1663_s12 + $0x148] sm:$0xff] %v445_v41  ;;  %v447_v42 = vld [vmem:[%s1658_s11 + $0x2a0] sm:$0xff]  ;;  %v449_v43 = vld [vmem:[%s1658_s11 + $0x2b0] sm:$0xff] }
  0x2e   : > { %v451_v44 = vld [vmem:[%s1658_s11 + $0x2c0] sm:$0xff]  ;;  %448 = vst [vmem:[%s1663_s12 + $0x150] sm:$0xff] %v447_v42  ;;  %450 = vst [vmem:[%s1663_s12 + $0x158] sm:$0xff] %v449_v43  ;;  %v453_v45 = vld [vmem:[%s1658_s11 + $0x2d0] sm:$0xff] }
  0x2f   : > { %452 = vst [vmem:[%s1663_s12 + $0x160] sm:$0xff] %v451_v44  ;;  %v455_v46 = vld [vmem:[%s1658_s11 + $0x2e0] sm:$0xff]  ;;  %v457_v47 = vld [vmem:[%s1658_s11 + $0x2f0] sm:$0xff]  ;;  %454 = vst [vmem:[%s1663_s12 + $0x168] sm:$0xff] %v453_v45 }
  0x30   : > { %456 = vst [vmem:[%s1663_s12 + $0x170] sm:$0xff] %v455_v46  ;;  %458 = vst [vmem:[%s1663_s12 + $0x178] sm:$0xff] %v457_v47  ;;  %v459_v48 = vld [vmem:[%s1658_s11 + $0x300] sm:$0xff]  ;;  %v461_v49 = vld [vmem:[%s1658_s11 + $0x310] sm:$0xff] }
  0x31   : > { %v463_v50 = vld [vmem:[%s1658_s11 + $0x320] sm:$0xff]  ;;  %460 = vst [vmem:[%s1663_s12 + $0x180] sm:$0xff] %v459_v48  ;;  %462 = vst [vmem:[%s1663_s12 + $0x188] sm:$0xff] %v461_v49  ;;  %v465_v51 = vld [vmem:[%s1658_s11 + $0x330] sm:$0xff] }
  0x32   : > { %464 = vst [vmem:[%s1663_s12 + $0x190] sm:$0xff] %v463_v50  ;;  %v467_v52 = vld [vmem:[%s1658_s11 + $0x340] sm:$0xff]  ;;  %v469_v53 = vld [vmem:[%s1658_s11 + $0x350] sm:$0xff]  ;;  %466 = vst [vmem:[%s1663_s12 + $0x198] sm:$0xff] %v465_v51 }
  0x33   : > { %468 = vst [vmem:[%s1663_s12 + $0x1a0] sm:$0xff] %v467_v52  ;;  %470 = vst [vmem:[%s1663_s12 + $0x1a8] sm:$0xff] %v469_v53  ;;  %v471_v54 = vld [vmem:[%s1658_s11 + $0x360] sm:$0xff]  ;;  %v473_v55 = vld [vmem:[%s1658_s11 + $0x370] sm:$0xff] }
  0x34   : > { %v475_v56 = vld [vmem:[%s1658_s11 + $0x380] sm:$0xff]  ;;  %472 = vst [vmem:[%s1663_s12 + $0x1b0] sm:$0xff] %v471_v54  ;;  %474 = vst [vmem:[%s1663_s12 + $0x1b8] sm:$0xff] %v473_v55  ;;  %v477_v57 = vld [vmem:[%s1658_s11 + $0x390] sm:$0xff] }
  0x35   : > { %476 = vst [vmem:[%s1663_s12 + $0x1c0] sm:$0xff] %v475_v56  ;;  %v479_v58 = vld [vmem:[%s1658_s11 + $0x3a0] sm:$0xff]  ;;  %v481_v59 = vld [vmem:[%s1658_s11 + $0x3b0] sm:$0xff]  ;;  %478 = vst [vmem:[%s1663_s12 + $0x1c8] sm:$0xff] %v477_v57 }
  0x36   : > { %480 = vst [vmem:[%s1663_s12 + $0x1d0] sm:$0xff] %v479_v58  ;;  %482 = vst [vmem:[%s1663_s12 + $0x1d8] sm:$0xff] %v481_v59  ;;  %v483_v60 = vld [vmem:[%s1658_s11 + $0x3c0] sm:$0xff]  ;;  %v485_v61 = vld [vmem:[%s1658_s11 + $0x3d0] sm:$0xff] }
  0x37   : > { %v487_v62 = vld [vmem:[%s1658_s11 + $0x3e0] sm:$0xff]  ;;  %484 = vst [vmem:[%s1663_s12 + $0x1e0] sm:$0xff] %v483_v60  ;;  %486 = vst [vmem:[%s1663_s12 + $0x1e8] sm:$0xff] %v485_v61  ;;  %v489_v63 = vld [vmem:[%s1658_s11 + $0x3f0] sm:$0xff] }
  0x38   : > { %488 = vst [vmem:[%s1663_s12 + $0x1f0] sm:$0xff] %v487_v62  ;;  %490 = vst [vmem:[%s1663_s12 + $0x1f8] sm:$0xff] %v489_v63 }
  0x39 PF: > { %p1276_p7 = scmp.ge.s32.totalorder %s1570_s21, 1  ;;  %p511_p8 = scmp.lt.s32.totalorder %s1570_s21, 19 }
  0x3b   : > { %p512_p9 = pnand %p1276_p7, %p511_p8 }
  0x3c   : > { %s518_s13 = sand.u32 (!%p512_p9), 1, %s1546_s15   ;;  %s1278_s14 = sshll.u32 (!%p512_p9), %s1554_s17, 2 }
  0x3d   : > { %515 = sbr.rel (%p512_p9) target bundleno = 378 (0x17a), region = 70  ;;  %s1277_s24 = sshll.u32 (!%p512_p9), %s518_s13, 9 }
  0x3e   : > { %p567_p10 = scmp.lt.s32.totalorder (!%p512_p9), %s1278_s14, 35  ;;  %s1280_s25 = sshll.u32 (!%p512_p9), %s1558_s18, 1 }
  0x3f   : > { %p577_p11 = scmp.lt.s32.totalorder (!%p512_p9), %s1280_s25, 3  ;;  %s1816_s13 = scalar_lea.vmem (!%p512_p9), [#allocation3], %s1277_s24 }
  0x40   : > { %p1284_p12 = scmp.ne.s32.totalorder (!%p512_p9), %s1554_s17, 0 }
  0x44   : > { %s1936_s14 = smov (!%p567_p10, %s1278_s14), 35  ;;  %s1938_s25 = smov (!%p577_p11, %s1280_s25), 3 }
  0x45   : > { %s1279_s26 = sshll.u32 %s1936_s14, 2  ;;  %s579_s15 = scalar_lea.vmem %s1920_s2, %s1938_s25  ;;  %v1572_v0 = vmov (!%p1284_p12), 0.0  }
  0x46   : > { %s1798_s30 = scalar_lea.vmem %s1918_s0, %s1279_s26  ;;  %s584_s18 = scalar_lea.vmem %s1921_s3, %s1938_s25  ;;  %600 = vst [vmem:[#allocation2] sm:$0xff] (!%p1284_p12), %v1572_v0  ;;  %601 = vst [vmem:[#allocation2 + $0x8] sm:$0xff] (!%p1284_p12), %v1572_v0 }
  0x47   : > { %s1283_s9 = sshll.u32 %s1938_s25, 2  ;;  %599 = sbr.rel (%p1284_p12) target bundleno = 78 (0x4e), region = 78 }
  0x48   : > { %s1814_s12 = scalar_lea.vmem %s1922_s4, %s1283_s9 }
  0x4e PF: > { %v1416_v1 = vld [vmem:[%s1816_s13 + $0x4] ss:$8 sps:$4 sm:$0xff]   ;;  %v1420_v3 = vld [vmem:[%s1816_s13] ss:$8 sps:$4 sm:$0xff]   ;;  %v1422_v5 = vld [vmem:[%s1816_s13 + $0x14] ss:$8 sps:$4 sm:$0xff]  }
  0x4f   : > { %v1418_v2 = vld [vmem:[%s1816_s13 + $0x104] ss:$8 sps:$4 sm:$0xff]   ;;  %1004 = vmatprep.subr.bf16.mxu0 %v1416_v1  ;;  %v1421_v4 = vld [vmem:[%s1816_s13 + $0x100] ss:$8 sps:$4 sm:$0xff]   ;;  %v1424_v6 = vld [vmem:[%s1816_s13 + $0x114] ss:$8 sps:$4 sm:$0xff]  }
  0x50   : > { %1045 = vmatprep.subr.bf16.mxu1 %v1418_v2  ;;  %1005 = vmatpush1.bf16.msra.mxu0 %v1420_v3  ;;  %v1426_v7 = vld [vmem:[%s1816_s13 + $0x10] ss:$8 sps:$4 sm:$0xff]   ;;  %v1428_v9 = vld [vmem:[%s1816_s13 + $0x24] ss:$8 sps:$4 sm:$0xff]   ;;  %v1432_v11 = vld [vmem:[%s1816_s13 + $0x20] ss:$8 sps:$4 sm:$0xff]  }
  0x51   : > { %1046 = vmatpush1.bf16.msra.mxu1 %v1421_v4  ;;  %1006 = vmatprep.subr.bf16.mxu0 %v1422_v5  ;;  %v1427_v8 = vld [vmem:[%s1816_s13 + $0x110] ss:$8 sps:$4 sm:$0xff]   ;;  %v1430_v10 = vld [vmem:[%s1816_s13 + $0x124] ss:$8 sps:$4 sm:$0xff]   ;;  %v1433_v12 = vld [vmem:[%s1816_s13 + $0x120] ss:$8 sps:$4 sm:$0xff]  }
  0x52   : > { %1047 = vmatprep.subr.bf16.mxu1 %v1424_v6  ;;  %v1434_v13 = vld [vmem:[%s1816_s13 + $0x34] ss:$8 sps:$4 sm:$0xff]   ;;  %v1438_v15 = vld [vmem:[%s1816_s13 + $0x30] ss:$8 sps:$4 sm:$0xff]   ;;  %v1440_v17 = vld [vmem:[%s1816_s13 + $0x44] ss:$8 sps:$4 sm:$0xff]  }
  0x53   : > { %v1436_v14 = vld [vmem:[%s1816_s13 + $0x134] ss:$8 sps:$4 sm:$0xff]   ;;  %v1439_v16 = vld [vmem:[%s1816_s13 + $0x130] ss:$8 sps:$4 sm:$0xff]   ;;  %v1442_v18 = vld [vmem:[%s1816_s13 + $0x144] ss:$8 sps:$4 sm:$0xff]  }
  0x54   : > { %1007 = vmatpush1.bf16.msra.mxu0 %v1426_v7  ;;  %v1444_v19 = vld [vmem:[%s1816_s13 + $0x40] ss:$8 sps:$4 sm:$0xff]   ;;  %v1446_v21 = vld [vmem:[%s1816_s13 + $0x54] ss:$8 sps:$4 sm:$0xff]   ;;  %v1450_v23 = vld [vmem:[%s1816_s13 + $0x50] ss:$8 sps:$4 sm:$0xff]  }
  0x55   : > { %1048 = vmatpush1.bf16.msra.mxu1 %v1427_v8  ;;  %1008 = vmatprep.subr.bf16.mxu0 %v1428_v9  ;;  %v1445_v20 = vld [vmem:[%s1816_s13 + $0x140] ss:$8 sps:$4 sm:$0xff]   ;;  %v1448_v22 = vld [vmem:[%s1816_s13 + $0x154] ss:$8 sps:$4 sm:$0xff]   ;;  %v1451_v24 = vld [vmem:[%s1816_s13 + $0x150] ss:$8 sps:$4 sm:$0xff]  }
  0x56   : > { %1049 = vmatprep.subr.bf16.mxu1 %v1430_v10  ;;  %v1452_v25 = vld [vmem:[%s1816_s13 + $0x64] ss:$8 sps:$4 sm:$0xff]   ;;  %v1456_v27 = vld [vmem:[%s1816_s13 + $0x60] ss:$8 sps:$4 sm:$0xff]   ;;  %v1458_v29 = vld [vmem:[%s1816_s13 + $0x74] ss:$8 sps:$4 sm:$0xff]  }
  0x57   : > { %v1454_v26 = vld [vmem:[%s1816_s13 + $0x164] ss:$8 sps:$4 sm:$0xff]   ;;  %v1457_v28 = vld [vmem:[%s1816_s13 + $0x160] ss:$8 sps:$4 sm:$0xff]   ;;  %v1460_v30 = vld [vmem:[%s1816_s13 + $0x174] ss:$8 sps:$4 sm:$0xff]  }
  0x58   : > { %1009 = vmatpush1.bf16.msra.mxu0 %v1432_v11  ;;  %v1462_v31 = vld [vmem:[%s1816_s13 + $0x70] ss:$8 sps:$4 sm:$0xff]   ;;  %v1464_v33 = vld [vmem:[%s1816_s13 + $0x84] ss:$8 sps:$4 sm:$0xff]   ;;  %v1468_v35 = vld [vmem:[%s1816_s13 + $0x80] ss:$8 sps:$4 sm:$0xff]  }
  0x59   : > { %1050 = vmatpush1.bf16.msra.mxu1 %v1433_v12  ;;  %1010 = vmatprep.subr.bf16.mxu0 %v1434_v13  ;;  %v1463_v32 = vld [vmem:[%s1816_s13 + $0x170] ss:$8 sps:$4 sm:$0xff]   ;;  %v1466_v34 = vld [vmem:[%s1816_s13 + $0x184] ss:$8 sps:$4 sm:$0xff]   ;;  %v1469_v36 = vld [vmem:[%s1816_s13 + $0x180] ss:$8 sps:$4 sm:$0xff]  }
  0x5a   : > { %1051 = vmatprep.subr.bf16.mxu1 %v1436_v14  ;;  %v1470_v37 = vld [vmem:[%s1816_s13 + $0x94] ss:$8 sps:$4 sm:$0xff]   ;;  %v1474_v39 = vld [vmem:[%s1816_s13 + $0x90] ss:$8 sps:$4 sm:$0xff]   ;;  %v1476_v41 = vld [vmem:[%s1816_s13 + $0xa4] ss:$8 sps:$4 sm:$0xff]  }
  0x5b   : > { %v1472_v38 = vld [vmem:[%s1816_s13 + $0x194] ss:$8 sps:$4 sm:$0xff]   ;;  %v1475_v40 = vld [vmem:[%s1816_s13 + $0x190] ss:$8 sps:$4 sm:$0xff]   ;;  %v1478_v42 = vld [vmem:[%s1816_s13 + $0x1a4] ss:$8 sps:$4 sm:$0xff]  }
  0x5c   : > { %1011 = vmatpush1.bf16.msra.mxu0 %v1438_v15  ;;  %v1480_v43 = vld [vmem:[%s1816_s13 + $0xa0] ss:$8 sps:$4 sm:$0xff]   ;;  %v1482_v45 = vld [vmem:[%s1816_s13 + $0xb4] ss:$8 sps:$4 sm:$0xff]   ;;  %v1486_v50 = vld [vmem:[%s1816_s13 + $0xb0] ss:$8 sps:$4 sm:$0xff]  }
  0x5d   : > { %1052 = vmatpush1.bf16.msra.mxu1 %v1439_v16  ;;  %1012 = vmatprep.subr.bf16.mxu0 %v1440_v17  ;;  %v1481_v44 = vld [vmem:[%s1816_s13 + $0x1a0] ss:$8 sps:$4 sm:$0xff]   ;;  %v1484_v46 = vld [vmem:[%s1816_s13 + $0x1b4] ss:$8 sps:$4 sm:$0xff]   ;;  %v1487_v51 = vld [vmem:[%s1816_s13 + $0x1b0] ss:$8 sps:$4 sm:$0xff]  }
  0x5e   : > { %1053 = vmatprep.subr.bf16.mxu1 %v1442_v18  ;;  %v604_v47 = vld [vmem:[%s1798_s30] sm:$0xff]  ;;  %v605_v49 = vld [vmem:[%s1798_s30 + $0x8] sm:$0xff]  ;;  %v1488_v53 = vld [vmem:[%s1816_s13 + $0xc4] ss:$8 sps:$4 sm:$0xff]   ;;  %p1353_p13 = scmp.ne.s32.totalorder %s1554_s17, 8 }
  0x5f   : > { %v1286_v48 = vcombine.high %v604_v47, %v604_v47  ;;  %v1288_v52 = vcombine.high %v605_v49, %v605_v49  ;;  %v1490_v54 = vld [vmem:[%s1816_s13 + $0x1c4] ss:$8 sps:$4 sm:$0xff]   ;;  %v1492_v55 = vld [vmem:[%s1816_s13 + $0xc0] ss:$8 sps:$4 sm:$0xff]   ;;  %v1494_v57 = vld [vmem:[%s1816_s13 + $0xd4] ss:$8 sps:$4 sm:$0xff]   ;;  %v1285_v5 = vcombine.low %v604_v47, %v604_v47  ;;  %v1287_v6 = vcombine.low %v605_v49, %v605_v49 }
  0x60   : > { %1013 = vmatpush1.bf16.msra.mxu0 %v1444_v19  ;;  %v1493_v56 = vld [vmem:[%s1816_s13 + $0x1c0] ss:$8 sps:$4 sm:$0xff]   ;;  %v1496_v58 = vld [vmem:[%s1816_s13 + $0x1d4] ss:$8 sps:$4 sm:$0xff]   ;;  %v1498_v59 = vld [vmem:[%s1816_s13 + $0xd0] ss:$8 sps:$4 sm:$0xff]  }
  0x61   : > { %1054 = vmatpush1.bf16.msra.mxu1 %v1445_v20  ;;  %1014 = vmatprep.subr.bf16.mxu0 %v1446_v21  ;;  %v1499_v60 = vld [vmem:[%s1816_s13 + $0x1d0] ss:$8 sps:$4 sm:$0xff]   ;;  %v1500_v61 = vld [vmem:[%s1816_s13 + $0xe4] ss:$8 sps:$4 sm:$0xff]   ;;  %v1504_v63 = vld [vmem:[%s1816_s13 + $0xe0] ss:$8 sps:$4 sm:$0xff]   ;;  %v1098_v21 = vlaneseq (!%p1353_p13) }
  0x62   : > { %1055 = vmatprep.subr.bf16.mxu1 %v1448_v22  ;;  %1036 = vmatprep.mubr.bf16.mxu0 %v1286_v48  ;;  %v1502_v62 = vld [vmem:[%s1816_s13 + $0x1e4] ss:$8 sps:$4 sm:$0xff]   ;;  %v1505_v0 = vld [vmem:[%s1816_s13 + $0x1e0] ss:$8 sps:$4 sm:$0xff]   ;;  %v1506_v1 = vld [vmem:[%s1816_s13 + $0xf4] ss:$8 sps:$4 sm:$0xff]  }
  0x63   : > { %1077 = vmatprep.mubr.bf16.mxu1 %v1288_v52  ;;  %v1508_v2 = vld [vmem:[%s1816_s13 + $0x1f4] ss:$8 sps:$4 sm:$0xff]   ;;  %v1510_v3 = vld [vmem:[%s1816_s13 + $0xf0] ss:$8 sps:$4 sm:$0xff]   ;;  %v1099_v22 = vshrl.u32 (!%p1353_p13), %v1098_v21, 7 }
  0x64   : > { %1015 = vmatpush1.bf16.msra.mxu0 %v1450_v23  ;;  %v1511_v4 = vld [vmem:[%s1816_s13 + $0x1f0] ss:$8 sps:$4 sm:$0xff]  }
  0x65   : > { %1056 = vmatpush1.bf16.msra.mxu1 %v1451_v24  ;;  %1016 = vmatprep.subr.bf16.mxu0 %v1452_v25  ;;  %v602_v8 = vld [vmem:[#allocation2] sm:$0xff]  ;;  %v603_v12 = vld [vmem:[#allocation2 + $0x8] sm:$0xff]  ;;  %v1100_v25 = vsub.s32 (!%p1353_p13), 0, %v1099_v22 }
  0x66   : > { %1057 = vmatprep.subr.bf16.mxu1 %v1454_v26  ;;  %v1096_v23 = vld [vmem:[%s579_s15] sm:$0x3] (!%p1353_p13)  ;;  %v1104_v26 = vsub.s32 (!%p1353_p13), 1, %v1099_v22 }
  0x67   : > { %v1110_v24 = vld [vmem:[%s584_s18] sm:$0x3] (!%p1353_p13) }
  0x68   : > { %1017 = vmatpush1.bf16.msra.mxu0 %v1456_v27 }
  0x69   : > { %1058 = vmatpush1.bf16.msra.mxu1 %v1457_v28  ;;  %1018 = vmatprep.subr.bf16.mxu0 %v1458_v29  ;;  %v1101_v29 = vrot.slane (!%p1353_p13), %v1096_v23, %v1100_v25 }
  0x6a   : > { %1059 = vmatprep.subr.bf16.mxu1 %v1460_v30  ;;  %v1105_v30 = vrot.slane (!%p1353_p13), %v1096_v23, %v1104_v26 }
  0x6c   : > { %1019 = vmatpush1.bf16.msra.mxu0 %v1462_v31  ;;  %v1115_v31 = vrot.slane (!%p1353_p13), %v1110_v24, %v1100_v25 }
  0x6d   : > { %1060 = vmatpush1.bf16.msra.mxu1 %v1463_v32  ;;  %1020 = vmatprep.subr.bf16.mxu0 %v1464_v33  ;;  %v1119_v32 = vrot.slane (!%p1353_p13), %v1110_v24, %v1104_v26 }
  0x6e   : > { %1061 = vmatprep.subr.bf16.mxu1 %v1466_v34 }
  0x70   : > { %1021 = vmatpush1.bf16.msra.mxu0 %v1468_v35 }
  0x71   : > { %1062 = vmatpush1.bf16.msra.mxu1 %v1469_v36  ;;  %1022 = vmatprep.subr.bf16.mxu0 %v1470_v37 }
  0x72   : > { %1063 = vmatprep.subr.bf16.mxu1 %v1472_v38 }
  0x74   : > { %1023 = vmatpush1.bf16.msra.mxu0 %v1474_v39 }
  0x75   : > { %1064 = vmatpush1.bf16.msra.mxu1 %v1475_v40  ;;  %1024 = vmatprep.subr.bf16.mxu0 %v1476_v41 }
  0x76   : > { %1065 = vmatprep.subr.bf16.mxu1 %v1478_v42 }
  0x78   : > { %1025 = vmatpush1.bf16.msra.mxu0 %v1480_v43 }
  0x79   : > { %1066 = vmatpush1.bf16.msra.mxu1 %v1481_v44  ;;  %1026 = vmatprep.subr.bf16.mxu0 %v1482_v45 }
  0x7a   : > { %1067 = vmatprep.subr.bf16.mxu1 %v1484_v46 }
  0x7c   : > { %1027 = vmatpush1.bf16.msra.mxu0 %v1486_v50 }
  0x7d   : > { %1068 = vmatpush1.bf16.msra.mxu1 %v1487_v51  ;;  %1028 = vmatprep.subr.bf16.mxu0 %v1488_v53 }
  0x7e   : > { %1069 = vmatprep.subr.bf16.mxu1 %v1490_v54 }
  0x80   : > { %1029 = vmatpush1.bf16.msra.mxu0 %v1492_v55 }
  0x81   : > { %1070 = vmatpush1.bf16.msra.mxu1 %v1493_v56  ;;  %1030 = vmatprep.subr.bf16.mxu0 %v1494_v57 }
  0x82   : > { %1071 = vmatprep.subr.bf16.mxu1 %v1496_v58 }
  0x84   : > { %1031 = vmatpush1.bf16.msra.mxu0 %v1498_v59 }
  0x85   : > { %1072 = vmatpush1.bf16.msra.mxu1 %v1499_v60  ;;  %1032 = vmatprep.subr.bf16.mxu0 %v1500_v61 }
  0x86   : > { %1073 = vmatprep.subr.bf16.mxu1 %v1502_v62 }
  0x88   : > { %1033 = vmatpush1.bf16.msra.mxu0 %v1504_v63 }
  0x89   : > { %1074 = vmatpush1.bf16.msra.mxu1 %v1505_v0  ;;  %1034 = vmatprep.subr.bf16.mxu0 %v1506_v1 }
  0x8a   : > { %1075 = vmatprep.subr.bf16.mxu1 %v1508_v2 }
  0x8c   : > { %1035 = vmatpush1.bf16.msra.mxu0 %v1510_v3 }
  0x8d   : > { %1076 = vmatpush1.bf16.msra.mxu1 %v1511_v4 }
  0x8f   : > { %1037 = vmatmul.mubr.bf16.vlgmr.msra.gmra.mrb[0].mxu0 %v1285_v5 }
  0x90   : > { %1078 = vmatmul.mubr.bf16.vlgmr.msra.gmra.mrb[0].mxu1 %v1287_v6 }
 0x162   : > { %v1038_v7 = vpop.f32.mrb[0].mxu0 }
 0x163   : > { %v1079_v9 = vpop.f32.mrb[0].mxu1  ;;  %v1040_v11 = vpop.f32.mrb[1].mxu0  ;;  %1093 = sbr.rel (%p1353_p13) target bundleno = 378 (0x17a), region = 82 }
 0x164   : > { %v1080_v10 = vadd.f32 %v1079_v9, %v1038_v7  ;;  %v1081_v13 = vpop.f32.mrb[1].mxu1  ;;  %v1042_v15 = vpop.f32.mrb[2].mxu0 }
 0x165   : > { %v1082_v14 = vadd.f32 %v1081_v13, %v1040_v11  ;;  %v1083_v16 = vpop.f32.mrb[2].mxu1  ;;  %v1043_v18 = vpop.f32.mrb[3].mxu0 }
 0x166   : > { %v1086_v17 = vadd.f32 %v1080_v10, %v602_v8  ;;  %v1084_v19 = vpop.f32.mrb[3].mxu1 }
 0x167   : > { %v1087_v20 = vadd.f32 %v1082_v14, %v603_v12 }
 0x168   : > { %1088 = vst [vmem:[#allocation2] sm:$0xff] %v1086_v17 }
 0x169   : > { %1089 = vst [vmem:[#allocation2 + $0x8] sm:$0xff] %v1087_v20 }
 0x16f   : > { %v1094_v27 = vld [vmem:[#allocation2] sm:$0xff] }
 0x170   : > { %v1095_v28 = vld [vmem:[#allocation2 + $0x8] sm:$0xff]  ;;  %v1108_v33 = vmul.f32 %v1101_v29, %v1094_v27 }
 0x171   : > { %v1109_v34 = vmul.f32 %v1105_v30, %v1095_v28 }
 0x172   : > { %v1122_v35 = vadd.f32 %v1115_v31, %v1108_v33 }
 0x173   : > { %v1123_v36 = vadd.f32 %v1119_v32, %v1109_v34 }
 0x174   : > { %v1124_v37 = vmax.f32 %v1122_v35, 0.0 }
 0x175   : > { %v1125_v38 = vmax.f32 %v1123_v36, 0.0 }
 0x177   : > { %v1358_v39 = vpack.c.bf16 %v1125_v38, %v1124_v37 }
 0x179   : > { %1134 = vst [vmem:[%s1814_s12] sm:$0xff] %v1358_v39 }
 0x17a PF: > { %s14_s21 = sadd.s32 1, %s1570_s21   ;;  %s1923_s15 = smov %s1550_s16 }
 0x17b   : > { %p11_p0 = scmp.ge.s32.totalorder %s14_s21, 20   ;;  %s1924_s16 = smov %s1649_s28 }
 0x17c   : > { %s1925_s17 = smov %s1562_s19  ;;  %s1926_s18 = smov %s1566_s20 }
 0x17d   : > { %s1927_s19 = smov %s1930_s22  ;;  %s1928_s20 = smov %s1934_s23 }
 0x17e   :  { %13 = sbr.rel (!%p11_p0) target bundleno = 4 (0x4), region = 126 }

// kernel: resnet18_forward.40
= control target key start
LH: loop header
LB: loop body
LE: loop exit
PB: predicated region body
PF: predicated region fallthrough
CT: control target
= control target key end

     0   :  { %s1691_s18 = smov 0   ;;  %s1693_s19 = smov 0   ;;  %s2017_s0 = inlined_call_operand.vmem [shape: bf16[8,4608], index: 0, kind: input, shape index: {}]   ;;  %s2018_s1 = inlined_call_operand.vmem [shape: bf16[4608,512], index: 1, kind: input, shape index: {}]   ;;  %s2019_s2 = inlined_call_operand.vmem [shape: f32[1,512], index: 2, kind: input, shape index: {}]   ;;  %s2020_s3 = inlined_call_operand.vmem [shape: f32[1,512], index: 3, kind: input, shape index: {}]   ;;  %s2021_s4 = inlined_call_operand.vmem [shape: bf16[8,512], index: 4, kind: input, shape index: {}]   ;;  %s2022_s5 = inlined_call_operand.vmem [shape: bf16[8,512], index: 5, kind: output, shape index: {}]  }
   0x1   :  { %s1695_s20 = smov 0   ;;  %s1697_s21 = smov 0  }
   0x2   :  { %s1699_s22 = smov 0   ;;  %s1701_s23 = smov 0  }
   0x3   :  { %s1703_s24 = smov 0  }
   0x4 LB: > { %s27_s25 = sadd.s32 1, %s1650_s22  ;;  %s30_s26 = sadd.s32 1, %s1654_s23  ;;  %s1658_s24 = sphi %s1703_s24, %s15_s24   ;;  %s1654_s23 = sphi %s1701_s23, %s2028_s23   ;;  %s1650_s22 = sphi %s1699_s22, %s2027_s22   ;;  %s1646_s21 = sphi %s1697_s21, %s2026_s21   ;;  %s1642_s20 = sphi %s1695_s20, %s2025_s20   ;;  %s1638_s19 = sphi %s1693_s19, %s2024_s19   ;;  %s1634_s18 = sphi %s1691_s18, %s2023_s18  }
   0x5   : > { %p28_p0 = scmp.ge.s32.totalorder %s27_s25, 9  ;;  %p78_p1 = scmp.ne.s32.totalorder %s1638_s19, %s1634_s18 }
   0x6   : > { %p79_p2 = scmp.eq.s32.totalorder %s1658_s24, 0  ;;  %s71_s30 = sadd.s32 1, %s1638_s19 }
   0x7   : > { %s2030_s25 = smov (%p28_p0, %s27_s25), 0  ;;  %s2032_s26 = smov (!%p28_p0, %s30_s26), %s1654_s23 }
   0x8   : > { %p80_p3 = por %p79_p2, %p78_p1  ;;  %p32_p4 = scmp.ge.s32.totalorder %s2032_s26, 2 }
   0x9   : > { %s66_s27 = ssub.s32 %s1650_s22, %s2030_s25  ;;  %p1356_p6 = scmp.ge.s32.totalorder %s1658_s24, 18 }
   0xa   : > { %s2034_s26 = smov (%p32_p4, %s2032_s26), 0 }
   0xb   : > { %s67_s28 = ssub.s32 %s1654_s23, %s2034_s26  ;;  %212 = sbr.rel (%p1356_p6) target bundleno = 57 (0x39), region = 16 }
   0xc   : > { %s68_s29 = sor.u32 %s67_s28, %s66_s27 }
   0xd   : > { %p69_p5 = scmp.eq.s32.totalorder %s68_s29, 0 }
   0xf   : > { %s1742_s6 = scalar_select %p69_p5, %s1638_s19, %s71_s30  }
  0x12   : > { %228 = sbr.rel (!%p80_p3) target bundleno = 57 (0x39), region = 24  ;;  %s230_s7 = sand.u32 (%p80_p3), 1, %s1638_s19  }
  0x13   : > { %s1359_s8 = sshll.u32 (%p80_p3), %s1654_s23, 1  ;;  %s1357_s9 = sshll.u32 (%p80_p3), %s230_s7, 9 }
  0x14   : > { %s1445_s10 = sshll.u32 (%p80_p3), %s1650_s22, 8  ;;  %s1756_s16 = scalar_lea.vmem (%p80_p3), [#allocation3], %s1357_s9 }
  0x15   : > { %s236_s11 = sadd.s32 (%p80_p3), %s1445_s10, %s1359_s8 }
  0x16   : > { %s1361_s12 = sshll.u32 (%p80_p3), %s236_s11, 2 }
  0x17   : > { %s1751_s15 = scalar_lea.vmem (%p80_p3), %s2018_s1, %s1361_s12 }
  0x18   : > { %v392_v0 = vld [vmem:[%s1751_s15] sm:$0xff] (%p80_p3)  ;;  %v394_v1 = vld [vmem:[%s1751_s15 + $0x10] sm:$0xff] (%p80_p3) }
  0x19   : > { %v396_v2 = vld [vmem:[%s1751_s15 + $0x20] sm:$0xff]  ;;  %393 = vst [vmem:[%s1756_s16] sm:$0xff] %v392_v0  ;;  %395 = vst [vmem:[%s1756_s16 + $0x8] sm:$0xff] %v394_v1  ;;  %v398_v3 = vld [vmem:[%s1751_s15 + $0x30] sm:$0xff] }
  0x1a   : > { %397 = vst [vmem:[%s1756_s16 + $0x10] sm:$0xff] %v396_v2  ;;  %v400_v4 = vld [vmem:[%s1751_s15 + $0x40] sm:$0xff]  ;;  %v402_v5 = vld [vmem:[%s1751_s15 + $0x50] sm:$0xff]  ;;  %399 = vst [vmem:[%s1756_s16 + $0x18] sm:$0xff] %v398_v3 }
  0x1b   : > { %401 = vst [vmem:[%s1756_s16 + $0x20] sm:$0xff] %v400_v4  ;;  %403 = vst [vmem:[%s1756_s16 + $0x28] sm:$0xff] %v402_v5  ;;  %v404_v6 = vld [vmem:[%s1751_s15 + $0x60] sm:$0xff]  ;;  %v406_v7 = vld [vmem:[%s1751_s15 + $0x70] sm:$0xff] }
  0x1c   : > { %v408_v8 = vld [vmem:[%s1751_s15 + $0x80] sm:$0xff]  ;;  %405 = vst [vmem:[%s1756_s16 + $0x30] sm:$0xff] %v404_v6  ;;  %407 = vst [vmem:[%s1756_s16 + $0x38] sm:$0xff] %v406_v7  ;;  %v410_v9 = vld [vmem:[%s1751_s15 + $0x90] sm:$0xff] }
  0x1d   : > { %409 = vst [vmem:[%s1756_s16 + $0x40] sm:$0xff] %v408_v8  ;;  %v412_v10 = vld [vmem:[%s1751_s15 + $0xa0] sm:$0xff]  ;;  %v414_v11 = vld [vmem:[%s1751_s15 + $0xb0] sm:$0xff]  ;;  %411 = vst [vmem:[%s1756_s16 + $0x48] sm:$0xff] %v410_v9 }
  0x1e   : > { %413 = vst [vmem:[%s1756_s16 + $0x50] sm:$0xff] %v412_v10  ;;  %415 = vst [vmem:[%s1756_s16 + $0x58] sm:$0xff] %v414_v11  ;;  %v416_v12 = vld [vmem:[%s1751_s15 + $0xc0] sm:$0xff]  ;;  %v418_v13 = vld [vmem:[%s1751_s15 + $0xd0] sm:$0xff] }
  0x1f   : > { %v420_v14 = vld [vmem:[%s1751_s15 + $0xe0] sm:$0xff]  ;;  %417 = vst [vmem:[%s1756_s16 + $0x60] sm:$0xff] %v416_v12  ;;  %419 = vst [vmem:[%s1756_s16 + $0x68] sm:$0xff] %v418_v13  ;;  %v422_v15 = vld [vmem:[%s1751_s15 + $0xf0] sm:$0xff] }
  0x20   : > { %421 = vst [vmem:[%s1756_s16 + $0x70] sm:$0xff] %v420_v14  ;;  %v424_v16 = vld [vmem:[%s1751_s15 + $0x100] sm:$0xff]  ;;  %v426_v17 = vld [vmem:[%s1751_s15 + $0x110] sm:$0xff]  ;;  %423 = vst [vmem:[%s1756_s16 + $0x78] sm:$0xff] %v422_v15 }
  0x21   : > { %425 = vst [vmem:[%s1756_s16 + $0x80] sm:$0xff] %v424_v16  ;;  %427 = vst [vmem:[%s1756_s16 + $0x88] sm:$0xff] %v426_v17  ;;  %v428_v18 = vld [vmem:[%s1751_s15 + $0x120] sm:$0xff]  ;;  %v430_v19 = vld [vmem:[%s1751_s15 + $0x130] sm:$0xff] }
  0x22   : > { %v432_v20 = vld [vmem:[%s1751_s15 + $0x140] sm:$0xff]  ;;  %429 = vst [vmem:[%s1756_s16 + $0x90] sm:$0xff] %v428_v18  ;;  %431 = vst [vmem:[%s1756_s16 + $0x98] sm:$0xff] %v430_v19  ;;  %v434_v21 = vld [vmem:[%s1751_s15 + $0x150] sm:$0xff] }
  0x23   : > { %433 = vst [vmem:[%s1756_s16 + $0xa0] sm:$0xff] %v432_v20  ;;  %v436_v22 = vld [vmem:[%s1751_s15 + $0x160] sm:$0xff]  ;;  %v438_v23 = vld [vmem:[%s1751_s15 + $0x170] sm:$0xff]  ;;  %435 = vst [vmem:[%s1756_s16 + $0xa8] sm:$0xff] %v434_v21 }
  0x24   : > { %437 = vst [vmem:[%s1756_s16 + $0xb0] sm:$0xff] %v436_v22  ;;  %439 = vst [vmem:[%s1756_s16 + $0xb8] sm:$0xff] %v438_v23  ;;  %v440_v24 = vld [vmem:[%s1751_s15 + $0x180] sm:$0xff]  ;;  %v442_v25 = vld [vmem:[%s1751_s15 + $0x190] sm:$0xff] }
  0x25   : > { %v444_v26 = vld [vmem:[%s1751_s15 + $0x1a0] sm:$0xff]  ;;  %441 = vst [vmem:[%s1756_s16 + $0xc0] sm:$0xff] %v440_v24  ;;  %443 = vst [vmem:[%s1756_s16 + $0xc8] sm:$0xff] %v442_v25  ;;  %v446_v27 = vld [vmem:[%s1751_s15 + $0x1b0] sm:$0xff] }
  0x26   : > { %445 = vst [vmem:[%s1756_s16 + $0xd0] sm:$0xff] %v444_v26  ;;  %v448_v28 = vld [vmem:[%s1751_s15 + $0x1c0] sm:$0xff]  ;;  %v450_v29 = vld [vmem:[%s1751_s15 + $0x1d0] sm:$0xff]  ;;  %447 = vst [vmem:[%s1756_s16 + $0xd8] sm:$0xff] %v446_v27 }
  0x27   : > { %449 = vst [vmem:[%s1756_s16 + $0xe0] sm:$0xff] %v448_v28  ;;  %451 = vst [vmem:[%s1756_s16 + $0xe8] sm:$0xff] %v450_v29  ;;  %v452_v30 = vld [vmem:[%s1751_s15 + $0x1e0] sm:$0xff]  ;;  %v454_v31 = vld [vmem:[%s1751_s15 + $0x1f0] sm:$0xff] }
  0x28   : > { %v456_v32 = vld [vmem:[%s1751_s15 + $0x200] sm:$0xff]  ;;  %453 = vst [vmem:[%s1756_s16 + $0xf0] sm:$0xff] %v452_v30  ;;  %455 = vst [vmem:[%s1756_s16 + $0xf8] sm:$0xff] %v454_v31  ;;  %v458_v33 = vld [vmem:[%s1751_s15 + $0x210] sm:$0xff] }
  0x29   : > { %457 = vst [vmem:[%s1756_s16 + $0x100] sm:$0xff] %v456_v32  ;;  %v460_v34 = vld [vmem:[%s1751_s15 + $0x220] sm:$0xff]  ;;  %v462_v35 = vld [vmem:[%s1751_s15 + $0x230] sm:$0xff]  ;;  %459 = vst [vmem:[%s1756_s16 + $0x108] sm:$0xff] %v458_v33 }
  0x2a   : > { %461 = vst [vmem:[%s1756_s16 + $0x110] sm:$0xff] %v460_v34  ;;  %463 = vst [vmem:[%s1756_s16 + $0x118] sm:$0xff] %v462_v35  ;;  %v464_v36 = vld [vmem:[%s1751_s15 + $0x240] sm:$0xff]  ;;  %v466_v37 = vld [vmem:[%s1751_s15 + $0x250] sm:$0xff] }
  0x2b   : > { %v468_v38 = vld [vmem:[%s1751_s15 + $0x260] sm:$0xff]  ;;  %465 = vst [vmem:[%s1756_s16 + $0x120] sm:$0xff] %v464_v36  ;;  %467 = vst [vmem:[%s1756_s16 + $0x128] sm:$0xff] %v466_v37  ;;  %v470_v39 = vld [vmem:[%s1751_s15 + $0x270] sm:$0xff] }
  0x2c   : > { %469 = vst [vmem:[%s1756_s16 + $0x130] sm:$0xff] %v468_v38  ;;  %v472_v40 = vld [vmem:[%s1751_s15 + $0x280] sm:$0xff]  ;;  %v474_v41 = vld [vmem:[%s1751_s15 + $0x290] sm:$0xff]  ;;  %471 = vst [vmem:[%s1756_s16 + $0x138] sm:$0xff] %v470_v39 }
  0x2d   : > { %473 = vst [vmem:[%s1756_s16 + $0x140] sm:$0xff] %v472_v40  ;;  %475 = vst [vmem:[%s1756_s16 + $0x148] sm:$0xff] %v474_v41  ;;  %v476_v42 = vld [vmem:[%s1751_s15 + $0x2a0] sm:$0xff]  ;;  %v478_v43 = vld [vmem:[%s1751_s15 + $0x2b0] sm:$0xff] }
  0x2e   : > { %v480_v44 = vld [vmem:[%s1751_s15 + $0x2c0] sm:$0xff]  ;;  %477 = vst [vmem:[%s1756_s16 + $0x150] sm:$0xff] %v476_v42  ;;  %479 = vst [vmem:[%s1756_s16 + $0x158] sm:$0xff] %v478_v43  ;;  %v482_v45 = vld [vmem:[%s1751_s15 + $0x2d0] sm:$0xff] }
  0x2f   : > { %481 = vst [vmem:[%s1756_s16 + $0x160] sm:$0xff] %v480_v44  ;;  %v484_v46 = vld [vmem:[%s1751_s15 + $0x2e0] sm:$0xff]  ;;  %v486_v47 = vld [vmem:[%s1751_s15 + $0x2f0] sm:$0xff]  ;;  %483 = vst [vmem:[%s1756_s16 + $0x168] sm:$0xff] %v482_v45 }
  0x30   : > { %485 = vst [vmem:[%s1756_s16 + $0x170] sm:$0xff] %v484_v46  ;;  %487 = vst [vmem:[%s1756_s16 + $0x178] sm:$0xff] %v486_v47  ;;  %v488_v48 = vld [vmem:[%s1751_s15 + $0x300] sm:$0xff]  ;;  %v490_v49 = vld [vmem:[%s1751_s15 + $0x310] sm:$0xff] }
  0x31   : > { %v492_v50 = vld [vmem:[%s1751_s15 + $0x320] sm:$0xff]  ;;  %489 = vst [vmem:[%s1756_s16 + $0x180] sm:$0xff] %v488_v48  ;;  %491 = vst [vmem:[%s1756_s16 + $0x188] sm:$0xff] %v490_v49  ;;  %v494_v51 = vld [vmem:[%s1751_s15 + $0x330] sm:$0xff] }
  0x32   : > { %493 = vst [vmem:[%s1756_s16 + $0x190] sm:$0xff] %v492_v50  ;;  %v496_v52 = vld [vmem:[%s1751_s15 + $0x340] sm:$0xff]  ;;  %v498_v53 = vld [vmem:[%s1751_s15 + $0x350] sm:$0xff]  ;;  %495 = vst [vmem:[%s1756_s16 + $0x198] sm:$0xff] %v494_v51 }
  0x33   : > { %497 = vst [vmem:[%s1756_s16 + $0x1a0] sm:$0xff] %v496_v52  ;;  %499 = vst [vmem:[%s1756_s16 + $0x1a8] sm:$0xff] %v498_v53  ;;  %v500_v54 = vld [vmem:[%s1751_s15 + $0x360] sm:$0xff]  ;;  %v502_v55 = vld [vmem:[%s1751_s15 + $0x370] sm:$0xff] }
  0x34   : > { %v504_v56 = vld [vmem:[%s1751_s15 + $0x380] sm:$0xff]  ;;  %501 = vst [vmem:[%s1756_s16 + $0x1b0] sm:$0xff] %v500_v54  ;;  %503 = vst [vmem:[%s1756_s16 + $0x1b8] sm:$0xff] %v502_v55  ;;  %v506_v57 = vld [vmem:[%s1751_s15 + $0x390] sm:$0xff] }
  0x35   : > { %505 = vst [vmem:[%s1756_s16 + $0x1c0] sm:$0xff] %v504_v56  ;;  %v508_v58 = vld [vmem:[%s1751_s15 + $0x3a0] sm:$0xff]  ;;  %v510_v59 = vld [vmem:[%s1751_s15 + $0x3b0] sm:$0xff]  ;;  %507 = vst [vmem:[%s1756_s16 + $0x1c8] sm:$0xff] %v506_v57 }
  0x36   : > { %509 = vst [vmem:[%s1756_s16 + $0x1d0] sm:$0xff] %v508_v58  ;;  %511 = vst [vmem:[%s1756_s16 + $0x1d8] sm:$0xff] %v510_v59  ;;  %v512_v60 = vld [vmem:[%s1751_s15 + $0x3c0] sm:$0xff]  ;;  %v514_v61 = vld [vmem:[%s1751_s15 + $0x3d0] sm:$0xff] }
  0x37   : > { %v516_v62 = vld [vmem:[%s1751_s15 + $0x3e0] sm:$0xff]  ;;  %513 = vst [vmem:[%s1756_s16 + $0x1e0] sm:$0xff] %v512_v60  ;;  %515 = vst [vmem:[%s1756_s16 + $0x1e8] sm:$0xff] %v514_v61  ;;  %v518_v63 = vld [vmem:[%s1751_s15 + $0x3f0] sm:$0xff] }
  0x38   : > { %517 = vst [vmem:[%s1756_s16 + $0x1f0] sm:$0xff] %v516_v62  ;;  %519 = vst [vmem:[%s1756_s16 + $0x1f8] sm:$0xff] %v518_v63 }
  0x39 PF: > { %p1362_p7 = scmp.ge.s32.totalorder %s1658_s24, 1  ;;  %p553_p8 = scmp.lt.s32.totalorder %s1658_s24, 19 }
  0x3b   : > { %p554_p9 = pnand %p1362_p7, %p553_p8 }
  0x3c   : > { %s560_s17 = sand.u32 (!%p554_p9), 1, %s1634_s18   ;;  %s1364_s27 = sshll.u32 (!%p554_p9), %s1642_s20, 2 }
  0x3d   : > { %557 = sbr.rel (%p554_p9) target bundleno = 380 (0x17c), region = 74  ;;  %s1363_s28 = sshll.u32 (!%p554_p9), %s560_s17, 9 }
  0x3e   : > { %p620_p10 = scmp.lt.s32.totalorder (!%p554_p9), %s1364_s27, 35  ;;  %s1366_s29 = sshll.u32 (!%p554_p9), %s1646_s21, 1 }
  0x3f   : > { %p630_p11 = scmp.lt.s32.totalorder (!%p554_p9), %s1366_s29, 3  ;;  %s1914_s8 = scalar_lea.vmem (!%p554_p9), [#allocation3], %s1363_s28 }
  0x40   : > { %p1372_p12 = scmp.ne.s32.totalorder (!%p554_p9), %s1642_s20, 0 }
  0x44   : > { %s2036_s27 = smov (!%p620_p10, %s1364_s27), 35  ;;  %s2038_s29 = smov (!%p630_p11, %s1366_s29), 3 }
  0x45   : > { %s1365_s30 = sshll.u32 %s2036_s27, 2  ;;  %s632_s18 = scalar_lea.vmem %s2019_s2, %s2038_s29  ;;  %v1660_v0 = vmov (!%p1372_p12), 0.0  }
  0x46   : > { %s1891_s9 = scalar_lea.vmem %s2017_s0, %s1365_s30  ;;  %s637_s21 = scalar_lea.vmem %s2020_s3, %s2038_s29  ;;  %663 = vst [vmem:[#allocation2] sm:$0xff] (!%p1372_p12), %v1660_v0  ;;  %664 = vst [vmem:[#allocation2 + $0x8] sm:$0xff] (!%p1372_p12), %v1660_v0 }
  0x47   : > { %s1369_s14 = sshll.u32 %s2038_s29, 2  ;;  %662 = sbr.rel (%p1372_p12) target bundleno = 78 (0x4e), region = 82 }
  0x48   : > { %s1907_s17 = scalar_lea.vmem %s2021_s4, %s1369_s14  ;;  %s1912_s7 = scalar_lea.vmem %s2022_s5, %s1369_s14 }
  0x4e PF: > { %v1504_v1 = vld [vmem:[%s1914_s8 + $0x4] ss:$8 sps:$4 sm:$0xff]   ;;  %v1508_v3 = vld [vmem:[%s1914_s8] ss:$8 sps:$4 sm:$0xff]   ;;  %v1510_v5 = vld [vmem:[%s1914_s8 + $0x14] ss:$8 sps:$4 sm:$0xff]  }
  0x4f   : > { %v1506_v2 = vld [vmem:[%s1914_s8 + $0x104] ss:$8 sps:$4 sm:$0xff]   ;;  %1067 = vmatprep.subr.bf16.mxu0 %v1504_v1  ;;  %v1509_v4 = vld [vmem:[%s1914_s8 + $0x100] ss:$8 sps:$4 sm:$0xff]   ;;  %v1512_v6 = vld [vmem:[%s1914_s8 + $0x114] ss:$8 sps:$4 sm:$0xff]  }
  0x50   : > { %1108 = vmatprep.subr.bf16.mxu1 %v1506_v2  ;;  %1068 = vmatpush1.bf16.msra.mxu0 %v1508_v3  ;;  %v1514_v7 = vld [vmem:[%s1914_s8 + $0x10] ss:$8 sps:$4 sm:$0xff]   ;;  %v1516_v9 = vld [vmem:[%s1914_s8 + $0x24] ss:$8 sps:$4 sm:$0xff]   ;;  %v1520_v11 = vld [vmem:[%s1914_s8 + $0x20] ss:$8 sps:$4 sm:$0xff]  }
  0x51   : > { %1109 = vmatpush1.bf16.msra.mxu1 %v1509_v4  ;;  %1069 = vmatprep.subr.bf16.mxu0 %v1510_v5  ;;  %v1515_v8 = vld [vmem:[%s1914_s8 + $0x110] ss:$8 sps:$4 sm:$0xff]   ;;  %v1518_v10 = vld [vmem:[%s1914_s8 + $0x124] ss:$8 sps:$4 sm:$0xff]   ;;  %v1521_v12 = vld [vmem:[%s1914_s8 + $0x120] ss:$8 sps:$4 sm:$0xff]  }
  0x52   : > { %1110 = vmatprep.subr.bf16.mxu1 %v1512_v6  ;;  %v1522_v13 = vld [vmem:[%s1914_s8 + $0x34] ss:$8 sps:$4 sm:$0xff]   ;;  %v1526_v15 = vld [vmem:[%s1914_s8 + $0x30] ss:$8 sps:$4 sm:$0xff]   ;;  %v1528_v17 = vld [vmem:[%s1914_s8 + $0x44] ss:$8 sps:$4 sm:$0xff]  }
  0x53   : > { %v1524_v14 = vld [vmem:[%s1914_s8 + $0x134] ss:$8 sps:$4 sm:$0xff]   ;;  %v1527_v16 = vld [vmem:[%s1914_s8 + $0x130] ss:$8 sps:$4 sm:$0xff]   ;;  %v1530_v18 = vld [vmem:[%s1914_s8 + $0x144] ss:$8 sps:$4 sm:$0xff]  }
  0x54   : > { %1070 = vmatpush1.bf16.msra.mxu0 %v1514_v7  ;;  %v1532_v19 = vld [vmem:[%s1914_s8 + $0x40] ss:$8 sps:$4 sm:$0xff]   ;;  %v1534_v21 = vld [vmem:[%s1914_s8 + $0x54] ss:$8 sps:$4 sm:$0xff]   ;;  %v1538_v23 = vld [vmem:[%s1914_s8 + $0x50] ss:$8 sps:$4 sm:$0xff]  }
  0x55   : > { %1111 = vmatpush1.bf16.msra.mxu1 %v1515_v8  ;;  %1071 = vmatprep.subr.bf16.mxu0 %v1516_v9  ;;  %v1533_v20 = vld [vmem:[%s1914_s8 + $0x140] ss:$8 sps:$4 sm:$0xff]   ;;  %v1536_v22 = vld [vmem:[%s1914_s8 + $0x154] ss:$8 sps:$4 sm:$0xff]   ;;  %v1539_v24 = vld [vmem:[%s1914_s8 + $0x150] ss:$8 sps:$4 sm:$0xff]  }
  0x56   : > { %1112 = vmatprep.subr.bf16.mxu1 %v1518_v10  ;;  %v1540_v25 = vld [vmem:[%s1914_s8 + $0x64] ss:$8 sps:$4 sm:$0xff]   ;;  %v1544_v27 = vld [vmem:[%s1914_s8 + $0x60] ss:$8 sps:$4 sm:$0xff]   ;;  %v1546_v29 = vld [vmem:[%s1914_s8 + $0x74] ss:$8 sps:$4 sm:$0xff]  }
  0x57   : > { %v1542_v26 = vld [vmem:[%s1914_s8 + $0x164] ss:$8 sps:$4 sm:$0xff]   ;;  %v1545_v28 = vld [vmem:[%s1914_s8 + $0x160] ss:$8 sps:$4 sm:$0xff]   ;;  %v1548_v30 = vld [vmem:[%s1914_s8 + $0x174] ss:$8 sps:$4 sm:$0xff]  }
  0x58   : > { %1072 = vmatpush1.bf16.msra.mxu0 %v1520_v11  ;;  %v1550_v31 = vld [vmem:[%s1914_s8 + $0x70] ss:$8 sps:$4 sm:$0xff]   ;;  %v1552_v33 = vld [vmem:[%s1914_s8 + $0x84] ss:$8 sps:$4 sm:$0xff]   ;;  %v1556_v35 = vld [vmem:[%s1914_s8 + $0x80] ss:$8 sps:$4 sm:$0xff]  }
  0x59   : > { %1113 = vmatpush1.bf16.msra.mxu1 %v1521_v12  ;;  %1073 = vmatprep.subr.bf16.mxu0 %v1522_v13  ;;  %v1551_v32 = vld [vmem:[%s1914_s8 + $0x170] ss:$8 sps:$4 sm:$0xff]   ;;  %v1554_v34 = vld [vmem:[%s1914_s8 + $0x184] ss:$8 sps:$4 sm:$0xff]   ;;  %v1557_v36 = vld [vmem:[%s1914_s8 + $0x180] ss:$8 sps:$4 sm:$0xff]  }
  0x5a   : > { %1114 = vmatprep.subr.bf16.mxu1 %v1524_v14  ;;  %v1558_v37 = vld [vmem:[%s1914_s8 + $0x94] ss:$8 sps:$4 sm:$0xff]   ;;  %v1562_v39 = vld [vmem:[%s1914_s8 + $0x90] ss:$8 sps:$4 sm:$0xff]   ;;  %v1564_v41 = vld [vmem:[%s1914_s8 + $0xa4] ss:$8 sps:$4 sm:$0xff]  }
  0x5b   : > { %v1560_v38 = vld [vmem:[%s1914_s8 + $0x194] ss:$8 sps:$4 sm:$0xff]   ;;  %v1563_v40 = vld [vmem:[%s1914_s8 + $0x190] ss:$8 sps:$4 sm:$0xff]   ;;  %v1566_v42 = vld [vmem:[%s1914_s8 + $0x1a4] ss:$8 sps:$4 sm:$0xff]  }
  0x5c   : > { %1074 = vmatpush1.bf16.msra.mxu0 %v1526_v15  ;;  %v1568_v43 = vld [vmem:[%s1914_s8 + $0xa0] ss:$8 sps:$4 sm:$0xff]   ;;  %v1570_v45 = vld [vmem:[%s1914_s8 + $0xb4] ss:$8 sps:$4 sm:$0xff]   ;;  %v1574_v50 = vld [vmem:[%s1914_s8 + $0xb0] ss:$8 sps:$4 sm:$0xff]  }
  0x5d   : > { %1115 = vmatpush1.bf16.msra.mxu1 %v1527_v16  ;;  %1075 = vmatprep.subr.bf16.mxu0 %v1528_v17  ;;  %v1569_v44 = vld [vmem:[%s1914_s8 + $0x1a0] ss:$8 sps:$4 sm:$0xff]   ;;  %v1572_v46 = vld [vmem:[%s1914_s8 + $0x1b4] ss:$8 sps:$4 sm:$0xff]   ;;  %v1575_v51 = vld [vmem:[%s1914_s8 + $0x1b0] ss:$8 sps:$4 sm:$0xff]  }
  0x5e   : > { %1116 = vmatprep.subr.bf16.mxu1 %v1530_v18  ;;  %v667_v47 = vld [vmem:[%s1891_s9] sm:$0xff]  ;;  %v668_v49 = vld [vmem:[%s1891_s9 + $0x8] sm:$0xff]  ;;  %v1576_v53 = vld [vmem:[%s1914_s8 + $0xc4] ss:$8 sps:$4 sm:$0xff]   ;;  %p1441_p13 = scmp.ne.s32.totalorder %s1642_s20, 8 }
  0x5f   : > { %v1374_v48 = vcombine.high %v667_v47, %v667_v47  ;;  %v1376_v52 = vcombine.high %v668_v49, %v668_v49  ;;  %v1578_v54 = vld [vmem:[%s1914_s8 + $0x1c4] ss:$8 sps:$4 sm:$0xff]   ;;  %v1580_v55 = vld [vmem:[%s1914_s8 + $0xc0] ss:$8 sps:$4 sm:$0xff]   ;;  %v1582_v57 = vld [vmem:[%s1914_s8 + $0xd4] ss:$8 sps:$4 sm:$0xff]   ;;  %v1373_v5 = vcombine.low %v667_v47, %v667_v47  ;;  %v1375_v6 = vcombine.low %v668_v49, %v668_v49 }
  0x60   : > { %1076 = vmatpush1.bf16.msra.mxu0 %v1532_v19  ;;  %v1581_v56 = vld [vmem:[%s1914_s8 + $0x1c0] ss:$8 sps:$4 sm:$0xff]   ;;  %v1584_v58 = vld [vmem:[%s1914_s8 + $0x1d4] ss:$8 sps:$4 sm:$0xff]   ;;  %v1586_v59 = vld [vmem:[%s1914_s8 + $0xd0] ss:$8 sps:$4 sm:$0xff]  }
  0x61   : > { %1117 = vmatpush1.bf16.msra.mxu1 %v1533_v20  ;;  %1077 = vmatprep.subr.bf16.mxu0 %v1534_v21  ;;  %v1587_v60 = vld [vmem:[%s1914_s8 + $0x1d0] ss:$8 sps:$4 sm:$0xff]   ;;  %v1588_v61 = vld [vmem:[%s1914_s8 + $0xe4] ss:$8 sps:$4 sm:$0xff]   ;;  %v1592_v63 = vld [vmem:[%s1914_s8 + $0xe0] ss:$8 sps:$4 sm:$0xff]   ;;  %v1161_v21 = vlaneseq (!%p1441_p13) }
  0x62   : > { %1118 = vmatprep.subr.bf16.mxu1 %v1536_v22  ;;  %1099 = vmatprep.mubr.bf16.mxu0 %v1374_v48  ;;  %v1590_v62 = vld [vmem:[%s1914_s8 + $0x1e4] ss:$8 sps:$4 sm:$0xff]   ;;  %v1593_v0 = vld [vmem:[%s1914_s8 + $0x1e0] ss:$8 sps:$4 sm:$0xff]   ;;  %v1594_v1 = vld [vmem:[%s1914_s8 + $0xf4] ss:$8 sps:$4 sm:$0xff]  }
  0x63   : > { %1140 = vmatprep.mubr.bf16.mxu1 %v1376_v52  ;;  %v1596_v2 = vld [vmem:[%s1914_s8 + $0x1f4] ss:$8 sps:$4 sm:$0xff]   ;;  %v1598_v3 = vld [vmem:[%s1914_s8 + $0xf0] ss:$8 sps:$4 sm:$0xff]   ;;  %v1162_v22 = vshrl.u32 (!%p1441_p13), %v1161_v21, 7 }
  0x64   : > { %1078 = vmatpush1.bf16.msra.mxu0 %v1538_v23  ;;  %v1599_v4 = vld [vmem:[%s1914_s8 + $0x1f0] ss:$8 sps:$4 sm:$0xff]  }
  0x65   : > { %1119 = vmatpush1.bf16.msra.mxu1 %v1539_v24  ;;  %1079 = vmatprep.subr.bf16.mxu0 %v1540_v25  ;;  %v665_v8 = vld [vmem:[#allocation2] sm:$0xff]  ;;  %v666_v12 = vld [vmem:[#allocation2 + $0x8] sm:$0xff]  ;;  %v1163_v25 = vsub.s32 (!%p1441_p13), 0, %v1162_v22 }
  0x66   : > { %1120 = vmatprep.subr.bf16.mxu1 %v1542_v26  ;;  %v1159_v23 = vld [vmem:[%s632_s18] sm:$0x3] (!%p1441_p13)  ;;  %v1167_v26 = vsub.s32 (!%p1441_p13), 1, %v1162_v22 }
  0x67   : > { %v1173_v24 = vld [vmem:[%s637_s21] sm:$0x3] (!%p1441_p13) }
  0x68   : > { %1080 = vmatpush1.bf16.msra.mxu0 %v1544_v27 }
  0x69   : > { %1121 = vmatpush1.bf16.msra.mxu1 %v1545_v28  ;;  %1081 = vmatprep.subr.bf16.mxu0 %v1546_v29  ;;  %v1187_v29 = vld [vmem:[%s1907_s17] sm:$0xff] (!%p1441_p13) }
  0x6a   : > { %1122 = vmatprep.subr.bf16.mxu1 %v1548_v30  ;;  %v1164_v30 = vrot.slane (!%p1441_p13), %v1159_v23, %v1163_v25 }
  0x6c   : > { %1082 = vmatpush1.bf16.msra.mxu0 %v1550_v31  ;;  %v1168_v31 = vrot.slane (!%p1441_p13), %v1159_v23, %v1167_v26 }
  0x6d   : > { %1123 = vmatpush1.bf16.msra.mxu1 %v1551_v32  ;;  %1083 = vmatprep.subr.bf16.mxu0 %v1552_v33  ;;  %v1178_v32 = vrot.slane (!%p1441_p13), %v1173_v24, %v1163_v25  ;;  %v1182_v33 = vrot.slane (!%p1441_p13), %v1173_v24, %v1167_v26 }
  0x6e   : > { %1124 = vmatprep.subr.bf16.mxu1 %v1554_v34 }
  0x70   : > { %1084 = vmatpush1.bf16.msra.mxu0 %v1556_v35 }
  0x71   : > { %1125 = vmatpush1.bf16.msra.mxu1 %v1557_v36  ;;  %1085 = vmatprep.subr.bf16.mxu0 %v1558_v37  ;;  %v1188_v36 = vunpack.c.l.bf16 (!%p1441_p13), %v1187_v29  ;;  %v1189_v37 = vunpack.c.h.bf16 (!%p1441_p13), %v1187_v29 }
  0x72   : > { %1126 = vmatprep.subr.bf16.mxu1 %v1560_v38 }
  0x74   : > { %1086 = vmatpush1.bf16.msra.mxu0 %v1562_v39 }
  0x75   : > { %1127 = vmatpush1.bf16.msra.mxu1 %v1563_v40  ;;  %1087 = vmatprep.subr.bf16.mxu0 %v1564_v41 }
  0x76   : > { %1128 = vmatprep.subr.bf16.mxu1 %v1566_v42 }
  0x78   : > { %1088 = vmatpush1.bf16.msra.mxu0 %v1568_v43 }
  0x79   : > { %1129 = vmatpush1.bf16.msra.mxu1 %v1569_v44  ;;  %1089 = vmatprep.subr.bf16.mxu0 %v1570_v45 }
  0x7a   : > { %1130 = vmatprep.subr.bf16.mxu1 %v1572_v46 }
  0x7c   : > { %1090 = vmatpush1.bf16.msra.mxu0 %v1574_v50 }
  0x7d   : > { %1131 = vmatpush1.bf16.msra.mxu1 %v1575_v51  ;;  %1091 = vmatprep.subr.bf16.mxu0 %v1576_v53 }
  0x7e   : > { %1132 = vmatprep.subr.bf16.mxu1 %v1578_v54 }
  0x80   : > { %1092 = vmatpush1.bf16.msra.mxu0 %v1580_v55 }
  0x81   : > { %1133 = vmatpush1.bf16.msra.mxu1 %v1581_v56  ;;  %1093 = vmatprep.subr.bf16.mxu0 %v1582_v57 }
  0x82   : > { %1134 = vmatprep.subr.bf16.mxu1 %v1584_v58 }
  0x84   : > { %1094 = vmatpush1.bf16.msra.mxu0 %v1586_v59 }
  0x85   : > { %1135 = vmatpush1.bf16.msra.mxu1 %v1587_v60  ;;  %1095 = vmatprep.subr.bf16.mxu0 %v1588_v61 }
  0x86   : > { %1136 = vmatprep.subr.bf16.mxu1 %v1590_v62 }
  0x88   : > { %1096 = vmatpush1.bf16.msra.mxu0 %v1592_v63 }
  0x89   : > { %1137 = vmatpush1.bf16.msra.mxu1 %v1593_v0  ;;  %1097 = vmatprep.subr.bf16.mxu0 %v1594_v1 }
  0x8a   : > { %1138 = vmatprep.subr.bf16.mxu1 %v1596_v2 }
  0x8c   : > { %1098 = vmatpush1.bf16.msra.mxu0 %v1598_v3 }
  0x8d   : > { %1139 = vmatpush1.bf16.msra.mxu1 %v1599_v4 }
  0x8f   : > { %1100 = vmatmul.mubr.bf16.vlgmr.msra.gmra.mrb[0].mxu0 %v1373_v5 }
  0x90   : > { %1141 = vmatmul.mubr.bf16.vlgmr.msra.gmra.mrb[0].mxu1 %v1375_v6 }
 0x162   : > { %v1101_v7 = vpop.f32.mrb[0].mxu0 }
 0x163   : > { %v1142_v9 = vpop.f32.mrb[0].mxu1  ;;  %v1103_v11 = vpop.f32.mrb[1].mxu0  ;;  %1156 = sbr.rel (%p1441_p13) target bundleno = 380 (0x17c), region = 86 }
 0x164   : > { %v1143_v10 = vadd.f32 %v1142_v9, %v1101_v7  ;;  %v1144_v13 = vpop.f32.mrb[1].mxu1  ;;  %v1105_v15 = vpop.f32.mrb[2].mxu0 }
 0x165   : > { %v1145_v14 = vadd.f32 %v1144_v13, %v1103_v11  ;;  %v1146_v16 = vpop.f32.mrb[2].mxu1  ;;  %v1106_v18 = vpop.f32.mrb[3].mxu0 }
 0x166   : > { %v1149_v17 = vadd.f32 %v1143_v10, %v665_v8  ;;  %v1147_v19 = vpop.f32.mrb[3].mxu1 }
 0x167   : > { %v1150_v20 = vadd.f32 %v1145_v14, %v666_v12 }
 0x168   : > { %1151 = vst [vmem:[#allocation2] sm:$0xff] %v1149_v17 }
 0x169   : > { %1152 = vst [vmem:[#allocation2 + $0x8] sm:$0xff] %v1150_v20 }
 0x16f   : > { %v1157_v27 = vld [vmem:[#allocation2] sm:$0xff] }
 0x170   : > { %v1158_v28 = vld [vmem:[#allocation2 + $0x8] sm:$0xff]  ;;  %v1171_v34 = vmul.f32 %v1164_v30, %v1157_v27 }
 0x171   : > { %v1172_v35 = vmul.f32 %v1168_v31, %v1158_v28 }
 0x172   : > { %v1185_v38 = vadd.f32 %v1178_v32, %v1171_v34 }
 0x173   : > { %v1186_v39 = vadd.f32 %v1182_v33, %v1172_v35 }
 0x174   : > { %v1190_v40 = vadd.f32 %v1188_v36, %v1185_v38 }
 0x175   : > { %v1191_v41 = vadd.f32 %v1189_v37, %v1186_v39 }
 0x176   : > { %v1192_v42 = vmax.f32 %v1190_v40, 0.0 }
 0x177   : > { %v1193_v43 = vmax.f32 %v1191_v41, 0.0 }
 0x179   : > { %v1446_v44 = vpack.c.bf16 %v1193_v43, %v1192_v42 }
 0x17b   : > { %1202 = vst [vmem:[%s1912_s7] sm:$0xff] %v1446_v44 }
 0x17c PF: > { %s15_s24 = sadd.s32 1, %s1658_s24   ;;  %s2023_s18 = smov %s1638_s19 }
 0x17d   : > { %p12_p0 = scmp.ge.s32.totalorder %s15_s24, 20   ;;  %s2024_s19 = smov %s1742_s6 }
 0x17e   : > { %s2025_s20 = smov %s1650_s22  ;;  %s2026_s21 = smov %s1654_s23 }
 0x17f   : > { %s2027_s22 = smov %s2030_s25  ;;  %s2028_s23 = smov %s2034_s26 }
 0x180   :  { %14 = sbr.rel (!%p12_p0) target bundleno = 4 (0x4), region = 133 }

// kernel: resnet18_forward.43
= control target key start
LH: loop header
LB: loop body
LE: loop exit
PB: predicated region body
PF: predicated region fallthrough
CT: control target
= control target key end

     0   :  { %s657_s1 = inlined_call_operand.vmem [shape: bf16[512,128], index: 1, kind: input, shape index: {}]   ;;  %s658_s0 = inlined_call_operand.vmem [shape: bf16[8,512], index: 0, kind: input, shape index: {}]   ;;  %s659_s2 = inlined_call_operand.vmem [shape: f32[1,128], index: 2, kind: input, shape index: {}]   ;;  %s660_s3 = inlined_call_operand.vmem [shape: f32[1,128], index: 3, kind: input, shape index: {}]   ;;  %s661_s4 = inlined_call_operand.vmem [shape: f32[8,128], index: 4, kind: output, shape index: {}]  }
   0x1   :  { %v485_v0 = vld [vmem:[%s657_s1 + $0x40] sm:$0xff]   ;;  %v489_v4 = vld [vmem:[%s657_s1 + $0x48] sm:$0xff]   ;;  %v493_v8 = vld [vmem:[%s657_s1 + $0x50] sm:$0xff]  }
   0x2   :  { %v486_v1 = vld [vmem:[%s657_s1 + $0xc0] sm:$0xff]   ;;  %441 = vmatprep.subr.bf16.mxu0 %v485_v0  ;;  %v490_v5 = vld [vmem:[%s657_s1 + $0xc8] sm:$0xff]   ;;  %v494_v9 = vld [vmem:[%s657_s1 + $0xd0] sm:$0xff]  }
   0x3   :  { %v487_v2 = vld [vmem:[%s657_s1] sm:$0xff]   ;;  %463 = vmatprep.subr.bf16.mxu1 %v486_v1  ;;  %v491_v6 = vld [vmem:[%s657_s1 + $0x8] sm:$0xff]   ;;  %v495_v10 = vld [vmem:[%s657_s1 + $0x10] sm:$0xff]  }
   0x4   :  { %v488_v3 = vld [vmem:[%s657_s1 + $0x80] sm:$0xff]   ;;  %442 = vmatpush3.bf16.msra.mxu0 %v487_v2  ;;  %v492_v7 = vld [vmem:[%s657_s1 + $0x88] sm:$0xff]   ;;  %v496_v11 = vld [vmem:[%s657_s1 + $0x90] sm:$0xff]  }
   0x5   :  { %464 = vmatpush3.bf16.msra.mxu1 %v488_v3  ;;  %443 = vmatprep.subr.bf16.mxu0 %v489_v4  ;;  %v497_v12 = vld [vmem:[%s657_s1 + $0x58] sm:$0xff]   ;;  %v501_v16 = vld [vmem:[%s657_s1 + $0x60] sm:$0xff]   ;;  %v505_v20 = vld [vmem:[%s657_s1 + $0x68] sm:$0xff]  }
   0x6   :  { %465 = vmatprep.subr.bf16.mxu1 %v490_v5  ;;  %v498_v13 = vld [vmem:[%s657_s1 + $0xd8] sm:$0xff]   ;;  %v502_v17 = vld [vmem:[%s657_s1 + $0xe0] sm:$0xff]   ;;  %v506_v21 = vld [vmem:[%s657_s1 + $0xe8] sm:$0xff]  }
   0x7   :  { %v499_v14 = vld [vmem:[%s657_s1 + $0x18] sm:$0xff]   ;;  %v503_v18 = vld [vmem:[%s657_s1 + $0x20] sm:$0xff]   ;;  %v507_v22 = vld [vmem:[%s657_s1 + $0x28] sm:$0xff]  }
   0x8   :  { %444 = vmatpush3.bf16.msra.mxu0 %v491_v6  ;;  %v500_v15 = vld [vmem:[%s657_s1 + $0x98] sm:$0xff]   ;;  %v504_v19 = vld [vmem:[%s657_s1 + $0xa0] sm:$0xff]   ;;  %v508_v23 = vld [vmem:[%s657_s1 + $0xa8] sm:$0xff]  }
   0x9   :  { %466 = vmatpush3.bf16.msra.mxu1 %v492_v7  ;;  %445 = vmatprep.subr.bf16.mxu0 %v493_v8  ;;  %v509_v24 = vld [vmem:[%s657_s1 + $0x70] sm:$0xff]   ;;  %v513_v28 = vld [vmem:[%s657_s1 + $0x78] sm:$0xff]   ;;  %v24_v32 = vld [vmem:[%s658_s0] sm:$0xff] }
   0xa   :  { %467 = vmatprep.subr.bf16.mxu1 %v494_v9  ;;  %v510_v25 = vld [vmem:[%s657_s1 + $0xf0] sm:$0xff]   ;;  %v514_v29 = vld [vmem:[%s657_s1 + $0xf8] sm:$0xff]   ;;  %v25_v33 = vld [vmem:[%s658_s0 + $0x8] sm:$0xff]  ;;  %v403_v34 = vcombine.low %v24_v32, %v24_v32  ;;  %v404_v35 = vcombine.high %v24_v32, %v24_v32 }
   0xb   :  { %v511_v26 = vld [vmem:[%s657_s1 + $0x30] sm:$0xff]   ;;  %v515_v30 = vld [vmem:[%s657_s1 + $0x38] sm:$0xff]   ;;  %v405_v36 = vcombine.low %v25_v33, %v25_v33  ;;  %v406_v37 = vcombine.high %v25_v33, %v25_v33  ;;  %v439_v46 = vld [vmem:[%s659_s2] ss:$0 sm:$0xff] }
   0xc   :  { %446 = vmatpush3.bf16.msra.mxu0 %v495_v10  ;;  %v512_v27 = vld [vmem:[%s657_s1 + $0xb0] sm:$0xff]   ;;  %v516_v31 = vld [vmem:[%s657_s1 + $0xb8] sm:$0xff]   ;;  %328 = vmatprep.mubr.bf16.mxu0 %v404_v35  ;;  %v440_v50 = vld [vmem:[%s660_s3] ss:$0 sm:$0xff] }
   0xd   :  { %468 = vmatpush3.bf16.msra.mxu1 %v496_v11  ;;  %447 = vmatprep.subr.bf16.mxu0 %v497_v12 }
   0xe   :  { %469 = vmatprep.subr.bf16.mxu1 %v498_v13  ;;  %368 = vmatprep.mubr.bf16.mxu1 %v406_v37 }
  0x10   :  { %448 = vmatpush3.bf16.msra.mxu0 %v499_v14 }
  0x11   :  { %470 = vmatpush3.bf16.msra.mxu1 %v500_v15  ;;  %449 = vmatprep.subr.bf16.mxu0 %v501_v16 }
  0x12   :  { %471 = vmatprep.subr.bf16.mxu1 %v502_v17 }
  0x14   :  { %450 = vmatpush3.bf16.msra.mxu0 %v503_v18 }
  0x15   :  { %472 = vmatpush3.bf16.msra.mxu1 %v504_v19  ;;  %451 = vmatprep.subr.bf16.mxu0 %v505_v20 }
  0x16   :  { %473 = vmatprep.subr.bf16.mxu1 %v506_v21 }
  0x18   :  { %452 = vmatpush3.bf16.msra.mxu0 %v507_v22 }
  0x19   :  { %474 = vmatpush3.bf16.msra.mxu1 %v508_v23  ;;  %453 = vmatprep.subr.bf16.mxu0 %v509_v24 }
  0x1a   :  { %475 = vmatprep.subr.bf16.mxu1 %v510_v25 }
  0x1c   :  { %454 = vmatpush3.bf16.msra.mxu0 %v511_v26 }
  0x1d   :  { %476 = vmatpush3.bf16.msra.mxu1 %v512_v27  ;;  %455 = vmatprep.subr.bf16.mxu0 %v513_v28 }
  0x1e   :  { %477 = vmatprep.subr.bf16.mxu1 %v514_v29 }
  0x20   :  { %456 = vmatpush3.bf16.msra.mxu0 %v515_v30 }
  0x21   :  { %478 = vmatpush3.bf16.msra.mxu1 %v516_v31 }
  0x23   :  { %329 = vmatmul.mubr.bf16.vlgmr.msra.gmra.mrb[0].mxu0 %v403_v34 }
  0x24   :  { %369 = vmatmul.mubr.bf16.vlgmr.msra.gmra.mrb[0].mxu1 %v405_v36 }
  0xf6   :  { %v457_v38 = vpop.f32.mrb[0].mxu0 }
  0xf7   :  { %v479_v39 = vpop.f32.mrb[0].mxu1  ;;  %v458_v40 = vpop.f32.mrb[1].mxu0 }
  0xf8   :  { %v480_v41 = vpop.f32.mrb[1].mxu1  ;;  %v459_v42 = vadd.f32 %v458_v40, %v457_v38  ;;  %v460_v44 = vpop.f32.mrb[2].mxu0 }
  0xf9   :  { %v481_v43 = vadd.f32 %v480_v41, %v479_v39  ;;  %v482_v45 = vpop.f32.mrb[2].mxu1  ;;  %v461_v47 = vpop.f32.mrb[3].mxu0 }
  0xfa   :  { %v483_v48 = vpop.f32.mrb[3].mxu1 }
  0xfb   :  { %v371_v49 = vadd.f32 %v481_v43, %v459_v42 }
  0xfd   :  { %v389_v51 = vmul.f32 %v439_v46, %v371_v49 }
  0xff   :  { %v397_v52 = vadd.f32 %v440_v50, %v389_v51 }
 0x101   :  { %398 = vst [vmem:[%s661_s4] sm:$0xff] %v397_v52 }

</bundles_post_ra>
